<compile_context>
chip_gen: v5e
topology: v5e:2x2
jax: 0.10.0
libtpu: 0.0.40
codegen_flags: <defaults>
</compile_context>

<pallas_src>
import functools

import jax
import jax.numpy as jnp
from jax.experimental import pallas as pl
from jax.experimental.pallas import tpu as pltpu

LRELU_SLOPE = 0.1
IN_EPS = 1e-5
CH_ALIGN = 16          # channel padding multiple (bf16 sublane packing)
LANE = 128
TQ_CAP = 8 * 1024      # max lanes per in-kernel tile (bounds tap-slab VMEM)


def _round_up(x, m):
    return (x + m - 1) // m * m


def _geometry(D, H, W):
    """Static geometry of the padded-volume flat layout."""
    Dp, Hp, Wp = D + 2, H + 2, W + 2
    HpWp = Hp * Wp
    Lin = Dp * HpWp                       # flattened padded volume length
    delta = HpWp + Wp + 1                 # max |tap lane offset|
    dp_pad = _round_up(delta, LANE)       # 128-aligned halo on each lane end
    lin128 = _round_up(Lin, LANE)
    tq = lin128 if lin128 <= TQ_CAP else TQ_CAP
    ltot = _round_up(Lin, tq)             # lanes actually computed
    qt_num = ltot // tq
    lb = 2 * dp_pad + ltot                # total buffer lanes (mult of 128)
    return dict(D=D, H=H, W=W, Dp=Dp, Hp=Hp, Wp=Wp, HpWp=HpWp, Lin=Lin,
                delta=delta, dp_pad=dp_pad, tq=tq, ltot=ltot,
                qt_num=qt_num, lb=lb)


# ---------------------------------------------------------------------------
# Fused Conv3d(k=3,p=1) + InstanceNorm + LeakyReLU + per-sample channel add
# ---------------------------------------------------------------------------
def _conv3x3_in_lrelu_kernel(
    x_ref, w_ref, g_ref, b_ref, add_ref, mask_ref, o_ref, slab_ref,
    *, starts, cin_p, cout_p, tq, qt_num, dp_pad, ltot, lb, cnt,
):
    """One grid step = one sample, processed in static lane tiles of `tq`.

    x_ref    : (1, cin_p, lb)        bf16   padded-volume flat input buffer
    w_ref    : (cout_p, 27*cin_p)    bf16   conv taps packed along K
    g/b_ref  : (cout_p, 1)           f32    InstanceNorm affine (gamma/beta)
    add_ref  : (1, cout_p, 1)        f32    per-sample temb row (post-act add)
    mask_ref : (1, ltot)             f32    {0,1} interior-voxel mask
    o_ref    : (1, cout_p, lb)              output buffer (same layout as x)
    slab_ref : (27*cin_p, tq)        bf16   VMEM scratch for the stacked taps
    """
    acc_sum = jnp.zeros((cout_p, 1), jnp.float32)
    acc_sq = jnp.zeros((cout_p, 1), jnp.float32)

    # ---- pass 1: conv (one big-K matmul per tile) + incremental IN stats ---
    for j in range(qt_num):
        q0 = j * tq
        # Gather all 27 shifted slices first (XLU rotates), then one MXU call.
        for t, s in enumerate(starts):
            slab_ref[t * cin_p:(t + 1) * cin_p, :] = (
                x_ref[0, :, q0 + s:q0 + s + tq])
        acc = jnp.dot(w_ref[...], slab_ref[...],
                      preferred_element_type=jnp.float32)      # (cout_p, tq)

        m = mask_ref[:, q0:q0 + tq]                            # (1, tq) {0,1}
        ym = acc * m
        acc_sum = acc_sum + jnp.sum(ym, axis=1, keepdims=True)
        acc_sq = acc_sq + jnp.sum(ym * acc, axis=1, keepdims=True)

        # Raw conv result, lane-aligned dense store.
        o_ref[0, :, dp_pad + q0:dp_pad + q0 + tq] = acc.astype(o_ref.dtype)

    # ---- InstanceNorm statistics (f32, biased var, eps inside rsqrt) -------
    inv_cnt = 1.0 / cnt
    mean = acc_sum * inv_cnt
    var = jnp.maximum(acc_sq * inv_cnt - mean * mean, 0.0)
    scale = g_ref[...] * jax.lax.rsqrt(var + IN_EPS)           # (cout_p, 1)
    shift = b_ref[...] - mean * scale
    add = add_ref[0]                                           # (cout_p, 1)

    # ---- pass 2: normalize + affine + LeakyReLU + temb add, masked ---------
    for j in range(qt_num):
        lo = dp_pad + j * tq
        y = o_ref[0, :, lo:lo + tq].astype(jnp.float32)
        z = y * scale + shift
        z = jnp.where(z >= 0, z, LRELU_SLOPE * z)              # LeakyReLU(0.1)
        z = (z + add) * mask_ref[:, j * tq:j * tq + tq]        # halo -> 0
        o_ref[0, :, lo:lo + tq] = z.astype(o_ref.dtype)

    # Zero the lane halos so this buffer is directly the next conv's input.
    o_ref[0, :, 0:dp_pad] = jnp.zeros((cout_p, dp_pad), o_ref.dtype)
    o_ref[0, :, dp_pad + ltot:lb] = jnp.zeros(
        (cout_p, lb - dp_pad - ltot), o_ref.dtype)


def conv3x3_in_lrelu_block(x_buf, w2d, gamma, beta, add_rows, mask, geo,
                           cin_p, cout_p, out_dtype):
    """x_buf: (N, cin_p, lb) bf16 padded-volume flat layout.
    Returns (N, cout_p, lb) `out_dtype` in the same layout (zero halos)."""
    N = x_buf.shape[0]
    tq, qt_num = geo["tq"], geo["qt_num"]
    ltot, lb, dp_pad = geo["ltot"], geo["lb"], geo["dp_pad"]

    # Tap lane offsets (relative read start within the buffer), all static.
    starts = tuple(
        dp_pad + (kd - 1) * geo["HpWp"] + (kh - 1) * geo["Wp"] + (kw - 1)
        for kd in range(3) for kh in range(3) for kw in range(3))

    kernel = functools.partial(
        _conv3x3_in_lrelu_kernel, starts=starts, cin_p=cin_p, cout_p=cout_p,
        tq=tq, qt_num=qt_num, dp_pad=dp_pad, ltot=ltot, lb=lb,
        cnt=float(geo["D"] * geo["H"] * geo["W"]))

    # Size-derived VMEM budget (double-buffered in/out + scratch), capped so
    # it stays inside v7x's 64 MiB per-TC VMEM.
    out_bytes = jnp.dtype(out_dtype).itemsize
    est = (2 * cin_p * lb * 2 + 2 * cout_p * lb * out_bytes
           + cout_p * 27 * cin_p * 2 + ltot * 4 + 3 * cout_p * 4
           + 27 * cin_p * tq * 2 + 2 * cout_p * tq * 4)
    vmem_limit = int(min(max(2 * est, 32 << 20), 64 << 20))

    # TODO(synk): for N == 1 on v7x, add a second "parallel" grid axis (e.g.
    # split the lane range per core and combine partial IN stats) so both
    # TensorCores are busy.
    return pl.pallas_call(
        kernel,
        out_shape=jax.ShapeDtypeStruct((N, cout_p, lb), out_dtype),
        grid=(N,),
        in_specs=[
            pl.BlockSpec((1, cin_p, lb), lambda n: (n, 0, 0)),
            pl.BlockSpec((cout_p, 27 * cin_p), lambda n: (0, 0)),
            pl.BlockSpec((cout_p, 1), lambda n: (0, 0)),
            pl.BlockSpec((cout_p, 1), lambda n: (0, 0)),
            pl.BlockSpec((1, cout_p, 1), lambda n: (n, 0, 0)),
            pl.BlockSpec((1, ltot), lambda n: (0, 0)),
        ],
        out_specs=pl.BlockSpec((1, cout_p, lb), lambda n: (n, 0, 0)),
        scratch_shapes=[
            pltpu.VMEM((27 * cin_p, tq), jnp.bfloat16),
        ],
        compiler_params=pltpu.CompilerParams(
            dimension_semantics=("parallel",),
            vmem_limit_bytes=vmem_limit,
        ),
    )(x_buf, w2d, gamma, beta, add_rows, mask)


# ---------------------------------------------------------------------------
# Layout / parameter packing helpers (one-time, outside the kernels)
# ---------------------------------------------------------------------------
def _interior_mask(geo):
    p = jnp.arange(geo["ltot"], dtype=jnp.int32)
    dd = p // geo["HpWp"]
    rem = p % geo["HpWp"]
    hh = rem // geo["Wp"]
    ww = rem % geo["Wp"]
    valid = ((p < geo["Lin"])
             & (dd >= 1) & (dd <= geo["D"])
             & (hh >= 1) & (hh <= geo["H"])
             & (ww >= 1) & (ww <= geo["W"]))
    return valid.astype(jnp.float32).reshape(1, geo["ltot"])


def to_block_layout(h, cin_p, geo):
    """NCDHW f32 -> (N, cin_p, lb) bf16 padded-volume flat layout."""
    N, C = h.shape[:2]
    x = jnp.pad(h, ((0, 0), (0, cin_p - C), (1, 1), (1, 1), (1, 1)))
    x = x.reshape(N, cin_p, geo["Lin"])
    x = jnp.pad(x, ((0, 0), (0, 0),
                    (geo["dp_pad"], geo["lb"] - geo["dp_pad"] - geo["Lin"])))
    return x.astype(jnp.bfloat16)


def from_block_layout(y, cout, geo):
    """(N, cout_p, lb) -> NCDHW (N, cout, D, H, W)."""
    N = y.shape[0]
    y = y[:, :cout, geo["dp_pad"]:geo["dp_pad"] + geo["Lin"]]
    y = y.reshape(N, cout, geo["Dp"], geo["Hp"], geo["Wp"])
    return y[:, :, 1:geo["D"] + 1, 1:geo["H"] + 1, 1:geo["W"] + 1]


def pack_weight(w, cin_p, cout_p):
    """PyTorch (Cout, Cin, 3,3,3) -> (cout_p, 27*cin_p) bf16, col = t*cin_p+c."""
    Cout, Cin = w.shape[:2]
    wt = jnp.transpose(w, (0, 2, 3, 4, 1))              # (Cout,3,3,3,Cin)
    wt = jnp.pad(wt, ((0, cout_p - Cout), (0, 0), (0, 0), (0, 0),
                      (0, cin_p - Cin)))
    return wt.reshape(cout_p, 27 * cin_p).astype(jnp.bfloat16)


def _pad_vec(v, n):
    return jnp.pad(v.astype(jnp.float32), (0, n - v.shape[0])).reshape(n, 1)


# ---------------------------------------------------------------------------
# Small XLA glue (deconv / temb projection / concat) -- intentionally not
# Pallas: tiny, launch-overhead-dominated ops that XLA fuses well.
# ---------------------------------------------------------------------------
def deconv2x(x, w, b):
    """ConvTranspose3d(k=2, s=2). x: (N,Cin,D,H,W); w: (Cin,Cout,2,2,2)."""
    N, Cin, D, H, W = x.shape
    Cout = w.shape[1]
    y = jnp.einsum("nidhw,ioabc->nodahbwc", x, w)
    y = y.reshape(N, Cout, 2 * D, 2 * H, 2 * W)
    return y + b.reshape(1, Cout, 1, 1, 1)


def temb_project(temb, w, b):
    s = temb * jax.nn.sigmoid(temb)          # swish / SiLU (nonlinearity)
    return s @ w + b                         # (N, out_chns)


def upcat_forward(params, x, x_e, temb):
    """x, x_e: NCDHW float32; temb: (N, 512). Returns NCDHW float32."""
    x = x.astype(jnp.float32)
    x0 = deconv2x(x, params["up_w"], params["up_b"])

    if x_e is not None:
        xe = x_e.astype(jnp.float32)
        # torch.nn.functional.pad(x_0, sp, 'replicate'): pad the high end of
        # any mismatched spatial dim by 1 (NCDHW spatial axes 2, 3, 4).
        pads = [(0, 0)] * 5
        for ax in (2, 3, 4):
            if xe.shape[ax] != x0.shape[ax]:
                pads[ax] = (0, 1)
        x0 = jnp.pad(x0, pads, mode="edge")
        h = jnp.concatenate([xe, x0], axis=1)
    else:
        h = x0

    N, C, D, H, W = h.shape
    out_chns = params["c0_w"].shape[0]
    geo = _geometry(D, H, W)
    mask = _interior_mask(geo)

    cin0 = _round_up(C, CH_ALIGN)
    cmid = _round_up(out_chns, CH_ALIGN)     # conv_0 out == conv_1 in padding
    cout1 = _round_up(out_chns, CH_ALIGN)

    x_buf = to_block_layout(h, cin0, geo)
    w0 = pack_weight(params["c0_w"], cin0, cmid)
    w1 = pack_weight(params["c1_w"], cmid, cout1)

    g0 = _pad_vec(params["c0_g"], cmid)
    b0 = _pad_vec(params["c0_beta"], cmid)
    g1 = _pad_vec(params["c1_g"], cout1)
    b1 = _pad_vec(params["c1_beta"], cout1)

    emb = temb_project(temb.astype(jnp.float32), params["p_w"], params["p_b"])
    add0 = jnp.pad(emb, ((0, 0), (0, cmid - out_chns))).reshape(N, cmid, 1)
    add1 = jnp.zeros((N, cout1, 1), jnp.float32)

    # conv_0: output stays in the kernel's padded-flat layout (bf16) and feeds
    # conv_1 directly -- no NCDHW layout round-trip between the two convs.
    # Conv biases (c0_b / c1_b) cancel exactly under InstanceNorm.
    h1 = conv3x3_in_lrelu_block(x_buf, w0, g0, b0, add0, mask, geo,
                                cin0, cmid, jnp.bfloat16)
    h2 = conv3x3_in_lrelu_block(h1, w1, g1, b1, add1, mask, geo,
                                cmid, cout1, jnp.float32)
    return from_block_layout(h2, out_chns, geo)


# ---------------------------------------------------------------------------
# Deterministic parameter construction + demo
# ---------------------------------------------------------------------------
def make_params(key, in_chns, cat_chns, out_chns):
    up_chns = in_chns // 2                    # halves=True, deconv mode
    mid_chns = cat_chns + up_chns
    ks = jax.random.split(key, 8)

    def rnd(k, shape, scale):
        return (scale * jax.random.normal(k, shape)).astype(jnp.float32)

    return {
        # UpSample "deconv": ConvTranspose3d(in_chns, up_chns, 2, stride=2)
        "up_w": rnd(ks[0], (in_chns, up_chns, 2, 2, 2), 0.15),
        "up_b": rnd(ks[1], (up_chns,), 0.05),
        # temb_proj: Linear(512, out_chns) (stored transposed: (512, out))
        "p_w": rnd(ks[2], (512, out_chns), 0.03),
        "p_b": rnd(ks[3], (out_chns,), 0.05),
        # conv_0: Conv3d(mid_chns, out_chns, 3, padding=1) + InstanceNorm
        "c0_w": rnd(ks[4], (out_chns, mid_chns, 3, 3, 3), 0.1),
        "c0_b": rnd(ks[5], (out_chns,), 0.05),       # cancels under IN
        "c0_g": jnp.ones((out_chns,), jnp.float32),
        "c0_beta": jnp.zeros((out_chns,), jnp.float32),
        # conv_1: Conv3d(out_chns, out_chns, 3, padding=1) + InstanceNorm
        "c1_w": rnd(ks[6], (out_chns, out_chns, 3, 3, 3), 0.1),
        "c1_b": rnd(ks[7], (out_chns,), 0.05),       # cancels under IN
        "c1_g": jnp.ones((out_chns,), jnp.float32),
        "c1_beta": jnp.zeros((out_chns,), jnp.float32),
    }


if __name__ == "__main__":
    # Small BraTS-like 3-D decoder stage: spatial_dims=3,
    # in_chns=8, cat_chns=4, out_chns=8  (up_chns = 4).
    N, IN_C, CAT_C, OUT_C = 2, 8, 4, 8
    D = H = W = 4                             # encoder feature is 2x spatial

    key = jax.random.PRNGKey(0)
    kx, ke, kt, kp = jax.random.split(key, 4)
    x = jax.random.normal(kx, (N, IN_C, D, H, W), jnp.float32)          # NCDHW
    x_e = jax.random.normal(ke, (N, CAT_C, 2 * D, 2 * H, 2 * W), jnp.float32)
    temb = jax.random.normal(kt, (N, 512), jnp.float32)
    params = make_params(kp, IN_C, CAT_C, OUT_C)

    out = jax.jit(upcat_forward)(params, x, x_e, temb)
    out = jax.block_until_ready(out)
    assert out.shape == (N, OUT_C, 2 * D, 2 * H, 2 * W), out.shape
    assert bool(jnp.all(jnp.isfinite(out)))
    print("KERNEL_OK")
</pallas_src>

<mosaic_0001>
module attributes {stable_mosaic.version = 11 : i64} {
  func.func @_conv3x3_in_lrelu_kernel(%arg0: i32, %arg1: memref<1x16x1280xbf16, #tpu.memory_space<vmem>>, %arg2: memref<16x432xbf16, #tpu.memory_space<vmem>>, %arg3: memref<16x1xf32, #tpu.memory_space<vmem>>, %arg4: memref<16x1xf32, #tpu.memory_space<vmem>>, %arg5: memref<1x16x1xf32, #tpu.memory_space<vmem>>, %arg6: memref<1x1024xf32, #tpu.memory_space<vmem>>, %arg7: memref<1x16x1280xbf16, #tpu.memory_space<vmem>>, %arg8: memref<432x1024xbf16, #tpu.memory_space<vmem>>) attributes {dimension_semantics = [#tpu.dimension_semantics<parallel>], iteration_bounds = array<i64: 2>, scalar_prefetch = 0 : i64, scratch_operands = 1 : i64, tpu.core_type = #tpu.core_type<tc>, window_params = [{transform_indices = @transform_0, window_bounds = array<i64: 1, 16, 1280>}, {pipeline_mode = #tpu.pipeline_mode<synchronous>, transform_indices = @transform_1, window_bounds = array<i64: 16, 432>}, {pipeline_mode = #tpu.pipeline_mode<synchronous>, transform_indices = @transform_2, window_bounds = array<i64: 16, 1>}, {pipeline_mode = #tpu.pipeline_mode<synchronous>, transform_indices = @transform_3, window_bounds = array<i64: 16, 1>}, {transform_indices = @transform_4, window_bounds = array<i64: 1, 16, 1>}, {pipeline_mode = #tpu.pipeline_mode<synchronous>, transform_indices = @transform_5, window_bounds = array<i64: 1, 1024>}, {transform_indices = @transform_6, window_bounds = array<i64: 1, 16, 1280>}]} {
    %cst = arith.constant 0.000000e+00 : f32
    %0 = vector.broadcast %cst : f32 to vector<16x1xf32>
    %cst_0 = arith.constant 0.000000e+00 : f32
    %1 = vector.broadcast %cst_0 : f32 to vector<16x1xf32>
    %c0 = arith.constant 0 : index
    %c0_1 = arith.constant 0 : index
    %c17 = arith.constant 17 : index
    %2 = vector.load %arg1[%c0, %c0_1, %c17] : memref<1x16x1280xbf16, #tpu.memory_space<vmem>>, vector<1x16x1024xbf16>
    %3 = vector.shape_cast %2 : vector<1x16x1024xbf16> to vector<16x1024xbf16>
    %c0_2 = arith.constant 0 : index
    %c0_3 = arith.constant 0 : index
    %4 = vector.load %arg8[%c0_2, %c0_3] : memref<432x1024xbf16, #tpu.memory_space<vmem>>, vector<16x1024xbf16>
    tpu.vector_store %arg8[%c0_2, %c0_3], %3 {strides = array<i32>} : memref<432x1024xbf16, #tpu.memory_space<vmem>>, vector<16x1024xbf16>,
    %c0_4 = arith.constant 0 : index
    %c0_5 = arith.constant 0 : index
    %c18 = arith.constant 18 : index
    %5 = vector.load %arg1[%c0_4, %c0_5, %c18] : memref<1x16x1280xbf16, #tpu.memory_space<vmem>>, vector<1x16x1024xbf16>
    %6 = vector.shape_cast %5 : vector<1x16x1024xbf16> to vector<16x1024xbf16>
    %c16 = arith.constant 16 : index
    %c0_6 = arith.constant 0 : index
    %7 = vector.load %arg8[%c16, %c0_6] : memref<432x1024xbf16, #tpu.memory_space<vmem>>, vector<16x1024xbf16>
    tpu.vector_store %arg8[%c16, %c0_6], %6 {strides = array<i32>} : memref<432x1024xbf16, #tpu.memory_space<vmem>>, vector<16x1024xbf16>,
    %c0_7 = arith.constant 0 : index
    %c0_8 = arith.constant 0 : index
    %c19 = arith.constant 19 : index
    %8 = vector.load %arg1[%c0_7, %c0_8, %c19] : memref<1x16x1280xbf16, #tpu.memory_space<vmem>>, vector<1x16x1024xbf16>
    %9 = vector.shape_cast %8 : vector<1x16x1024xbf16> to vector<16x1024xbf16>
    %c32 = arith.constant 32 : index
    %c0_9 = arith.constant 0 : index
    %10 = vector.load %arg8[%c32, %c0_9] : memref<432x1024xbf16, #tpu.memory_space<vmem>>, vector<16x1024xbf16>
    tpu.vector_store %arg8[%c32, %c0_9], %9 {strides = array<i32>} : memref<432x1024xbf16, #tpu.memory_space<vmem>>, vector<16x1024xbf16>,
    %c0_10 = arith.constant 0 : index
    %c0_11 = arith.constant 0 : index
    %c27 = arith.constant 27 : index
    %11 = vector.load %arg1[%c0_10, %c0_11, %c27] : memref<1x16x1280xbf16, #tpu.memory_space<vmem>>, vector<1x16x1024xbf16>
    %12 = vector.shape_cast %11 : vector<1x16x1024xbf16> to vector<16x1024xbf16>
    %c48 = arith.constant 48 : index
    %c0_12 = arith.constant 0 : index
    %13 = vector.load %arg8[%c48, %c0_12] : memref<432x1024xbf16, #tpu.memory_space<vmem>>, vector<16x1024xbf16>
    tpu.vector_store %arg8[%c48, %c0_12], %12 {strides = array<i32>} : memref<432x1024xbf16, #tpu.memory_space<vmem>>, vector<16x1024xbf16>,
    %c0_13 = arith.constant 0 : index
    %c0_14 = arith.constant 0 : index
    %c28 = arith.constant 28 : index
    %14 = vector.load %arg1[%c0_13, %c0_14, %c28] : memref<1x16x1280xbf16, #tpu.memory_space<vmem>>, vector<1x16x1024xbf16>
    %15 = vector.shape_cast %14 : vector<1x16x1024xbf16> to vector<16x1024xbf16>
    %c64 = arith.constant 64 : index
    %c0_15 = arith.constant 0 : index
    %16 = vector.load %arg8[%c64, %c0_15] : memref<432x1024xbf16, #tpu.memory_space<vmem>>, vector<16x1024xbf16>
    tpu.vector_store %arg8[%c64, %c0_15], %15 {strides = array<i32>} : memref<432x1024xbf16, #tpu.memory_space<vmem>>, vector<16x1024xbf16>,
    %c0_16 = arith.constant 0 : index
    %c0_17 = arith.constant 0 : index
    %c29 = arith.constant 29 : index
    %17 = vector.load %arg1[%c0_16, %c0_17, %c29] : memref<1x16x1280xbf16, #tpu.memory_space<vmem>>, vector<1x16x1024xbf16>
    %18 = vector.shape_cast %17 : vector<1x16x1024xbf16> to vector<16x1024xbf16>
    %c80 = arith.constant 80 : index
    %c0_18 = arith.constant 0 : index
    %19 = vector.load %arg8[%c80, %c0_18] : memref<432x1024xbf16, #tpu.memory_space<vmem>>, vector<16x1024xbf16>
    tpu.vector_store %arg8[%c80, %c0_18], %18 {strides = array<i32>} : memref<432x1024xbf16, #tpu.memory_space<vmem>>, vector<16x1024xbf16>,
    %c0_19 = arith.constant 0 : index
    %c0_20 = arith.constant 0 : index
    %c37 = arith.constant 37 : index
    %20 = vector.load %arg1[%c0_19, %c0_20, %c37] : memref<1x16x1280xbf16, #tpu.memory_space<vmem>>, vector<1x16x1024xbf16>
    %21 = vector.shape_cast %20 : vector<1x16x1024xbf16> to vector<16x1024xbf16>
    %c96 = arith.constant 96 : index
    %c0_21 = arith.constant 0 : index
    %22 = vector.load %arg8[%c96, %c0_21] : memref<432x1024xbf16, #tpu.memory_space<vmem>>, vector<16x1024xbf16>
    tpu.vector_store %arg8[%c96, %c0_21], %21 {strides = array<i32>} : memref<432x1024xbf16, #tpu.memory_space<vmem>>, vector<16x1024xbf16>,
    %c0_22 = arith.constant 0 : index
    %c0_23 = arith.constant 0 : index
    %c38 = arith.constant 38 : index
    %23 = vector.load %arg1[%c0_22, %c0_23, %c38] : memref<1x16x1280xbf16, #tpu.memory_space<vmem>>, vector<1x16x1024xbf16>
    %24 = vector.shape_cast %23 : vector<1x16x1024xbf16> to vector<16x1024xbf16>
    %c112 = arith.constant 112 : index
    %c0_24 = arith.constant 0 : index
    %25 = vector.load %arg8[%c112, %c0_24] : memref<432x1024xbf16, #tpu.memory_space<vmem>>, vector<16x1024xbf16>
    tpu.vector_store %arg8[%c112, %c0_24], %24 {strides = array<i32>} : memref<432x1024xbf16, #tpu.memory_space<vmem>>, vector<16x1024xbf16>,
    %c0_25 = arith.constant 0 : index
    %c0_26 = arith.constant 0 : index
    %c39 = arith.constant 39 : index
    %26 = vector.load %arg1[%c0_25, %c0_26, %c39] : memref<1x16x1280xbf16, #tpu.memory_space<vmem>>, vector<1x16x1024xbf16>
    %27 = vector.shape_cast %26 : vector<1x16x1024xbf16> to vector<16x1024xbf16>
    %c128 = arith.constant 128 : index
    %c0_27 = arith.constant 0 : index
    %28 = vector.load %arg8[%c128, %c0_27] : memref<432x1024xbf16, #tpu.memory_space<vmem>>, vector<16x1024xbf16>
    tpu.vector_store %arg8[%c128, %c0_27], %27 {strides = array<i32>} : memref<432x1024xbf16, #tpu.memory_space<vmem>>, vector<16x1024xbf16>,
    %c0_28 = arith.constant 0 : index
    %c0_29 = arith.constant 0 : index
    %c117 = arith.constant 117 : index
    %29 = vector.load %arg1[%c0_28, %c0_29, %c117] : memref<1x16x1280xbf16, #tpu.memory_space<vmem>>, vector<1x16x1024xbf16>
    %30 = vector.shape_cast %29 : vector<1x16x1024xbf16> to vector<16x1024xbf16>
    %c144 = arith.constant 144 : index
    %c0_30 = arith.constant 0 : index
    %31 = vector.load %arg8[%c144, %c0_30] : memref<432x1024xbf16, #tpu.memory_space<vmem>>, vector<16x1024xbf16>
    tpu.vector_store %arg8[%c144, %c0_30], %30 {strides = array<i32>} : memref<432x1024xbf16, #tpu.memory_space<vmem>>, vector<16x1024xbf16>,
    %c0_31 = arith.constant 0 : index
    %c0_32 = arith.constant 0 : index
    %c118 = arith.constant 118 : index
    %32 = vector.load %arg1[%c0_31, %c0_32, %c118] : memref<1x16x1280xbf16, #tpu.memory_space<vmem>>, vector<1x16x1024xbf16>
    %33 = vector.shape_cast %32 : vector<1x16x1024xbf16> to vector<16x1024xbf16>
    %c160 = arith.constant 160 : index
    %c0_33 = arith.constant 0 : index
    %34 = vector.load %arg8[%c160, %c0_33] : memref<432x1024xbf16, #tpu.memory_space<vmem>>, vector<16x1024xbf16>
    tpu.vector_store %arg8[%c160, %c0_33], %33 {strides = array<i32>} : memref<432x1024xbf16, #tpu.memory_space<vmem>>, vector<16x1024xbf16>,
    %c0_34 = arith.constant 0 : index
    %c0_35 = arith.constant 0 : index
    %c119 = arith.constant 119 : index
    %35 = vector.load %arg1[%c0_34, %c0_35, %c119] : memref<1x16x1280xbf16, #tpu.memory_space<vmem>>, vector<1x16x1024xbf16>
    %36 = vector.shape_cast %35 : vector<1x16x1024xbf16> to vector<16x1024xbf16>
    %c176 = arith.constant 176 : index
    %c0_36 = arith.constant 0 : index
    %37 = vector.load %arg8[%c176, %c0_36] : memref<432x1024xbf16, #tpu.memory_space<vmem>>, vector<16x1024xbf16>
    tpu.vector_store %arg8[%c176, %c0_36], %36 {strides = array<i32>} : memref<432x1024xbf16, #tpu.memory_space<vmem>>, vector<16x1024xbf16>,
    %c0_37 = arith.constant 0 : index
    %c0_38 = arith.constant 0 : index
    %c127 = arith.constant 127 : index
    %38 = vector.load %arg1[%c0_37, %c0_38, %c127] : memref<1x16x1280xbf16, #tpu.memory_space<vmem>>, vector<1x16x1024xbf16>
    %39 = vector.shape_cast %38 : vector<1x16x1024xbf16> to vector<16x1024xbf16>
    %c192 = arith.constant 192 : index
    %c0_39 = arith.constant 0 : index
    %40 = vector.load %arg8[%c192, %c0_39] : memref<432x1024xbf16, #tpu.memory_space<vmem>>, vector<16x1024xbf16>
    tpu.vector_store %arg8[%c192, %c0_39], %39 {strides = array<i32>} : memref<432x1024xbf16, #tpu.memory_space<vmem>>, vector<16x1024xbf16>,
    %c0_40 = arith.constant 0 : index
    %c0_41 = arith.constant 0 : index
    %c128_42 = arith.constant 128 : index
    %41 = vector.load %arg1[%c0_40, %c0_41, %c128_42] : memref<1x16x1280xbf16, #tpu.memory_space<vmem>>, vector<1x16x1024xbf16>
    %42 = vector.shape_cast %41 : vector<1x16x1024xbf16> to vector<16x1024xbf16>
    %c208 = arith.constant 208 : index
    %c0_43 = arith.constant 0 : index
    %43 = vector.load %arg8[%c208, %c0_43] : memref<432x1024xbf16, #tpu.memory_space<vmem>>, vector<16x1024xbf16>
    tpu.vector_store %arg8[%c208, %c0_43], %42 {strides = array<i32>} : memref<432x1024xbf16, #tpu.memory_space<vmem>>, vector<16x1024xbf16>,
    %c0_44 = arith.constant 0 : index
    %c0_45 = arith.constant 0 : index
    %c129 = arith.constant 129 : index
    %44 = vector.load %arg1[%c0_44, %c0_45, %c129] : memref<1x16x1280xbf16, #tpu.memory_space<vmem>>, vector<1x16x1024xbf16>
    %45 = vector.shape_cast %44 : vector<1x16x1024xbf16> to vector<16x1024xbf16>
    %c224 = arith.constant 224 : index
    %c0_46 = arith.constant 0 : index
    %46 = vector.load %arg8[%c224, %c0_46] : memref<432x1024xbf16, #tpu.memory_space<vmem>>, vector<16x1024xbf16>
    tpu.vector_store %arg8[%c224, %c0_46], %45 {strides = array<i32>} : memref<432x1024xbf16, #tpu.memory_space<vmem>>, vector<16x1024xbf16>,
    %c0_47 = arith.constant 0 : index
    %c0_48 = arith.constant 0 : index
    %c137 = arith.constant 137 : index
    %47 = vector.load %arg1[%c0_47, %c0_48, %c137] : memref<1x16x1280xbf16, #tpu.memory_space<vmem>>, vector<1x16x1024xbf16>
    %48 = vector.shape_cast %47 : vector<1x16x1024xbf16> to vector<16x1024xbf16>
    %c240 = arith.constant 240 : index
    %c0_49 = arith.constant 0 : index
    %49 = vector.load %arg8[%c240, %c0_49] : memref<432x1024xbf16, #tpu.memory_space<vmem>>, vector<16x1024xbf16>
    tpu.vector_store %arg8[%c240, %c0_49], %48 {strides = array<i32>} : memref<432x1024xbf16, #tpu.memory_space<vmem>>, vector<16x1024xbf16>,
    %c0_50 = arith.constant 0 : index
    %c0_51 = arith.constant 0 : index
    %c138 = arith.constant 138 : index
    %50 = vector.load %arg1[%c0_50, %c0_51, %c138] : memref<1x16x1280xbf16, #tpu.memory_space<vmem>>, vector<1x16x1024xbf16>
    %51 = vector.shape_cast %50 : vector<1x16x1024xbf16> to vector<16x1024xbf16>
    %c256 = arith.constant 256 : index
    %c0_52 = arith.constant 0 : index
    %52 = vector.load %arg8[%c256, %c0_52] : memref<432x1024xbf16, #tpu.memory_space<vmem>>, vector<16x1024xbf16>
    tpu.vector_store %arg8[%c256, %c0_52], %51 {strides = array<i32>} : memref<432x1024xbf16, #tpu.memory_space<vmem>>, vector<16x1024xbf16>,
    %c0_53 = arith.constant 0 : index
    %c0_54 = arith.constant 0 : index
    %c139 = arith.constant 139 : index
    %53 = vector.load %arg1[%c0_53, %c0_54, %c139] : memref<1x16x1280xbf16, #tpu.memory_space<vmem>>, vector<1x16x1024xbf16>
    %54 = vector.shape_cast %53 : vector<1x16x1024xbf16> to vector<16x1024xbf16>
    %c272 = arith.constant 272 : index
    %c0_55 = arith.constant 0 : index
    %55 = vector.load %arg8[%c272, %c0_55] : memref<432x1024xbf16, #tpu.memory_space<vmem>>, vector<16x1024xbf16>
    tpu.vector_store %arg8[%c272, %c0_55], %54 {strides = array<i32>} : memref<432x1024xbf16, #tpu.memory_space<vmem>>, vector<16x1024xbf16>,
    %c0_56 = arith.constant 0 : index
    %c0_57 = arith.constant 0 : index
    %c217 = arith.constant 217 : index
    %56 = vector.load %arg1[%c0_56, %c0_57, %c217] : memref<1x16x1280xbf16, #tpu.memory_space<vmem>>, vector<1x16x1024xbf16>
    %57 = vector.shape_cast %56 : vector<1x16x1024xbf16> to vector<16x1024xbf16>
    %c288 = arith.constant 288 : index
    %c0_58 = arith.constant 0 : index
    %58 = vector.load %arg8[%c288, %c0_58] : memref<432x1024xbf16, #tpu.memory_space<vmem>>, vector<16x1024xbf16>
    tpu.vector_store %arg8[%c288, %c0_58], %57 {strides = array<i32>} : memref<432x1024xbf16, #tpu.memory_space<vmem>>, vector<16x1024xbf16>,
    %c0_59 = arith.constant 0 : index
    %c0_60 = arith.constant 0 : index
    %c218 = arith.constant 218 : index
    %59 = vector.load %arg1[%c0_59, %c0_60, %c218] : memref<1x16x1280xbf16, #tpu.memory_space<vmem>>, vector<1x16x1024xbf16>
    %60 = vector.shape_cast %59 : vector<1x16x1024xbf16> to vector<16x1024xbf16>
    %c304 = arith.constant 304 : index
    %c0_61 = arith.constant 0 : index
    %61 = vector.load %arg8[%c304, %c0_61] : memref<432x1024xbf16, #tpu.memory_space<vmem>>, vector<16x1024xbf16>
    tpu.vector_store %arg8[%c304, %c0_61], %60 {strides = array<i32>} : memref<432x1024xbf16, #tpu.memory_space<vmem>>, vector<16x1024xbf16>,
    %c0_62 = arith.constant 0 : index
    %c0_63 = arith.constant 0 : index
    %c219 = arith.constant 219 : index
    %62 = vector.load %arg1[%c0_62, %c0_63, %c219] : memref<1x16x1280xbf16, #tpu.memory_space<vmem>>, vector<1x16x1024xbf16>
    %63 = vector.shape_cast %62 : vector<1x16x1024xbf16> to vector<16x1024xbf16>
    %c320 = arith.constant 320 : index
    %c0_64 = arith.constant 0 : index
    %64 = vector.load %arg8[%c320, %c0_64] : memref<432x1024xbf16, #tpu.memory_space<vmem>>, vector<16x1024xbf16>
    tpu.vector_store %arg8[%c320, %c0_64], %63 {strides = array<i32>} : memref<432x1024xbf16, #tpu.memory_space<vmem>>, vector<16x1024xbf16>,
    %c0_65 = arith.constant 0 : index
    %c0_66 = arith.constant 0 : index
    %c227 = arith.constant 227 : index
    %65 = vector.load %arg1[%c0_65, %c0_66, %c227] : memref<1x16x1280xbf16, #tpu.memory_space<vmem>>, vector<1x16x1024xbf16>
    %66 = vector.shape_cast %65 : vector<1x16x1024xbf16> to vector<16x1024xbf16>
    %c336 = arith.constant 336 : index
    %c0_67 = arith.constant 0 : index
    %67 = vector.load %arg8[%c336, %c0_67] : memref<432x1024xbf16, #tpu.memory_space<vmem>>, vector<16x1024xbf16>
    tpu.vector_store %arg8[%c336, %c0_67], %66 {strides = array<i32>} : memref<432x1024xbf16, #tpu.memory_space<vmem>>, vector<16x1024xbf16>,
    %c0_68 = arith.constant 0 : index
    %c0_69 = arith.constant 0 : index
    %c228 = arith.constant 228 : index
    %68 = vector.load %arg1[%c0_68, %c0_69, %c228] : memref<1x16x1280xbf16, #tpu.memory_space<vmem>>, vector<1x16x1024xbf16>
    %69 = vector.shape_cast %68 : vector<1x16x1024xbf16> to vector<16x1024xbf16>
    %c352 = arith.constant 352 : index
    %c0_70 = arith.constant 0 : index
    %70 = vector.load %arg8[%c352, %c0_70] : memref<432x1024xbf16, #tpu.memory_space<vmem>>, vector<16x1024xbf16>
    tpu.vector_store %arg8[%c352, %c0_70], %69 {strides = array<i32>} : memref<432x1024xbf16, #tpu.memory_space<vmem>>, vector<16x1024xbf16>,
    %c0_71 = arith.constant 0 : index
    %c0_72 = arith.constant 0 : index
    %c229 = arith.constant 229 : index
    %71 = vector.load %arg1[%c0_71, %c0_72, %c229] : memref<1x16x1280xbf16, #tpu.memory_space<vmem>>, vector<1x16x1024xbf16>
    %72 = vector.shape_cast %71 : vector<1x16x1024xbf16> to vector<16x1024xbf16>
    %c368 = arith.constant 368 : index
    %c0_73 = arith.constant 0 : index
    %73 = vector.load %arg8[%c368, %c0_73] : memref<432x1024xbf16, #tpu.memory_space<vmem>>, vector<16x1024xbf16>
    tpu.vector_store %arg8[%c368, %c0_73], %72 {strides = array<i32>} : memref<432x1024xbf16, #tpu.memory_space<vmem>>, vector<16x1024xbf16>,
    %c0_74 = arith.constant 0 : index
    %c0_75 = arith.constant 0 : index
    %c237 = arith.constant 237 : index
    %74 = vector.load %arg1[%c0_74, %c0_75, %c237] : memref<1x16x1280xbf16, #tpu.memory_space<vmem>>, vector<1x16x1024xbf16>
    %75 = vector.shape_cast %74 : vector<1x16x1024xbf16> to vector<16x1024xbf16>
    %c384 = arith.constant 384 : index
    %c0_76 = arith.constant 0 : index
    %76 = vector.load %arg8[%c384, %c0_76] : memref<432x1024xbf16, #tpu.memory_space<vmem>>, vector<16x1024xbf16>
    tpu.vector_store %arg8[%c384, %c0_76], %75 {strides = array<i32>} : memref<432x1024xbf16, #tpu.memory_space<vmem>>, vector<16x1024xbf16>,
    %c0_77 = arith.constant 0 : index
    %c0_78 = arith.constant 0 : index
    %c238 = arith.constant 238 : index
    %77 = vector.load %arg1[%c0_77, %c0_78, %c238] : memref<1x16x1280xbf16, #tpu.memory_space<vmem>>, vector<1x16x1024xbf16>
    %78 = vector.shape_cast %77 : vector<1x16x1024xbf16> to vector<16x1024xbf16>
    %c400 = arith.constant 400 : index
    %c0_79 = arith.constant 0 : index
    %79 = vector.load %arg8[%c400, %c0_79] : memref<432x1024xbf16, #tpu.memory_space<vmem>>, vector<16x1024xbf16>
    tpu.vector_store %arg8[%c400, %c0_79], %78 {strides = array<i32>} : memref<432x1024xbf16, #tpu.memory_space<vmem>>, vector<16x1024xbf16>,
    %c0_80 = arith.constant 0 : index
    %c0_81 = arith.constant 0 : index
    %c239 = arith.constant 239 : index
    %80 = vector.load %arg1[%c0_80, %c0_81, %c239] : memref<1x16x1280xbf16, #tpu.memory_space<vmem>>, vector<1x16x1024xbf16>
    %81 = vector.shape_cast %80 : vector<1x16x1024xbf16> to vector<16x1024xbf16>
    %c416 = arith.constant 416 : index
    %c0_82 = arith.constant 0 : index
    %82 = vector.load %arg8[%c416, %c0_82] : memref<432x1024xbf16, #tpu.memory_space<vmem>>, vector<16x1024xbf16>
    tpu.vector_store %arg8[%c416, %c0_82], %81 {strides = array<i32>} : memref<432x1024xbf16, #tpu.memory_space<vmem>>, vector<16x1024xbf16>,
    %c0_83 = arith.constant 0 : index
    %c0_84 = arith.constant 0 : index
    %83 = vector.load %arg2[%c0_83, %c0_84] : memref<16x432xbf16, #tpu.memory_space<vmem>>, vector<16x432xbf16>
    %c0_85 = arith.constant 0 : index
    %c0_86 = arith.constant 0 : index
    %84 = vector.load %arg8[%c0_85, %c0_86] : memref<432x1024xbf16, #tpu.memory_space<vmem>>, vector<432x1024xbf16>
    %cst_87 = arith.constant dense<0.000000e+00> : vector<16x1024xf32>
    %85 = tpu.matmul %83, %84, %cst_87 {dimension_numbers = #tpu.dot_dimension_numbers<[1], [0], [0], [1], [0, 0, 1, 1], [], []>} : vector<16x432xbf16>, vector<432x1024xbf16>, vector<16x1024xf32> -> vector<16x1024xf32>
    %c0_88 = arith.constant 0 : index
    %c0_89 = arith.constant 0 : index
    %86 = vector.load %arg6[%c0_88, %c0_89] : memref<1x1024xf32, #tpu.memory_space<vmem>>, vector<1x1024xf32>
    %87 = vector.broadcast %86 : vector<1x1024xf32> to vector<16x1024xf32>
    %88 = arith.mulf %85, %87 : vector<16x1024xf32>
    %cst_90 = arith.constant dense<0.000000e+00> : vector<16xf32>
    %89 = vector.multi_reduction <add>, %88, %cst_90 [1] : vector<16x1024xf32> to vector<16xf32>
    %90 = vector.shape_cast %89 : vector<16xf32> to vector<16x1xf32>
    %91 = arith.addf %0, %90 : vector<16x1xf32>
    %92 = arith.mulf %88, %85 : vector<16x1024xf32>
    %cst_91 = arith.constant dense<0.000000e+00> : vector<16xf32>
    %93 = vector.multi_reduction <add>, %92, %cst_91 [1] : vector<16x1024xf32> to vector<16xf32>
    %94 = vector.shape_cast %93 : vector<16xf32> to vector<16x1xf32>
    %95 = arith.addf %1, %94 : vector<16x1xf32>
    %96 = arith.truncf %85 : vector<16x1024xf32> to vector<16x1024xbf16>
    %c0_92 = arith.constant 0 : index
    %c0_93 = arith.constant 0 : index
    %c128_94 = arith.constant 128 : index
    %97 = vector.load %arg7[%c0_92, %c0_93, %c128_94] : memref<1x16x1280xbf16, #tpu.memory_space<vmem>>, vector<1x16x1024xbf16>
    %98 = vector.shape_cast %97 : vector<1x16x1024xbf16> to vector<16x1024xbf16>
    %99 = vector.shape_cast %96 : vector<16x1024xbf16> to vector<1x16x1024xbf16>
    tpu.vector_store %arg7[%c0_92, %c0_93, %c128_94], %99 {strides = array<i32>} : memref<1x16x1280xbf16, #tpu.memory_space<vmem>>, vector<1x16x1024xbf16>,
    %cst_95 = arith.constant 0.001953125 : f32
    %100 = vector.broadcast %cst_95 : f32 to vector<16x1xf32>
    %101 = arith.mulf %91, %100 : vector<16x1xf32>
    %cst_96 = arith.constant 0.001953125 : f32
    %102 = vector.broadcast %cst_96 : f32 to vector<16x1xf32>
    %103 = arith.mulf %95, %102 : vector<16x1xf32>
    %104 = arith.mulf %101, %101 : vector<16x1xf32>
    %105 = arith.subf %103, %104 : vector<16x1xf32>
    %cst_97 = arith.constant 0.000000e+00 : f32
    %106 = vector.broadcast %cst_97 : f32 to vector<16x1xf32>
    %107 = arith.maximumf %105, %106 : vector<16x1xf32>
    %c0_98 = arith.constant 0 : index
    %c0_99 = arith.constant 0 : index
    %108 = vector.load %arg3[%c0_98, %c0_99] : memref<16x1xf32, #tpu.memory_space<vmem>>, vector<16x1xf32>
    %cst_100 = arith.constant 9.99999974E-6 : f32
    %109 = vector.broadcast %cst_100 : f32 to vector<16x1xf32>
    %110 = arith.addf %107, %109 : vector<16x1xf32>
    %111 = math.rsqrt %110 : vector<16x1xf32>
    %112 = arith.mulf %108, %111 : vector<16x1xf32>
    %c0_101 = arith.constant 0 : index
    %c0_102 = arith.constant 0 : index
    %113 = vector.load %arg4[%c0_101, %c0_102] : memref<16x1xf32, #tpu.memory_space<vmem>>, vector<16x1xf32>
    %114 = arith.mulf %101, %112 : vector<16x1xf32>
    %115 = arith.subf %113, %114 : vector<16x1xf32>
    %c0_103 = arith.constant 0 : index
    %c0_104 = arith.constant 0 : index
    %c0_105 = arith.constant 0 : index
    %116 = vector.load %arg5[%c0_103, %c0_104, %c0_105] : memref<1x16x1xf32, #tpu.memory_space<vmem>>, vector<1x16x1xf32>
    %117 = vector.shape_cast %116 : vector<1x16x1xf32> to vector<16x1xf32>
    %c0_106 = arith.constant 0 : index
    %c0_107 = arith.constant 0 : index
    %c128_108 = arith.constant 128 : index
    %118 = vector.load %arg7[%c0_106, %c0_107, %c128_108] : memref<1x16x1280xbf16, #tpu.memory_space<vmem>>, vector<1x16x1024xbf16>
    %119 = vector.shape_cast %118 : vector<1x16x1024xbf16> to vector<16x1024xbf16>
    %120 = arith.extf %119 : vector<16x1024xbf16> to vector<16x1024xf32>
    %121 = vector.broadcast %112 : vector<16x1xf32> to vector<16x1024xf32>
    %122 = arith.mulf %120, %121 : vector<16x1024xf32>
    %123 = vector.broadcast %115 : vector<16x1xf32> to vector<16x1024xf32>
    %124 = arith.addf %122, %123 : vector<16x1024xf32>
    %cst_109 = arith.constant 0.000000e+00 : f32
    %125 = vector.broadcast %cst_109 : f32 to vector<16x1024xf32>
    %126 = arith.cmpf oge, %124, %125 : vector<16x1024xf32>
    %cst_110 = arith.constant 1.000000e-01 : f32
    %127 = vector.broadcast %cst_110 : f32 to vector<16x1024xf32>
    %128 = arith.mulf %127, %124 : vector<16x1024xf32>
    %129 = arith.select %126, %124, %128 : vector<16x1024xi1>, vector<16x1024xf32>
    %130 = vector.broadcast %117 : vector<16x1xf32> to vector<16x1024xf32>
    %131 = arith.addf %129, %130 : vector<16x1024xf32>
    %c0_111 = arith.constant 0 : index
    %c0_112 = arith.constant 0 : index
    %132 = vector.load %arg6[%c0_111, %c0_112] : memref<1x1024xf32, #tpu.memory_space<vmem>>, vector<1x1024xf32>
    %133 = vector.broadcast %132 : vector<1x1024xf32> to vector<16x1024xf32>
    %134 = arith.mulf %131, %133 : vector<16x1024xf32>
    %135 = arith.truncf %134 : vector<16x1024xf32> to vector<16x1024xbf16>
    %c0_113 = arith.constant 0 : index
    %c0_114 = arith.constant 0 : index
    %c128_115 = arith.constant 128 : index
    %136 = vector.load %arg7[%c0_113, %c0_114, %c128_115] : memref<1x16x1280xbf16, #tpu.memory_space<vmem>>, vector<1x16x1024xbf16>
    %137 = vector.shape_cast %136 : vector<1x16x1024xbf16> to vector<16x1024xbf16>
    %138 = vector.shape_cast %135 : vector<16x1024xbf16> to vector<1x16x1024xbf16>
    tpu.vector_store %arg7[%c0_113, %c0_114, %c128_115], %138 {strides = array<i32>} : memref<1x16x1280xbf16, #tpu.memory_space<vmem>>, vector<1x16x1024xbf16>,
    %cst_116 = arith.constant 0.000000e+00 : bf16
    %139 = vector.broadcast %cst_116 : bf16 to vector<16x128xbf16>
    %c0_117 = arith.constant 0 : index
    %c0_118 = arith.constant 0 : index
    %c0_119 = arith.constant 0 : index
    %140 = vector.load %arg7[%c0_117, %c0_118, %c0_119] : memref<1x16x1280xbf16, #tpu.memory_space<vmem>>, vector<1x16x128xbf16>
    %141 = vector.shape_cast %140 : vector<1x16x128xbf16> to vector<16x128xbf16>
    %142 = vector.shape_cast %139 : vector<16x128xbf16> to vector<1x16x128xbf16>
    tpu.vector_store %arg7[%c0_117, %c0_118, %c0_119], %142 {strides = array<i32>} : memref<1x16x1280xbf16, #tpu.memory_space<vmem>>, vector<1x16x128xbf16>,
    %cst_120 = arith.constant 0.000000e+00 : bf16
    %143 = vector.broadcast %cst_120 : bf16 to vector<16x128xbf16>
    %c0_121 = arith.constant 0 : index
    %c0_122 = arith.constant 0 : index
    %c1152 = arith.constant 1152 : index
    %144 = vector.load %arg7[%c0_121, %c0_122, %c1152] : memref<1x16x1280xbf16, #tpu.memory_space<vmem>>, vector<1x16x128xbf16>
    %145 = vector.shape_cast %144 : vector<1x16x128xbf16> to vector<16x128xbf16>
    %146 = vector.shape_cast %143 : vector<16x128xbf16> to vector<1x16x128xbf16>
    tpu.vector_store %arg7[%c0_121, %c0_122, %c1152], %146 {strides = array<i32>} : memref<1x16x1280xbf16, #tpu.memory_space<vmem>>, vector<1x16x128xbf16>,
    return
  }
  func.func @transform_0(%arg0: i32) -> (i32, i32, i32) {
    %c0_i32 = arith.constant 0 : i32
    %c0_i32_0 = arith.constant 0 : i32
    %c0_i32_1 = arith.constant 0 : i32
    return %arg0, %c0_i32, %c0_i32_0 : i32, i32, i32
  }
  func.func @transform_1(%arg0: i32) -> (i32, i32) {
    %c0_i32 = arith.constant 0 : i32
    %c0_i32_0 = arith.constant 0 : i32
    %c0_i32_1 = arith.constant 0 : i32
    return %c0_i32, %c0_i32_0 : i32, i32
  }
  func.func @transform_2(%arg0: i32) -> (i32, i32) {
    %c0_i32 = arith.constant 0 : i32
    %c0_i32_0 = arith.constant 0 : i32
    %c0_i32_1 = arith.constant 0 : i32
    return %c0_i32, %c0_i32_0 : i32, i32
  }
  func.func @transform_3(%arg0: i32) -> (i32, i32) {
    %c0_i32 = arith.constant 0 : i32
    %c0_i32_0 = arith.constant 0 : i32
    %c0_i32_1 = arith.constant 0 : i32
    return %c0_i32, %c0_i32_0 : i32, i32
  }
  func.func @transform_4(%arg0: i32) -> (i32, i32, i32) {
    %c0_i32 = arith.constant 0 : i32
    %c0_i32_0 = arith.constant 0 : i32
    %c0_i32_1 = arith.constant 0 : i32
    return %arg0, %c0_i32, %c0_i32_0 : i32, i32, i32
  }
  func.func @transform_5(%arg0: i32) -> (i32, i32) {
    %c0_i32 = arith.constant 0 : i32
    %c0_i32_0 = arith.constant 0 : i32
    %c0_i32_1 = arith.constant 0 : i32
    return %c0_i32, %c0_i32_0 : i32, i32
  }
  func.func @transform_6(%arg0: i32) -> (i32, i32, i32) {
    %c0_i32 = arith.constant 0 : i32
    %c0_i32_0 = arith.constant 0 : i32
    %c0_i32_1 = arith.constant 0 : i32
    return %arg0, %c0_i32, %c0_i32_0 : i32, i32, i32
  }
}

module attributes {stable_mosaic.version = 11 : i64} {
  func.func @_conv3x3_in_lrelu_kernel(%arg0: i32, %arg1: memref<1x16x1280xbf16, #tpu.memory_space<vmem>>, %arg2: memref<16x432xbf16, #tpu.memory_space<vmem>>, %arg3: memref<16x1xf32, #tpu.memory_space<vmem>>, %arg4: memref<16x1xf32, #tpu.memory_space<vmem>>, %arg5: memref<1x16x1xf32, #tpu.memory_space<vmem>>, %arg6: memref<1x1024xf32, #tpu.memory_space<vmem>>, %arg7: memref<1x16x1280xf32, #tpu.memory_space<vmem>>, %arg8: memref<432x1024xbf16, #tpu.memory_space<vmem>>) attributes {dimension_semantics = [#tpu.dimension_semantics<parallel>], iteration_bounds = array<i64: 2>, scalar_prefetch = 0 : i64, scratch_operands = 1 : i64, tpu.core_type = #tpu.core_type<tc>, window_params = [{transform_indices = @transform_0, window_bounds = array<i64: 1, 16, 1280>}, {pipeline_mode = #tpu.pipeline_mode<synchronous>, transform_indices = @transform_1, window_bounds = array<i64: 16, 432>}, {pipeline_mode = #tpu.pipeline_mode<synchronous>, transform_indices = @transform_2, window_bounds = array<i64: 16, 1>}, {pipeline_mode = #tpu.pipeline_mode<synchronous>, transform_indices = @transform_3, window_bounds = array<i64: 16, 1>}, {transform_indices = @transform_4, window_bounds = array<i64: 1, 16, 1>}, {pipeline_mode = #tpu.pipeline_mode<synchronous>, transform_indices = @transform_5, window_bounds = array<i64: 1, 1024>}, {transform_indices = @transform_6, window_bounds = array<i64: 1, 16, 1280>}]} {
    %cst = arith.constant 0.000000e+00 : f32
    %0 = vector.broadcast %cst : f32 to vector<16x1xf32>
    %cst_0 = arith.constant 0.000000e+00 : f32
    %1 = vector.broadcast %cst_0 : f32 to vector<16x1xf32>
    %c0 = arith.constant 0 : index
    %c0_1 = arith.constant 0 : index
    %c17 = arith.constant 17 : index
    %2 = vector.load %arg1[%c0, %c0_1, %c17] : memref<1x16x1280xbf16, #tpu.memory_space<vmem>>, vector<1x16x1024xbf16>
    %3 = vector.shape_cast %2 : vector<1x16x1024xbf16> to vector<16x1024xbf16>
    %c0_2 = arith.constant 0 : index
    %c0_3 = arith.constant 0 : index
    %4 = vector.load %arg8[%c0_2, %c0_3] : memref<432x1024xbf16, #tpu.memory_space<vmem>>, vector<16x1024xbf16>
    tpu.vector_store %arg8[%c0_2, %c0_3], %3 {strides = array<i32>} : memref<432x1024xbf16, #tpu.memory_space<vmem>>, vector<16x1024xbf16>,
    %c0_4 = arith.constant 0 : index
    %c0_5 = arith.constant 0 : index
    %c18 = arith.constant 18 : index
    %5 = vector.load %arg1[%c0_4, %c0_5, %c18] : memref<1x16x1280xbf16, #tpu.memory_space<vmem>>, vector<1x16x1024xbf16>
    %6 = vector.shape_cast %5 : vector<1x16x1024xbf16> to vector<16x1024xbf16>
    %c16 = arith.constant 16 : index
    %c0_6 = arith.constant 0 : index
    %7 = vector.load %arg8[%c16, %c0_6] : memref<432x1024xbf16, #tpu.memory_space<vmem>>, vector<16x1024xbf16>
    tpu.vector_store %arg8[%c16, %c0_6], %6 {strides = array<i32>} : memref<432x1024xbf16, #tpu.memory_space<vmem>>, vector<16x1024xbf16>,
    %c0_7 = arith.constant 0 : index
    %c0_8 = arith.constant 0 : index
    %c19 = arith.constant 19 : index
    %8 = vector.load %arg1[%c0_7, %c0_8, %c19] : memref<1x16x1280xbf16, #tpu.memory_space<vmem>>, vector<1x16x1024xbf16>
    %9 = vector.shape_cast %8 : vector<1x16x1024xbf16> to vector<16x1024xbf16>
    %c32 = arith.constant 32 : index
    %c0_9 = arith.constant 0 : index
    %10 = vector.load %arg8[%c32, %c0_9] : memref<432x1024xbf16, #tpu.memory_space<vmem>>, vector<16x1024xbf16>
    tpu.vector_store %arg8[%c32, %c0_9], %9 {strides = array<i32>} : memref<432x1024xbf16, #tpu.memory_space<vmem>>, vector<16x1024xbf16>,
    %c0_10 = arith.constant 0 : index
    %c0_11 = arith.constant 0 : index
    %c27 = arith.constant 27 : index
    %11 = vector.load %arg1[%c0_10, %c0_11, %c27] : memref<1x16x1280xbf16, #tpu.memory_space<vmem>>, vector<1x16x1024xbf16>
    %12 = vector.shape_cast %11 : vector<1x16x1024xbf16> to vector<16x1024xbf16>
    %c48 = arith.constant 48 : index
    %c0_12 = arith.constant 0 : index
    %13 = vector.load %arg8[%c48, %c0_12] : memref<432x1024xbf16, #tpu.memory_space<vmem>>, vector<16x1024xbf16>
    tpu.vector_store %arg8[%c48, %c0_12], %12 {strides = array<i32>} : memref<432x1024xbf16, #tpu.memory_space<vmem>>, vector<16x1024xbf16>,
    %c0_13 = arith.constant 0 : index
    %c0_14 = arith.constant 0 : index
    %c28 = arith.constant 28 : index
    %14 = vector.load %arg1[%c0_13, %c0_14, %c28] : memref<1x16x1280xbf16, #tpu.memory_space<vmem>>, vector<1x16x1024xbf16>
    %15 = vector.shape_cast %14 : vector<1x16x1024xbf16> to vector<16x1024xbf16>
    %c64 = arith.constant 64 : index
    %c0_15 = arith.constant 0 : index
    %16 = vector.load %arg8[%c64, %c0_15] : memref<432x1024xbf16, #tpu.memory_space<vmem>>, vector<16x1024xbf16>
    tpu.vector_store %arg8[%c64, %c0_15], %15 {strides = array<i32>} : memref<432x1024xbf16, #tpu.memory_space<vmem>>, vector<16x1024xbf16>,
    %c0_16 = arith.constant 0 : index
    %c0_17 = arith.constant 0 : index
    %c29 = arith.constant 29 : index
    %17 = vector.load %arg1[%c0_16, %c0_17, %c29] : memref<1x16x1280xbf16, #tpu.memory_space<vmem>>, vector<1x16x1024xbf16>
    %18 = vector.shape_cast %17 : vector<1x16x1024xbf16> to vector<16x1024xbf16>
    %c80 = arith.constant 80 : index
    %c0_18 = arith.constant 0 : index
    %19 = vector.load %arg8[%c80, %c0_18] : memref<432x1024xbf16, #tpu.memory_space<vmem>>, vector<16x1024xbf16>
    tpu.vector_store %arg8[%c80, %c0_18], %18 {strides = array<i32>} : memref<432x1024xbf16, #tpu.memory_space<vmem>>, vector<16x1024xbf16>,
    %c0_19 = arith.constant 0 : index
    %c0_20 = arith.constant 0 : index
    %c37 = arith.constant 37 : index
    %20 = vector.load %arg1[%c0_19, %c0_20, %c37] : memref<1x16x1280xbf16, #tpu.memory_space<vmem>>, vector<1x16x1024xbf16>
    %21 = vector.shape_cast %20 : vector<1x16x1024xbf16> to vector<16x1024xbf16>
    %c96 = arith.constant 96 : index
    %c0_21 = arith.constant 0 : index
    %22 = vector.load %arg8[%c96, %c0_21] : memref<432x1024xbf16, #tpu.memory_space<vmem>>, vector<16x1024xbf16>
    tpu.vector_store %arg8[%c96, %c0_21], %21 {strides = array<i32>} : memref<432x1024xbf16, #tpu.memory_space<vmem>>, vector<16x1024xbf16>,
    %c0_22 = arith.constant 0 : index
    %c0_23 = arith.constant 0 : index
    %c38 = arith.constant 38 : index
    %23 = vector.load %arg1[%c0_22, %c0_23, %c38] : memref<1x16x1280xbf16, #tpu.memory_space<vmem>>, vector<1x16x1024xbf16>
    %24 = vector.shape_cast %23 : vector<1x16x1024xbf16> to vector<16x1024xbf16>
    %c112 = arith.constant 112 : index
    %c0_24 = arith.constant 0 : index
    %25 = vector.load %arg8[%c112, %c0_24] : memref<432x1024xbf16, #tpu.memory_space<vmem>>, vector<16x1024xbf16>
    tpu.vector_store %arg8[%c112, %c0_24], %24 {strides = array<i32>} : memref<432x1024xbf16, #tpu.memory_space<vmem>>, vector<16x1024xbf16>,
    %c0_25 = arith.constant 0 : index
    %c0_26 = arith.constant 0 : index
    %c39 = arith.constant 39 : index
    %26 = vector.load %arg1[%c0_25, %c0_26, %c39] : memref<1x16x1280xbf16, #tpu.memory_space<vmem>>, vector<1x16x1024xbf16>
    %27 = vector.shape_cast %26 : vector<1x16x1024xbf16> to vector<16x1024xbf16>
    %c128 = arith.constant 128 : index
    %c0_27 = arith.constant 0 : index
    %28 = vector.load %arg8[%c128, %c0_27] : memref<432x1024xbf16, #tpu.memory_space<vmem>>, vector<16x1024xbf16>
    tpu.vector_store %arg8[%c128, %c0_27], %27 {strides = array<i32>} : memref<432x1024xbf16, #tpu.memory_space<vmem>>, vector<16x1024xbf16>,
    %c0_28 = arith.constant 0 : index
    %c0_29 = arith.constant 0 : index
    %c117 = arith.constant 117 : index
    %29 = vector.load %arg1[%c0_28, %c0_29, %c117] : memref<1x16x1280xbf16, #tpu.memory_space<vmem>>, vector<1x16x1024xbf16>
    %30 = vector.shape_cast %29 : vector<1x16x1024xbf16> to vector<16x1024xbf16>
    %c144 = arith.constant 144 : index
    %c0_30 = arith.constant 0 : index
    %31 = vector.load %arg8[%c144, %c0_30] : memref<432x1024xbf16, #tpu.memory_space<vmem>>, vector<16x1024xbf16>
    tpu.vector_store %arg8[%c144, %c0_30], %30 {strides = array<i32>} : memref<432x1024xbf16, #tpu.memory_space<vmem>>, vector<16x1024xbf16>,
    %c0_31 = arith.constant 0 : index
    %c0_32 = arith.constant 0 : index
    %c118 = arith.constant 118 : index
    %32 = vector.load %arg1[%c0_31, %c0_32, %c118] : memref<1x16x1280xbf16, #tpu.memory_space<vmem>>, vector<1x16x1024xbf16>
    %33 = vector.shape_cast %32 : vector<1x16x1024xbf16> to vector<16x1024xbf16>
    %c160 = arith.constant 160 : index
    %c0_33 = arith.constant 0 : index
    %34 = vector.load %arg8[%c160, %c0_33] : memref<432x1024xbf16, #tpu.memory_space<vmem>>, vector<16x1024xbf16>
    tpu.vector_store %arg8[%c160, %c0_33], %33 {strides = array<i32>} : memref<432x1024xbf16, #tpu.memory_space<vmem>>, vector<16x1024xbf16>,
    %c0_34 = arith.constant 0 : index
    %c0_35 = arith.constant 0 : index
    %c119 = arith.constant 119 : index
    %35 = vector.load %arg1[%c0_34, %c0_35, %c119] : memref<1x16x1280xbf16, #tpu.memory_space<vmem>>, vector<1x16x1024xbf16>
    %36 = vector.shape_cast %35 : vector<1x16x1024xbf16> to vector<16x1024xbf16>
    %c176 = arith.constant 176 : index
    %c0_36 = arith.constant 0 : index
    %37 = vector.load %arg8[%c176, %c0_36] : memref<432x1024xbf16, #tpu.memory_space<vmem>>, vector<16x1024xbf16>
    tpu.vector_store %arg8[%c176, %c0_36], %36 {strides = array<i32>} : memref<432x1024xbf16, #tpu.memory_space<vmem>>, vector<16x1024xbf16>,
    %c0_37 = arith.constant 0 : index
    %c0_38 = arith.constant 0 : index
    %c127 = arith.constant 127 : index
    %38 = vector.load %arg1[%c0_37, %c0_38, %c127] : memref<1x16x1280xbf16, #tpu.memory_space<vmem>>, vector<1x16x1024xbf16>
    %39 = vector.shape_cast %38 : vector<1x16x1024xbf16> to vector<16x1024xbf16>
    %c192 = arith.constant 192 : index
    %c0_39 = arith.constant 0 : index
    %40 = vector.load %arg8[%c192, %c0_39] : memref<432x1024xbf16, #tpu.memory_space<vmem>>, vector<16x1024xbf16>
    tpu.vector_store %arg8[%c192, %c0_39], %39 {strides = array<i32>} : memref<432x1024xbf16, #tpu.memory_space<vmem>>, vector<16x1024xbf16>,
    %c0_40 = arith.constant 0 : index
    %c0_41 = arith.constant 0 : index
    %c128_42 = arith.constant 128 : index
    %41 = vector.load %arg1[%c0_40, %c0_41, %c128_42] : memref<1x16x1280xbf16, #tpu.memory_space<vmem>>, vector<1x16x1024xbf16>
    %42 = vector.shape_cast %41 : vector<1x16x1024xbf16> to vector<16x1024xbf16>
    %c208 = arith.constant 208 : index
    %c0_43 = arith.constant 0 : index
    %43 = vector.load %arg8[%c208, %c0_43] : memref<432x1024xbf16, #tpu.memory_space<vmem>>, vector<16x1024xbf16>
    tpu.vector_store %arg8[%c208, %c0_43], %42 {strides = array<i32>} : memref<432x1024xbf16, #tpu.memory_space<vmem>>, vector<16x1024xbf16>,
    %c0_44 = arith.constant 0 : index
    %c0_45 = arith.constant 0 : index
    %c129 = arith.constant 129 : index
    %44 = vector.load %arg1[%c0_44, %c0_45, %c129] : memref<1x16x1280xbf16, #tpu.memory_space<vmem>>, vector<1x16x1024xbf16>
    %45 = vector.shape_cast %44 : vector<1x16x1024xbf16> to vector<16x1024xbf16>
    %c224 = arith.constant 224 : index
    %c0_46 = arith.constant 0 : index
    %46 = vector.load %arg8[%c224, %c0_46] : memref<432x1024xbf16, #tpu.memory_space<vmem>>, vector<16x1024xbf16>
    tpu.vector_store %arg8[%c224, %c0_46], %45 {strides = array<i32>} : memref<432x1024xbf16, #tpu.memory_space<vmem>>, vector<16x1024xbf16>,
    %c0_47 = arith.constant 0 : index
    %c0_48 = arith.constant 0 : index
    %c137 = arith.constant 137 : index
    %47 = vector.load %arg1[%c0_47, %c0_48, %c137] : memref<1x16x1280xbf16, #tpu.memory_space<vmem>>, vector<1x16x1024xbf16>
    %48 = vector.shape_cast %47 : vector<1x16x1024xbf16> to vector<16x1024xbf16>
    %c240 = arith.constant 240 : index
    %c0_49 = arith.constant 0 : index
    %49 = vector.load %arg8[%c240, %c0_49] : memref<432x1024xbf16, #tpu.memory_space<vmem>>, vector<16x1024xbf16>
    tpu.vector_store %arg8[%c240, %c0_49], %48 {strides = array<i32>} : memref<432x1024xbf16, #tpu.memory_space<vmem>>, vector<16x1024xbf16>,
    %c0_50 = arith.constant 0 : index
    %c0_51 = arith.constant 0 : index
    %c138 = arith.constant 138 : index
    %50 = vector.load %arg1[%c0_50, %c0_51, %c138] : memref<1x16x1280xbf16, #tpu.memory_space<vmem>>, vector<1x16x1024xbf16>
    %51 = vector.shape_cast %50 : vector<1x16x1024xbf16> to vector<16x1024xbf16>
    %c256 = arith.constant 256 : index
    %c0_52 = arith.constant 0 : index
    %52 = vector.load %arg8[%c256, %c0_52] : memref<432x1024xbf16, #tpu.memory_space<vmem>>, vector<16x1024xbf16>
    tpu.vector_store %arg8[%c256, %c0_52], %51 {strides = array<i32>} : memref<432x1024xbf16, #tpu.memory_space<vmem>>, vector<16x1024xbf16>,
    %c0_53 = arith.constant 0 : index
    %c0_54 = arith.constant 0 : index
    %c139 = arith.constant 139 : index
    %53 = vector.load %arg1[%c0_53, %c0_54, %c139] : memref<1x16x1280xbf16, #tpu.memory_space<vmem>>, vector<1x16x1024xbf16>
    %54 = vector.shape_cast %53 : vector<1x16x1024xbf16> to vector<16x1024xbf16>
    %c272 = arith.constant 272 : index
    %c0_55 = arith.constant 0 : index
    %55 = vector.load %arg8[%c272, %c0_55] : memref<432x1024xbf16, #tpu.memory_space<vmem>>, vector<16x1024xbf16>
    tpu.vector_store %arg8[%c272, %c0_55], %54 {strides = array<i32>} : memref<432x1024xbf16, #tpu.memory_space<vmem>>, vector<16x1024xbf16>,
    %c0_56 = arith.constant 0 : index
    %c0_57 = arith.constant 0 : index
    %c217 = arith.constant 217 : index
    %56 = vector.load %arg1[%c0_56, %c0_57, %c217] : memref<1x16x1280xbf16, #tpu.memory_space<vmem>>, vector<1x16x1024xbf16>
    %57 = vector.shape_cast %56 : vector<1x16x1024xbf16> to vector<16x1024xbf16>
    %c288 = arith.constant 288 : index
    %c0_58 = arith.constant 0 : index
    %58 = vector.load %arg8[%c288, %c0_58] : memref<432x1024xbf16, #tpu.memory_space<vmem>>, vector<16x1024xbf16>
    tpu.vector_store %arg8[%c288, %c0_58], %57 {strides = array<i32>} : memref<432x1024xbf16, #tpu.memory_space<vmem>>, vector<16x1024xbf16>,
    %c0_59 = arith.constant 0 : index
    %c0_60 = arith.constant 0 : index
    %c218 = arith.constant 218 : index
    %59 = vector.load %arg1[%c0_59, %c0_60, %c218] : memref<1x16x1280xbf16, #tpu.memory_space<vmem>>, vector<1x16x1024xbf16>
    %60 = vector.shape_cast %59 : vector<1x16x1024xbf16> to vector<16x1024xbf16>
    %c304 = arith.constant 304 : index
    %c0_61 = arith.constant 0 : index
    %61 = vector.load %arg8[%c304, %c0_61] : memref<432x1024xbf16, #tpu.memory_space<vmem>>, vector<16x1024xbf16>
    tpu.vector_store %arg8[%c304, %c0_61], %60 {strides = array<i32>} : memref<432x1024xbf16, #tpu.memory_space<vmem>>, vector<16x1024xbf16>,
    %c0_62 = arith.constant 0 : index
    %c0_63 = arith.constant 0 : index
    %c219 = arith.constant 219 : index
    %62 = vector.load %arg1[%c0_62, %c0_63, %c219] : memref<1x16x1280xbf16, #tpu.memory_space<vmem>>, vector<1x16x1024xbf16>
    %63 = vector.shape_cast %62 : vector<1x16x1024xbf16> to vector<16x1024xbf16>
    %c320 = arith.constant 320 : index
    %c0_64 = arith.constant 0 : index
    %64 = vector.load %arg8[%c320, %c0_64] : memref<432x1024xbf16, #tpu.memory_space<vmem>>, vector<16x1024xbf16>
    tpu.vector_store %arg8[%c320, %c0_64], %63 {strides = array<i32>} : memref<432x1024xbf16, #tpu.memory_space<vmem>>, vector<16x1024xbf16>,
    %c0_65 = arith.constant 0 : index
    %c0_66 = arith.constant 0 : index
    %c227 = arith.constant 227 : index
    %65 = vector.load %arg1[%c0_65, %c0_66, %c227] : memref<1x16x1280xbf16, #tpu.memory_space<vmem>>, vector<1x16x1024xbf16>
    %66 = vector.shape_cast %65 : vector<1x16x1024xbf16> to vector<16x1024xbf16>
    %c336 = arith.constant 336 : index
    %c0_67 = arith.constant 0 : index
    %67 = vector.load %arg8[%c336, %c0_67] : memref<432x1024xbf16, #tpu.memory_space<vmem>>, vector<16x1024xbf16>
    tpu.vector_store %arg8[%c336, %c0_67], %66 {strides = array<i32>} : memref<432x1024xbf16, #tpu.memory_space<vmem>>, vector<16x1024xbf16>,
    %c0_68 = arith.constant 0 : index
    %c0_69 = arith.constant 0 : index
    %c228 = arith.constant 228 : index
    %68 = vector.load %arg1[%c0_68, %c0_69, %c228] : memref<1x16x1280xbf16, #tpu.memory_space<vmem>>, vector<1x16x1024xbf16>
    %69 = vector.shape_cast %68 : vector<1x16x1024xbf16> to vector<16x1024xbf16>
    %c352 = arith.constant 352 : index
    %c0_70 = arith.constant 0 : index
    %70 = vector.load %arg8[%c352, %c0_70] : memref<432x1024xbf16, #tpu.memory_space<vmem>>, vector<16x1024xbf16>
    tpu.vector_store %arg8[%c352, %c0_70], %69 {strides = array<i32>} : memref<432x1024xbf16, #tpu.memory_space<vmem>>, vector<16x1024xbf16>,
    %c0_71 = arith.constant 0 : index
    %c0_72 = arith.constant 0 : index
    %c229 = arith.constant 229 : index
    %71 = vector.load %arg1[%c0_71, %c0_72, %c229] : memref<1x16x1280xbf16, #tpu.memory_space<vmem>>, vector<1x16x1024xbf16>
    %72 = vector.shape_cast %71 : vector<1x16x1024xbf16> to vector<16x1024xbf16>
    %c368 = arith.constant 368 : index
    %c0_73 = arith.constant 0 : index
    %73 = vector.load %arg8[%c368, %c0_73] : memref<432x1024xbf16, #tpu.memory_space<vmem>>, vector<16x1024xbf16>
    tpu.vector_store %arg8[%c368, %c0_73], %72 {strides = array<i32>} : memref<432x1024xbf16, #tpu.memory_space<vmem>>, vector<16x1024xbf16>,
    %c0_74 = arith.constant 0 : index
    %c0_75 = arith.constant 0 : index
    %c237 = arith.constant 237 : index
    %74 = vector.load %arg1[%c0_74, %c0_75, %c237] : memref<1x16x1280xbf16, #tpu.memory_space<vmem>>, vector<1x16x1024xbf16>
    %75 = vector.shape_cast %74 : vector<1x16x1024xbf16> to vector<16x1024xbf16>
    %c384 = arith.constant 384 : index
    %c0_76 = arith.constant 0 : index
    %76 = vector.load %arg8[%c384, %c0_76] : memref<432x1024xbf16, #tpu.memory_space<vmem>>, vector<16x1024xbf16>
    tpu.vector_store %arg8[%c384, %c0_76], %75 {strides = array<i32>} : memref<432x1024xbf16, #tpu.memory_space<vmem>>, vector<16x1024xbf16>,
    %c0_77 = arith.constant 0 : index
    %c0_78 = arith.constant 0 : index
    %c238 = arith.constant 238 : index
    %77 = vector.load %arg1[%c0_77, %c0_78, %c238] : memref<1x16x1280xbf16, #tpu.memory_space<vmem>>, vector<1x16x1024xbf16>
    %78 = vector.shape_cast %77 : vector<1x16x1024xbf16> to vector<16x1024xbf16>
    %c400 = arith.constant 400 : index
    %c0_79 = arith.constant 0 : index
    %79 = vector.load %arg8[%c400, %c0_79] : memref<432x1024xbf16, #tpu.memory_space<vmem>>, vector<16x1024xbf16>
    tpu.vector_store %arg8[%c400, %c0_79], %78 {strides = array<i32>} : memref<432x1024xbf16, #tpu.memory_space<vmem>>, vector<16x1024xbf16>,
    %c0_80 = arith.constant 0 : index
    %c0_81 = arith.constant 0 : index
    %c239 = arith.constant 239 : index
    %80 = vector.load %arg1[%c0_80, %c0_81, %c239] : memref<1x16x1280xbf16, #tpu.memory_space<vmem>>, vector<1x16x1024xbf16>
    %81 = vector.shape_cast %80 : vector<1x16x1024xbf16> to vector<16x1024xbf16>
    %c416 = arith.constant 416 : index
    %c0_82 = arith.constant 0 : index
    %82 = vector.load %arg8[%c416, %c0_82] : memref<432x1024xbf16, #tpu.memory_space<vmem>>, vector<16x1024xbf16>
    tpu.vector_store %arg8[%c416, %c0_82], %81 {strides = array<i32>} : memref<432x1024xbf16, #tpu.memory_space<vmem>>, vector<16x1024xbf16>,
    %c0_83 = arith.constant 0 : index
    %c0_84 = arith.constant 0 : index
    %83 = vector.load %arg2[%c0_83, %c0_84] : memref<16x432xbf16, #tpu.memory_space<vmem>>, vector<16x432xbf16>
    %c0_85 = arith.constant 0 : index
    %c0_86 = arith.constant 0 : index
    %84 = vector.load %arg8[%c0_85, %c0_86] : memref<432x1024xbf16, #tpu.memory_space<vmem>>, vector<432x1024xbf16>
    %cst_87 = arith.constant dense<0.000000e+00> : vector<16x1024xf32>
    %85 = tpu.matmul %83, %84, %cst_87 {dimension_numbers = #tpu.dot_dimension_numbers<[1], [0], [0], [1], [0, 0, 1, 1], [], []>} : vector<16x432xbf16>, vector<432x1024xbf16>, vector<16x1024xf32> -> vector<16x1024xf32>
    %c0_88 = arith.constant 0 : index
    %c0_89 = arith.constant 0 : index
    %86 = vector.load %arg6[%c0_88, %c0_89] : memref<1x1024xf32, #tpu.memory_space<vmem>>, vector<1x1024xf32>
    %87 = vector.broadcast %86 : vector<1x1024xf32> to vector<16x1024xf32>
    %88 = arith.mulf %85, %87 : vector<16x1024xf32>
    %cst_90 = arith.constant dense<0.000000e+00> : vector<16xf32>
    %89 = vector.multi_reduction <add>, %88, %cst_90 [1] : vector<16x1024xf32> to vector<16xf32>
    %90 = vector.shape_cast %89 : vector<16xf32> to vector<16x1xf32>
    %91 = arith.addf %0, %90 : vector<16x1xf32>
    %92 = arith.mulf %88, %85 : vector<16x1024xf32>
    %cst_91 = arith.constant dense<0.000000e+00> : vector<16xf32>
    %93 = vector.multi_reduction <add>, %92, %cst_91 [1] : vector<16x1024xf32> to vector<16xf32>
    %94 = vector.shape_cast %93 : vector<16xf32> to vector<16x1xf32>
    %95 = arith.addf %1, %94 : vector<16x1xf32>
    %c0_92 = arith.constant 0 : index
    %c0_93 = arith.constant 0 : index
    %c128_94 = arith.constant 128 : index
    %96 = vector.load %arg7[%c0_92, %c0_93, %c128_94] : memref<1x16x1280xf32, #tpu.memory_space<vmem>>, vector<1x16x1024xf32>
    %97 = vector.shape_cast %96 : vector<1x16x1024xf32> to vector<16x1024xf32>
    %98 = vector.shape_cast %85 : vector<16x1024xf32> to vector<1x16x1024xf32>
    tpu.vector_store %arg7[%c0_92, %c0_93, %c128_94], %98 {strides = array<i32>} : memref<1x16x1280xf32, #tpu.memory_space<vmem>>, vector<1x16x1024xf32>,
    %cst_95 = arith.constant 0.001953125 : f32
    %99 = vector.broadcast %cst_95 : f32 to vector<16x1xf32>
    %100 = arith.mulf %91, %99 : vector<16x1xf32>
    %cst_96 = arith.constant 0.001953125 : f32
    %101 = vector.broadcast %cst_96 : f32 to vector<16x1xf32>
    %102 = arith.mulf %95, %101 : vector<16x1xf32>
    %103 = arith.mulf %100, %100 : vector<16x1xf32>
    %104 = arith.subf %102, %103 : vector<16x1xf32>
    %cst_97 = arith.constant 0.000000e+00 : f32
    %105 = vector.broadcast %cst_97 : f32 to vector<16x1xf32>
    %106 = arith.maximumf %104, %105 : vector<16x1xf32>
    %c0_98 = arith.constant 0 : index
    %c0_99 = arith.constant 0 : index
    %107 = vector.load %arg3[%c0_98, %c0_99] : memref<16x1xf32, #tpu.memory_space<vmem>>, vector<16x1xf32>
    %cst_100 = arith.constant 9.99999974E-6 : f32
    %108 = vector.broadcast %cst_100 : f32 to vector<16x1xf32>
    %109 = arith.addf %106, %108 : vector<16x1xf32>
    %110 = math.rsqrt %109 : vector<16x1xf32>
    %111 = arith.mulf %107, %110 : vector<16x1xf32>
    %c0_101 = arith.constant 0 : index
    %c0_102 = arith.constant 0 : index
    %112 = vector.load %arg4[%c0_101, %c0_102] : memref<16x1xf32, #tpu.memory_space<vmem>>, vector<16x1xf32>
    %113 = arith.mulf %100, %111 : vector<16x1xf32>
    %114 = arith.subf %112, %113 : vector<16x1xf32>
    %c0_103 = arith.constant 0 : index
    %c0_104 = arith.constant 0 : index
    %c0_105 = arith.constant 0 : index
    %115 = vector.load %arg5[%c0_103, %c0_104, %c0_105] : memref<1x16x1xf32, #tpu.memory_space<vmem>>, vector<1x16x1xf32>
    %116 = vector.shape_cast %115 : vector<1x16x1xf32> to vector<16x1xf32>
    %c0_106 = arith.constant 0 : index
    %c0_107 = arith.constant 0 : index
    %c128_108 = arith.constant 128 : index
    %117 = vector.load %arg7[%c0_106, %c0_107, %c128_108] : memref<1x16x1280xf32, #tpu.memory_space<vmem>>, vector<1x16x1024xf32>
    %118 = vector.shape_cast %117 : vector<1x16x1024xf32> to vector<16x1024xf32>
    %119 = vector.broadcast %111 : vector<16x1xf32> to vector<16x1024xf32>
    %120 = arith.mulf %118, %119 : vector<16x1024xf32>
    %121 = vector.broadcast %114 : vector<16x1xf32> to vector<16x1024xf32>
    %122 = arith.addf %120, %121 : vector<16x1024xf32>
    %cst_109 = arith.constant 0.000000e+00 : f32
    %123 = vector.broadcast %cst_109 : f32 to vector<16x1024xf32>
    %124 = arith.cmpf oge, %122, %123 : vector<16x1024xf32>
    %cst_110 = arith.constant 1.000000e-01 : f32
    %125 = vector.broadcast %cst_110 : f32 to vector<16x1024xf32>
    %126 = arith.mulf %125, %122 : vector<16x1024xf32>
    %127 = arith.select %124, %122, %126 : vector<16x1024xi1>, vector<16x1024xf32>
    %128 = vector.broadcast %116 : vector<16x1xf32> to vector<16x1024xf32>
    %129 = arith.addf %127, %128 : vector<16x1024xf32>
    %c0_111 = arith.constant 0 : index
    %c0_112 = arith.constant 0 : index
    %130 = vector.load %arg6[%c0_111, %c0_112] : memref<1x1024xf32, #tpu.memory_space<vmem>>, vector<1x1024xf32>
    %131 = vector.broadcast %130 : vector<1x1024xf32> to vector<16x1024xf32>
    %132 = arith.mulf %129, %131 : vector<16x1024xf32>
    %c0_113 = arith.constant 0 : index
    %c0_114 = arith.constant 0 : index
    %c128_115 = arith.constant 128 : index
    %133 = vector.load %arg7[%c0_113, %c0_114, %c128_115] : memref<1x16x1280xf32, #tpu.memory_space<vmem>>, vector<1x16x1024xf32>
    %134 = vector.shape_cast %133 : vector<1x16x1024xf32> to vector<16x1024xf32>
    %135 = vector.shape_cast %132 : vector<16x1024xf32> to vector<1x16x1024xf32>
    tpu.vector_store %arg7[%c0_113, %c0_114, %c128_115], %135 {strides = array<i32>} : memref<1x16x1280xf32, #tpu.memory_space<vmem>>, vector<1x16x1024xf32>,
    %cst_116 = arith.constant 0.000000e+00 : f32
    %136 = vector.broadcast %cst_116 : f32 to vector<16x128xf32>
    %c0_117 = arith.constant 0 : index
    %c0_118 = arith.constant 0 : index
    %c0_119 = arith.constant 0 : index
    %137 = vector.load %arg7[%c0_117, %c0_118, %c0_119] : memref<1x16x1280xf32, #tpu.memory_space<vmem>>, vector<1x16x128xf32>
    %138 = vector.shape_cast %137 : vector<1x16x128xf32> to vector<16x128xf32>
    %139 = vector.shape_cast %136 : vector<16x128xf32> to vector<1x16x128xf32>
    tpu.vector_store %arg7[%c0_117, %c0_118, %c0_119], %139 {strides = array<i32>} : memref<1x16x1280xf32, #tpu.memory_space<vmem>>, vector<1x16x128xf32>,
    %cst_120 = arith.constant 0.000000e+00 : f32
    %140 = vector.broadcast %cst_120 : f32 to vector<16x128xf32>
    %c0_121 = arith.constant 0 : index
    %c0_122 = arith.constant 0 : index
    %c1152 = arith.constant 1152 : index
    %141 = vector.load %arg7[%c0_121, %c0_122, %c1152] : memref<1x16x1280xf32, #tpu.memory_space<vmem>>, vector<1x16x128xf32>
    %142 = vector.shape_cast %141 : vector<1x16x128xf32> to vector<16x128xf32>
    %143 = vector.shape_cast %140 : vector<16x128xf32> to vector<1x16x128xf32>
    tpu.vector_store %arg7[%c0_121, %c0_122, %c1152], %143 {strides = array<i32>} : memref<1x16x1280xf32, #tpu.memory_space<vmem>>, vector<1x16x128xf32>,
    return
  }
  func.func @transform_0(%arg0: i32) -> (i32, i32, i32) {
    %c0_i32 = arith.constant 0 : i32
    %c0_i32_0 = arith.constant 0 : i32
    %c0_i32_1 = arith.constant 0 : i32
    return %arg0, %c0_i32, %c0_i32_0 : i32, i32, i32
  }
  func.func @transform_1(%arg0: i32) -> (i32, i32) {
    %c0_i32 = arith.constant 0 : i32
    %c0_i32_0 = arith.constant 0 : i32
    %c0_i32_1 = arith.constant 0 : i32
    return %c0_i32, %c0_i32_0 : i32, i32
  }
  func.func @transform_2(%arg0: i32) -> (i32, i32) {
    %c0_i32 = arith.constant 0 : i32
    %c0_i32_0 = arith.constant 0 : i32
    %c0_i32_1 = arith.constant 0 : i32
    return %c0_i32, %c0_i32_0 : i32, i32
  }
  func.func @transform_3(%arg0: i32) -> (i32, i32) {
    %c0_i32 = arith.constant 0 : i32
    %c0_i32_0 = arith.constant 0 : i32
    %c0_i32_1 = arith.constant 0 : i32
    return %c0_i32, %c0_i32_0 : i32, i32
  }
  func.func @transform_4(%arg0: i32) -> (i32, i32, i32) {
    %c0_i32 = arith.constant 0 : i32
    %c0_i32_0 = arith.constant 0 : i32
    %c0_i32_1 = arith.constant 0 : i32
    return %arg0, %c0_i32, %c0_i32_0 : i32, i32, i32
  }
  func.func @transform_5(%arg0: i32) -> (i32, i32) {
    %c0_i32 = arith.constant 0 : i32
    %c0_i32_0 = arith.constant 0 : i32
    %c0_i32_1 = arith.constant 0 : i32
    return %c0_i32, %c0_i32_0 : i32, i32
  }
  func.func @transform_6(%arg0: i32) -> (i32, i32, i32) {
    %c0_i32 = arith.constant 0 : i32
    %c0_i32_0 = arith.constant 0 : i32
    %c0_i32_1 = arith.constant 0 : i32
    return %arg0, %c0_i32, %c0_i32_0 : i32, i32, i32
  }
}

</mosaic_0001>

<bundles_post_ra>
// kernel: upcat_forward.2
= control target key start
LH: loop header
LB: loop body
LE: loop exit
PB: predicated region body
PF: predicated region fallthrough
CT: control target
= control target key end

     0   :  { %s5873_s21 = smov 0   ;;  %s8012_s0 = inlined_call_operand.vmem [shape: bf16[2,16,1280], index: 0, kind: input, shape index: {}]   ;;  %s8013_s1 = inlined_call_operand.vmem [shape: bf16[16,432], index: 1, kind: input, shape index: {}]   ;;  %s8014_s2 = inlined_call_operand.vmem [shape: f32[16,1], index: 2, kind: input, shape index: {}]   ;;  %s8015_s3 = inlined_call_operand.vmem [shape: f32[16,1], index: 3, kind: input, shape index: {}]   ;;  %s8016_s4 = inlined_call_operand.vmem [shape: f32[2,16,1], index: 4, kind: input, shape index: {}]   ;;  %s8017_s5 = inlined_call_operand.vmem [shape: f32[1,1024], index: 5, kind: input, shape index: {}]   ;;  %s8018_s6 = inlined_call_operand.vmem [shape: bf16[2,16,1280], index: 6, kind: output, shape index: {}]  }
   0x1 LB: > { %s4640_s22 = sadd.s32 4294967295, %s5809_s21   ;;  %p4644_p0 = scmp.ge.s32.totalorder %s5809_s21, 1  ;;  %s5809_s21 = sphi %s5873_s21, %s16_s21  }
   0x2   : > { %p222_p1 = scmp.lt.s32.totalorder %s5809_s21, 3 }
   0x4   : > { %p223_p2 = pnand %p4644_p0, %p222_p1 }
   0x5   : > { %p257_p3 = scmp.lt.s32.totalorder (!%p223_p2), %s4640_s22, 1  ;;  %s5811_s27 = smov (!%p223_p2), 111  }
   0x6   : > { %226 = sbr.rel (%p223_p2) target bundleno = 1319 (0x527), region = 44  ;;  %s5812_s28 = smov (!%p223_p2), 110  }
   0x7   : > { %s5813_s29 = smov (!%p223_p2), 109   ;;  %s5814_s30 = smov (!%p223_p2), 101  }
   0x8   : > { %s5815_s7 = smov (!%p223_p2), 100   ;;  %s5816_s8 = smov (!%p223_p2), 99  }
   0x9   : > { %s5817_s9 = smov (!%p223_p2), 91   ;;  %s5818_s10 = smov (!%p223_p2), 90  }
   0xa   : > { %s5819_s11 = smov (!%p223_p2), 89   ;;  %s5820_s12 = smov (!%p223_p2), 11  }
   0xb   : > { %s8096_s22 = smov (!%p257_p3, %s4640_s22), 1  ;;  %vm323_vm0 = vcmask 1043456   ;;  %vm325_vm1 = vcmask 908288   ;;  %vm408_vm2 = vcmask 900096   ;;  %vm491_vm3 = vcmask 891904   ;;  %s5821_s13 = smov 10  }
   0xc   : > { %s5760_s23 = smul.u32 80, %s8096_s22  ;;  %vm574_vm4 = vcmask 826368   ;;  %vm657_vm5 = vcmask 818176   ;;  %vm740_vm6 = vcmask 809984   ;;  %vm823_vm7 = vcmask 744448   ;;  %s5822_s14 = smov 9  }
   0xd   : > { %vm906_vm8 = vcmask 736256   ;;  %s5823_s15 = smov 1   ;;  %vm989_vm9 = vcmask 728064   ;;  %s5824_s16 = smov 27   ;;  %vm1072_vm10 = vcmask 89088   ;;  %vm1155_vm11 = vcmask 80896  }
   0xe   : > { %s5889_s26 = scalar_lea.vmem %s8012_s0, %s5760_s23  ;;  %s5825_s17 = smov 119   ;;  %vm1238_vm12 = vcmask 72704   ;;  %vm1321_vm13 = vcmask 7168   ;;  %vm2167_vm14 = vcmask 220160   ;;  %vm1503_vm15 = vcmask 973824  }
   0xf   : > { %v277_v0 = vld [vmem:[%s5889_s26 + $0x20] sm:$0xf]  ;;  %v5893_v1 = vld [vmem:[%s5889_s26 + $0x10] sm:$0xff]  ;;  %v5901_v3 = vld [vmem:[%s5889_s26 + $0x28] sm:$0xff]  ;;  %s5826_s18 = smov 28   ;;  %s5827_s19 = smov 127  }
  0x10   : > { %v5896_v2 = vld [vmem:[%s5889_s26] sm:$0xff]  ;;  %301 = vrot.lane.b32.xlu2 %v277_v0, %s5811_s27  ;;  %297 = vrot.lane.b32.xlu1 %v5893_v1, %s5811_s27  ;;  %v5904_v4 = vld [vmem:[%s5889_s26 + $0x18] sm:$0xff]  ;;  %s5828_s20 = smov 29   ;;  %s5829_s24 = smov 37  }
  0x11   : > { %293 = vrot.lane.b32.xlu0 %v5896_v2, %s5811_s27  ;;  %v5907_v5 = vld [vmem:[%s5889_s26 + $0x8] sm:$0xff]  ;;  %v5913_v6 = vld [vmem:[%s5889_s26 + $0x40] sm:$0xff]  ;;  %v5916_v7 = vld [vmem:[%s5889_s26 + $0x38] sm:$0xff]  ;;  %s5830_s25 = smov 38  }
  0x12   : > { %v5919_v8 = vld [vmem:[%s5889_s26 + $0x30] sm:$0xff]  ;;  %v282_v9 = vld [vmem:[%s5889_s26 + $0x48] sm:$0xf]  ;;  %v361_v10 = vld [vmem:[%s5889_s26 + $0x20] sm:$0xf] }
  0x13   : > { %v366_v11 = vld [vmem:[%s5889_s26 + $0x48] sm:$0xf]  ;;  %v444_v12 = vld [vmem:[%s5889_s26 + $0x20] sm:$0xf] }
  0x14   : > { %v449_v13 = vld [vmem:[%s5889_s26 + $0x48] sm:$0xf]  ;;  %v527_v14 = vld [vmem:[%s5889_s26 + $0x20] sm:$0xf] }
  0x15   : > { %v532_v17 = vld [vmem:[%s5889_s26 + $0x48] sm:$0xf]  ;;  %v610_v19 = vld [vmem:[%s5889_s26 + $0x20] sm:$0xf] }
  0x16   : > { %v615_v33 = vld [vmem:[%s5889_s26 + $0x48] sm:$0xf]  ;;  %v693_v62 = vld [vmem:[%s5889_s26 + $0x20] sm:$0xf] }
  0x18   : > { %303 = vrot.lane.b32.xlu2 %v5901_v3, %s5811_s27  ;;  %299 = vrot.lane.b32.xlu1 %v5904_v4, %s5811_s27 }
  0x19   : > { %295 = vrot.lane.b32.xlu0 %v5907_v5, %s5811_s27 }
  0x20   : > { %309 = vrot.lane.b32.xlu2 %v5913_v6, %s5811_s27  ;;  %307 = vrot.lane.b32.xlu1 %v5916_v7, %s5811_s27 }
  0x21   : > { %305 = vrot.lane.b32.xlu0 %v5919_v8, %s5811_s27 }
  0x28   : > { %379 = vrot.lane.b32.xlu2 %v5907_v5, %s5812_s28  ;;  %377 = vrot.lane.b32.xlu1 %v5896_v2, %s5812_s28 }
  0x29   : > { %311 = vrot.lane.b32.xlu0 %v282_v9, %s5811_s27  ;;  %s5831_s27 = smov 39  }
  0x30   : > { %385 = vrot.lane.b32.xlu2 %v361_v10, %s5812_s28  ;;  %383 = vrot.lane.b32.xlu1 %v5904_v4, %s5812_s28 }
  0x31   : > { %381 = vrot.lane.b32.xlu0 %v5893_v1, %s5812_s28 }
  0x38   : > { %391 = vrot.lane.b32.xlu2 %v5916_v7, %s5812_s28  ;;  %389 = vrot.lane.b32.xlu1 %v5919_v8, %s5812_s28 }
  0x39   : > { %387 = vrot.lane.b32.xlu0 %v5901_v3, %s5812_s28 }
  0x40   : > { %460 = vrot.lane.b32.xlu2 %v5896_v2, %s5813_s29  ;;  %395 = vrot.lane.b32.xlu1 %v366_v11, %s5812_s28 }
  0x41   : > { %393 = vrot.lane.b32.xlu0 %v5913_v6, %s5812_s28  ;;  %s5832_s28 = smov 17  }
  0x48   : > { %466 = vrot.lane.b32.xlu2 %v5904_v4, %s5813_s29  ;;  %464 = vrot.lane.b32.xlu1 %v5893_v1, %s5813_s29 }
  0x49   : > { %462 = vrot.lane.b32.xlu0 %v5907_v5, %s5813_s29 }
  0x50   : > { %472 = vrot.lane.b32.xlu2 %v5919_v8, %s5813_s29  ;;  %470 = vrot.lane.b32.xlu1 %v5901_v3, %s5813_s29 }
  0x51   : > { %468 = vrot.lane.b32.xlu0 %v444_v12, %s5813_s29 }
  0x58   : > { %478 = vrot.lane.b32.xlu2 %v449_v13, %s5813_s29  ;;  %476 = vrot.lane.b32.xlu1 %v5913_v6, %s5813_s29 }
  0x59   : > { %474 = vrot.lane.b32.xlu0 %v5916_v7, %s5813_s29  ;;  %s5833_s29 = smov 117  }
  0x60   : > { %547 = vrot.lane.b32.xlu2 %v5893_v1, %s5814_s30  ;;  %545 = vrot.lane.b32.xlu1 %v5907_v5, %s5814_s30 }
  0x61   : > { %543 = vrot.lane.b32.xlu0 %v5896_v2, %s5814_s30 }
  0x68   : > { %553 = vrot.lane.b32.xlu2 %v5901_v3, %s5814_s30  ;;  %551 = vrot.lane.b32.xlu1 %v527_v14, %s5814_s30 }
  0x69   : > { %549 = vrot.lane.b32.xlu0 %v5904_v4, %s5814_s30 }
  0x6a   : > { %v302_v15 = vpop.permute.xlu2 %301 }
  0x6b   : > { %v317_v23 = vrot.slane %v302_v15, 4  ;;  %v698_v15 = vld [vmem:[%s5889_s26 + $0x48] sm:$0xf] }
  0x70   : > { %559 = vrot.lane.b32.xlu2 %v5913_v6, %s5814_s30  ;;  %557 = vrot.lane.b32.xlu1 %v5916_v7, %s5814_s30 }
  0x71   : > { %555 = vrot.lane.b32.xlu0 %v5919_v8, %s5814_s30 }
  0x72   : > { %v304_v16 = vpop.permute.xlu2 %303 }
  0x73   : > { %v318_v41 = vrot.slane %v304_v16, 4 }
  0x78   : > { %628 = vrot.lane.b32.xlu2 %v5907_v5, %s5815_s7  ;;  %626 = vrot.lane.b32.xlu1 %v5896_v2, %s5815_s7 }
  0x79   : > { %561 = vrot.lane.b32.xlu0 %v532_v17, %s5814_s30  ;;  %s5834_s30 = smov 18  }
  0x7a   : > { %v5959_v18 = vpop.permute.xlu2 %309 }
  0x7b   : > { %v321_v40 = vrot.slane %v5959_v18, 4 }
  0x80   : > { %634 = vrot.lane.b32.xlu2 %v610_v19, %s5815_s7  ;;  %632 = vrot.lane.b32.xlu1 %v5904_v4, %s5815_s7 }
  0x81   : > { %630 = vrot.lane.b32.xlu0 %v5893_v1, %s5815_s7 }
  0x82   : > { %v5967_v20 = vpop.permute.xlu2 %379  ;;  %v298_v21 = vpop.permute.xlu1 %297 }
  0x83   : > { %v294_v22 = vpop.permute.xlu0 %293  ;;  %v315_v26 = vrot.slane %v298_v21, 4  ;;  %v398_v53 = vrot.slane %v5967_v20, 4 }
  0x84   : > { %v313_v29 = vrot.slane %v294_v22, 4 }
  0x88   : > { %640 = vrot.lane.b32.xlu2 %v5916_v7, %s5815_s7  ;;  %638 = vrot.lane.b32.xlu1 %v5919_v8, %s5815_s7 }
  0x89   : > { %636 = vrot.lane.b32.xlu0 %v5901_v3, %s5815_s7 }
  0x8a   : > { %v5975_v24 = vpop.permute.xlu2 %385  ;;  %v300_v25 = vpop.permute.xlu1 %299 }
  0x8b   : > { %v316_v27 = vrot.slane %v300_v25, 4  ;;  %v296_v28 = vpop.permute.xlu0 %295  ;;  %v401_v0 = vrot.slane %v5975_v24, 4 }
  0x8c   : > { %v314_v30 = vrot.slane %v296_v28, 4 }
  0x8d   : > { %v329_v31 = vsel %vm323_vm0, %v315_v26, %v316_v27  ;;  %v331_v32 = vsel %vm323_vm0, %v316_v27, %v317_v23 }
  0x8e   : > { %v330_v34 = vsel %vm325_vm1, %v298_v21, %v329_v31  ;;  %v332_v35 = vsel %vm325_vm1, %v300_v25, %v331_v32  ;;  %v324_v36 = vsel %vm323_vm0, %v313_v29, %v314_v30  ;;  %v327_v37 = vsel %vm323_vm0, %v314_v30, %v315_v26 }
  0x8f   : > { %351 = vst [vmem:[#allocation2 + $0x10] sm:$0xff] %v330_v34  ;;  %v326_v38 = vsel %vm325_vm1, %v294_v22, %v324_v36  ;;  %v328_v39 = vsel %vm325_vm1, %v296_v28, %v327_v37  ;;  %v776_v36 = vld [vmem:[%s5889_s26 + $0x20] sm:$0xf] }
  0x90   : > { %352 = vst [vmem:[#allocation2 + $0x18] sm:$0xff] %v332_v35  ;;  %709 = vrot.lane.b32.xlu2 %v5896_v2, %s5816_s8  ;;  %644 = vrot.lane.b32.xlu1 %v615_v33, %s5815_s7 }
  0x91   : > { %349 = vst [vmem:[#allocation2] sm:$0xff] %v326_v38  ;;  %642 = vrot.lane.b32.xlu0 %v5913_v6, %s5815_s7  ;;  %s5835_s7 = smov 118  }
  0x92   : > { %350 = vst [vmem:[#allocation2 + $0x8] sm:$0xff] %v328_v39  ;;  %v5992_v42 = vpop.permute.xlu2 %391  ;;  %v308_v43 = vpop.permute.xlu1 %307 }
  0x93   : > { %v320_v44 = vrot.slane %v308_v43, 4  ;;  %v306_v45 = vpop.permute.xlu0 %305  ;;  %v404_v22 = vrot.slane %v5992_v42, 4 }
  0x94   : > { %v319_v46 = vrot.slane %v306_v45, 4 }
  0x95   : > { %v337_v47 = vsel %vm323_vm0, %v320_v44, %v321_v40 }
  0x96   : > { %v338_v48 = vsel %vm325_vm1, %v308_v43, %v337_v47  ;;  %v333_v49 = vsel %vm323_vm0, %v318_v41, %v319_v46  ;;  %v335_v50 = vsel %vm323_vm0, %v319_v46, %v320_v44 }
  0x97   : > { %355 = vst [vmem:[#allocation2 + $0x30] sm:$0xff] %v338_v48  ;;  %v334_v51 = vsel %vm325_vm1, %v304_v16, %v333_v49  ;;  %v336_v52 = vsel %vm325_vm1, %v306_v45, %v335_v50 }
  0x98   : > { %353 = vst [vmem:[#allocation2 + $0x20] sm:$0xff] %v334_v51  ;;  %715 = vrot.lane.b32.xlu2 %v5904_v4, %s5816_s8  ;;  %713 = vrot.lane.b32.xlu1 %v5893_v1, %s5816_s8 }
  0x99   : > { %354 = vst [vmem:[#allocation2 + $0x28] sm:$0xff] %v336_v52  ;;  %711 = vrot.lane.b32.xlu0 %v5907_v5, %s5816_s8 }
  0x9a   : > { %v6007_v54 = vpop.permute.xlu2 %460  ;;  %v378_v55 = vpop.permute.xlu1 %377 }
  0x9b   : > { %v397_v56 = vrot.slane %v378_v55, 4  ;;  %v312_v57 = vpop.permute.xlu0 %311  ;;  %v480_v43 = vrot.slane %v6007_v54, 4 }
  0x9c   : > { %v322_v58 = vrot.slane %v312_v57, 4 }
  0x9d   : > { %v407_v59 = vsel %vm323_vm0, %v397_v56, %v398_v53 }
  0x9e   : > { %v409_v60 = vsel %vm408_vm2, %v378_v55, %v407_v59  ;;  %v339_v61 = vsel %vm323_vm0, %v321_v40, %v322_v58 }
  0x9f   : > { %432 = vst [vmem:[#allocation2 + $0x40] sm:$0xff] %v409_v60  ;;  %v340_v63 = vsel %vm325_vm1, %v5959_v18, %v339_v61  ;;  %vm2084_vm1 = vcmask 228352  }
  0xa0   : > { %356 = vst [vmem:[#allocation2 + $0x38] sm:$0xff] %v340_v63  ;;  %721 = vrot.lane.b32.xlu2 %v5919_v8, %s5816_s8  ;;  %719 = vrot.lane.b32.xlu1 %v5901_v3, %s5816_s8  ;;  %v781_v63 = vld [vmem:[%s5889_s26 + $0x48] sm:$0xf] }
  0xa1   : > { %717 = vrot.lane.b32.xlu0 %v693_v62, %s5816_s8 }
  0xa2   : > { %v6021_v9 = vpop.permute.xlu2 %466  ;;  %v384_v10 = vpop.permute.xlu1 %383 }
  0xa3   : > { %v400_v11 = vrot.slane %v384_v10, 4  ;;  %v382_v12 = vpop.permute.xlu0 %381  ;;  %v483_v41 = vrot.slane %v6021_v9, 4 }
  0xa4   : > { %v399_v13 = vrot.slane %v382_v12, 4 }
  0xa5   : > { %v414_v14 = vsel %vm323_vm0, %v400_v11, %v401_v0 }
  0xa6   : > { %v415_v16 = vsel %vm408_vm2, %v384_v10, %v414_v14  ;;  %v410_v17 = vsel %vm323_vm0, %v398_v53, %v399_v13  ;;  %v412_v18 = vsel %vm323_vm0, %v399_v13, %v400_v11 }
  0xa7   : > { %435 = vst [vmem:[#allocation2 + $0x58] sm:$0xff] %v415_v16  ;;  %v411_v19 = vsel %vm408_vm2, %v5967_v20, %v410_v17  ;;  %v413_v21 = vsel %vm408_vm2, %v382_v12, %v412_v18 }
  0xa8   : > { %433 = vst [vmem:[#allocation2 + $0x48] sm:$0xff] %v411_v19  ;;  %727 = vrot.lane.b32.xlu2 %v698_v15, %s5816_s8  ;;  %725 = vrot.lane.b32.xlu1 %v5913_v6, %s5816_s8 }
  0xa9   : > { %434 = vst [vmem:[#allocation2 + $0x50] sm:$0xff] %v413_v21  ;;  %723 = vrot.lane.b32.xlu0 %v5916_v7, %s5816_s8  ;;  %s5836_s8 = smov 19  }
  0xaa   : > { %v6037_v23 = vpop.permute.xlu2 %472  ;;  %v390_v24 = vpop.permute.xlu1 %389 }
  0xab   : > { %v403_v25 = vrot.slane %v390_v24, 4  ;;  %v388_v26 = vpop.permute.xlu0 %387  ;;  %v486_v55 = vrot.slane %v6037_v23, 4 }
  0xac   : > { %v402_v20 = vrot.slane %v388_v26, 4 }
  0xad   : > { %v418_v27 = vsel %vm323_vm0, %v403_v25, %v404_v22 }
  0xae   : > { %v419_v28 = vsel %vm408_vm2, %v390_v24, %v418_v27  ;;  %v416_v29 = vsel %vm323_vm0, %v402_v20, %v403_v25 }
  0xaf   : > { %437 = vst [vmem:[#allocation2 + $0x68] sm:$0xff] %v419_v28  ;;  %v417_v30 = vsel %vm408_vm2, %v388_v26, %v416_v29 }
  0xb0   : > { %436 = vst [vmem:[#allocation2 + $0x60] sm:$0xff] %v417_v30  ;;  %796 = vrot.lane.b32.xlu2 %v5893_v1, %s5817_s9  ;;  %794 = vrot.lane.b32.xlu1 %v5907_v5, %s5817_s9 }
  0xb1   : > { %792 = vrot.lane.b32.xlu0 %v5896_v2, %s5817_s9 }
  0xb2   : > { %v479_v31 = vpop.permute.xlu2 %478  ;;  %v396_v32 = vpop.permute.xlu1 %395 }
  0xb3   : > { %v406_v33 = vrot.slane %v396_v32, 4  ;;  %v394_v34 = vpop.permute.xlu0 %393  ;;  %v489_v10 = vrot.slane %v479_v31, 4 }
  0xb4   : > { %v405_v35 = vrot.slane %v394_v34, 4 }
  0xb6   : > { %v420_v37 = vsel %vm323_vm0, %v404_v22, %v405_v35  ;;  %v422_v38 = vsel %vm323_vm0, %v405_v35, %v406_v33 }
  0xb7   : > { %v421_v39 = vsel %vm408_vm2, %v5992_v42, %v420_v37  ;;  %v423_v40 = vsel %vm408_vm2, %v394_v34, %v422_v38  ;;  %v864_v37 = vld [vmem:[%s5889_s26 + $0x48] sm:$0xf]  ;;  %vm1420_vm2 = vcmask 1039360  }
  0xb8   : > { %438 = vst [vmem:[#allocation2 + $0x70] sm:$0xff] %v421_v39  ;;  %802 = vrot.lane.b32.xlu2 %v5901_v3, %s5817_s9  ;;  %800 = vrot.lane.b32.xlu1 %v776_v36, %s5817_s9 }
  0xb9   : > { %439 = vst [vmem:[#allocation2 + $0x78] sm:$0xff] %v423_v40  ;;  %798 = vrot.lane.b32.xlu0 %v5904_v4, %s5817_s9 }
  0xba   : > { %v6062_v44 = vpop.permute.xlu2 %547  ;;  %v465_v45 = vpop.permute.xlu1 %464 }
  0xbb   : > { %v482_v42 = vrot.slane %v465_v45, 4  ;;  %v463_v46 = vpop.permute.xlu0 %462  ;;  %v565_v24 = vrot.slane %v6062_v44, 4 }
  0xbc   : > { %v481_v47 = vrot.slane %v463_v46, 4 }
  0xbd   : > { %v495_v48 = vsel %vm323_vm0, %v482_v42, %v483_v41 }
  0xbe   : > { %v496_v49 = vsel %vm491_vm3, %v465_v45, %v495_v48  ;;  %v490_v50 = vsel %vm323_vm0, %v480_v43, %v481_v47  ;;  %v493_v51 = vsel %vm323_vm0, %v481_v47, %v482_v42 }
  0xbf   : > { %517 = vst [vmem:[#allocation2 + $0x90] sm:$0xff] %v496_v49  ;;  %v492_v52 = vsel %vm491_vm3, %v6007_v54, %v490_v50  ;;  %v494_v53 = vsel %vm491_vm3, %v463_v46, %v493_v51 }
  0xc0   : > { %515 = vst [vmem:[#allocation2 + $0x80] sm:$0xff] %v492_v52  ;;  %808 = vrot.lane.b32.xlu2 %v5913_v6, %s5817_s9  ;;  %806 = vrot.lane.b32.xlu1 %v5916_v7, %s5817_s9 }
  0xc1   : > { %516 = vst [vmem:[#allocation2 + $0x88] sm:$0xff] %v494_v53  ;;  %804 = vrot.lane.b32.xlu0 %v5919_v8, %s5817_s9 }
  0xc2   : > { %v6078_v56 = vpop.permute.xlu2 %553  ;;  %v471_v57 = vpop.permute.xlu1 %470 }
  0xc3   : > { %v485_v54 = vrot.slane %v471_v57, 4  ;;  %v469_v58 = vpop.permute.xlu0 %468  ;;  %v568_v45 = vrot.slane %v6078_v56, 4 }
  0xc4   : > { %v484_v59 = vrot.slane %v469_v58, 4 }
  0xc5   : > { %v499_v60 = vsel %vm323_vm0, %v485_v54, %v486_v55 }
  0xc6   : > { %v500_v61 = vsel %vm491_vm3, %v471_v57, %v499_v60  ;;  %v497_v62 = vsel %vm323_vm0, %v483_v41, %v484_v59 }
  0xc7   : > { %519 = vst [vmem:[#allocation2 + $0xa0] sm:$0xff] %v500_v61  ;;  %v498_v0 = vsel %vm491_vm3, %v6021_v9, %v497_v62  ;;  %v859_v9 = vld [vmem:[%s5889_s26 + $0x20] sm:$0xf] }
  0xc8   : > { %518 = vst [vmem:[#allocation2 + $0x98] sm:$0xff] %v498_v0  ;;  %877 = vrot.lane.b32.xlu2 %v5907_v5, %s5818_s10  ;;  %875 = vrot.lane.b32.xlu1 %v5896_v2, %s5818_s10  ;;  %v942_v0 = vld [vmem:[%s5889_s26 + $0x20] sm:$0xf] }
  0xc9   : > { %810 = vrot.lane.b32.xlu0 %v781_v63, %s5817_s9 }
  0xca   : > { %v6091_v11 = vpop.permute.xlu2 %559  ;;  %v477_v12 = vpop.permute.xlu1 %476 }
  0xcb   : > { %v488_v13 = vrot.slane %v477_v12, 4  ;;  %v475_v14 = vpop.permute.xlu0 %474  ;;  %v571_v43 = vrot.slane %v6091_v11, 4 }
  0xcc   : > { %v487_v15 = vrot.slane %v475_v14, 4 }
  0xcd   : > { %v505_v16 = vsel %vm323_vm0, %v488_v13, %v489_v10 }
  0xce   : > { %v506_v17 = vsel %vm491_vm3, %v477_v12, %v505_v16  ;;  %v501_v18 = vsel %vm323_vm0, %v486_v55, %v487_v15  ;;  %v503_v19 = vsel %vm323_vm0, %v487_v15, %v488_v13 }
  0xcf   : > { %522 = vst [vmem:[#allocation2 + $0xb8] sm:$0xff] %v506_v17  ;;  %v502_v21 = vsel %vm491_vm3, %v6037_v23, %v501_v18  ;;  %v504_v22 = vsel %vm491_vm3, %v475_v14, %v503_v19  ;;  %v947_v18 = vld [vmem:[%s5889_s26 + $0x48] sm:$0xf]  ;;  %vm2001_vm3 = vcmask 236544  }
  0xd0   : > { %520 = vst [vmem:[#allocation2 + $0xa8] sm:$0xff] %v502_v21  ;;  %883 = vrot.lane.b32.xlu2 %v859_v9, %s5818_s10  ;;  %881 = vrot.lane.b32.xlu1 %v5904_v4, %s5818_s10 }
  0xd1   : > { %521 = vst [vmem:[#allocation2 + $0xb0] sm:$0xff] %v504_v22  ;;  %879 = vrot.lane.b32.xlu0 %v5893_v1, %s5818_s10 }
  0xd2   : > { %v6107_v25 = vpop.permute.xlu2 %628  ;;  %v546_v26 = vpop.permute.xlu1 %545 }
  0xd3   : > { %v564_v20 = vrot.slane %v546_v26, 4  ;;  %v544_v23 = vpop.permute.xlu0 %543  ;;  %v647_v57 = vrot.slane %v6107_v25, 4 }
  0xd4   : > { %v563_v27 = vrot.slane %v544_v23, 4 }
  0xd5   : > { %v576_v28 = vsel %vm323_vm0, %v564_v20, %v565_v24 }
  0xd6   : > { %v577_v29 = vsel %vm574_vm4, %v546_v26, %v576_v28  ;;  %v573_v30 = vsel %vm323_vm0, %v563_v27, %v564_v20 }
  0xd7   : > { %599 = vst [vmem:[#allocation2 + $0xc8] sm:$0xff] %v577_v29  ;;  %v575_v31 = vsel %vm574_vm4, %v544_v23, %v573_v30 }
  0xd8   : > { %598 = vst [vmem:[#allocation2 + $0xc0] sm:$0xff] %v575_v31  ;;  %889 = vrot.lane.b32.xlu2 %v5916_v7, %s5818_s10  ;;  %887 = vrot.lane.b32.xlu1 %v5919_v8, %s5818_s10 }
  0xd9   : > { %885 = vrot.lane.b32.xlu0 %v5901_v3, %s5818_s10 }
  0xda   : > { %v635_v32 = vpop.permute.xlu2 %634  ;;  %v552_v33 = vpop.permute.xlu1 %551 }
  0xdb   : > { %v567_v34 = vrot.slane %v552_v33, 4  ;;  %v550_v35 = vpop.permute.xlu0 %549  ;;  %v650_v12 = vrot.slane %v635_v32, 4 }
  0xdc   : > { %v566_v36 = vrot.slane %v550_v35, 4 }
  0xde   : > { %v578_v38 = vsel %vm323_vm0, %v565_v24, %v566_v36  ;;  %v580_v39 = vsel %vm323_vm0, %v566_v36, %v567_v34 }
  0xdf   : > { %v579_v40 = vsel %vm574_vm4, %v6062_v44, %v578_v38  ;;  %v581_v41 = vsel %vm574_vm4, %v550_v35, %v580_v39  ;;  %v1025_v38 = vld [vmem:[%s5889_s26 + $0x20] sm:$0xf] }
  0xe0   : > { %600 = vst [vmem:[#allocation2 + $0xd0] sm:$0xff] %v579_v40  ;;  %958 = vrot.lane.b32.xlu2 %v5896_v2, %s5819_s11  ;;  %893 = vrot.lane.b32.xlu1 %v864_v37, %s5818_s10 }
  0xe1   : > { %601 = vst [vmem:[#allocation2 + $0xd8] sm:$0xff] %v581_v41  ;;  %891 = vrot.lane.b32.xlu0 %v5913_v6, %s5818_s10 }
  0xe2   : > { %v6132_v42 = vpop.permute.xlu2 %640  ;;  %v558_v44 = vpop.permute.xlu1 %557 }
  0xe3   : > { %v570_v46 = vrot.slane %v558_v44, 4  ;;  %v556_v47 = vpop.permute.xlu0 %555  ;;  %v653_v26 = vrot.slane %v6132_v42, 4 }
  0xe4   : > { %v569_v48 = vrot.slane %v556_v47, 4 }
  0xe5   : > { %v586_v49 = vsel %vm323_vm0, %v570_v46, %v571_v43 }
  0xe6   : > { %v587_v50 = vsel %vm574_vm4, %v558_v44, %v586_v49  ;;  %v582_v51 = vsel %vm323_vm0, %v568_v45, %v569_v48  ;;  %v584_v52 = vsel %vm323_vm0, %v569_v48, %v570_v46 }
  0xe7   : > { %604 = vst [vmem:[#allocation2 + $0xf0] sm:$0xff] %v587_v50  ;;  %v583_v53 = vsel %vm574_vm4, %v6078_v56, %v582_v51  ;;  %v585_v55 = vsel %vm574_vm4, %v556_v47, %v584_v52 }
  0xe8   : > { %602 = vst [vmem:[#allocation2 + $0xe0] sm:$0xff] %v583_v53  ;;  %964 = vrot.lane.b32.xlu2 %v5904_v4, %s5819_s11  ;;  %962 = vrot.lane.b32.xlu1 %v5893_v1, %s5819_s11 }
  0xe9   : > { %603 = vst [vmem:[#allocation2 + $0xe8] sm:$0xff] %v585_v55  ;;  %960 = vrot.lane.b32.xlu0 %v5907_v5, %s5819_s11 }
  0xea   : > { %v6148_v54 = vpop.permute.xlu2 %709  ;;  %v627_v58 = vpop.permute.xlu1 %626 }
  0xeb   : > { %v646_v56 = vrot.slane %v627_v58, 4  ;;  %v562_v59 = vpop.permute.xlu0 %561  ;;  %v729_v44 = vrot.slane %v6148_v54, 4 }
  0xec   : > { %v572_v60 = vrot.slane %v562_v59, 4 }
  0xed   : > { %v656_v61 = vsel %vm323_vm0, %v646_v56, %v647_v57 }
  0xee   : > { %v658_v62 = vsel %vm657_vm5, %v627_v58, %v656_v61  ;;  %v588_v63 = vsel %vm323_vm0, %v571_v43, %v572_v60 }
  0xef   : > { %681 = vst [vmem:[#allocation2 + $0x100] sm:$0xff] %v658_v62  ;;  %v589_v10 = vsel %vm574_vm4, %v6091_v11, %v588_v63  ;;  %vm1918_vm4 = vcmask 302080  }
  0xf0   : > { %605 = vst [vmem:[#allocation2 + $0xf8] sm:$0xff] %v589_v10  ;;  %970 = vrot.lane.b32.xlu2 %v5919_v8, %s5819_s11  ;;  %968 = vrot.lane.b32.xlu1 %v5901_v3, %s5819_s11 }
  0xf1   : > { %966 = vrot.lane.b32.xlu0 %v942_v0, %s5819_s11  ;;  %v1030_v0 = vld [vmem:[%s5889_s26 + $0x48] sm:$0xf] }
  0xf2   : > { %v6161_v13 = vpop.permute.xlu2 %715  ;;  %v633_v14 = vpop.permute.xlu1 %632 }
  0xf3   : > { %v649_v15 = vrot.slane %v633_v14, 4  ;;  %v631_v16 = vpop.permute.xlu0 %630  ;;  %v732_v45 = vrot.slane %v6161_v13, 4 }
  0xf4   : > { %v648_v9 = vrot.slane %v631_v16, 4 }
  0xf5   : > { %v663_v17 = vsel %vm323_vm0, %v649_v15, %v650_v12 }
  0xf6   : > { %v664_v11 = vsel %vm657_vm5, %v633_v14, %v663_v17  ;;  %v659_v19 = vsel %vm323_vm0, %v647_v57, %v648_v9  ;;  %v661_v21 = vsel %vm323_vm0, %v648_v9, %v649_v15 }
  0xf7   : > { %684 = vst [vmem:[#allocation2 + $0x118] sm:$0xff] %v664_v11  ;;  %v660_v22 = vsel %vm657_vm5, %v6107_v25, %v659_v19  ;;  %v662_v24 = vsel %vm657_vm5, %v631_v16, %v661_v21 }
  0xf8   : > { %682 = vst [vmem:[#allocation2 + $0x108] sm:$0xff] %v660_v22  ;;  %976 = vrot.lane.b32.xlu2 %v947_v18, %s5819_s11  ;;  %974 = vrot.lane.b32.xlu1 %v5913_v6, %s5819_s11 }
  0xf9   : > { %683 = vst [vmem:[#allocation2 + $0x110] sm:$0xff] %v662_v24  ;;  %972 = vrot.lane.b32.xlu0 %v5916_v7, %s5819_s11 }
  0xfa   : > { %v6177_v20 = vpop.permute.xlu2 %721  ;;  %v639_v23 = vpop.permute.xlu1 %638 }
  0xfb   : > { %v652_v27 = vrot.slane %v639_v23, 4  ;;  %v637_v28 = vpop.permute.xlu0 %636  ;;  %v735_v58 = vrot.slane %v6177_v20, 4 }
  0xfc   : > { %v651_v25 = vrot.slane %v637_v28, 4 }
  0xfd   : > { %v667_v29 = vsel %vm323_vm0, %v652_v27, %v653_v26 }
  0xfe   : > { %v668_v30 = vsel %vm657_vm5, %v639_v23, %v667_v29  ;;  %v665_v31 = vsel %vm323_vm0, %v651_v25, %v652_v27 }
  0xff   : > { %686 = vst [vmem:[#allocation2 + $0x128] sm:$0xff] %v668_v30  ;;  %v666_v32 = vsel %vm657_vm5, %v637_v28, %v665_v31 }
 0x100   : > { %685 = vst [vmem:[#allocation2 + $0x120] sm:$0xff] %v666_v32  ;;  %1045 = vrot.lane.b32.xlu2 %v5893_v1, %s5820_s12  ;;  %1043 = vrot.lane.b32.xlu1 %v5907_v5, %s5820_s12 }
 0x101   : > { %1041 = vrot.lane.b32.xlu0 %v5896_v2, %s5820_s12 }
 0x102   : > { %v728_v33 = vpop.permute.xlu2 %727  ;;  %v645_v34 = vpop.permute.xlu1 %644 }
 0x103   : > { %v655_v35 = vrot.slane %v645_v34, 4  ;;  %v643_v36 = vpop.permute.xlu0 %642  ;;  %v738_v12 = vrot.slane %v728_v33, 4  ;;  %v6262_v34 = vld [vmem:[%s5889_s26] sm:$0xff] }
 0x104   : > { %v654_v37 = vrot.slane %v643_v36, 4 }
 0x106   : > { %v669_v39 = vsel %vm323_vm0, %v653_v26, %v654_v37  ;;  %v671_v40 = vsel %vm323_vm0, %v654_v37, %v655_v35  ;;  %v1113_v35 = vld [vmem:[%s5889_s26 + $0x48] sm:$0xf] }
 0x107   : > { %v670_v41 = vsel %vm657_vm5, %v6132_v42, %v669_v39  ;;  %v672_v43 = vsel %vm657_vm5, %v643_v36, %v671_v40  ;;  %vm1835_vm5 = vcmask 310272  }
 0x108   : > { %687 = vst [vmem:[#allocation2 + $0x130] sm:$0xff] %v670_v41  ;;  %1051 = vrot.lane.b32.xlu2 %v5901_v3, %s5820_s12  ;;  %1049 = vrot.lane.b32.xlu1 %v1025_v38, %s5820_s12 }
 0x109   : > { %688 = vst [vmem:[#allocation2 + $0x138] sm:$0xff] %v672_v43  ;;  %1047 = vrot.lane.b32.xlu0 %v5904_v4, %s5820_s12 }
 0x10a   : > { %v6202_v46 = vpop.permute.xlu2 %796  ;;  %v714_v47 = vpop.permute.xlu1 %713 }
 0x10b   : > { %v731_v42 = vrot.slane %v714_v47, 4  ;;  %v712_v48 = vpop.permute.xlu0 %711  ;;  %v814_v22 = vrot.slane %v6202_v46, 4 }
 0x10c   : > { %v730_v49 = vrot.slane %v712_v48, 4 }
 0x10d   : > { %v744_v50 = vsel %vm323_vm0, %v731_v42, %v732_v45 }
 0x10e   : > { %v745_v51 = vsel %vm740_vm6, %v714_v47, %v744_v50  ;;  %v739_v52 = vsel %vm323_vm0, %v729_v44, %v730_v49  ;;  %v742_v53 = vsel %vm323_vm0, %v730_v49, %v731_v42  ;;  %v6284_v47 = vld [vmem:[%s5889_s26 + $0x18] sm:$0xff]  ;;  %v6287_v42 = vld [vmem:[%s5889_s26 + $0x10] sm:$0xff] }
 0x10f   : > { %766 = vst [vmem:[#allocation2 + $0x150] sm:$0xff] %v745_v51  ;;  %v741_v55 = vsel %vm740_vm6, %v6148_v54, %v739_v52  ;;  %v743_v57 = vsel %vm740_vm6, %v712_v48, %v742_v53  ;;  %v6293_v51 = vld [vmem:[%s5889_s26 + $0x8] sm:$0xff] }
 0x110   : > { %764 = vst [vmem:[#allocation2 + $0x140] sm:$0xff] %v741_v55  ;;  %1057 = vrot.lane.b32.xlu2 %v5913_v6, %s5820_s12  ;;  %1055 = vrot.lane.b32.xlu1 %v5916_v7, %s5820_s12 }
 0x111   : > { %765 = vst [vmem:[#allocation2 + $0x148] sm:$0xff] %v743_v57  ;;  %1053 = vrot.lane.b32.xlu0 %v5919_v8, %s5820_s12 }
 0x112   : > { %v6218_v56 = vpop.permute.xlu2 %802  ;;  %v720_v59 = vpop.permute.xlu1 %719 }
 0x113   : > { %v734_v54 = vrot.slane %v720_v59, 4  ;;  %v718_v60 = vpop.permute.xlu0 %717  ;;  %v817_v39 = vrot.slane %v6218_v56, 4 }
 0x114   : > { %v733_v61 = vrot.slane %v718_v60, 4 }
 0x115   : > { %v748_v62 = vsel %vm323_vm0, %v734_v54, %v735_v58 }
 0x116   : > { %v749_v63 = vsel %vm740_vm6, %v720_v59, %v748_v62  ;;  %v746_v6 = vsel %vm323_vm0, %v732_v45, %v733_v61  ;;  %v6309_v61 = vld [vmem:[%s5889_s26 + $0x30] sm:$0xff]  ;;  %v1192_v62 = vld [vmem:[%s5889_s26 + $0x28] sm:$0xff] }
 0x117   : > { %768 = vst [vmem:[#allocation2 + $0x160] sm:$0xff] %v749_v63  ;;  %v747_v10 = vsel %vm740_vm6, %v6161_v13, %v746_v6  ;;  %v1108_v13 = vld [vmem:[%s5889_s26 + $0x20] sm:$0xf] }
 0x118   : > { %767 = vst [vmem:[#allocation2 + $0x158] sm:$0xff] %v747_v10  ;;  %1126 = vrot.lane.b32.xlu2 %v5907_v5, %s5821_s13  ;;  %1124 = vrot.lane.b32.xlu1 %v5896_v2, %s5821_s13 }
 0x119   : > { %1059 = vrot.lane.b32.xlu0 %v1030_v0, %s5820_s12  ;;  %v1191_v0 = vld [vmem:[%s5889_s26 + $0x20] sm:$0xf] }
 0x11a   : > { %v6231_v14 = vpop.permute.xlu2 %808  ;;  %v726_v15 = vpop.permute.xlu1 %725 }
 0x11b   : > { %v737_v16 = vrot.slane %v726_v15, 4  ;;  %v724_v9 = vpop.permute.xlu0 %723  ;;  %v820_v38 = vrot.slane %v6231_v14, 4 }
 0x11c   : > { %v736_v17 = vrot.slane %v724_v9, 4 }
 0x11d   : > { %v754_v18 = vsel %vm323_vm0, %v737_v16, %v738_v12 }
 0x11e   : > { %v755_v11 = vsel %vm740_vm6, %v726_v15, %v754_v18  ;;  %v750_v19 = vsel %vm323_vm0, %v735_v58, %v736_v17  ;;  %v752_v5 = vsel %vm323_vm0, %v736_v17, %v737_v16  ;;  %v6323_v15 = vld [vmem:[%s5889_s26 + $0x4] sm:$0xff] }
 0x11f   : > { %771 = vst [vmem:[#allocation2 + $0x178] sm:$0xff] %v755_v11  ;;  %v751_v2 = vsel %vm740_vm6, %v6177_v20, %v750_v19  ;;  %v753_v21 = vsel %vm740_vm6, %v724_v9, %v752_v5  ;;  %v1196_v11 = vld [vmem:[%s5889_s26 + $0x48] sm:$0xf]  ;;  %vm1752_vm6 = vcmask 318464  }
 0x120   : > { %769 = vst [vmem:[#allocation2 + $0x168] sm:$0xff] %v751_v2  ;;  %1132 = vrot.lane.b32.xlu2 %v1108_v13, %s5821_s13  ;;  %1130 = vrot.lane.b32.xlu1 %v5904_v4, %s5821_s13 }
 0x121   : > { %770 = vst [vmem:[#allocation2 + $0x170] sm:$0xff] %v753_v21  ;;  %1128 = vrot.lane.b32.xlu0 %v5893_v1, %s5821_s13  ;;  %v6334_v21 = vld [vmem:[%s5889_s26 + $0x38] sm:$0xff] }
 0x122   : > { %v6247_v24 = vpop.permute.xlu2 %877  ;;  %v795_v26 = vpop.permute.xlu1 %794  ;;  %1361 = vst [vmem:[#allocation2 + $0x340] sm:$0xff] %v6323_v15 }
 0x123   : > { %v813_v23 = vrot.slane %v795_v26, 4  ;;  %v793_v20 = vpop.permute.xlu0 %792  ;;  %v896_v55 = vrot.slane %v6247_v24, 4 }
 0x124   : > { %v812_v27 = vrot.slane %v793_v20, 4 }
 0x125   : > { %v825_v28 = vsel %vm323_vm0, %v813_v23, %v814_v22 }
 0x126   : > { %v826_v25 = vsel %vm823_vm7, %v795_v26, %v825_v28  ;;  %v822_v4 = vsel %vm323_vm0, %v812_v27, %v813_v23 }
 0x127   : > { %848 = vst [vmem:[#allocation2 + $0x188] sm:$0xff] %v826_v25  ;;  %v824_v29 = vsel %vm823_vm7, %v793_v20, %v822_v4  ;;  %v6346_v20 = vld [vmem:[%s5889_s26 + $0x2c] sm:$0xff] }
 0x128   : > { %847 = vst [vmem:[#allocation2 + $0x180] sm:$0xff] %v824_v29  ;;  %1138 = vrot.lane.b32.xlu2 %v5916_v7, %s5821_s13  ;;  %1136 = vrot.lane.b32.xlu1 %v5919_v8, %s5821_s13  ;;  %v6268_v7 = vld [vmem:[%s5889_s26 + $0x40] sm:$0xff] }
 0x129   : > { %1134 = vrot.lane.b32.xlu0 %v5901_v3, %s5821_s13  ;;  %1365 = vst [vmem:[#allocation2 + $0x360] sm:$0xff] %v6346_v20 }
 0x12a   : > { %v6259_v1 = vpop.permute.xlu2 %883  ;;  %v801_v30 = vpop.permute.xlu1 %800 }
 0x12b   : > { %v816_v31 = vrot.slane %v801_v30, 4  ;;  %v799_v32 = vpop.permute.xlu0 %798  ;;  %v899_v12 = vrot.slane %v6259_v1, 4 }
 0x12c   : > { %v815_v33 = vrot.slane %v799_v32, 4 }
 0x12e   : > { %v827_v36 = vsel %vm323_vm0, %v814_v22, %v815_v33  ;;  %v829_v37 = vsel %vm323_vm0, %v815_v33, %v816_v31 }
 0x12f   : > { %v828_v8 = vsel %vm823_vm7, %v6202_v46, %v827_v36  ;;  %v830_v3 = vsel %vm823_vm7, %v799_v32, %v829_v37 }
 0x130   : > { %849 = vst [vmem:[#allocation2 + $0x190] sm:$0xff] %v828_v8  ;;  %1207 = vrot.lane.b32.xlu2 %v6262_v34, %s5822_s14  ;;  %1142 = vrot.lane.b32.xlu1 %v1113_v35, %s5821_s13 }
 0x131   : > { %850 = vst [vmem:[#allocation2 + $0x198] sm:$0xff] %v830_v3  ;;  %1140 = vrot.lane.b32.xlu0 %v6268_v7, %s5821_s13 }
 0x132   : > { %v6280_v40 = vpop.permute.xlu2 %889  ;;  %v807_v41 = vpop.permute.xlu1 %806 }
 0x133   : > { %v819_v43 = vrot.slane %v807_v41, 4  ;;  %v805_v45 = vpop.permute.xlu0 %804  ;;  %v902_v23 = vrot.slane %v6280_v40, 4 }
 0x134   : > { %v818_v44 = vrot.slane %v805_v45, 4 }
 0x135   : > { %v835_v46 = vsel %vm323_vm0, %v819_v43, %v820_v38 }
 0x136   : > { %v836_v48 = vsel %vm823_vm7, %v807_v41, %v835_v46  ;;  %v831_v49 = vsel %vm323_vm0, %v817_v39, %v818_v44  ;;  %v833_v50 = vsel %vm323_vm0, %v818_v44, %v819_v43 }
 0x137   : > { %853 = vst [vmem:[#allocation2 + $0x1b0] sm:$0xff] %v836_v48  ;;  %v832_v52 = vsel %vm823_vm7, %v6218_v56, %v831_v49  ;;  %v834_v53 = vsel %vm823_vm7, %v805_v45, %v833_v50  ;;  %v4859_v50 = vld [vmem:[#allocation2 + $0x180] sm:$0xf] }
 0x138   : > { %851 = vst [vmem:[#allocation2 + $0x1a0] sm:$0xff] %v832_v52  ;;  %1213 = vrot.lane.b32.xlu2 %v6284_v47, %s5822_s14  ;;  %1211 = vrot.lane.b32.xlu1 %v6287_v42, %s5822_s14 }
 0x139   : > { %852 = vst [vmem:[#allocation2 + $0x1a8] sm:$0xff] %v834_v53  ;;  %1209 = vrot.lane.b32.xlu0 %v6293_v51, %s5822_s14 }
 0x13a   : > { %v6305_v57 = vpop.permute.xlu2 %958  ;;  %v876_v58 = vpop.permute.xlu1 %875 }
 0x13b   : > { %v895_v56 = vrot.slane %v876_v58, 4  ;;  %v811_v59 = vpop.permute.xlu0 %810 }
 0x13c   : > { %v821_v54 = vrot.slane %v811_v59, 4 }
 0x13d   : > { %v905_v60 = vsel %vm323_vm0, %v895_v56, %v896_v55 }
 0x13e   : > { %v907_v63 = vsel %vm906_vm8, %v876_v58, %v905_v60  ;;  %v837_v6 = vsel %vm323_vm0, %v820_v38, %v821_v54  ;;  %v5588_v58 = vld [vmem:[#allocation2 + $0x15c] sm:$0xf0] }
 0x13f   : > { %930 = vst [vmem:[#allocation2 + $0x1c0] sm:$0xff] %v907_v63  ;;  %v838_v10 = vsel %vm823_vm7, %v6231_v14, %v837_v6  ;;  %v5596_v44 = vld [vmem:[#allocation2 + $0x19c] sm:$0xf0]  ;;  %vm2416_vm7 = vcmask 138240  }
 0x140   : > { %854 = vst [vmem:[#allocation2 + $0x1b8] sm:$0xff] %v838_v10  ;;  %1219 = vrot.lane.b32.xlu2 %v6309_v61, %s5822_s14  ;;  %1217 = vrot.lane.b32.xlu1 %v1192_v62, %s5822_s14  ;;  %v4860_v52 = vor.u32 %v5596_v44, %v4859_v50 }
 0x141   : > { %1215 = vrot.lane.b32.xlu0 %v1191_v0, %s5822_s14 }
 0x142   : > { %v6325_v16 = vpop.permute.xlu2 %964  ;;  %v882_v9 = vpop.permute.xlu1 %881 }
 0x143   : > { %v898_v17 = vrot.slane %v882_v9, 4  ;;  %v880_v14 = vpop.permute.xlu0 %879  ;;  %v981_v45 = vrot.slane %v6325_v16, 4 }
 0x144   : > { %v897_v18 = vrot.slane %v880_v14, 4 }
 0x145   : > { %v912_v13 = vsel %vm323_vm0, %v898_v17, %v899_v12 }
 0x146   : > { %v913_v19 = vsel %vm906_vm8, %v882_v9, %v912_v13  ;;  %v908_v5 = vsel %vm323_vm0, %v896_v55, %v897_v18  ;;  %v910_v2 = vsel %vm323_vm0, %v897_v18, %v898_v17  ;;  %v4891_v41 = vld [vmem:[#allocation2 + $0x1c0] sm:$0xf]  ;;  %v6379_v55 = vld [vmem:[%s5889_s26 + $0xc] sm:$0xff] }
 0x147   : > { %933 = vst [vmem:[#allocation2 + $0x1d8] sm:$0xff] %v913_v19  ;;  %v909_v22 = vsel %vm906_vm8, %v6247_v24, %v908_v5  ;;  %v911_v26 = vsel %vm906_vm8, %v880_v14, %v910_v2  ;;  %v4795_v17 = vld [vmem:[#allocation2 + $0x100] sm:$0xf] }
 0x148   : > { %931 = vst [vmem:[#allocation2 + $0x1c8] sm:$0xff] %v909_v22  ;;  %1225 = vrot.lane.b32.xlu2 %v1196_v11, %s5822_s14  ;;  %1223 = vrot.lane.b32.xlu1 %v6268_v7, %s5822_s14  ;;  %v1274_v7 = vld [vmem:[%s5889_s26 + $0x20] sm:$0xf]  ;;  %v6398_v11 = vld [vmem:[%s5889_s26 + $0x34] sm:$0xff] }
 0x149   : > { %932 = vst [vmem:[#allocation2 + $0x1d0] sm:$0xff] %v911_v26  ;;  %1221 = vrot.lane.b32.xlu0 %v6334_v21, %s5822_s14  ;;  %v5572_v19 = vld [vmem:[#allocation2 + $0xdc] sm:$0xf0] }
 0x14a   : > { %v6348_v27 = vpop.permute.xlu2 %970  ;;  %v888_v28 = vpop.permute.xlu1 %887  ;;  %v4763_v22 = vld [vmem:[#allocation2 + $0xc0] sm:$0xf] }
 0x14b   : > { %v901_v24 = vrot.slane %v888_v28, 4  ;;  %v886_v25 = vpop.permute.xlu0 %885  ;;  %v984_v6 = vrot.slane %v6348_v27, 4  ;;  %v4764_v26 = vor.u32 %v5572_v19, %v4763_v22 }
 0x14c   : > { %v900_v4 = vrot.slane %v886_v25, 4 }
 0x14d   : > { %v916_v29 = vsel %vm323_vm0, %v901_v24, %v902_v23 }
 0x14e   : > { %v917_v1 = vsel %vm906_vm8, %v888_v28, %v916_v29  ;;  %v914_v30 = vsel %vm323_vm0, %v900_v4, %v901_v24  ;;  %v5564_v28 = vld [vmem:[#allocation2 + $0x9c] sm:$0xf0] }
 0x14f   : > { %935 = vst [vmem:[#allocation2 + $0x1e8] sm:$0xff] %v917_v1  ;;  %v915_v31 = vsel %vm906_vm8, %v886_v25, %v914_v30  ;;  %v4731_v29 = vld [vmem:[#allocation2 + $0x80] sm:$0xf] }
 0x150   : > { %934 = vst [vmem:[#allocation2 + $0x1e0] sm:$0xff] %v915_v31  ;;  %1294 = vrot.lane.b32.xlu2 %v6287_v42, %s5823_s15  ;;  %1292 = vrot.lane.b32.xlu1 %v6293_v51, %s5823_s15  ;;  %v4732_v30 = vor.u32 %v5564_v28, %v4731_v29 }
 0x151   : > { %1290 = vrot.lane.b32.xlu0 %v6262_v34, %s5823_s15 }
 0x152   : > { %v6361_v32 = vpop.permute.xlu2 %976  ;;  %v894_v33 = vpop.permute.xlu1 %893 }
 0x153   : > { %v904_v35 = vrot.slane %v894_v33, 4  ;;  %v892_v36 = vpop.permute.xlu0 %891  ;;  %v5556_v33 = vld [vmem:[#allocation2 + $0x5c] sm:$0xf0] }
 0x154   : > { %v903_v37 = vrot.slane %v892_v36, 4 }
 0x156   : > { %v918_v8 = vsel %vm323_vm0, %v902_v23, %v903_v37  ;;  %v920_v3 = vsel %vm323_vm0, %v903_v37, %v904_v35  ;;  %v987_v23 = vrot.slane %v6361_v32, 4 }
 0x157   : > { %v919_v38 = vsel %vm906_vm8, %v6280_v40, %v918_v8  ;;  %v921_v39 = vsel %vm906_vm8, %v892_v36, %v920_v3  ;;  %v5604_v43 = vld [vmem:[#allocation2 + $0x1dc] sm:$0xf0]  ;;  %v978_v40 = vrot.slane %v6305_v57, 4  ;;  %vm1669_vm8 = vcmask 957440  }
 0x158   : > { %936 = vst [vmem:[#allocation2 + $0x1f0] sm:$0xff] %v919_v38  ;;  %1300 = vrot.lane.b32.xlu2 %v1192_v62, %s5823_s15  ;;  %1298 = vrot.lane.b32.xlu1 %v1274_v7, %s5823_s15  ;;  %v4892_v34 = vor.u32 %v5604_v43, %v4891_v41  ;;  %v4827_v62 = vld [vmem:[#allocation2 + $0x140] sm:$0xf] }
 0x159   : > { %937 = vst [vmem:[#allocation2 + $0x1f8] sm:$0xff] %v921_v39  ;;  %1296 = vrot.lane.b32.xlu0 %v6284_v47, %s5823_s15  ;;  %v4828_v63 = vor.u32 %v5588_v58, %v4827_v62  ;;  %v4699_v8 = vld [vmem:[#allocation2 + $0x40] sm:$0xf] }
 0x15a   : > { %3771 = vmatpush.bf16.msra.mxu0 %v4892_v34  ;;  %v6375_v46 = vpop.permute.xlu2 %1045  ;;  %v963_v42 = vpop.permute.xlu1 %962  ;;  %v4700_v3 = vor.u32 %v5556_v33, %v4699_v8  ;;  %v5548_v39 = vld [vmem:[#allocation2 + $0x1c] sm:$0xf0] }
 0x15b   : > { %v980_v48 = vrot.slane %v963_v42, 4  ;;  %v961_v49 = vpop.permute.xlu0 %960  ;;  %v1063_v38 = vrot.slane %v6375_v46, 4 }
 0x15c   : > { %v979_v51 = vrot.slane %v961_v49, 4 }
 0x15d   : > { %v993_v53 = vsel %vm323_vm0, %v980_v48, %v981_v45 }
 0x15e   : > { %v994_v47 = vsel %vm989_vm9, %v963_v42, %v993_v53  ;;  %v988_v56 = vsel %vm323_vm0, %v978_v40, %v979_v51  ;;  %v991_v59 = vsel %vm323_vm0, %v979_v51, %v980_v48  ;;  %3772 = vmatpush.bf16.msra.mxu0 %v4860_v52 }
 0x15f   : > { %1015 = vst [vmem:[#allocation2 + $0x210] sm:$0xff] %v994_v47  ;;  %v990_v54 = vsel %vm989_vm9, %v6305_v57, %v988_v56  ;;  %v992_v60 = vsel %vm989_vm9, %v961_v49, %v991_v59  ;;  %v5580_v57 = vld [vmem:[#allocation2 + $0x11c] sm:$0xf0] }
 0x160   : > { %1013 = vst [vmem:[#allocation2 + $0x200] sm:$0xff] %v990_v54  ;;  %2138 = vrot.lane.b32.xlu2 %v6379_v55, %s5824_s16  ;;  %2136 = vrot.lane.b32.xlu1 %v6323_v15, %s5824_s16  ;;  %v4796_v18 = vor.u32 %v5580_v57, %v4795_v17 }
 0x161   : > { %1014 = vst [vmem:[#allocation2 + $0x208] sm:$0xff] %v992_v60  ;;  %1302 = vrot.lane.b32.xlu0 %v6309_v61, %s5823_s15 }
 0x162   : > { %3773 = vmatpush.bf16.msra.mxu0 %v4828_v63  ;;  %v6394_v0 = vpop.permute.xlu2 %1051  ;;  %v969_v10 = vpop.permute.xlu1 %968 }
 0x163   : > { %v983_v12 = vrot.slane %v969_v10, 4  ;;  %v967_v9 = vpop.permute.xlu0 %966  ;;  %v1066_v63 = vrot.slane %v6394_v0, 4 }
 0x164   : > { %v982_v14 = vrot.slane %v967_v9, 4 }
 0x165   : > { %v997_v13 = vsel %vm323_vm0, %v983_v12, %v984_v6 }
 0x166   : > { %v998_v5 = vsel %vm989_vm9, %v969_v10, %v997_v13  ;;  %v995_v2 = vsel %vm323_vm0, %v981_v45, %v982_v14  ;;  %3774 = vmatpush.bf16.msra.mxu0 %v4796_v18  ;;  %v4667_v45 = vld [vmem:[#allocation2] sm:$0xf] }
 0x167   : > { %1017 = vst [vmem:[#allocation2 + $0x220] sm:$0xff] %v998_v5  ;;  %v996_v61 = vsel %vm989_vm9, %v6325_v16, %v995_v2  ;;  %v4668_v40 = vor.u32 %v5548_v39, %v4667_v45 }
 0x168   : > { %1016 = vst [vmem:[#allocation2 + $0x218] sm:$0xff] %v996_v61  ;;  %1472 = vrot.lane.b32.xlu2 %v6323_v15, %s5825_s17  ;;  %2148 = vrot.lane.b32.xlu1 %v6398_v11, %s5824_s16 }
 0x169   : > { %2146 = vrot.lane.b32.xlu0 %v6346_v20, %s5824_s16 }
 0x16a   : > { %3775 = vmatpush.bf16.msra.mxu0 %v4764_v26  ;;  %v6411_v24 = vpop.permute.xlu2 %1057  ;;  %v975_v16 = vpop.permute.xlu1 %974 }
 0x16b   : > { %v986_v25 = vrot.slane %v975_v16, 4  ;;  %v973_v4 = vpop.permute.xlu0 %972  ;;  %v1069_v62 = vrot.slane %v6411_v24, 4 }
 0x16c   : > { %v985_v1 = vrot.slane %v973_v4, 4 }
 0x16d   : > { %v1003_v31 = vsel %vm323_vm0, %v986_v25, %v987_v23 }
 0x16e   : > { %v1004_v35 = vsel %vm989_vm9, %v975_v16, %v1003_v31  ;;  %v999_v32 = vsel %vm323_vm0, %v984_v6, %v985_v1  ;;  %v1001_v36 = vsel %vm323_vm0, %v985_v1, %v986_v25  ;;  %3776 = vmatpush.bf16.msra.mxu0 %v4732_v30 }
 0x16f   : > { %1020 = vst [vmem:[#allocation2 + $0x238] sm:$0xff] %v1004_v35  ;;  %v1000_v37 = vsel %vm989_vm9, %v6348_v27, %v999_v32  ;;  %v1002_v7 = vsel %vm989_vm9, %v973_v4, %v1001_v36  ;;  %vm2333_vm9 = vcmask 146432  }
 0x170   : > { %1018 = vst [vmem:[#allocation2 + $0x228] sm:$0xff] %v1000_v37  ;;  %1484 = vrot.lane.b32.xlu2 %v6398_v11, %s5825_s17  ;;  %1482 = vrot.lane.b32.xlu1 %v6346_v20, %s5825_s17 }
 0x171   : > { %1019 = vst [vmem:[#allocation2 + $0x230] sm:$0xff] %v1002_v7  ;;  %1474 = vrot.lane.b32.xlu0 %v6379_v55, %s5825_s17 }
 0x172   : > { %3777 = vmatpush.bf16.msra.mxu0 %v4700_v3  ;;  %v6427_v27 = vpop.permute.xlu2 %1126  ;;  %v1044_v41 = vpop.permute.xlu1 %1043 }
 0x173   : > { %v1062_v43 = vrot.slane %v1044_v41, 4  ;;  %v1042_v34 = vpop.permute.xlu0 %1041  ;;  %v1145_v5 = vrot.slane %v6427_v27, 4 }
 0x174   : > { %v1061_v44 = vrot.slane %v1042_v34, 4 }
 0x175   : > { %v1074_v42 = vsel %vm323_vm0, %v1062_v43, %v1063_v38 }
 0x176   : > { %v1075_v48 = vsel %vm1072_vm10, %v1044_v41, %v1074_v42  ;;  %v1071_v49 = vsel %vm323_vm0, %v1061_v44, %v1062_v43  ;;  %3778 = vmatpush.bf16.msra.mxu0 %v4668_v40 }
 0x177   : > { %1097 = vst [vmem:[#allocation2 + $0x248] sm:$0xff] %v1075_v48  ;;  %v1073_v50 = vsel %vm1072_vm10, %v1042_v34, %v1071_v49 }
 0x178   : > { %1096 = vst [vmem:[#allocation2 + $0x240] sm:$0xff] %v1073_v50  ;;  %2063 = vrot.lane.b32.xlu2 %v6346_v20, %s5826_s18  ;;  %2055 = vrot.lane.b32.xlu1 %v6379_v55, %s5826_s18 }
 0x179   : > { %2053 = vrot.lane.b32.xlu0 %v6323_v15, %s5826_s18 }
 0x17a   : > { %v1133_v51 = vpop.permute.xlu2 %1132  ;;  %v1050_v52 = vpop.permute.xlu1 %1049 }
 0x17b   : > { %v1065_v53 = vrot.slane %v1050_v52, 4  ;;  %v1048_v58 = vpop.permute.xlu0 %1047  ;;  %v1148_v4 = vrot.slane %v1133_v51, 4 }
 0x17c   : > { %v1064_v47 = vrot.slane %v1048_v58, 4 }
 0x17e   : > { %v1076_v56 = vsel %vm323_vm0, %v1063_v38, %v1064_v47  ;;  %v1078_v59 = vsel %vm323_vm0, %v1064_v47, %v1065_v53 }
 0x17f   : > { %v1077_v54 = vsel %vm1072_vm10, %v6375_v46, %v1076_v56  ;;  %v1079_v60 = vsel %vm1072_vm10, %v1048_v58, %v1078_v59 }
 0x180   : > { %1098 = vst [vmem:[#allocation2 + $0x250] sm:$0xff] %v1077_v54  ;;  %1391 = vrot.lane.b32.xlu2 %v6379_v55, %s5827_s19  ;;  %1389 = vrot.lane.b32.xlu1 %v6323_v15, %s5827_s19 }
 0x181   : > { %1099 = vst [vmem:[#allocation2 + $0x258] sm:$0xff] %v1079_v60  ;;  %2065 = vrot.lane.b32.xlu0 %v6398_v11, %s5826_s18 }
 0x182   : > { %v6452_v6 = vpop.permute.xlu2 %1138  ;;  %v1056_v46 = vpop.permute.xlu1 %1055 }
 0x183   : > { %v1068_v57 = vrot.slane %v1056_v46, 4  ;;  %v1054_v10 = vpop.permute.xlu0 %1053  ;;  %v1151_v8 = vrot.slane %v6452_v6, 4 }
 0x184   : > { %v1067_v12 = vrot.slane %v1054_v10, 4 }
 0x185   : > { %v1084_v9 = vsel %vm323_vm0, %v1068_v57, %v1069_v62 }
 0x186   : > { %v1085_v17 = vsel %vm1072_vm10, %v1056_v46, %v1084_v9  ;;  %v1080_v14 = vsel %vm323_vm0, %v1066_v63, %v1067_v12  ;;  %v1082_v18 = vsel %vm323_vm0, %v1067_v12, %v1068_v57 }
 0x187   : > { %1102 = vst [vmem:[#allocation2 + $0x270] sm:$0xff] %v1085_v17  ;;  %v1081_v13 = vsel %vm1072_vm10, %v6394_v0, %v1080_v14  ;;  %v1083_v19 = vsel %vm1072_vm10, %v1054_v10, %v1082_v18 }
 0x188   : > { %1100 = vst [vmem:[#allocation2 + $0x260] sm:$0xff] %v1081_v13  ;;  %1970 = vrot.lane.b32.xlu2 %v6323_v15, %s5828_s20  ;;  %1401 = vrot.lane.b32.xlu1 %v6398_v11, %s5827_s19 }
 0x189   : > { %1101 = vst [vmem:[#allocation2 + $0x268] sm:$0xff] %v1083_v19  ;;  %1399 = vrot.lane.b32.xlu0 %v6346_v20, %s5827_s19 }
 0x18a   : > { %v6468_v2 = vpop.permute.xlu2 %1207  ;;  %v1125_v61 = vpop.permute.xlu1 %1124 }
 0x18b   : > { %v1144_v0 = vrot.slane %v1125_v61, 4  ;;  %v1060_v22 = vpop.permute.xlu0 %1059  ;;  %v1227_v56 = vrot.slane %v6468_v2, 4 }
 0x18c   : > { %v1070_v26 = vrot.slane %v1060_v22, 4 }
 0x18d   : > { %v1154_v23 = vsel %vm323_vm0, %v1144_v0, %v1145_v5 }
 0x18e   : > { %v1156_v28 = vsel %vm1155_vm11, %v1125_v61, %v1154_v23  ;;  %v1086_v16 = vsel %vm323_vm0, %v1069_v62, %v1070_v26 }
 0x18f   : > { %1179 = vst [vmem:[#allocation2 + $0x280] sm:$0xff] %v1156_v28  ;;  %v1087_v25 = vsel %vm1072_vm10, %v6411_v24, %v1086_v16  ;;  %vm1586_vm10 = vcmask 965632  }
 0x190   : > { %1103 = vst [vmem:[#allocation2 + $0x278] sm:$0xff] %v1087_v25  ;;  %1982 = vrot.lane.b32.xlu2 %v6398_v11, %s5828_s20  ;;  %1980 = vrot.lane.b32.xlu1 %v6346_v20, %s5828_s20 }
 0x191   : > { %1972 = vrot.lane.b32.xlu0 %v6379_v55, %s5828_s20 }
 0x192   : > { %v6481_v29 = vpop.permute.xlu2 %1213  ;;  %v1131_v1 = vpop.permute.xlu1 %1130 }
 0x193   : > { %v1147_v30 = vrot.slane %v1131_v1, 4  ;;  %v1129_v31 = vpop.permute.xlu0 %1128  ;;  %v1230_v47 = vrot.slane %v6481_v29, 4 }
 0x194   : > { %v1146_v33 = vrot.slane %v1129_v31, 4 }
 0x195   : > { %v1161_v35 = vsel %vm323_vm0, %v1147_v30, %v1148_v4 }
 0x196   : > { %v1162_v24 = vsel %vm1155_vm11, %v1131_v1, %v1161_v35  ;;  %v1157_v32 = vsel %vm323_vm0, %v1145_v5, %v1146_v33  ;;  %v1159_v36 = vsel %vm323_vm0, %v1146_v33, %v1147_v30 }
 0x197   : > { %1182 = vst [vmem:[#allocation2 + $0x298] sm:$0xff] %v1162_v24  ;;  %v1158_v37 = vsel %vm1155_vm11, %v6427_v27, %v1157_v32  ;;  %v1160_v7 = vsel %vm1155_vm11, %v1129_v31, %v1159_v36 }
 0x198   : > { %1180 = vst [vmem:[#allocation2 + $0x288] sm:$0xff] %v1158_v37  ;;  %1897 = vrot.lane.b32.xlu2 %v6346_v20, %s5829_s24  ;;  %1889 = vrot.lane.b32.xlu1 %v6379_v55, %s5829_s24 }
 0x199   : > { %1181 = vst [vmem:[#allocation2 + $0x290] sm:$0xff] %v1160_v7  ;;  %1887 = vrot.lane.b32.xlu0 %v6323_v15, %s5829_s24 }
 0x19a   : > { %v6497_v3 = vpop.permute.xlu2 %1219  ;;  %v1137_v38 = vpop.permute.xlu1 %1136 }
 0x19b   : > { %v1150_v39 = vrot.slane %v1137_v38, 4  ;;  %v1135_v27 = vpop.permute.xlu0 %1134  ;;  %v1233_v17 = vrot.slane %v6497_v3, 4 }
 0x19c   : > { %v1149_v41 = vrot.slane %v1135_v27, 4 }
 0x19d   : > { %v1165_v43 = vsel %vm323_vm0, %v1150_v39, %v1151_v8 }
 0x19e   : > { %v1166_v34 = vsel %vm1155_vm11, %v1137_v38, %v1165_v43  ;;  %v1163_v45 = vsel %vm323_vm0, %v1149_v41, %v1150_v39 }
 0x19f   : > { %1184 = vst [vmem:[#allocation2 + $0x2a8] sm:$0xff] %v1166_v34  ;;  %v1164_v44 = vsel %vm1155_vm11, %v1135_v27, %v1163_v45 }
 0x1a0   : > { %1183 = vst [vmem:[#allocation2 + $0x2a0] sm:$0xff] %v1164_v44  ;;  %1806 = vrot.lane.b32.xlu2 %v6379_v55, %s5830_s25  ;;  %1804 = vrot.lane.b32.xlu1 %v6323_v15, %s5830_s25 }
 0x1a1   : > { %1899 = vrot.lane.b32.xlu0 %v6398_v11, %s5829_s24 }
 0x1a2   : > { %v1226_v40 = vpop.permute.xlu2 %1225  ;;  %v1143_v42 = vpop.permute.xlu1 %1142 }
 0x1a3   : > { %v1153_v48 = vrot.slane %v1143_v42, 4  ;;  %v1141_v49 = vpop.permute.xlu0 %1140  ;;  %v1236_v26 = vrot.slane %v1226_v40, 4 }
 0x1a4   : > { %v1152_v50 = vrot.slane %v1141_v49, 4 }
 0x1a6   : > { %v1167_v51 = vsel %vm323_vm0, %v1151_v8, %v1152_v50  ;;  %v1169_v52 = vsel %vm323_vm0, %v1152_v50, %v1153_v48 }
 0x1a7   : > { %v1168_v53 = vsel %vm1155_vm11, %v6452_v6, %v1167_v51  ;;  %v1170_v58 = vsel %vm1155_vm11, %v1141_v49, %v1169_v52  ;;  %vm2250_vm11 = vcmask 154624  }
 0x1a8   : > { %1185 = vst [vmem:[#allocation2 + $0x2b0] sm:$0xff] %v1168_v53  ;;  %1721 = vrot.lane.b32.xlu2 %v6323_v15, %s5831_s27  ;;  %1816 = vrot.lane.b32.xlu1 %v6398_v11, %s5830_s25 }
 0x1a9   : > { %1186 = vst [vmem:[#allocation2 + $0x2b8] sm:$0xff] %v1170_v58  ;;  %1814 = vrot.lane.b32.xlu0 %v6346_v20, %s5830_s25 }
 0x1aa   : > { %v6522_v59 = vpop.permute.xlu2 %1294  ;;  %v1212_v54 = vpop.permute.xlu1 %1211 }
 0x1ab   : > { %v1229_v60 = vrot.slane %v1212_v54, 4  ;;  %v1210_v62 = vpop.permute.xlu0 %1209  ;;  %v1312_v24 = vrot.slane %v6522_v59, 4 }
 0x1ac   : > { %v1228_v63 = vrot.slane %v1210_v62, 4 }
 0x1ad   : > { %v1242_v6 = vsel %vm323_vm0, %v1229_v60, %v1230_v47 }
 0x1ae   : > { %v1243_v46 = vsel %vm1238_vm12, %v1212_v54, %v1242_v6  ;;  %v1237_v57 = vsel %vm323_vm0, %v1227_v56, %v1228_v63  ;;  %v1240_v10 = vsel %vm323_vm0, %v1228_v63, %v1229_v60 }
 0x1af   : > { %1264 = vst [vmem:[#allocation2 + $0x2d0] sm:$0xff] %v1243_v46  ;;  %v1239_v12 = vsel %vm1238_vm12, %v6468_v2, %v1237_v57  ;;  %v1241_v9 = vsel %vm1238_vm12, %v1210_v62, %v1240_v10 }
 0x1b0   : > { %1262 = vst [vmem:[#allocation2 + $0x2c0] sm:$0xff] %v1239_v12  ;;  %1733 = vrot.lane.b32.xlu2 %v6398_v11, %s5831_s27  ;;  %1731 = vrot.lane.b32.xlu1 %v6346_v20, %s5831_s27 }
 0x1b1   : > { %1263 = vst [vmem:[#allocation2 + $0x2c8] sm:$0xff] %v1241_v9  ;;  %1723 = vrot.lane.b32.xlu0 %v6379_v55, %s5831_s27 }
 0x1b2   : > { %v6538_v14 = vpop.permute.xlu2 %1300  ;;  %v1218_v18 = vpop.permute.xlu1 %1217 }
 0x1b3   : > { %v1232_v13 = vrot.slane %v1218_v18, 4  ;;  %v1216_v19 = vpop.permute.xlu0 %1215  ;;  %v1315_v51 = vrot.slane %v6538_v14, 4 }
 0x1b4   : > { %v1231_v5 = vrot.slane %v1216_v19, 4 }
 0x1b5   : > { %v1246_v2 = vsel %vm323_vm0, %v1232_v13, %v1233_v17 }
 0x1b6   : > { %v1247_v61 = vsel %vm1238_vm12, %v1218_v18, %v1246_v2  ;;  %v1244_v0 = vsel %vm323_vm0, %v1230_v47, %v1231_v5 }
 0x1b7   : > { %1266 = vst [vmem:[#allocation2 + $0x2e0] sm:$0xff] %v1247_v61  ;;  %v1245_v22 = vsel %vm1238_vm12, %v6481_v29, %v1244_v0 }
 0x1b8   : > { %1265 = vst [vmem:[#allocation2 + $0x2d8] sm:$0xff] %v1245_v22  ;;  %2395 = vrot.lane.b32.xlu2 %v6346_v20, %s5832_s28  ;;  %2387 = vrot.lane.b32.xlu1 %v6379_v55, %s5832_s28 }
 0x1b9   : > { %2385 = vrot.lane.b32.xlu0 %v6323_v15, %s5832_s28 }
 0x1ba   : > { %v6551_v23 = vpop.permute.xlu2 %2138  ;;  %v1224_v28 = vpop.permute.xlu1 %1223 }
 0x1bb   : > { %v1235_v16 = vrot.slane %v1224_v28, 4  ;;  %v1222_v25 = vpop.permute.xlu0 %1221  ;;  %v2157_v50 = vrot.slane %v6551_v23, 4 }
 0x1bc   : > { %v1234_v4 = vrot.slane %v1222_v25, 4 }
 0x1bd   : > { %v1252_v29 = vsel %vm323_vm0, %v1235_v16, %v1236_v26 }
 0x1be   : > { %v1253_v1 = vsel %vm1238_vm12, %v1224_v28, %v1252_v29  ;;  %v1248_v30 = vsel %vm323_vm0, %v1233_v17, %v1234_v4  ;;  %v1250_v31 = vsel %vm323_vm0, %v1234_v4, %v1235_v16 }
 0x1bf   : > { %1269 = vst [vmem:[#allocation2 + $0x2f8] sm:$0xff] %v1253_v1  ;;  %v1249_v33 = vsel %vm1238_vm12, %v6497_v3, %v1248_v30  ;;  %v1251_v35 = vsel %vm1238_vm12, %v1222_v25, %v1250_v31  ;;  %v6660_v31 = vld [vmem:[%s5889_s26 + $0x3c] sm:$0xff]  ;;  %vm3767_vm12 = vcmask 392192  }
 0x1c0   : > { %1267 = vst [vmem:[#allocation2 + $0x2e8] sm:$0xff] %v1249_v33  ;;  %1640 = vrot.lane.b32.xlu2 %v6379_v55, %s5833_s29  ;;  %1638 = vrot.lane.b32.xlu1 %v6323_v15, %s5833_s29 }
 0x1c1   : > { %1268 = vst [vmem:[#allocation2 + $0x2f0] sm:$0xff] %v1251_v35  ;;  %2397 = vrot.lane.b32.xlu0 %v6398_v11, %s5832_s28 }
 0x1c2   : > { %v6567_v32 = vpop.permute.xlu2 %1472  ;;  %v1293_v36 = vpop.permute.xlu1 %1292 }
 0x1c3   : > { %v1311_v37 = vrot.slane %v1293_v36, 4  ;;  %v1291_v7 = vpop.permute.xlu0 %1290 }
 0x1c4   : > { %v1310_v8 = vrot.slane %v1291_v7, 4 }
 0x1c5   : > { %v1323_v3 = vsel %vm323_vm0, %v1311_v37, %v1312_v24 }
 0x1c6   : > { %v1324_v38 = vsel %vm1321_vm13, %v1293_v36, %v1323_v3  ;;  %v1320_v39 = vsel %vm323_vm0, %v1310_v8, %v1311_v37 }
 0x1c7   : > { %1346 = vst [vmem:[#allocation2 + $0x308] sm:$0xff] %v1324_v38  ;;  %v1322_v27 = vsel %vm1321_vm13, %v1291_v7, %v1320_v39 }
 0x1c8   : > { %1345 = vst [vmem:[#allocation2 + $0x300] sm:$0xff] %v1322_v27  ;;  %2302 = vrot.lane.b32.xlu2 %v6323_v15, %s5834_s30  ;;  %1650 = vrot.lane.b32.xlu1 %v6398_v11, %s5833_s29 }
 0x1c9   : > { %1648 = vrot.lane.b32.xlu0 %v6346_v20, %s5833_s29 }
 0x1ca   : > { %v6579_v41 = vpop.permute.xlu2 %1484  ;;  %v1299_v43 = vpop.permute.xlu1 %1298 }
 0x1cb   : > { %v1314_v34 = vrot.slane %v1299_v43, 4  ;;  %v1297_v45 = vpop.permute.xlu0 %1296  ;;  %v1498_v17 = vrot.slane %v6579_v41, 4 }
 0x1cc   : > { %v1313_v44 = vrot.slane %v1297_v45, 4 }
 0x1ce   : > { %v1325_v40 = vsel %vm323_vm0, %v1312_v24, %v1313_v44  ;;  %v1327_v42 = vsel %vm323_vm0, %v1313_v44, %v1314_v34 }
 0x1cf   : > { %v1326_v48 = vsel %vm1321_vm13, %v6522_v59, %v1325_v40  ;;  %v1328_v49 = vsel %vm1321_vm13, %v1297_v45, %v1327_v42 }
 0x1d0   : > { %1347 = vst [vmem:[#allocation2 + $0x310] sm:$0xff] %v1326_v48  ;;  %2314 = vrot.lane.b32.xlu2 %v6398_v11, %s5834_s30  ;;  %2312 = vrot.lane.b32.xlu1 %v6346_v20, %s5834_s30 }
 0x1d1   : > { %1348 = vst [vmem:[#allocation2 + $0x318] sm:$0xff] %v1328_v49  ;;  %2304 = vrot.lane.b32.xlu0 %v6379_v55, %s5834_s30 }
 0x1d2   : > { %v6594_v52 = vpop.permute.xlu2 %2063  ;;  %v2137_v53 = vpop.permute.xlu1 %2136 }
 0x1d3   : > { %v2156_v58 = vrot.slane %v2137_v53, 4  ;;  %v6596_v47 = vpop.permute.xlu0 %1302  ;;  %v2078_v8 = vrot.slane %v6594_v52, 4 }
 0x1d4   : > { %v1316_v56 = vrot.slane %v6596_v47, 4 }
 0x1d5   : > { %v2166_v59 = vsel %vm323_vm0, %v2156_v58, %v2157_v50 }
 0x1d6   : > { %v2168_v54 = vsel %vm2167_vm14, %v2137_v53, %v2166_v59  ;;  %v1329_v60 = vsel %vm323_vm0, %v1315_v51, %v1316_v56 }
 0x1d7   : > { %2191 = vst [vmem:[#allocation2 + $0x5c0] sm:$0xff] %v2168_v54  ;;  %v1330_v62 = vsel %vm1321_vm13, %v6538_v14, %v1329_v60  ;;  %v1492_v14 = vrot.slane %v6567_v32, 4 }
 0x1d8   : > { %1349 = vst [vmem:[#allocation2 + $0x320] sm:$0xff] %v1330_v62  ;;  %1565 = vrot.lane.b32.xlu2 %v6346_v20, %s5835_s7  ;;  %1557 = vrot.lane.b32.xlu1 %v6379_v55, %s5835_s7 }
 0x1d9   : > { %1555 = vrot.lane.b32.xlu0 %v6323_v15, %s5835_s7 }
 0x1da   : > { %v6614_v63 = vpop.permute.xlu2 %1391  ;;  %v6616_v6 = vpop.permute.xlu1 %2148 }
 0x1db   : > { %v2162_v46 = vrot.slane %v6616_v6, 4  ;;  %v2147_v57 = vpop.permute.xlu0 %2146  ;;  %v1410_v7 = vrot.slane %v6614_v63, 4 }
 0x1dc   : > { %v2161_v10 = vrot.slane %v2147_v57, 4 }
 0x1de   : > { %v2175_v12 = vsel %vm323_vm0, %v2161_v10, %v2162_v46  ;;  %v5403_v26 = vld [vmem:[#allocation2 + $0x5c0] sm:$0xf] }
 0x1df   : > { %v2176_v9 = vsel %vm2167_vm14, %v2147_v57, %v2175_v12 }
 0x1e0   : > { %2195 = vst [vmem:[#allocation2 + $0x5e0] sm:$0xff] %v2176_v9  ;;  %2221 = vrot.lane.b32.xlu2 %v6379_v55, %s5836_s8  ;;  %2219 = vrot.lane.b32.xlu1 %v6323_v15, %s5836_s8  ;;  %v6640_v55 = vld [vmem:[%s5889_s26 + $0x14] sm:$0xff] }
 0x1e1   : > { %1567 = vrot.lane.b32.xlu0 %v6398_v11, %s5835_s7 }
 0x1e2   : > { %v6631_v18 = vpop.permute.xlu2 %1970  ;;  %v1483_v13 = vpop.permute.xlu1 %1482 }
 0x1e3   : > { %v1497_v19 = vrot.slane %v1483_v13, 4  ;;  %v6633_v5 = vpop.permute.xlu0 %1474  ;;  %v1990_v57 = vrot.slane %v6631_v18, 4 }
 0x1e4   : > { %v1493_v2 = vrot.slane %v6633_v5, 4 }
 0x1e5   : > { %v1511_v15 = vsel %vm323_vm0, %v1497_v19, %v1498_v17  ;;  %v5083_v19 = vld [vmem:[#allocation2 + $0x340] sm:$0xf] }
 0x1e6   : > { %v1512_v61 = vsel %vm1503_vm15, %v1483_v13, %v1511_v15  ;;  %v1502_v0 = vsel %vm323_vm0, %v1492_v14, %v1493_v2  ;;  %v5652_v15 = vld [vmem:[#allocation2 + $0x35c] sm:$0xf0] }
 0x1e7   : > { %1531 = vst [vmem:[#allocation2 + $0x3e0] sm:$0xff] %v1512_v61  ;;  %v1504_v22 = vsel %vm1503_vm15, %v6567_v32, %v1502_v0  ;;  %v5732_v28 = vld [vmem:[#allocation2 + $0x5dc] sm:$0xf0]  ;;  %v5648_v61 = vld [vmem:[#allocation2 + $0x344] sm:$0xf] }
 0x1e8   : > { %1527 = vst [vmem:[#allocation2 + $0x3c0] sm:$0xff] %v1504_v22  ;;  %1476 = vrot.lane.b32.xlu2 %v6640_v55, %s5825_s17  ;;  %2231 = vrot.lane.b32.xlu1 %v6398_v11, %s5836_s8  ;;  %v5404_v16 = vor.u32 %v5732_v28, %v5403_v26 }
 0x1e9   : > { %2229 = vrot.lane.b32.xlu0 %v6346_v20, %s5836_s8 }
 0x1ea   : > { %3799 = vmatpush.bf16.msra.mxu2 %v5404_v16  ;;  %v6654_v25 = vpop.permute.xlu2 %1982  ;;  %v6656_v4 = vpop.permute.xlu1 %2055  ;;  %v5085_v16 = vld [vmem:[#allocation2 + $0x360] sm:$0xf0] }
 0x1eb   : > { %v2074_v29 = vrot.slane %v6656_v4, 4  ;;  %v2054_v1 = vpop.permute.xlu0 %2053  ;;  %v1996_v62 = vrot.slane %v6654_v25, 4 }
 0x1ec   : > { %v2073_v30 = vrot.slane %v2054_v1, 4 }
 0x1ee   : > { %v2083_v11 = vsel %vm323_vm0, %v2073_v30, %v2074_v29  ;;  %v5668_v33 = vld [vmem:[#allocation2 + $0x3dc] sm:$0xf0]  ;;  %v5149_v35 = vld [vmem:[#allocation2 + $0x3e0] sm:$0xf0] }
 0x1ef   : > { %v2085_v20 = vsel %vm2084_vm1, %v2054_v1, %v2083_v11  ;;  %v5147_v24 = vld [vmem:[#allocation2 + $0x3c0] sm:$0xf]  ;;  %v5664_v32 = vld [vmem:[#allocation2 + $0x3c4] sm:$0xf] }
 0x1f0   : > { %2108 = vst [vmem:[#allocation2 + $0x580] sm:$0xff] %v2085_v20  ;;  %1403 = vrot.lane.b32.xlu2 %v6660_v31, %s5827_s19  ;;  %1393 = vrot.lane.b32.xlu1 %v6640_v55, %s5827_s19  ;;  %v5148_v36 = vor.u32 %v5668_v33, %v5147_v24  ;;  %v5152_v37 = vor.u32 %v5664_v32, %v5149_v35 }
 0x1f1   : > { %1486 = vrot.lane.b32.xlu0 %v6660_v31, %s5825_s17  ;;  %v5088_v32 = vor.u32 %v5648_v61, %v5085_v16  ;;  %v5019_v61 = vld [vmem:[#allocation2 + $0x2c0] sm:$0xf] }
 0x1f2   : > { %3785 = vmatpush.bf16.msra.mxu1 %v5148_v36  ;;  %3841 = vmatpush.bf16.msrb.mxu0 %v5152_v37  ;;  %v6674_v3 = vpop.permute.xlu2 %1897  ;;  %v1390_v38 = vpop.permute.xlu1 %1389 }
 0x1f3   : > { %v1409_v39 = vrot.slane %v1390_v38, 4  ;;  %v6676_v27 = vpop.permute.xlu0 %2065 }
 0x1f4   : > { %v2079_v43 = vrot.slane %v6676_v27, 4 }
 0x1f5   : > { %v1419_v34 = vsel %vm323_vm0, %v1409_v39, %v1410_v7 }
 0x1f6   : > { %v1421_v45 = vsel %vm1420_vm2, %v1390_v38, %v1419_v34  ;;  %v2092_v44 = vsel %vm323_vm0, %v2078_v8, %v2079_v43  ;;  %v5644_v38 = vld [vmem:[#allocation2 + $0x31c] sm:$0xf0] }
 0x1f7   : > { %1444 = vst [vmem:[#allocation2 + $0x380] sm:$0xff] %v1421_v45  ;;  %v2093_v40 = vsel %vm2084_vm1, %v6594_v52, %v2092_v44  ;;  %v5371_v59 = vld [vmem:[#allocation2 + $0x580] sm:$0xf]  ;;  %v5053_v45 = vld [vmem:[#allocation2 + $0x320] sm:$0xf0] }
 0x1f8   : > { %2112 = vst [vmem:[#allocation2 + $0x5a0] sm:$0xff] %v2093_v40  ;;  %2057 = vrot.lane.b32.xlu2 %v6640_v55, %s5826_s18  ;;  %2150 = vrot.lane.b32.xlu1 %v6660_v31, %s5824_s16  ;;  %v5051_v40 = vld [vmem:[#allocation2 + $0x300] sm:$0xf] }
 0x1f9   : > { %2140 = vrot.lane.b32.xlu0 %v6640_v55, %s5824_s16 }
 0x1fa   : > { %v6694_v42 = vpop.permute.xlu2 %1806  ;;  %v6696_v48 = vpop.permute.xlu1 %1401 }
 0x1fb   : > { %v1415_v49 = vrot.slane %v6696_v48, 4  ;;  %v1400_v51 = vpop.permute.xlu0 %1399 }
 0x1fc   : > { %v1414_v53 = vrot.slane %v1400_v51, 4 }
 0x1fe   : > { %v1428_v52 = vsel %vm323_vm0, %v1414_v53, %v1415_v49  ;;  %v5115_v26 = vld [vmem:[#allocation2 + $0x380] sm:$0xf]  ;;  %v5656_v28 = vld [vmem:[#allocation2 + $0x384] sm:$0xf]  ;;  %v5052_v53 = vor.u32 %v5644_v38, %v5051_v40 }
 0x1ff   : > { %v1429_v58 = vsel %vm1420_vm2, %v1400_v51, %v1428_v52  ;;  %v5724_v54 = vld [vmem:[#allocation2 + $0x59c] sm:$0xf0] }
 0x200   : > { %1448 = vst [vmem:[#allocation2 + $0x3a0] sm:$0xff] %v1429_v58  ;;  %1974 = vrot.lane.b32.xlu2 %v6640_v55, %s5828_s20  ;;  %1304 = vrot.lane.b32.xlu1 %v6334_v21, %s5823_s15  ;;  %v5372_v60 = vor.u32 %v5724_v54, %v5371_v59  ;;  %v5640_v58 = vld [vmem:[#allocation2 + $0x304] sm:$0xf]  ;;  %v1825_v59 = vrot.slane %v6694_v42, 4  ;;  %v5620_v38 = vld [vmem:[#allocation2 + $0x25c] sm:$0xf0] }
 0x201   : > { %2067 = vrot.lane.b32.xlu0 %v6660_v31, %s5826_s18  ;;  %v5056_v54 = vor.u32 %v5640_v58, %v5053_v45  ;;  %v4955_v40 = vld [vmem:[#allocation2 + $0x240] sm:$0xf] }
 0x202   : > { %3800 = vmatpush.bf16.msra.mxu2 %v5372_v60  ;;  %v6711_v10 = vpop.permute.xlu2 %1721  ;;  %v1981_v12 = vpop.permute.xlu1 %1980  ;;  %v5636_v60 = vld [vmem:[#allocation2 + $0x2dc] sm:$0xf0] }
 0x203   : > { %v1995_v9 = vrot.slane %v1981_v12, 4  ;;  %v6713_v14 = vpop.permute.xlu0 %1972 }
 0x204   : > { %v1991_v13 = vrot.slane %v6713_v14, 4 }
 0x205   : > { %v2009_v21 = vsel %vm323_vm0, %v1995_v9, %v1996_v62 }
 0x206   : > { %v2010_v0 = vsel %vm2001_vm3, %v1981_v12, %v2009_v21  ;;  %v2000_v22 = vsel %vm323_vm0, %v1990_v57, %v1991_v13  ;;  %v1912_v57 = vrot.slane %v6674_v3, 4  ;;  %v5021_v21 = vld [vmem:[#allocation2 + $0x2e0] sm:$0xf0] }
 0x207   : > { %2029 = vst [vmem:[#allocation2 + $0x560] sm:$0xff] %v2010_v0  ;;  %v2002_v1 = vsel %vm2001_vm3, %v6631_v18, %v2000_v22  ;;  %v5660_v30 = vld [vmem:[#allocation2 + $0x39c] sm:$0xf0]  ;;  %v5117_v11 = vld [vmem:[#allocation2 + $0x3a0] sm:$0xf0]  ;;  %v5084_v18 = vor.u32 %v5652_v15, %v5083_v19  ;;  %v5020_v22 = vor.u32 %v5636_v60, %v5019_v61 }
 0x208   : > { %2025 = vst [vmem:[#allocation2 + $0x540] sm:$0xff] %v2002_v1  ;;  %1901 = vrot.lane.b32.xlu2 %v6660_v31, %s5829_s24  ;;  %1891 = vrot.lane.b32.xlu1 %v6640_v55, %s5829_s24  ;;  %v5116_v33 = vor.u32 %v5660_v30, %v5115_v26  ;;  %v5120_v35 = vor.u32 %v5656_v28, %v5117_v11  ;;  %v5632_v26 = vld [vmem:[#allocation2 + $0x2c4] sm:$0xf]  ;;  %v5628_v1 = vld [vmem:[#allocation2 + $0x29c] sm:$0xf0] }
 0x209   : > { %1984 = vrot.lane.b32.xlu0 %v6660_v31, %s5828_s20  ;;  %v5024_v16 = vor.u32 %v5632_v26, %v5021_v21 }
 0x20a   : > { %3786 = vmatpush.bf16.msra.mxu1 %v5116_v33  ;;  %3842 = vmatpush.bf16.msrb.mxu0 %v5120_v35  ;;  %v6731_v20 = vpop.permute.xlu2 %1733  ;;  %v6733_v24 = vpop.permute.xlu1 %1889  ;;  %v4989_v33 = vld [vmem:[#allocation2 + $0x2a0] sm:$0xf0] }
 0x20b   : > { %v1908_v36 = vrot.slane %v6733_v24, 4  ;;  %v1888_v37 = vpop.permute.xlu0 %1887 }
 0x20c   : > { %v1907_v8 = vrot.slane %v1888_v37, 4 }
 0x20e   : > { %v1917_v39 = vsel %vm323_vm0, %v1907_v8, %v1908_v36  ;;  %3787 = vmatpush.bf16.msra.mxu1 %v5084_v18  ;;  %3843 = vmatpush.bf16.msrb.mxu0 %v5088_v32  ;;  %v5716_v34 = vld [vmem:[#allocation2 + $0x55c] sm:$0xf0] }
 0x20f   : > { %v1919_v44 = vsel %vm1918_vm4, %v1888_v37, %v1917_v39  ;;  %v5339_v51 = vld [vmem:[#allocation2 + $0x540] sm:$0xf]  ;;  %v5624_v37 = vld [vmem:[#allocation2 + $0x284] sm:$0xf] }
 0x210   : > { %1942 = vst [vmem:[#allocation2 + $0x500] sm:$0xff] %v1919_v44  ;;  %1725 = vrot.lane.b32.xlu2 %v6640_v55, %s5831_s27  ;;  %1818 = vrot.lane.b32.xlu1 %v6660_v31, %s5830_s25  ;;  %v5340_v52 = vor.u32 %v5716_v34, %v5339_v51  ;;  %v4987_v18 = vld [vmem:[#allocation2 + $0x280] sm:$0xf]  ;;  %v4992_v8 = vor.u32 %v5624_v37, %v4989_v33  ;;  %v4957_v34 = vld [vmem:[#allocation2 + $0x260] sm:$0xf0] }
 0x211   : > { %1808 = vrot.lane.b32.xlu0 %v6640_v55, %s5830_s25  ;;  %v4988_v32 = vor.u32 %v5628_v1, %v4987_v18  ;;  %v5728_v1 = vld [vmem:[#allocation2 + $0x5c4] sm:$0xf] }
 0x212   : > { %3788 = vmatpush.bf16.msra.mxu1 %v5052_v53  ;;  %3801 = vmatpush.bf16.msra.mxu2 %v5340_v52  ;;  %v6748_v12 = vpop.permute.xlu2 %2395  ;;  %v1805_v9 = vpop.permute.xlu1 %1804  ;;  %v4956_v53 = vor.u32 %v5620_v38, %v4955_v40  ;;  %v5616_v52 = vld [vmem:[#allocation2 + $0x244] sm:$0xf] }
 0x213   : > { %3844 = vmatpush.bf16.msrb.mxu0 %v5056_v54  ;;  %v1824_v19 = vrot.slane %v1805_v9, 4  ;;  %v6750_v15 = vpop.permute.xlu0 %1899  ;;  %v4960_v58 = vor.u32 %v5616_v52, %v4957_v34  ;;  %v5612_v54 = vld [vmem:[#allocation2 + $0x21c] sm:$0xf0]  ;;  %v5373_v37 = vld [vmem:[#allocation2 + $0x5a0] sm:$0xf0] }
 0x214   : > { %v1913_v0 = vrot.slane %v6750_v15, 4 }
 0x215   : > { %v1834_v28 = vsel %vm323_vm0, %v1824_v19, %v1825_v59  ;;  %v4923_v19 = vld [vmem:[#allocation2 + $0x200] sm:$0xf] }
 0x216   : > { %v1836_v30 = vsel %vm1835_vm5, %v1805_v9, %v1834_v28  ;;  %v1926_v11 = vsel %vm323_vm0, %v1912_v57, %v1913_v0  ;;  %3789 = vmatpush.bf16.msra.mxu1 %v5020_v22  ;;  %v4925_v57 = vld [vmem:[#allocation2 + $0x220] sm:$0xf0]  ;;  %v4924_v26 = vor.u32 %v5612_v54, %v4923_v19 }
 0x217   : > { %1859 = vst [vmem:[#allocation2 + $0x4c0] sm:$0xff] %v1836_v30  ;;  %v1927_v35 = vsel %vm1918_vm4, %v6674_v3, %v1926_v11  ;;  %3845 = vmatpush.bf16.msrb.mxu0 %v5024_v16  ;;  %v5405_v9 = vld [vmem:[#allocation2 + $0x5e0] sm:$0xf0]  ;;  %v5307_v61 = vld [vmem:[#allocation2 + $0x500] sm:$0xf]  ;;  %v8028_v30 = vrot.slane %v6731_v20, 4 }
 0x218   : > { %1946 = vst [vmem:[#allocation2 + $0x520] sm:$0xff] %v1927_v35  ;;  %2399 = vrot.lane.b32.xlu2 %v6660_v31, %s5832_s28  ;;  %2389 = vrot.lane.b32.xlu1 %v6640_v55, %s5832_s28  ;;  %v5608_v16 = vld [vmem:[#allocation2 + $0x204] sm:$0xf]  ;;  %v5408_v33 = vor.u32 %v5728_v1, %v5405_v9  ;;  %v1741_v35 = vrot.slane %v6711_v10, 4 }
 0x219   : > { %1735 = vrot.lane.b32.xlu0 %v6660_v31, %s5831_s27  ;;  %v4928_v11 = vor.u32 %v5608_v16, %v4925_v57  ;;  %v5341_v54 = vld [vmem:[#allocation2 + $0x560] sm:$0xf0] }
 0x21a   : > { %3790 = vmatpush.bf16.msra.mxu1 %v4988_v32  ;;  %v6768_v39 = vpop.permute.xlu2 %1640  ;;  %v6770_v3 = vpop.permute.xlu1 %1816  ;;  %v5704_v1 = vld [vmem:[#allocation2 + $0x504] sm:$0xf] }
 0x21b   : > { %3846 = vmatpush.bf16.msrb.mxu0 %v4992_v8  ;;  %v1830_v45 = vrot.slane %v6770_v3, 4  ;;  %v1815_v44 = vpop.permute.xlu0 %1814 }
 0x21c   : > { %v1829_v51 = vrot.slane %v1815_v44, 4 }
 0x21e   : > { %v1843_v60 = vsel %vm323_vm0, %v1829_v51, %v1830_v45  ;;  %3791 = vmatpush.bf16.msra.mxu1 %v4956_v53  ;;  %v5275_v57 = vld [vmem:[#allocation2 + $0x4c0] sm:$0xf] }
 0x21f   : > { %v1844_v21 = vsel %vm1835_vm5, %v1815_v44, %v1843_v60  ;;  %3847 = vmatpush.bf16.msrb.mxu0 %v4960_v58  ;;  %v5708_v22 = vld [vmem:[#allocation2 + $0x51c] sm:$0xf0]  ;;  %v5720_v44 = vld [vmem:[#allocation2 + $0x584] sm:$0xf] }
 0x220   : > { %1863 = vst [vmem:[#allocation2 + $0x4e0] sm:$0xff] %v1844_v21  ;;  %2306 = vrot.lane.b32.xlu2 %v6640_v55, %s5834_s30  ;;  %1652 = vrot.lane.b32.xlu1 %v6660_v31, %s5833_s29  ;;  %v5308_v28 = vor.u32 %v5708_v22, %v5307_v61  ;;  %v5376_v51 = vor.u32 %v5720_v44, %v5373_v37  ;;  %v5712_v58 = vld [vmem:[#allocation2 + $0x544] sm:$0xf] }
 0x221   : > { %1642 = vrot.lane.b32.xlu0 %v6640_v55, %s5833_s29  ;;  %v5344_v19 = vor.u32 %v5712_v58, %v5341_v54  ;;  %v5309_v22 = vld [vmem:[#allocation2 + $0x520] sm:$0xf0]  ;;  %v2410_v58 = vrot.slane %v6748_v12, 4 }
 0x222   : > { %3792 = vmatpush.bf16.msra.mxu1 %v4924_v26  ;;  %3802 = vmatpush.bf16.msra.mxu2 %v5308_v28  ;;  %v6785_v18 = vpop.permute.xlu2 %2302  ;;  %v1732_v32 = vpop.permute.xlu1 %1731 }
 0x223   : > { %3848 = vmatpush.bf16.msrb.mxu0 %v4928_v11  ;;  %v1746_v8 = vrot.slane %v1732_v32, 4  ;;  %v6787_v38 = vpop.permute.xlu0 %1723  ;;  %v5312_v11 = vor.u32 %v5704_v1, %v5309_v22 }
 0x224   : > { %v1742_v34 = vrot.slane %v6787_v38, 4 }
 0x225   : > { %v1760_v40 = vsel %vm323_vm0, %v1746_v8, %v8028_v30 }
 0x226   : > { %3855 = vmatpush.bf16.msrb.mxu1 %v5408_v33  ;;  %v1761_v53 = vsel %vm1752_vm6, %v1732_v32, %v1760_v40  ;;  %v1751_v52 = vsel %vm323_vm0, %v1741_v35, %v1742_v34  ;;  %v6811_v33 = vld [vmem:[%s5889_s26 + $0x1c] sm:$0xff] }
 0x227   : > { %1780 = vst [vmem:[#allocation2 + $0x4a0] sm:$0xff] %v1761_v53  ;;  %v1753_v60 = vsel %vm1752_vm6, %v6711_v10, %v1751_v52  ;;  %v5700_v9 = vld [vmem:[#allocation2 + $0x4dc] sm:$0xf0]  ;;  %v5277_v37 = vld [vmem:[#allocation2 + $0x4e0] sm:$0xf0]  ;;  %v8019_v53 = vrot.slane %v6768_v39, 4 }
 0x228   : > { %1776 = vst [vmem:[#allocation2 + $0x480] sm:$0xff] %v1753_v60  ;;  %1569 = vrot.lane.b32.xlu2 %v6660_v31, %s5835_s7  ;;  %1559 = vrot.lane.b32.xlu1 %v6640_v55, %s5835_s7  ;;  %v5276_v21 = vor.u32 %v5700_v9, %v5275_v57 }
 0x229   : > { %2316 = vrot.lane.b32.xlu0 %v6660_v31, %s5834_s30 }
 0x22a   : > { %3856 = vmatpush.bf16.msrb.mxu1 %v5376_v51  ;;  %3803 = vmatpush.bf16.msra.mxu2 %v5276_v21  ;;  %v6805_v61 = vpop.permute.xlu2 %2314  ;;  %v6807_v10 = vpop.permute.xlu1 %2387  ;;  %v5696_v51 = vld [vmem:[#allocation2 + $0x4c4] sm:$0xf] }
 0x22b   : > { %v8029_v26 = vrot.slane %v6807_v10, 4  ;;  %v2386_v28 = vpop.permute.xlu0 %2385  ;;  %v5280_v52 = vor.u32 %v5696_v51, %v5277_v37 }
 0x22c   : > { %v2405_v16 = vrot.slane %v2386_v28, 4 }
 0x22e   : > { %3857 = vmatpush.bf16.msrb.mxu1 %v5344_v19  ;;  %v2415_v35 = vsel %vm323_vm0, %v2405_v16, %v8029_v26  ;;  %v5692_v32 = vld [vmem:[#allocation2 + $0x49c] sm:$0xf0]  ;;  %v5245_v9 = vld [vmem:[#allocation2 + $0x4a0] sm:$0xf0] }
 0x22f   : > { %v2417_v8 = vsel %vm2416_vm7, %v2386_v28, %v2415_v35  ;;  %v5243_v44 = vld [vmem:[#allocation2 + $0x480] sm:$0xf]  ;;  %v5688_v57 = vld [vmem:[#allocation2 + $0x484] sm:$0xf] }
 0x230   : > { %2440 = vst [vmem:[#allocation2 + $0x680] sm:$0xff] %v2417_v8  ;;  %1478 = vrot.lane.b32.xlu2 %v6811_v33, %s5825_s17  ;;  %2233 = vrot.lane.b32.xlu1 %v6660_v31, %s5836_s8  ;;  %v5244_v40 = vor.u32 %v5692_v32, %v5243_v44  ;;  %v5248_v22 = vor.u32 %v5688_v57, %v5245_v9  ;;  %v6834_v28 = vld [vmem:[%s5889_s26 + $0x44] sm:$0xff]  ;;  %v2322_v57 = vrot.slane %v6785_v18, 4 }
 0x231   : > { %2223 = vrot.lane.b32.xlu0 %v6640_v55, %s5836_s8 }
 0x232   : > { %3858 = vmatpush.bf16.msrb.mxu1 %v5312_v11  ;;  %3804 = vmatpush.bf16.msra.mxu2 %v5244_v40  ;;  %v6825_v54 = vpop.permute.xlu2 %1565  ;;  %v1639_v60 = vpop.permute.xlu1 %1638 }
 0x233   : > { %v1658_v21 = vrot.slane %v1639_v60, 4  ;;  %v6827_v31 = vpop.permute.xlu0 %2397 }
 0x234   : > { %v2411_v19 = vrot.slane %v6827_v31, 4 }
 0x235   : > { %v1668_v55 = vsel %vm323_vm0, %v1658_v21, %v8019_v53 }
 0x236   : > { %3859 = vmatpush.bf16.msrb.mxu1 %v5280_v52  ;;  %v1670_v16 = vsel %vm1669_vm8, %v1639_v60, %v1668_v55  ;;  %v2424_v1 = vsel %vm323_vm0, %v2410_v58, %v2411_v19  ;;  %v8021_v60 = vrot.slane %v6805_v61, 4 }
 0x237   : > { %1693 = vst [vmem:[#allocation2 + $0x440] sm:$0xff] %v1670_v16  ;;  %v2425_v11 = vsel %vm2416_vm7, %v6748_v12, %v2424_v1  ;;  %v5499_v51 = vld [vmem:[#allocation2 + $0x680] sm:$0xf] }
 0x238   : > { %2444 = vst [vmem:[#allocation2 + $0x6a0] sm:$0xff] %v2425_v11  ;;  %2152 = vrot.lane.b32.xlu2 %v6834_v28, %s5824_s16  ;;  %2142 = vrot.lane.b32.xlu1 %v6811_v33, %s5824_s16 }
 0x239   : > { %1488 = vrot.lane.b32.xlu0 %v6834_v28, %s5825_s17 }
 0x23a   : > { %3860 = vmatpush.bf16.msrb.mxu1 %v5248_v22  ;;  %v6848_v35 = vpop.permute.xlu2 %2221  ;;  %v6850_v32 = vpop.permute.xlu1 %1650 }
 0x23b   : > { %v8027_v37 = vrot.slane %v6850_v32, 4  ;;  %v1649_v8 = vpop.permute.xlu0 %1648 }
 0x23c   : > { %v1663_v44 = vrot.slane %v1649_v8, 4 }
 0x23e   : > { %v1677_v12 = vsel %vm323_vm0, %v1663_v44, %v8027_v37 }
 0x23f   : > { %v1678_v40 = vsel %vm1669_vm8, %v1649_v8, %v1677_v12  ;;  %v5756_v52 = vld [vmem:[#allocation2 + $0x69c] sm:$0xf0] }
 0x240   : > { %1697 = vst [vmem:[#allocation2 + $0x460] sm:$0xff] %v1678_v40  ;;  %2059 = vrot.lane.b32.xlu2 %v6811_v33, %s5826_s18  ;;  %1405 = vrot.lane.b32.xlu1 %v6834_v28, %s5827_s19  ;;  %v5500_v58 = vor.u32 %v5756_v52, %v5499_v51  ;;  %v5211_v51 = vld [vmem:[#allocation2 + $0x440] sm:$0xf]  ;;  %v5680_v52 = vld [vmem:[#allocation2 + $0x444] sm:$0xf] }
 0x241   : > { %1395 = vrot.lane.b32.xlu0 %v6811_v33, %s5827_s19 }
 0x242   : > { %3818 = vmatpush.bf16.msra.mxu3 %v5500_v58  ;;  %v6865_v9 = vpop.permute.xlu2 %1476  ;;  %v2313_v21 = vpop.permute.xlu1 %2312 }
 0x243   : > { %v8030_v55 = vrot.slane %v6865_v9, 4  ;;  %v2327_v22 = vrot.slane %v2313_v21, 4  ;;  %v6868_v16 = vpop.permute.xlu0 %2304 }
 0x244   : > { %v2323_v1 = vrot.slane %v6868_v16, 4 }
 0x245   : > { %v1505_v11 = vsel %vm323_vm0, %v1493_v2, %v8030_v55  ;;  %v2341_v8 = vsel %vm323_vm0, %v2327_v22, %v8021_v60 }
 0x246   : > { %v1506_v44 = vsel %vm1503_vm15, %v6633_v5, %v1505_v11  ;;  %v2342_v12 = vsel %vm2333_vm9, %v2313_v21, %v2341_v8  ;;  %v2332_v40 = vsel %vm323_vm0, %v2322_v57, %v2323_v1 }
 0x247   : > { %1528 = vst [vmem:[#allocation2 + $0x3c8] sm:$0xff] %v1506_v44  ;;  %v2334_v58 = vsel %vm2333_vm9, %v6785_v18, %v2332_v40  ;;  %v5684_v2 = vld [vmem:[#allocation2 + $0x45c] sm:$0xf0]  ;;  %v5213_v53 = vld [vmem:[#allocation2 + $0x460] sm:$0xf0] }
 0x248   : > { %2361 = vst [vmem:[#allocation2 + $0x660] sm:$0xff] %v2342_v12  ;;  %1986 = vrot.lane.b32.xlu2 %v6834_v28, %s5828_s20  ;;  %1976 = vrot.lane.b32.xlu1 %v6811_v33, %s5828_s20  ;;  %v5212_v5 = vor.u32 %v5684_v2, %v5211_v51  ;;  %v5216_v21 = vor.u32 %v5680_v52, %v5213_v53  ;;  %v1278_v51 = vld [vmem:[%s5889_s26 + $0x40] sm:$0xff] }
 0x249   : > { %2357 = vst [vmem:[#allocation2 + $0x640] sm:$0xff] %v2334_v58  ;;  %2069 = vrot.lane.b32.xlu0 %v6834_v28, %s5826_s18 }
 0x24a   : > { %3805 = vmatpush.bf16.msra.mxu2 %v5212_v5  ;;  %3861 = vmatpush.bf16.msrb.mxu1 %v5216_v21  ;;  %v6893_v57 = vpop.permute.xlu2 %1403  ;;  %v6895_v18 = vpop.permute.xlu1 %1557  ;;  %v1580_v5 = vrot.slane %v6825_v54, 4 }
 0x24b   : > { %v8020_v22 = vrot.slane %v6893_v57, 4  ;;  %v8025_v11 = vrot.slane %v6895_v18, 4  ;;  %v1556_v8 = vpop.permute.xlu0 %1555 }
 0x24c   : > { %v1575_v44 = vrot.slane %v1556_v8, 4 }
 0x24d   : > { %v1430_v53 = vsel %vm323_vm0, %v1415_v49, %v8020_v22 }
 0x24e   : > { %v1431_v12 = vsel %vm1420_vm2, %v6696_v48, %v1430_v53  ;;  %v1585_v40 = vsel %vm323_vm0, %v1575_v44, %v8025_v11  ;;  %v8023_v48 = vrot.slane %v6848_v35, 4  ;;  %v5752_v11 = vld [vmem:[#allocation2 + $0x684] sm:$0xf] }
 0x24f   : > { %1449 = vst [vmem:[#allocation2 + $0x3a8] sm:$0xff] %v1431_v12  ;;  %v1587_v52 = vsel %vm1586_vm10, %v1556_v8, %v1585_v40  ;;  %v5748_v58 = vld [vmem:[#allocation2 + $0x65c] sm:$0xf0]  ;;  %v5469_v55 = vld [vmem:[#allocation2 + $0x660] sm:$0xf0] }
 0x250   : > { %1610 = vst [vmem:[#allocation2 + $0x400] sm:$0xff] %v1587_v52  ;;  %1903 = vrot.lane.b32.xlu2 %v6834_v28, %s5829_s24  ;;  %1893 = vrot.lane.b32.xlu1 %v6811_v33, %s5829_s24  ;;  %v5467_v49 = vld [vmem:[#allocation2 + $0x640] sm:$0xf]  ;;  %v5744_v26 = vld [vmem:[#allocation2 + $0x644] sm:$0xf] }
 0x251   : > { %1306 = vrot.lane.b32.xlu0 %v1278_v51, %s5823_s15  ;;  %v5468_v2 = vor.u32 %v5748_v58, %v5467_v49  ;;  %v1354_v58 = vld [vmem:[%s5889_s26 + $0xc] sm:$0xff] }
 0x252   : > { %v6918_v21 = vpop.permute.xlu2 %2057  ;;  %v2220_v8 = vpop.permute.xlu1 %2219  ;;  %1362 = vst [vmem:[#allocation2 + $0x348] sm:$0xff] %v1354_v58 }
 0x253   : > { %3819 = vmatpush.bf16.msra.mxu3 %v5468_v2  ;;  %v8026_v44 = vrot.slane %v6918_v21, 4  ;;  %v2239_v53 = vrot.slane %v2220_v8, 4  ;;  %v6921_v12 = vpop.permute.xlu0 %1567 }
 0x254   : > { %v1581_v40 = vrot.slane %v6921_v12, 4 }
 0x255   : > { %v2086_v51 = vsel %vm323_vm0, %v2074_v29, %v8026_v44  ;;  %v2249_v52 = vsel %vm323_vm0, %v2239_v53, %v8023_v48  ;;  %v1358_v29 = vld [vmem:[%s5889_s26 + $0x34] sm:$0xff] }
 0x256   : > { %v2087_v49 = vsel %vm2084_vm1, %v6656_v4, %v2086_v51  ;;  %v2251_v2 = vsel %vm2250_vm11, %v2220_v8, %v2249_v52  ;;  %v1594_v22 = vsel %vm323_vm0, %v1580_v5, %v1581_v40  ;;  %1366 = vst [vmem:[#allocation2 + $0x368] sm:$0xff] %v1358_v29  ;;  %v5501_v29 = vld [vmem:[#allocation2 + $0x6a0] sm:$0xf0] }
 0x257   : > { %2109 = vst [vmem:[#allocation2 + $0x588] sm:$0xff] %v2087_v49  ;;  %v1595_v60 = vsel %vm1586_vm10, %v6825_v54, %v1594_v22  ;;  %v4651_v54 = vld [vmem:[%s8013_s1] sm:$0xf]  ;;  %v5542_v22 = vld [vmem:[%s8013_s1 + $0xc] sm:$0xf0] }
 0x258   : > { %2274 = vst [vmem:[#allocation2 + $0x600] sm:$0xff] %v2251_v2  ;;  %2391 = vrot.lane.b32.xlu2 %v6811_v33, %s5832_s28  ;;  %1820 = vrot.lane.b32.xlu1 %v6834_v28, %s5830_s25  ;;  %v6960_v51 = vor.u32 %v5542_v22, %v4651_v54  ;;  %v4659_v54 = vld [vmem:[%s8013_s1 + $0x8] sm:$0xf]  ;;  %v5543_v22 = vld [vmem:[%s8013_s1 + $0x14] sm:$0xf0] }
 0x259   : > { %1614 = vst [vmem:[#allocation2 + $0x420] sm:$0xff] %v1595_v60  ;;  %1810 = vrot.lane.b32.xlu0 %v6811_v33, %s5830_s25  ;;  %v5672_v48 = vld [vmem:[#allocation2 + $0x404] sm:$0xf] }
 0x25a   : > { %v6948_v4 = vpop.permute.xlu2 %1974  ;;  %v6950_v5 = vpop.permute.xlu1 %2231  ;;  %3779 = vmatmul.bf16.vlgmr.msra.gmra.mxu0 %v6960_v51 }
 0x25b   : > { %v8022_v8 = vrot.slane %v6948_v4, 4  ;;  %v8024_v60 = vrot.slane %v6950_v5, 4  ;;  %v2230_v53 = vpop.permute.xlu0 %2229 }
 0x25c   : > { %v2244_v52 = vrot.slane %v2230_v53, 4 }
 0x25d   : > { %v2003_v58 = vsel %vm323_vm0, %v1991_v13, %v8022_v8  ;;  %v5179_v8 = vld [vmem:[#allocation2 + $0x400] sm:$0xf] }
 0x25e   : > { %v2004_v49 = vsel %vm2001_vm3, %v6713_v14, %v2003_v58  ;;  %v2258_v2 = vsel %vm323_vm0, %v2244_v52, %v8024_v60 }
 0x25f   : > { %2026 = vst [vmem:[#allocation2 + $0x548] sm:$0xff] %v2004_v49  ;;  %v2259_v13 = vsel %vm2250_vm11, %v2230_v53, %v2258_v2  ;;  %v5504_v2 = vor.u32 %v5752_v11, %v5501_v29 }
 0x260   : > { %2278 = vst [vmem:[#allocation2 + $0x620] sm:$0xff] %v2259_v13  ;;  %1737 = vrot.lane.b32.xlu2 %v6834_v28, %s5831_s27  ;;  %1727 = vrot.lane.b32.xlu1 %v6811_v33, %s5831_s27  ;;  %v5676_v14 = vld [vmem:[#allocation2 + $0x41c] sm:$0xf0]  ;;  %v5181_v52 = vld [vmem:[#allocation2 + $0x420] sm:$0xf0]  ;;  %v6990_v13 = vor.u32 %v5543_v22, %v4659_v54  ;;  %v5472_v22 = vor.u32 %v5744_v26, %v5469_v55 }
 0x261   : > { %2401 = vrot.lane.b32.xlu0 %v6834_v28, %s5832_s28  ;;  %v5180_v58 = vor.u32 %v5676_v14, %v5179_v8  ;;  %v5184_v60 = vor.u32 %v5672_v48, %v5181_v52  ;;  %v5600_v14 = vld [vmem:[#allocation2 + $0x1c4] sm:$0xf]  ;;  %v5541_v26 = vld [vmem:[%s8013_s1 + $0xc] sm:$0xf]  ;;  %v4661_v55 = vld [vmem:[%s8013_s1 + $0x18] sm:$0xf0] }
 0x262   : > { %v6986_v49 = vpop.permute.xlu2 %1901  ;;  %v6988_v53 = vpop.permute.xlu1 %1393  ;;  %v4893_v52 = vld [vmem:[#allocation2 + $0x1e0] sm:$0xf0] }
 0x263   : > { %3806 = vmatpush.bf16.msra.mxu2 %v5180_v58  ;;  %3862 = vmatpush.bf16.msrb.mxu1 %v5184_v60  ;;  %v1914_v44 = vrot.slane %v6986_v49, 4  ;;  %v8033_v37 = vrot.slane %v6988_v53, 4  ;;  %v6994_v30 = vpop.permute.xlu0 %1486  ;;  %v5736_v58 = vld [vmem:[#allocation2 + $0x604] sm:$0xf] }
 0x264   : > { %v8034_v48 = vrot.slane %v6994_v30, 4 }
 0x265   : > { %v1928_v11 = vsel %vm323_vm0, %v1913_v0, %v1914_v44  ;;  %v1422_v8 = vsel %vm323_vm0, %v1410_v7, %v8033_v37  ;;  %v5435_v0 = vld [vmem:[#allocation2 + $0x600] sm:$0xf]  ;;  %v1456_v37 = vld [vmem:[%s5889_s26 + $0x24] sm:$0xf] }
 0x266   : > { %v1929_v60 = vsel %vm1918_vm4, %v6750_v15, %v1928_v11  ;;  %v1423_v29 = vsel %vm1420_vm2, %v6614_v63, %v1422_v8  ;;  %v1513_v54 = vsel %vm323_vm0, %v1498_v17, %v8034_v48  ;;  %3807 = vmatmul.bf16.vlgmr.msra.gmra.mxu2 %v6990_v13  ;;  %v7031_v11 = vor.u32 %v5541_v26, %v4661_v55  ;;  %v5584_v26 = vld [vmem:[#allocation2 + $0x144] sm:$0xf] }
 0x267   : > { %3874 = vmatpush.bf16.msrb.mxu2 %v5504_v2  ;;  %1947 = vst [vmem:[#allocation2 + $0x528] sm:$0xff] %v1929_v60  ;;  %v1514_v7 = vsel %vm1503_vm15, %v6579_v41, %v1513_v54  ;;  %v5740_v15 = vld [vmem:[#allocation2 + $0x61c] sm:$0xf0]  ;;  %v5437_v2 = vld [vmem:[#allocation2 + $0x620] sm:$0xf0]  ;;  %v4896_v41 = vor.u32 %v5600_v14, %v4893_v52 }
 0x268   : > { %1445 = vst [vmem:[#allocation2 + $0x388] sm:$0xff] %v1423_v29  ;;  %1644 = vrot.lane.b32.xlu2 %v6811_v33, %s5833_s29  ;;  %v5436_v63 = vor.u32 %v5740_v15, %v5435_v0  ;;  %v5440_v17 = vor.u32 %v5736_v58, %v5437_v2  ;;  %2318 = vrot.lane.b32.xlu1 %v6834_v28, %s5834_s30  ;;  %v4861_v29 = vld [vmem:[#allocation2 + $0x1a0] sm:$0xf0] }
 0x269   : > { %1532 = vst [vmem:[#allocation2 + $0x3e8] sm:$0xff] %v1514_v7  ;;  %2308 = vrot.lane.b32.xlu0 %v6811_v33, %s5834_s30  ;;  %v5592_v14 = vld [vmem:[#allocation2 + $0x184] sm:$0xf] }
 0x26a   : > { %3820 = vmatpush.bf16.msra.mxu3 %v5436_v63  ;;  %v7033_v8 = vpop.permute.xlu2 %1725  ;;  %v7035_v60 = vpop.permute.xlu1 %2150  ;;  %v4864_v15 = vor.u32 %v5592_v14, %v4861_v29  ;;  %v4797_v14 = vld [vmem:[#allocation2 + $0x120] sm:$0xf0] }
 0x26b   : > { %3875 = vmatpush.bf16.msrb.mxu2 %v5472_v22  ;;  %v8031_v54 = vrot.slane %v7033_v8, 4  ;;  %v2163_v22 = vrot.slane %v7035_v60, 4  ;;  %v7039_v0 = vpop.permute.xlu0 %2140  ;;  %v4765_v48 = vld [vmem:[#allocation2 + $0xe0] sm:$0xf0] }
 0x26c   : > { %v2158_v58 = vrot.slane %v7039_v0, 4 }
 0x26d   : > { %v1754_v52 = vsel %vm323_vm0, %v1742_v34, %v8031_v54  ;;  %v2177_v7 = vsel %vm323_vm0, %v2162_v46, %v2163_v22  ;;  %5529 = vmatmul.msk.bf16.vlgmr.msra.gmra.mxu3 %vm3767_vm12, %v7031_v11 }
 0x26e   : > { %3827 = vmatpush.bf16.msrb.mxu3 %v4896_v41  ;;  %v1755_v2 = vsel %vm1752_vm6, %v6787_v38, %v1754_v52  ;;  %v2178_v63 = vsel %vm2167_vm14, %v6616_v6, %v2177_v7  ;;  %v2169_v34 = vsel %vm323_vm0, %v2157_v50, %v2158_v58  ;;  %v5155_v38 = vld [vmem:[#allocation2 + $0x3c8] sm:$0xf] }
 0x26f   : > { %3876 = vmatpush.bf16.msrb.mxu2 %v5440_v17  ;;  %v4829_v17 = vld [vmem:[#allocation2 + $0x160] sm:$0xf0]  ;;  %1777 = vst [vmem:[#allocation2 + $0x488] sm:$0xff] %v1755_v2  ;;  %v2170_v46 = vsel %vm2167_vm14, %v6551_v23, %v2169_v34  ;;  %v5123_v29 = vld [vmem:[#allocation2 + $0x388] sm:$0xf] }
 0x270   : > { %2196 = vst [vmem:[#allocation2 + $0x5e8] sm:$0xff] %v2178_v63  ;;  %2235 = vrot.lane.b32.xlu2 %v6834_v28, %s5836_s8  ;;  %v5669_v55 = vld [vmem:[#allocation2 + $0x3e4] sm:$0xf0]  ;;  %2225 = vrot.lane.b32.xlu1 %v6811_v33, %s5836_s8  ;;  %v4832_v6 = vor.u32 %v5584_v26, %v4829_v17  ;;  %v5576_v34 = vld [vmem:[#allocation2 + $0x104] sm:$0xf] }
 0x271   : > { %2192 = vst [vmem:[#allocation2 + $0x5c8] sm:$0xff] %v2170_v46  ;;  %1654 = vrot.lane.b32.xlu0 %v6834_v28, %s5833_s29  ;;  %v5156_v50 = vor.u32 %v5669_v55, %v5155_v38  ;;  %v5661_v63 = vld [vmem:[#allocation2 + $0x3a4] sm:$0xf0]  ;;  %v4800_v38 = vor.u32 %v5576_v34, %v4797_v14 }
 0x272   : > { %3828 = vmatpush.bf16.msrb.mxu3 %v4864_v15  ;;  %v7071_v41 = vpop.permute.xlu2 %2399  ;;  %v7073_v23 = vpop.permute.xlu1 %1304  ;;  %v5124_v26 = vor.u32 %v5661_v63, %v5123_v29  ;;  %v5091_v55 = vld [vmem:[#allocation2 + $0x348] sm:$0xf]  ;;  %v5568_v29 = vld [vmem:[#allocation2 + $0xc4] sm:$0xf] }
 0x273   : > { %3897 = vmatpush.bf16.msra.mxu2 %v5156_v50  ;;  %v8032_v52 = vrot.slane %v7071_v41, 4  ;;  %v1317_v7 = vrot.slane %v7073_v23, 4  ;;  %v7077_v15 = vpop.permute.xlu0 %2067  ;;  %v5653_v50 = vld [vmem:[#allocation2 + $0x364] sm:$0xf0]  ;;  %v4768_v63 = vor.u32 %v5568_v29, %v4765_v48  ;;  %v4701_v29 = vld [vmem:[#allocation2 + $0x60] sm:$0xf0] }
 0x274   : > { %v2080_v2 = vrot.slane %v7077_v15, 4 }
 0x275   : > { %v2426_v17 = vsel %vm323_vm0, %v2411_v19, %v8032_v52  ;;  %v1331_v46 = vsel %vm323_vm0, %v1316_v56, %v1317_v7  ;;  %v1461_v52 = vld [vmem:[%s5889_s26 + $0x4c] sm:$0xf] }
 0x276   : > { %3829 = vmatpush.bf16.msrb.mxu3 %v4832_v6  ;;  %v2427_v6 = vsel %vm2416_vm7, %v6827_v31, %v2426_v17  ;;  %v1332_v54 = vsel %vm1321_vm13, %v6596_v47, %v1331_v46  ;;  %v2094_v19 = vsel %vm323_vm0, %v2079_v43, %v2080_v2  ;;  %5530 = vmatmul.msk.bf16.vlgmr.msrb.gmra.mxu2 %vm3767_vm12, %v7031_v11  ;;  %v4733_v17 = vld [vmem:[#allocation2 + $0xa0] sm:$0xf0] }
 0x277   : > { %2445 = vst [vmem:[#allocation2 + $0x6a8] sm:$0xff] %v2427_v6  ;;  %v2095_v56 = vsel %vm2084_vm1, %v6676_v27, %v2094_v19  ;;  %3898 = vmatpush.bf16.msra.mxu2 %v5124_v26  ;;  %v5733_v31 = vld [vmem:[#allocation2 + $0x5e4] sm:$0xf0]  ;;  %v5092_v43 = vor.u32 %v5653_v50, %v5091_v55  ;;  %v2125_v19 = vld [vmem:[%s5889_s26 + $0x4c] sm:$0xf] }
 0x278   : > { %1350 = vst [vmem:[#allocation2 + $0x328] sm:$0xff] %v1332_v54  ;;  %1561 = vrot.lane.b32.xlu2 %v6811_v33, %s5835_s7  ;;  %v5411_v47 = vld [vmem:[#allocation2 + $0x5c8] sm:$0xf]  ;;  %1490 = vrot.lane.b32.xlu1 %v1461_v52, %s5825_s17  ;;  %v5540_v33 = vld [vmem:[%s8013_s1 + $0x4] sm:$0xf] }
 0x279   : > { %2113 = vst [vmem:[#allocation2 + $0x5a8] sm:$0xff] %v2095_v56  ;;  %1480 = vrot.lane.b32.xlu0 %v1456_v37, %s5825_s17  ;;  %v5412_v14 = vor.u32 %v5733_v31, %v5411_v47  ;;  %v4653_v54 = vld [vmem:[%s8013_s1 + $0x10] sm:$0xf0]  ;;  %v2120_v47 = vld [vmem:[%s5889_s26 + $0x24] sm:$0xf] }
 0x27a   : > { %3830 = vmatpush.bf16.msrb.mxu3 %v4800_v38  ;;  %v7109_v34 = vpop.permute.xlu2 %2306  ;;  %v7111_v27 = vpop.permute.xlu1 %1891  ;;  %v7123_v46 = vor.u32 %v5540_v33, %v4653_v54  ;;  %v5560_v38 = vld [vmem:[#allocation2 + $0x84] sm:$0xf]  ;;  %v5637_v54 = vld [vmem:[#allocation2 + $0x2e4] sm:$0xf0] }
 0x27b   : > { %3911 = vmatpush.bf16.msra.mxu0 %v5412_v14  ;;  %v8037_v52 = vrot.slane %v7109_v34, 4  ;;  %v1909_v37 = vrot.slane %v7111_v27, 4  ;;  %v7121_v48 = vpop.permute.xlu0 %1984  ;;  %3899 = vmatpush.bf16.msra.mxu2 %v5092_v43  ;;  %v4736_v6 = vor.u32 %v5560_v38, %v4733_v17  ;;  %v5059_v14 = vld [vmem:[#allocation2 + $0x308] sm:$0xf] }
 0x27c   : > { %v1997_v26 = vrot.slane %v7121_v48, 4  ;;  %3793 = vmatmul.bf16.vlgmr.msra.gmra.mxu1 %v7123_v46  ;;  %3849 = vmatmul.bf16.vlgmr.msrb.gmra.mxu0 %v7123_v46 }
 0x27d   : > { %v2335_v55 = vsel %vm323_vm0, %v2323_v1, %v8037_v52  ;;  %v1920_v50 = vsel %vm323_vm0, %v1908_v36, %v1909_v37  ;;  %v5552_v36 = vld [vmem:[#allocation2 + $0x44] sm:$0xf] }
 0x27e   : > { %3831 = vmatpush.bf16.msrb.mxu3 %v4768_v63  ;;  %v2336_v56 = vsel %vm2333_vm9, %v6868_v16, %v2335_v55  ;;  %v1921_v31 = vsel %vm1918_vm4, %v6733_v24, %v1920_v50  ;;  %v2011_v1 = vsel %vm323_vm0, %v1996_v62, %v1997_v26  ;;  %v5379_v16 = vld [vmem:[#allocation2 + $0x588] sm:$0xf]  ;;  %v4704_v33 = vor.u32 %v5552_v36, %v4701_v29  ;;  %v4669_v55 = vld [vmem:[#allocation2 + $0x20] sm:$0xf0] }
 0x27f   : > { %2358 = vst [vmem:[#allocation2 + $0x648] sm:$0xff] %v2336_v56  ;;  %v2012_v43 = vsel %vm2001_vm3, %v6654_v25, %v2011_v1  ;;  %v5645_v63 = vld [vmem:[#allocation2 + $0x324] sm:$0xf0] }
 0x280   : > { %1943 = vst [vmem:[#allocation2 + $0x508] sm:$0xff] %v1921_v31  ;;  %2154 = vrot.lane.b32.xlu2 %v2125_v19, %s5824_s16  ;;  %v5060_v24 = vor.u32 %v5645_v63, %v5059_v14  ;;  %v5725_v17 = vld [vmem:[#allocation2 + $0x5a4] sm:$0xf0]  ;;  %2144 = vrot.lane.b32.xlu1 %v2120_v47, %s5824_s16  ;;  %v5544_v47 = vld [vmem:[#allocation2 + $0x4] sm:$0xf] }
 0x281   : > { %2030 = vst [vmem:[#allocation2 + $0x568] sm:$0xff] %v2012_v43  ;;  %1571 = vrot.lane.b32.xlu0 %v6834_v28, %s5835_s7  ;;  %v5380_v62 = vor.u32 %v5725_v17, %v5379_v16  ;;  %v5027_v56 = vld [vmem:[#allocation2 + $0x2c8] sm:$0xf]  ;;  %v4672_v43 = vor.u32 %v5544_v47, %v4669_v55  ;;  %v2037_v63 = vld [vmem:[%s5889_s26 + $0x24] sm:$0xf] }
 0x282   : > { %3832 = vmatpush.bf16.msrb.mxu3 %v4736_v6  ;;  %3900 = vmatpush.bf16.msra.mxu2 %v5060_v24  ;;  %v7155_v25 = vpop.permute.xlu2 %1569  ;;  %v7157_v38 = vpop.permute.xlu1 %1818  ;;  %v5605_v28 = vld [vmem:[#allocation2 + $0x1e4] sm:$0xf0]  ;;  %v5028_v1 = vor.u32 %v5637_v54, %v5027_v56 }
 0x283   : > { %3912 = vmatpush.bf16.msra.mxu0 %v5380_v62  ;;  %v8035_v50 = vrot.slane %v7155_v25, 4  ;;  %v1831_v6 = vrot.slane %v7157_v38, 4  ;;  %v7161_v19 = vpop.permute.xlu0 %1808  ;;  %v4899_v14 = vld [vmem:[#allocation2 + $0x1c8] sm:$0xf] }
 0x284   : > { %v8045_v31 = vrot.slane %v7161_v19, 4  ;;  %v5629_v24 = vld [vmem:[#allocation2 + $0x2a4] sm:$0xf0]  ;;  %v4900_v62 = vor.u32 %v5605_v28, %v4899_v14 }
 0x285   : > { %v1596_v36 = vsel %vm323_vm0, %v1581_v40, %v8035_v50  ;;  %v1845_v29 = vsel %vm323_vm0, %v1830_v45, %v1831_v6  ;;  %v1373_v45 = vld [vmem:[%s5889_s26 + $0x24] sm:$0xf]  ;;  %v4995_v55 = vld [vmem:[#allocation2 + $0x288] sm:$0xf] }
 0x286   : > { %3833 = vmatpush.bf16.msrb.mxu3 %v4704_v33  ;;  %v1597_v16 = vsel %vm1586_vm10, %v6921_v12, %v1596_v36  ;;  %v1846_v17 = vsel %vm1835_vm5, %v6770_v3, %v1845_v29  ;;  %v1837_v40 = vsel %vm323_vm0, %v1825_v59, %v8045_v31  ;;  %3901 = vmatpush.bf16.msra.mxu2 %v5028_v1  ;;  %v1378_v33 = vld [vmem:[%s5889_s26 + $0x4c] sm:$0xf]  ;;  %v5597_v12 = vld [vmem:[#allocation2 + $0x1a4] sm:$0xf0] }
 0x287   : > { %1615 = vst [vmem:[#allocation2 + $0x428] sm:$0xff] %v1597_v16  ;;  %v1838_v54 = vsel %vm1835_vm5, %v6694_v42, %v1837_v40  ;;  %v4996_v3 = vor.u32 %v5629_v24, %v4995_v55  ;;  %v5347_v56 = vld [vmem:[#allocation2 + $0x548] sm:$0xf] }
 0x288   : > { %1864 = vst [vmem:[#allocation2 + $0x4e8] sm:$0xff] %v1846_v17  ;;  %2061 = vrot.lane.b32.xlu2 %v2037_v63, %s5826_s18  ;;  %v5717_v47 = vld [vmem:[#allocation2 + $0x564] sm:$0xf0]  ;;  %1407 = vrot.lane.b32.xlu1 %v1378_v33, %s5827_s19 }
 0x289   : > { %1860 = vst [vmem:[#allocation2 + $0x4c8] sm:$0xff] %v1838_v54  ;;  %1397 = vrot.lane.b32.xlu0 %v1373_v45, %s5827_s19  ;;  %v5348_v59 = vor.u32 %v5717_v47, %v5347_v56  ;;  %v4867_v28 = vld [vmem:[#allocation2 + $0x188] sm:$0xf]  ;;  %v8057_v54 = vrot.slane %v6865_v9, 4  ;;  %v1959_v47 = vld [vmem:[%s5889_s26 + $0x4c] sm:$0xf] }
 0x28a   : > { %3834 = vmatpush.bf16.msrb.mxu3 %v4672_v43  ;;  %v5621_v1 = vld [vmem:[#allocation2 + $0x264] sm:$0xf0]  ;;  %3902 = vmatpush.bf16.msra.mxu2 %v4996_v3  ;;  %v7191_v42 = vpop.permute.xlu2 %1478  ;;  %v7193_v36 = vpop.permute.xlu1 %2389  ;;  %v4868_v29 = vor.u32 %v5597_v12, %v4867_v28  ;;  %v8058_v12 = vrot.slane %v6807_v10, 4 }
 0x28b   : > { %v5315_v43 = vld [vmem:[#allocation2 + $0x508] sm:$0xf]  ;;  %3913 = vmatpush.bf16.msra.mxu0 %v5348_v59  ;;  %v8036_v14 = vrot.slane %v7191_v42, 4  ;;  %v2407_v63 = vrot.slane %v7193_v36, 4  ;;  %v7198_v24 = vpop.permute.xlu0 %1735  ;;  %v1954_v59 = vld [vmem:[%s5889_s26 + $0x24] sm:$0xf] }
 0x28c   : > { %v4963_v16 = vld [vmem:[#allocation2 + $0x248] sm:$0xf]  ;;  %v1748_v40 = vrot.slane %v7198_v24, 4  ;;  %3863 = vmatmul.bf16.vlgmr.msrb.gmra.mxu1 %v6990_v13 }
 0x28d   : > { %3835 = vmatmul.bf16.vlgmr.msrb.gmra.mxu3 %v6960_v51  ;;  %v5589_v17 = vld [vmem:[#allocation2 + $0x164] sm:$0xf0]  ;;  %v1507_v55 = vsel %vm323_vm0, %v8057_v54, %v8036_v14  ;;  %v2418_v3 = vsel %vm323_vm0, %v8058_v12, %v2407_v63  ;;  %v8059_v54 = vrot.slane %v6731_v20, 4  ;;  %v5729_v12 = vld [vmem:[#allocation2 + $0x5cc] sm:$0xf] }
 0x28e   : > { %3883 = vmatpush.bf16.msra.mxu3 %v4900_v62  ;;  %v4964_v62 = vor.u32 %v5621_v1, %v4963_v16  ;;  %v5709_v33 = vld [vmem:[#allocation2 + $0x524] sm:$0xf0]  ;;  %v2419_v16 = vsel %vm2416_vm7, %v6807_v10, %v2418_v3  ;;  %v5413_v14 = vld [vmem:[#allocation2 + $0x5e8] sm:$0xf0] }
 0x28f   : > { %v4835_v45 = vld [vmem:[#allocation2 + $0x148] sm:$0xf]  ;;  %v5316_v56 = vor.u32 %v5709_v33, %v5315_v43  ;;  %v1762_v50 = vsel %vm323_vm0, %v8059_v54, %v1748_v40  ;;  %v2042_v33 = vld [vmem:[%s5889_s26 + $0x4c] sm:$0xf]  ;;  %2441 = vst [vmem:[#allocation2 + $0x688] sm:$0xff] %v2419_v16  ;;  %v8060_v54 = vrot.slane %v6850_v32, 4 }
 0x290   : > { %v5613_v28 = vld [vmem:[#allocation2 + $0x224] sm:$0xf0]  ;;  %3903 = vmatpush.bf16.msra.mxu2 %v4964_v62  ;;  %v4836_v43 = vor.u32 %v5589_v17, %v4835_v45  ;;  %v1763_v52 = vsel %vm1752_vm6, %v6731_v20, %v1762_v50  ;;  %1988 = vrot.lane.b32.xlu2 %v1959_v47, %s5828_s20  ;;  %v5416_v62 = vor.u32 %v5729_v12, %v5413_v14  ;;  %v5721_v16 = vld [vmem:[#allocation2 + $0x58c] sm:$0xf] }
 0x291   : > { %v5581_v1 = vld [vmem:[#allocation2 + $0x124] sm:$0xf0]  ;;  %3914 = vmatpush.bf16.msra.mxu0 %v5316_v56  ;;  %1781 = vst [vmem:[#allocation2 + $0x4a8] sm:$0xff] %v1763_v52  ;;  %1978 = vrot.lane.b32.xlu1 %v1954_v59, %s5828_s20  ;;  %v5381_v56 = vld [vmem:[#allocation2 + $0x5a8] sm:$0xf0] }
 0x292   : > { %3884 = vmatpush.bf16.msra.mxu3 %v4868_v29  ;;  %v1508_v29 = vsel %vm1503_vm15, %v6865_v9, %v1507_v55  ;;  %v4931_v9 = vld [vmem:[#allocation2 + $0x208] sm:$0xf]  ;;  %2071 = vrot.lane.b32.xlu0 %v2042_v33, %s5826_s18  ;;  %v7231_v20 = vpop.permute.xlu1 %1652  ;;  %v5384_v33 = vor.u32 %v5721_v16, %v5381_v56  ;;  %v5713_v56 = vld [vmem:[#allocation2 + $0x54c] sm:$0xf]  ;;  %s7854_s18 = scalar_lea.vmem %s8018_s6, %s5760_s23 }
 0x293   : > { %1529 = vst [vmem:[#allocation2 + $0x3d0] sm:$0xff] %v1508_v29  ;;  %v5701_v55 = vld [vmem:[#allocation2 + $0x4e4] sm:$0xf0]  ;;  %v4932_v10 = vor.u32 %v5613_v28, %v4931_v9  ;;  %v7229_v29 = vpop.permute.xlu2 %2152  ;;  %v8038_v52 = vrot.slane %v7231_v20, 4  ;;  %v7235_v59 = vpop.permute.xlu0 %1642  ;;  %v1876_v9 = vld [vmem:[%s5889_s26 + $0x4c] sm:$0xf] }
 0x294   : > { %v5283_v3 = vld [vmem:[#allocation2 + $0x4c8] sm:$0xf]  ;;  %v8040_v47 = vrot.slane %v7229_v29, 4  ;;  %v1660_v14 = vrot.slane %v7235_v59, 4  ;;  %v5349_v16 = vld [vmem:[#allocation2 + $0x568] sm:$0xf0] }
 0x295   : > { %v5284_v17 = vor.u32 %v5701_v55, %v5283_v3  ;;  %v4803_v45 = vld [vmem:[#allocation2 + $0x108] sm:$0xf]  ;;  %3904 = vmatpush.bf16.msra.mxu2 %v4932_v10 }
 0x296   : > { %3885 = vmatpush.bf16.msra.mxu3 %v4836_v43  ;;  %v4804_v50 = vor.u32 %v5581_v1, %v4803_v45  ;;  %v5573_v28 = vld [vmem:[#allocation2 + $0xe4] sm:$0xf0]  ;;  %v2179_v1 = vsel %vm323_vm0, %v2163_v22, %v8040_v47  ;;  %v1679_v43 = vsel %vm323_vm0, %v8060_v54, %v8038_v52  ;;  %v8061_v22 = vrot.slane %v6768_v39, 4  ;;  %v1871_v45 = vld [vmem:[%s5889_s26 + $0x24] sm:$0xf] }
 0x297   : > { %3915 = vmatpush.bf16.msra.mxu0 %v5284_v17  ;;  %v4771_v12 = vld [vmem:[#allocation2 + $0xc8] sm:$0xf]  ;;  %v2180_v10 = vsel %vm2167_vm14, %v7035_v60, %v2179_v1  ;;  %v1680_v3 = vsel %vm1669_vm8, %v6850_v32, %v1679_v43  ;;  %v5697_v47 = vld [vmem:[#allocation2 + $0x4cc] sm:$0xf] }
 0x298   : > { %v5565_v55 = vld [vmem:[#allocation2 + $0xa4] sm:$0xf0]  ;;  %3905 = vmatmul.bf16.vlgmr.msra.gmra.mxu2 %v7123_v46  ;;  %v1671_v17 = vsel %vm323_vm0, %v8061_v22, %v1660_v14  ;;  %2197 = vst [vmem:[#allocation2 + $0x5f0] sm:$0xff] %v2180_v10  ;;  %1905 = vrot.lane.b32.xlu2 %v1876_v9, %s5829_s24  ;;  %v5705_v9 = vld [vmem:[#allocation2 + $0x50c] sm:$0xf] }
 0x299   : > { %3967 = vmatpush.bf16.msrb.mxu2 %v5416_v62  ;;  %v4772_v62 = vor.u32 %v5573_v28, %v4771_v12  ;;  %v1672_v54 = vsel %vm1669_vm8, %v6768_v39, %v1671_v17  ;;  %v5507_v60 = vld [vmem:[#allocation2 + $0x688] sm:$0xf]  ;;  %1698 = vst [vmem:[#allocation2 + $0x468] sm:$0xff] %v1680_v3  ;;  %1895 = vrot.lane.b32.xlu1 %v1871_v45, %s5829_s24 }
 0x29a   : > { %3886 = vmatpush.bf16.msra.mxu3 %v4804_v50  ;;  %v1279_v50 = vld [vmem:[%s5889_s26 + $0x48] sm:$0xf]  ;;  %1694 = vst [vmem:[#allocation2 + $0x448] sm:$0xff] %v1672_v54  ;;  %v5352_v12 = vor.u32 %v5713_v56, %v5349_v16  ;;  %v8063_v16 = vrot.slane %v6895_v18, 4 }
 0x29b   : > { %v5757_v1 = vld [vmem:[#allocation2 + $0x6a4] sm:$0xf0]  ;;  %1308 = vrot.lane.b32.xlu0 %v1279_v50, %s5823_s15  ;;  %v7266_v39 = vpop.permute.xlu2 %2059  ;;  %v5317_v50 = vld [vmem:[#allocation2 + $0x528] sm:$0xf0] }
 0x29c   : > { %v5251_v32 = vld [vmem:[#allocation2 + $0x488] sm:$0xf]  ;;  %v5508_v52 = vor.u32 %v5757_v1, %v5507_v60  ;;  %v8039_v22 = vrot.slane %v7266_v39, 4  ;;  %v5320_v60 = vor.u32 %v5705_v9, %v5317_v50 }
 0x29d   : > { %3968 = vmatpush.bf16.msrb.mxu2 %v5384_v33  ;;  %v5693_v43 = vld [vmem:[#allocation2 + $0x4a4] sm:$0xf0]  ;;  %v7268_v33 = vpop.permute.xlu1 %1559 }
 0x29e   : > { %3887 = vmatpush.bf16.msra.mxu3 %v4772_v62  ;;  %v5252_v28 = vor.u32 %v5693_v43, %v5251_v32  ;;  %v4739_v10 = vld [vmem:[#allocation2 + $0x88] sm:$0xf]  ;;  %3930 = vmatpush.bf16.msra.mxu1 %v5508_v52  ;;  %v8044_v17 = vrot.slane %v7268_v33, 4  ;;  %v7272_v62 = vpop.permute.xlu0 %2316  ;;  %v1705_v32 = vld [vmem:[%s5889_s26 + $0x24] sm:$0xf] }
 0x29f   : > { %v4740_v3 = vor.u32 %v5565_v55, %v4739_v10  ;;  %v5557_v45 = vld [vmem:[#allocation2 + $0x64] sm:$0xf0]  ;;  %v8042_v52 = vrot.slane %v7272_v62, 4  ;;  %v8062_v55 = vrot.slane %v6918_v21, 4  ;;  %v1793_v43 = vld [vmem:[%s5889_s26 + $0x4c] sm:$0xf] }
 0x2a0   : > { %3916 = vmatpush.bf16.msra.mxu0 %v5252_v28  ;;  %v1588_v54 = vsel %vm323_vm0, %v8063_v16, %v8044_v17  ;;  %v4707_v1 = vld [vmem:[#allocation2 + $0x48] sm:$0xf]  ;;  %v8064_v10 = vrot.slane %v6805_v61, 4  ;;  %v5285_v16 = vld [vmem:[#allocation2 + $0x4e8] sm:$0xf0]  ;;  %1729 = vrot.lane.b32.xlu2 %v1705_v32, %s5831_s27  ;;  %v1359_v17 = vld [vmem:[%s5889_s26 + $0x3c] sm:$0xff] }
 0x2a1   : > { %3969 = vmatpush.bf16.msrb.mxu2 %v5352_v12  ;;  %v2088_v56 = vsel %vm323_vm0, %v8062_v55, %v8039_v22  ;;  %v1589_v12 = vsel %vm1586_vm10, %v6895_v18, %v1588_v54  ;;  %v4708_v55 = vor.u32 %v5557_v45, %v4707_v1  ;;  %v1788_v22 = vld [vmem:[%s5889_s26 + $0x24] sm:$0xf]  ;;  %v5685_v50 = vld [vmem:[#allocation2 + $0x464] sm:$0xf0]  ;;  %1822 = vrot.lane.b32.xlu1 %v1793_v43, %s5830_s25 }
 0x2a2   : > { %3888 = vmatpush.bf16.msra.mxu3 %v4740_v3  ;;  %v2089_v28 = vsel %vm2084_vm1, %v6918_v21, %v2088_v56  ;;  %v2343_v3 = vsel %vm323_vm0, %v8064_v10, %v8042_v52  ;;  %v5549_v21 = vld [vmem:[#allocation2 + $0x24] sm:$0xf0]  ;;  %1611 = vst [vmem:[#allocation2 + $0x408] sm:$0xff] %v1589_v12  ;;  %v4901_v56 = vld [vmem:[#allocation2 + $0x1e8] sm:$0xf0]  ;;  %v5288_v54 = vor.u32 %v5697_v47, %v5285_v16 }
 0x2a3   : > { %2110 = vst [vmem:[#allocation2 + $0x590] sm:$0xff] %v2089_v28  ;;  %v2344_v9 = vsel %vm2333_vm9, %v6805_v61, %v2343_v3  ;;  %v5219_v18 = vld [vmem:[#allocation2 + $0x448] sm:$0xf]  ;;  %1812 = vrot.lane.b32.xlu0 %v1788_v22, %s5830_s25  ;;  %v7302_v28 = vpop.permute.xlu2 %1986  ;;  %v5601_v10 = vld [vmem:[#allocation2 + $0x1cc] sm:$0xf] }
 0x2a4   : > { %2362 = vst [vmem:[#allocation2 + $0x668] sm:$0xff] %v2344_v9  ;;  %v5220_v45 = vor.u32 %v5685_v50, %v5219_v18  ;;  %v4675_v1 = vld [vmem:[#allocation2 + $0x8] sm:$0xf]  ;;  %v5253_v12 = vld [vmem:[#allocation2 + $0x4a8] sm:$0xf0]  ;;  %v8041_v32 = vrot.slane %v7302_v28, 4  ;;  %v4904_v47 = vor.u32 %v5601_v10, %v4901_v56 }
 0x2a5   : > { %3970 = vmatpush.bf16.msrb.mxu2 %v5320_v60  ;;  %v7304_v61 = vpop.permute.xlu1 %2233  ;;  %v4676_v60 = vor.u32 %v5549_v21, %v4675_v1  ;;  %v4869_v16 = vld [vmem:[#allocation2 + $0x1a8] sm:$0xf0]  ;;  %v8065_v50 = vrot.slane %v6950_v5, 4  ;;  %1367 = vst [vmem:[#allocation2 + $0x370] sm:$0xff] %v1359_v17 }
 0x2a6   : > { %3889 = vmatpush.bf16.msra.mxu3 %v4708_v55  ;;  %3917 = vmatpush.bf16.msra.mxu0 %v5220_v45  ;;  %v2246_v43 = vrot.slane %v7304_v61, 4  ;;  %v7308_v22 = vpop.permute.xlu0 %2223  ;;  %v5689_v55 = vld [vmem:[#allocation2 + $0x48c] sm:$0xf]  ;;  %v2013_v9 = vsel %vm323_vm0, %v1997_v26, %v8041_v32  ;;  %v2369_v45 = vld [vmem:[%s5889_s26 + $0x24] sm:$0xf]  ;;  %v8066_v26 = vrot.slane %v6848_v35, 4 }
 0x2a7   : > { %v8043_v3 = vrot.slane %v7308_v22, 4  ;;  %v5256_v18 = vor.u32 %v5689_v55, %v5253_v12  ;;  %v2374_v56 = vld [vmem:[%s5889_s26 + $0x4c] sm:$0xf] }
 0x2a8   : > { %v2260_v21 = vsel %vm323_vm0, %v8065_v50, %v2246_v43  ;;  %v5593_v1 = vld [vmem:[#allocation2 + $0x18c] sm:$0xf]  ;;  %v5677_v50 = vld [vmem:[#allocation2 + $0x424] sm:$0xf0]  ;;  %2403 = vrot.lane.b32.xlu2 %v2374_v56, %s5832_s28 }
 0x2a9   : > { %3971 = vmatpush.bf16.msrb.mxu2 %v5288_v54  ;;  %v1710_v54 = vld [vmem:[%s5889_s26 + $0x4c] sm:$0xf]  ;;  %v2261_v10 = vsel %vm2250_vm11, %v6950_v5, %v2260_v21  ;;  %v2252_v32 = vsel %vm323_vm0, %v8066_v26, %v8043_v3  ;;  %v5187_v52 = vld [vmem:[#allocation2 + $0x408] sm:$0xf]  ;;  %v1355_v5 = vld [vmem:[%s5889_s26 + $0x14] sm:$0xff]  ;;  %2393 = vrot.lane.b32.xlu1 %v2369_v45, %s5832_s28  ;;  %s5539_s28 = sshll.u32 %s8096_s22, 4 }
 0x2aa   : > { %3890 = vmatpush.bf16.msra.mxu3 %v4676_v60  ;;  %v2014_v60 = vsel %vm2001_vm3, %v7121_v48, %v2013_v9  ;;  %v5681_v12 = vld [vmem:[#allocation2 + $0x44c] sm:$0xf]  ;;  %v2253_v55 = vsel %vm2250_vm11, %v6848_v35, %v2252_v32  ;;  %2279 = vst [vmem:[#allocation2 + $0x628] sm:$0xff] %v2261_v10  ;;  %v4872_v9 = vor.u32 %v5593_v1, %v4869_v16  ;;  %v5475_v26 = vld [vmem:[#allocation2 + $0x648] sm:$0xf] }
 0x2ab   : > { %2031 = vst [vmem:[#allocation2 + $0x570] sm:$0xff] %v2014_v60  ;;  %v5753_v48 = vld [vmem:[#allocation2 + $0x68c] sm:$0xf]  ;;  %v5188_v21 = vor.u32 %v5677_v50, %v5187_v52  ;;  %v5749_v3 = vld [vmem:[#allocation2 + $0x664] sm:$0xf0]  ;;  %1739 = vrot.lane.b32.xlu0 %v1710_v54, %s5831_s27  ;;  %v7341_v31 = vpop.permute.xlu2 %1903 }
 0x2ac   : > { %2275 = vst [vmem:[#allocation2 + $0x608] sm:$0xff] %v2253_v55  ;;  %v5476_v35 = vor.u32 %v5749_v3, %v5475_v26  ;;  %v4837_v60 = vld [vmem:[#allocation2 + $0x168] sm:$0xf0]  ;;  %v1915_v45 = vrot.slane %v7341_v31, 4 }
 0x2ad   : > { %3972 = vmatpush.bf16.msrb.mxu2 %v5256_v18  ;;  %3891 = vmatmul.bf16.vlgmr.msra.gmra.mxu3 %v6960_v51  ;;  %v5509_v18 = vld [vmem:[#allocation2 + $0x6a8] sm:$0xf0]  ;;  %v7343_v10 = vpop.permute.xlu1 %2142  ;;  %1363 = vst [vmem:[#allocation2 + $0x350] sm:$0xff] %v1355_v5 }
 0x2ae   : > { %3939 = vmatpush.bf16.msrb.mxu3 %v4904_v47  ;;  %v5221_v47 = vld [vmem:[#allocation2 + $0x468] sm:$0xf0]  ;;  %3918 = vmatpush.bf16.msra.mxu0 %v5188_v21  ;;  %v5512_v16 = vor.u32 %v5753_v48, %v5509_v18  ;;  %v2159_v54 = vrot.slane %v7343_v10, 4  ;;  %v7347_v3 = vpop.permute.xlu0 %1488  ;;  %v1930_v55 = vsel %vm323_vm0, %v1914_v44, %v1915_v45  ;;  %v8067_v44 = vrot.slane %v6994_v30, 4 }
 0x2af   : > { %v5224_v32 = vor.u32 %v5681_v12, %v5221_v47  ;;  %v5585_v52 = vld [vmem:[#allocation2 + $0x14c] sm:$0xf]  ;;  %3931 = vmatpush.bf16.msra.mxu1 %v5476_v35  ;;  %v1500_v50 = vrot.slane %v7347_v3, 4  ;;  %v1931_v35 = vsel %vm1918_vm4, %v6986_v49, %v1930_v55 }
 0x2b0   : > { %v5673_v56 = vld [vmem:[#allocation2 + $0x40c] sm:$0xf]  ;;  %v4840_v12 = vor.u32 %v5585_v52, %v4837_v60  ;;  %v2171_v48 = vsel %vm323_vm0, %v2158_v58, %v2159_v54  ;;  %1948 = vst [vmem:[#allocation2 + $0x530] sm:$0xff] %v1931_v35 }
 0x2b1   : > { %3973 = vmatpush.bf16.msrb.mxu2 %v5224_v32  ;;  %v5477_v1 = vld [vmem:[#allocation2 + $0x668] sm:$0xf0]  ;;  %3919 = vmatmul.bf16.vlgmr.msra.gmra.mxu0 %v6990_v13  ;;  %v2172_v32 = vsel %vm2167_vm14, %v7039_v0, %v2171_v48  ;;  %v1515_v18 = vsel %vm323_vm0, %v8067_v44, %v1500_v50  ;;  %v5741_v49 = vld [vmem:[#allocation2 + $0x624] sm:$0xf0] }
 0x2b2   : > { %3940 = vmatpush.bf16.msrb.mxu3 %v4872_v9  ;;  %3986 = vmatpush.bf16.msrb.mxu0 %v5512_v16  ;;  %v5189_v47 = vld [vmem:[#allocation2 + $0x428] sm:$0xf0]  ;;  %v2286_v9 = vld [vmem:[%s5889_s26 + $0x24] sm:$0xf]  ;;  %2193 = vst [vmem:[#allocation2 + $0x5d0] sm:$0xff] %v2172_v32 }
 0x2b3   : > { %v5192_v17 = vor.u32 %v5673_v56, %v5189_v47  ;;  %v5745_v5 = vld [vmem:[#allocation2 + $0x64c] sm:$0xf]  ;;  %v1622_v16 = vld [vmem:[%s5889_s26 + $0x24] sm:$0xf]  ;;  %v1516_v56 = vsel %vm1503_vm15, %v6994_v30, %v1515_v18  ;;  %2310 = vrot.lane.b32.xlu2 %v2286_v9, %s5834_s30  ;;  %v5443_v55 = vld [vmem:[#allocation2 + $0x608] sm:$0xf]  ;;  %v7378_v30 = vpop.permute.xlu2 %2391 }
 0x2b4   : > { %v5577_v21 = vld [vmem:[#allocation2 + $0x10c] sm:$0xf]  ;;  %v5480_v58 = vor.u32 %v5745_v5, %v5477_v1  ;;  %1533 = vst [vmem:[#allocation2 + $0x3f0] sm:$0xff] %v1516_v56  ;;  %1646 = vrot.lane.b32.xlu0 %v1622_v16, %s5833_s29  ;;  %v5444_v1 = vor.u32 %v5741_v49, %v5443_v55  ;;  %v8047_v9 = vrot.slane %v7378_v30, 4  ;;  %v8068_v49 = vrot.slane %v6893_v57, 4 }
 0x2b5   : > { %v4805_v26 = vld [vmem:[#allocation2 + $0x128] sm:$0xf0]  ;;  %3974 = vmatpush.bf16.msrb.mxu2 %v5192_v17  ;;  %v7380_v17 = vpop.permute.xlu1 %1405 }
 0x2b6   : > { %3941 = vmatpush.bf16.msrb.mxu3 %v4840_v12  ;;  %v1627_v60 = vld [vmem:[%s5889_s26 + $0x4c] sm:$0xf]  ;;  %3987 = vmatpush.bf16.msrb.mxu0 %v5480_v58  ;;  %v4808_v0 = vor.u32 %v5577_v21, %v4805_v26  ;;  %v1417_v21 = vrot.slane %v7380_v17, 4  ;;  %v7385_v26 = vpop.permute.xlu0 %1395  ;;  %v2420_v56 = vsel %vm323_vm0, %v2407_v63, %v8047_v9  ;;  %v8069_v63 = vrot.slane %v6988_v53, 4 }
 0x2b7   : > { %v5157_v52 = vld [vmem:[#allocation2 + $0x3e8] sm:$0xf0]  ;;  %1656 = vrot.lane.b32.xlu1 %v1627_v60, %s5833_s29  ;;  %3932 = vmatpush.bf16.msra.mxu1 %v5444_v1  ;;  %v1412_v58 = vrot.slane %v7385_v26, 4 }
 0x2b8   : > { %v5445_v47 = vld [vmem:[#allocation2 + $0x628] sm:$0xf0]  ;;  %3975 = vmatmul.bf16.vlgmr.msrb.gmra.mxu2 %v6990_v13 }
 0x2b9   : > { %v5737_v48 = vld [vmem:[#allocation2 + $0x60c] sm:$0xf] }
 0x2ba   : > { %v5665_v12 = vld [vmem:[#allocation2 + $0x3cc] sm:$0xf]  ;;  %v5448_v5 = vor.u32 %v5737_v48, %v5445_v47  ;;  %3942 = vmatpush.bf16.msrb.mxu3 %v4808_v0  ;;  %v1432_v47 = vsel %vm323_vm0, %v8068_v49, %v1417_v21  ;;  %5531 = vmatmul.msk.bf16.vlgmr.msra.gmra.mxu1 %vm3767_vm12, %v7031_v11 }
 0x2bb   : > { %v4773_v35 = vld [vmem:[#allocation2 + $0xe8] sm:$0xf0]  ;;  %v5160_v32 = vor.u32 %v5665_v12, %v5157_v52  ;;  %v2421_v12 = vsel %vm2416_vm7, %v7193_v36, %v2420_v56  ;;  %v5670_v56 = vld [vmem:[#allocation2 + $0x3ec] sm:$0xf0] }
 0x2bc   : > { %v5657_v44 = vld [vmem:[#allocation2 + $0x38c] sm:$0xf]  ;;  %3988 = vmatpush.bf16.msrb.mxu0 %v5448_v5  ;;  %v1433_v5 = vsel %vm1420_vm2, %v6893_v57, %v1432_v47  ;;  %2442 = vst [vmem:[#allocation2 + $0x690] sm:$0xff] %v2421_v12  ;;  %v7417_v12 = vpop.permute.xlu2 %1737 }
 0x2bd   : > { %v5569_v18 = vld [vmem:[#allocation2 + $0xcc] sm:$0xf]  ;;  %3953 = vmatpush.bf16.msrb.mxu1 %v5160_v32  ;;  %v1539_v32 = vld [vmem:[%s5889_s26 + $0x24] sm:$0xf]  ;;  %1450 = vst [vmem:[#allocation2 + $0x3b0] sm:$0xff] %v1433_v5 }
 0x2be   : > { %v4776_v60 = vor.u32 %v5569_v18, %v4773_v35  ;;  %v5125_v16 = vld [vmem:[#allocation2 + $0x3a8] sm:$0xf0]  ;;  %v1424_v35 = vsel %vm323_vm0, %v8069_v63, %v1412_v58 }
 0x2bf   : > { %v4741_v52 = vld [vmem:[#allocation2 + $0xa8] sm:$0xf0]  ;;  %v5128_v0 = vor.u32 %v5657_v44, %v5125_v16  ;;  %v1425_v44 = vsel %vm1420_vm2, %v6988_v53, %v1424_v35  ;;  %v5163_v16 = vld [vmem:[#allocation2 + $0x3d0] sm:$0xf]  ;;  %1563 = vrot.lane.b32.xlu1 %v1539_v32, %s5835_s7  ;;  %v7419_v53 = vpop.permute.xlu1 %1976  ;;  %v8070_v32 = vrot.slane %v6948_v4, 4 }
 0x2c0   : > { %v1544_v55 = vld [vmem:[%s5889_s26 + $0x4c] sm:$0xf]  ;;  %3943 = vmatpush.bf16.msrb.mxu3 %v4776_v60  ;;  %1446 = vst [vmem:[#allocation2 + $0x390] sm:$0xff] %v1425_v44  ;;  %v5164_v60 = vor.u32 %v5670_v56, %v5163_v16  ;;  %v5606_v16 = vld [vmem:[#allocation2 + $0x1ec] sm:$0xf0] }
 0x2c1   : > { %v5649_v48 = vld [vmem:[#allocation2 + $0x34c] sm:$0xf]  ;;  %3954 = vmatpush.bf16.msrb.mxu1 %v5128_v0  ;;  %1573 = vrot.lane.b32.xlu2 %v1544_v55, %s5835_s7  ;;  %v8046_v0 = vrot.slane %v7417_v12, 4  ;;  %v7423_v55 = vpop.permute.xlu0 %2069  ;;  %s266_s7 = scalar_lea.vmem %s8016_s4, %s5539_s28 }
 0x2c2   : > { %v5093_v1 = vld [vmem:[#allocation2 + $0x368] sm:$0xf0]  ;;  %4009 = vmatpush.bf16.msra.mxu0 %v5164_v60  ;;  %v2081_v5 = vrot.slane %v7423_v55, 4 }
 0x2c3   : > { %v2291_v18 = vld [vmem:[%s5889_s26 + $0x4c] sm:$0xf]  ;;  %v5096_v49 = vor.u32 %v5649_v48, %v5093_v1  ;;  %v1764_v35 = vsel %vm323_vm0, %v1748_v40, %v8046_v0  ;;  %5532 = vmatmul.msk.bf16.vlgmr.msrb.gmra.mxu0 %vm3767_vm12, %v7031_v11 }
 0x2c4   : > { %v5561_v36 = vld [vmem:[#allocation2 + $0x8c] sm:$0xf]  ;;  %2320 = vrot.lane.b32.xlu0 %v2291_v18, %s5834_s30  ;;  %v1765_v56 = vsel %vm1752_vm6, %v7198_v24, %v1764_v35  ;;  %v2096_v40 = vsel %vm323_vm0, %v2080_v2, %v2081_v5  ;;  %v5662_v24 = vld [vmem:[#allocation2 + $0x3ac] sm:$0xf0] }
 0x2c5   : > { %v4744_v57 = vor.u32 %v5561_v36, %v4741_v52  ;;  %v4709_v47 = vld [vmem:[#allocation2 + $0x68] sm:$0xf0]  ;;  %v8048_v52 = vrot.slane %v7419_v53, 4  ;;  %3955 = vmatpush.bf16.msrb.mxu1 %v5096_v49  ;;  %1782 = vst [vmem:[#allocation2 + $0x4b0] sm:$0xff] %v1765_v56  ;;  %v2097_v9 = vsel %vm2084_vm1, %v7077_v15, %v2096_v40  ;;  %v5099_v35 = vld [vmem:[#allocation2 + $0x350] sm:$0xf] }
 0x2c6   : > { %v5553_v48 = vld [vmem:[#allocation2 + $0x4c] sm:$0xf]  ;;  %2114 = vst [vmem:[#allocation2 + $0x5b0] sm:$0xff] %v2097_v9  ;;  %v5598_v40 = vld [vmem:[#allocation2 + $0x1ac] sm:$0xf0] }
 0x2c7   : > { %3944 = vmatpush.bf16.msrb.mxu3 %v4744_v57  ;;  %v5061_v1 = vld [vmem:[#allocation2 + $0x328] sm:$0xf0]  ;;  %v4712_v63 = vor.u32 %v5553_v48, %v4709_v47  ;;  %v2005_v18 = vsel %vm323_vm0, %v8070_v32, %v8048_v52  ;;  %v2203_v48 = vld [vmem:[%s5889_s26 + $0x24] sm:$0xf]  ;;  %v4907_v32 = vld [vmem:[#allocation2 + $0x1d0] sm:$0xf]  ;;  %v7455_v56 = vpop.permute.xlu1 %1893 }
 0x2c8   : > { %v5641_v44 = vld [vmem:[#allocation2 + $0x30c] sm:$0xf]  ;;  %v2006_v49 = vsel %vm2001_vm3, %v6948_v4, %v2005_v18  ;;  %v5131_v18 = vld [vmem:[#allocation2 + $0x390] sm:$0xf]  ;;  %v4908_v2 = vor.u32 %v5606_v16, %v4907_v32  ;;  %v8056_v9 = vrot.slane %v7455_v56, 4 }
 0x2c9   : > { %v5545_v36 = vld [vmem:[#allocation2 + $0xc] sm:$0xf]  ;;  %v5064_v60 = vor.u32 %v5641_v44, %v5061_v1  ;;  %2027 = vst [vmem:[#allocation2 + $0x550] sm:$0xff] %v2006_v49  ;;  %v5654_v52 = vld [vmem:[#allocation2 + $0x36c] sm:$0xf0]  ;;  %v5132_v1 = vor.u32 %v5662_v24, %v5131_v18  ;;  %v7453_v44 = vpop.permute.xlu2 %1644 }
 0x2ca   : > { %v4677_v57 = vld [vmem:[#allocation2 + $0x28] sm:$0xf0]  ;;  %v5590_v18 = vld [vmem:[#allocation2 + $0x16c] sm:$0xf0] }
 0x2cb   : > { %3945 = vmatpush.bf16.msrb.mxu3 %v4712_v63  ;;  %v2208_v47 = vld [vmem:[%s5889_s26 + $0x4c] sm:$0xf]  ;;  %3956 = vmatpush.bf16.msrb.mxu1 %v5064_v60  ;;  %v4680_v4 = vor.u32 %v5545_v36, %v4677_v57  ;;  %v8051_v36 = vrot.slane %v7453_v44, 4  ;;  %v7459_v57 = vpop.permute.xlu0 %1306  ;;  %v5100_v60 = vor.u32 %v5654_v52, %v5099_v35 }
 0x2cc   : > { %v5029_v0 = vld [vmem:[#allocation2 + $0x2e8] sm:$0xf0]  ;;  %2237 = vrot.lane.b32.xlu1 %v2208_v47, %s5836_s8  ;;  %2227 = vrot.lane.b32.xlu0 %v2203_v48, %s5836_s8  ;;  %v8055_v16 = vrot.slane %v7459_v57, 4  ;;  %v4875_v47 = vld [vmem:[#allocation2 + $0x190] sm:$0xf]  ;;  %v1922_v48 = vsel %vm323_vm0, %v1909_v37, %v8056_v9 }
 0x2cd   : > { %v5633_v63 = vld [vmem:[#allocation2 + $0x2cc] sm:$0xf]  ;;  %4010 = vmatpush.bf16.msra.mxu0 %v5132_v1  ;;  %v4876_v32 = vor.u32 %v5598_v40, %v4875_v47  ;;  %v1923_v35 = vsel %vm1918_vm4, %v7111_v27, %v1922_v48  ;;  %v5582_v40 = vld [vmem:[#allocation2 + $0x12c] sm:$0xf0]  ;;  %v5421_v9 = vld [vmem:[#allocation2 + $0x5f0] sm:$0xf0] }
 0x2ce   : > { %v5032_v15 = vor.u32 %v5633_v63, %v5029_v0  ;;  %v4997_v49 = vld [vmem:[#allocation2 + $0x2a8] sm:$0xf0]  ;;  %v1673_v0 = vsel %vm323_vm0, %v1660_v14, %v8051_v36  ;;  %v1333_v14 = vsel %vm323_vm0, %v1317_v7, %v8055_v16  ;;  %1944 = vst [vmem:[#allocation2 + $0x510] sm:$0xff] %v1923_v35  ;;  %v4811_v48 = vld [vmem:[#allocation2 + $0x110] sm:$0xf] }
 0x2cf   : > { %3946 = vmatpush.bf16.msrb.mxu3 %v4680_v4  ;;  %v5625_v24 = vld [vmem:[#allocation2 + $0x28c] sm:$0xf]  ;;  %v1674_v52 = vsel %vm1669_vm8, %v7235_v59, %v1673_v0  ;;  %v1334_v37 = vsel %vm1321_vm13, %v7073_v23, %v1333_v14  ;;  %v4843_v59 = vld [vmem:[#allocation2 + $0x150] sm:$0xf]  ;;  %v4812_v35 = vor.u32 %v5582_v40, %v4811_v48 }
 0x2d0   : > { %3957 = vmatpush.bf16.msrb.mxu1 %v5032_v15  ;;  %v5000_v4 = vor.u32 %v5625_v24, %v4997_v49  ;;  %1695 = vst [vmem:[#allocation2 + $0x450] sm:$0xff] %v1674_v52  ;;  %v4844_v27 = vor.u32 %v5590_v18, %v4843_v59  ;;  %v5617_v1 = vld [vmem:[#allocation2 + $0x24c] sm:$0xf]  ;;  %v7486_v15 = vpop.permute.xlu1 %1820  ;;  %v5734_v59 = vld [vmem:[#allocation2 + $0x5ec] sm:$0xf0] }
 0x2d1   : > { %4011 = vmatpush.bf16.msra.mxu0 %v5100_v60  ;;  %1351 = vst [vmem:[#allocation2 + $0x330] sm:$0xff] %v1334_v37  ;;  %v7484_v63 = vpop.permute.xlu2 %2235  ;;  %v8053_v23 = vrot.slane %v7486_v15, 4  ;;  %v4933_v60 = vld [vmem:[#allocation2 + $0x228] sm:$0xf0]  ;;  %v8071_v37 = vrot.slane %v7161_v19, 4 }
 0x2d2   : > { %3947 = vmatmul.bf16.vlgmr.msrb.gmra.mxu3 %v6960_v51  ;;  %v8049_v49 = vrot.slane %v7484_v63, 4  ;;  %v5609_v14 = vld [vmem:[#allocation2 + $0x20c] sm:$0xf]  ;;  %v5726_v40 = vld [vmem:[#allocation2 + $0x5ac] sm:$0xf0] }
 0x2d3   : > { %3995 = vmatpush.bf16.msra.mxu3 %v4908_v2  ;;  %v4965_v2 = vld [vmem:[#allocation2 + $0x268] sm:$0xf0]  ;;  %v7490_v47 = vpop.permute.xlu0 %1810  ;;  %v1847_v52 = vsel %vm323_vm0, %v1831_v6, %v8053_v23  ;;  %v5550_v36 = vld [vmem:[#allocation2 + $0x2c] sm:$0xf0] }
 0x2d4   : > { %3958 = vmatpush.bf16.msrb.mxu1 %v5000_v4  ;;  %v4968_v7 = vor.u32 %v5617_v1, %v4965_v2  ;;  %v8052_v0 = vrot.slane %v7490_v47, 4  ;;  %v2262_v24 = vsel %vm323_vm0, %v2246_v43, %v8049_v49  ;;  %v1848_v18 = vsel %vm1835_vm5, %v7157_v38, %v1847_v52  ;;  %v5718_v49 = vld [vmem:[#allocation2 + $0x56c] sm:$0xf0] }
 0x2d5   : > { %v2263_v4 = vsel %vm2250_vm11, %v7304_v61, %v2262_v24  ;;  %v4936_v2 = vor.u32 %v5609_v14, %v4933_v60  ;;  %v5067_v61 = vld [vmem:[#allocation2 + $0x310] sm:$0xf]  ;;  %1865 = vst [vmem:[#allocation2 + $0x4f0] sm:$0xff] %v1848_v18 }
 0x2d6   : > { %v1839_v43 = vsel %vm323_vm0, %v8071_v37, %v8052_v0  ;;  %2280 = vst [vmem:[#allocation2 + $0x630] sm:$0xff] %v2263_v4  ;;  %v5387_v14 = vld [vmem:[#allocation2 + $0x590] sm:$0xf] }
 0x2d7   : > { %3996 = vmatpush.bf16.msra.mxu3 %v4876_v32  ;;  %v5419_v32 = vld [vmem:[#allocation2 + $0x5d0] sm:$0xf]  ;;  %v1840_v6 = vsel %vm1835_vm5, %v7161_v19, %v1839_v43  ;;  %v5388_v18 = vor.u32 %v5726_v40, %v5387_v14 }
 0x2d8   : > { %3959 = vmatpush.bf16.msrb.mxu1 %v4968_v7  ;;  %v5420_v1 = vor.u32 %v5734_v59, %v5419_v32  ;;  %v4779_v7 = vld [vmem:[#allocation2 + $0xd0] sm:$0xf]  ;;  %1861 = vst [vmem:[#allocation2 + $0x4d0] sm:$0xff] %v1840_v6  ;;  %v7516_v60 = vpop.permute.xlu1 %1727 }
 0x2d9   : > { %v5646_v38 = vld [vmem:[#allocation2 + $0x32c] sm:$0xf0]  ;;  %v7514_v52 = vpop.permute.xlu2 %1561  ;;  %v1744_v32 = vrot.slane %v7516_v60, 4 }
 0x2da   : > { %v5068_v24 = vor.u32 %v5646_v38, %v5067_v61  ;;  %v5566_v4 = vld [vmem:[#allocation2 + $0xac] sm:$0xf0]  ;;  %v8050_v19 = vrot.slane %v7514_v52, 4 }
 0x2db   : > { %3997 = vmatpush.bf16.msra.mxu3 %v4844_v27  ;;  %v5574_v27 = vld [vmem:[#allocation2 + $0xec] sm:$0xf0] }
 0x2dc   : > { %3960 = vmatpush.bf16.msrb.mxu1 %v4936_v2  ;;  %v4780_v48 = vor.u32 %v5574_v27, %v4779_v7  ;;  %v5638_v37 = vld [vmem:[#allocation2 + $0x2ec] sm:$0xf0]  ;;  %4012 = vmatpush.bf16.msra.mxu0 %v5068_v24  ;;  %v8072_v27 = vrot.slane %v7268_v33, 4  ;;  %v8074_v24 = vrot.slane %v7071_v41, 4 }
 0x2dd   : > { %v4747_v2 = vld [vmem:[#allocation2 + $0x90] sm:$0xf] }
 0x2de   : > { %v5355_v59 = vld [vmem:[#allocation2 + $0x550] sm:$0xf]  ;;  %v1590_v6 = vsel %vm323_vm0, %v8072_v27, %v8050_v19  ;;  %v4748_v61 = vor.u32 %v5566_v4, %v4747_v2 }
 0x2df   : > { %3998 = vmatpush.bf16.msra.mxu3 %v4812_v35  ;;  %3961 = vmatmul.bf16.vlgmr.msrb.gmra.mxu1 %v7123_v46  ;;  %v7521_v35 = vpop.permute.xlu0 %2401  ;;  %v5035_v38 = vld [vmem:[#allocation2 + $0x2d0] sm:$0xf]  ;;  %v1591_v40 = vsel %vm1586_vm10, %v7268_v33, %v1590_v6 }
 0x2e0   : > { %4023 = vmatpush.bf16.msra.mxu1 %v5420_v1  ;;  %v2413_v43 = vrot.slane %v7521_v35, 4  ;;  %v8073_v1 = vrot.slane %v7033_v8, 4  ;;  %v5036_v27 = vor.u32 %v5638_v37, %v5035_v38  ;;  %v5558_v19 = vld [vmem:[#allocation2 + $0x6c] sm:$0xf0]  ;;  %1612 = vst [vmem:[#allocation2 + $0x410] sm:$0xff] %v1591_v40 }
 0x2e1   : > { %v5630_v2 = vld [vmem:[#allocation2 + $0x2ac] sm:$0xf0] }
 0x2e2   : > { %v1756_v7 = vsel %vm323_vm0, %v8073_v1, %v1744_v32  ;;  %v2428_v14 = vsel %vm323_vm0, %v8074_v24, %v2413_v43  ;;  %4013 = vmatpush.bf16.msra.mxu0 %v5036_v27  ;;  %v4715_v33 = vld [vmem:[#allocation2 + $0x50] sm:$0xf]  ;;  %v2155_v24 = vpop.permute.xlu2 %2154 }
 0x2e3   : > { %3999 = vmatpush.bf16.msra.mxu3 %v4780_v48  ;;  %v1757_v48 = vsel %vm1752_vm6, %v7033_v8, %v1756_v7  ;;  %v2429_v4 = vsel %vm2416_vm7, %v7071_v41, %v2428_v14  ;;  %v5323_v8 = vld [vmem:[#allocation2 + $0x510] sm:$0xf]  ;;  %v4716_v6 = vor.u32 %v5558_v19, %v4715_v33  ;;  %v2165_v0 = vrot.slane %v2155_v24, 4  ;;  %v7545_v41 = vpop.permute.xlu1 %2318 }
 0x2e4   : > { %4024 = vmatpush.bf16.msra.mxu1 %v5388_v18  ;;  %v5356_v18 = vor.u32 %v5718_v49, %v5355_v59  ;;  %1778 = vst [vmem:[#allocation2 + $0x490] sm:$0xff] %v1757_v48  ;;  %v5003_v1 = vld [vmem:[#allocation2 + $0x290] sm:$0xf]  ;;  %v5165_v48 = vld [vmem:[#allocation2 + $0x3f0] sm:$0xf0]  ;;  %v8054_v14 = vrot.slane %v7545_v41, 4 }
 0x2e5   : > { %2446 = vst [vmem:[#allocation2 + $0x6b0] sm:$0xff] %v2429_v4  ;;  %v5004_v7 = vor.u32 %v5630_v2, %v5003_v1  ;;  %v5710_v37 = vld [vmem:[#allocation2 + $0x52c] sm:$0xf0]  ;;  %v5666_v1 = vld [vmem:[#allocation2 + $0x3d4] sm:$0xf] }
 0x2e6   : > { %v4683_v38 = vld [vmem:[#allocation2 + $0x10] sm:$0xf]  ;;  %v5324_v59 = vor.u32 %v5710_v37, %v5323_v8  ;;  %v8077_v37 = vrot.slane %v7109_v34, 4 }
 0x2e7   : > { %4000 = vmatpush.bf16.msra.mxu3 %v4748_v61  ;;  %v5622_v40 = vld [vmem:[#allocation2 + $0x26c] sm:$0xf0]  ;;  %v7547_v49 = vpop.permute.xlu0 %2308  ;;  %4014 = vmatpush.bf16.msra.mxu0 %v5004_v7  ;;  %v4684_v33 = vor.u32 %v5550_v36, %v4683_v38  ;;  %v8076_v7 = vrot.slane %v7272_v62, 4  ;;  %v5730_v38 = vld [vmem:[#allocation2 + $0x5d4] sm:$0xf] }
 0x2e8   : > { %4025 = vmatpush.bf16.msra.mxu1 %v5356_v18  ;;  %v4971_v61 = vld [vmem:[#allocation2 + $0x250] sm:$0xf]  ;;  %v2325_v19 = vrot.slane %v7547_v49, 4  ;;  %v8075_v18 = vrot.slane %v7229_v29, 4 }
 0x2e9   : > { %v5291_v27 = vld [vmem:[#allocation2 + $0x4d0] sm:$0xf]  ;;  %v2345_v24 = vsel %vm323_vm0, %v8076_v7, %v8054_v14  ;;  %v5133_v7 = vld [vmem:[#allocation2 + $0x3b0] sm:$0xf0] }
 0x2ea   : > { %v5702_v4 = vld [vmem:[#allocation2 + $0x4ec] sm:$0xf0]  ;;  %v2181_v2 = vsel %vm323_vm0, %v8075_v18, %v2165_v0  ;;  %v2337_v23 = vsel %vm323_vm0, %v8077_v37, %v2325_v19  ;;  %v5168_v0 = vor.u32 %v5666_v1, %v5165_v48  ;;  %v5101_v14 = vld [vmem:[#allocation2 + $0x370] sm:$0xf0] }
 0x2eb   : > { %4001 = vmatpush.bf16.msra.mxu3 %v4716_v6  ;;  %v4972_v6 = vor.u32 %v5622_v40, %v4971_v61  ;;  %v2182_v8 = vsel %vm2167_vm14, %v7229_v29, %v2181_v2  ;;  %v5515_v36 = vld [vmem:[#allocation2 + $0x690] sm:$0xf]  ;;  %v2346_v29 = vsel %vm2333_vm9, %v7272_v62, %v2345_v24  ;;  %v2338_v40 = vsel %vm2333_vm9, %v7109_v34, %v2337_v23  ;;  %v5658_v2 = vld [vmem:[#allocation2 + $0x394] sm:$0xf]  ;;  %v2062_v62 = vpop.permute.xlu2 %2061 }
 0x2ec   : > { %4026 = vmatpush.bf16.msra.mxu1 %v5324_v59  ;;  %v5614_v59 = vld [vmem:[#allocation2 + $0x22c] sm:$0xf0]  ;;  %2198 = vst [vmem:[#allocation2 + $0x5f8] sm:$0xff] %v2182_v8  ;;  %v5292_v61 = vor.u32 %v5702_v4, %v5291_v27  ;;  %v5650_v8 = vld [vmem:[#allocation2 + $0x354] sm:$0xf]  ;;  %v5136_v24 = vor.u32 %v5658_v2, %v5133_v7  ;;  %v2077_v23 = vrot.slane %v2062_v62, 4  ;;  %v7571_v27 = vpop.permute.xlu1 %2225  ;;  %v5424_v4 = vor.u32 %v5730_v38, %v5421_v9 }
 0x2ed   : > { %v4939_v18 = vld [vmem:[#allocation2 + $0x210] sm:$0xf]  ;;  %2363 = vst [vmem:[#allocation2 + $0x670] sm:$0xff] %v2346_v29  ;;  %4015 = vmatpush.bf16.msra.mxu0 %v4972_v6  ;;  %v5389_v29 = vld [vmem:[#allocation2 + $0x5b0] sm:$0xf0] }
 0x2ee   : > { %v5758_v37 = vld [vmem:[#allocation2 + $0x6ac] sm:$0xf0]  ;;  %2359 = vst [vmem:[#allocation2 + $0x650] sm:$0xff] %v2338_v40  ;;  %v4940_v16 = vor.u32 %v5614_v59, %v4939_v18  ;;  %v8078_v40 = vrot.slane %v7266_v39, 4  ;;  %v5722_v2 = vld [vmem:[#allocation2 + $0x594] sm:$0xf] }
 0x2ef   : > { %4002 = vmatpush.bf16.msra.mxu3 %v4684_v33  ;;  %v5259_v48 = vld [vmem:[#allocation2 + $0x490] sm:$0xf]  ;;  %v5516_v1 = vor.u32 %v5758_v37, %v5515_v36  ;;  %v7573_v33 = vpop.permute.xlu0 %1654  ;;  %v5104_v36 = vor.u32 %v5650_v8, %v5101_v14  ;;  %v8080_v14 = vrot.slane %v7231_v20, 4  ;;  %v5392_v37 = vor.u32 %v5722_v2, %v5389_v29  ;;  %v5714_v62 = vld [vmem:[#allocation2 + $0x554] sm:$0xf] }
 0x2f0   : > { %4027 = vmatpush.bf16.msra.mxu1 %v5292_v61  ;;  %v5694_v34 = vld [vmem:[#allocation2 + $0x4ac] sm:$0xf0]  ;;  %v1666_v59 = vrot.slane %v7573_v33, 4  ;;  %v2090_v61 = vsel %vm323_vm0, %v8078_v40, %v2077_v23  ;;  %v4909_v2 = vld [vmem:[#allocation2 + $0x1f0] sm:$0xf0] }
 0x2f1   : > { %4042 = vmatpush.bf16.msra.mxu2 %v5516_v1  ;;  %v5260_v6 = vor.u32 %v5694_v34, %v5259_v48  ;;  %4016 = vmatpush.bf16.msra.mxu0 %v4940_v16  ;;  %v2091_v9 = vsel %vm2084_vm1, %v7266_v39, %v2090_v61  ;;  %v8079_v16 = vrot.slane %v7308_v22, 4  ;;  %v5069_v1 = vld [vmem:[#allocation2 + $0x330] sm:$0xf0] }
 0x2f2   : > { %4003 = vmatmul.bf16.vlgmr.msra.gmra.mxu3 %v6960_v51  ;;  %v1681_v18 = vsel %vm323_vm0, %v8080_v14, %v1666_v59  ;;  %2111 = vst [vmem:[#allocation2 + $0x598] sm:$0xff] %v2091_v9  ;;  %v5642_v34 = vld [vmem:[#allocation2 + $0x314] sm:$0xf] }
 0x2f3   : > { %4065 = vmatpush.bf16.msrb.mxu3 %v5168_v0  ;;  %v2242_v0 = vrot.slane %v7571_v27, 4  ;;  %v1682_v39 = vsel %vm1669_vm8, %v7231_v20, %v1681_v18  ;;  %v1989_v23 = vpop.permute.xlu2 %1988  ;;  %v5037_v61 = vld [vmem:[#allocation2 + $0x2f0] sm:$0xf0] }
 0x2f4   : > { %4028 = vmatpush.bf16.msra.mxu1 %v5260_v6  ;;  %v5750_v48 = vld [vmem:[#allocation2 + $0x66c] sm:$0xf0]  ;;  %4017 = vmatmul.bf16.vlgmr.msra.gmra.mxu0 %v7123_v46  ;;  %1699 = vst [vmem:[#allocation2 + $0x470] sm:$0xff] %v1682_v39  ;;  %v5357_v6 = vld [vmem:[#allocation2 + $0x570] sm:$0xf0]  ;;  %v1491_v40 = vpop.permute.xlu1 %1490 }
 0x2f5   : > { %4079 = vmatpush.bf16.msrb.mxu0 %v5424_v4  ;;  %v2254_v38 = vsel %vm323_vm0, %v8079_v16, %v2242_v0  ;;  %v5483_v8 = vld [vmem:[#allocation2 + $0x650] sm:$0xf]  ;;  %v5072_v4 = vor.u32 %v5642_v34, %v5069_v1  ;;  %v5360_v20 = vor.u32 %v5714_v62, %v5357_v6  ;;  %v1501_v9 = vrot.slane %v1491_v40, 4  ;;  %v5634_v18 = vld [vmem:[#allocation2 + $0x2d4] sm:$0xf] }
 0x2f6   : > { %v2255_v7 = vsel %vm2250_vm11, %v7308_v22, %v2254_v38  ;;  %v1999_v22 = vrot.slane %v1989_v23, 4  ;;  %v5706_v38 = vld [vmem:[#allocation2 + $0x514] sm:$0xf]  ;;  %v5742_v34 = vld [vmem:[#allocation2 + $0x62c] sm:$0xf0] }
 0x2f7   : > { %4066 = vmatpush.bf16.msrb.mxu3 %v5136_v24  ;;  %2276 = vst [vmem:[#allocation2 + $0x610] sm:$0xff] %v2255_v7  ;;  %v5484_v24 = vor.u32 %v5750_v48, %v5483_v8  ;;  %v1481_v29 = vpop.permute.xlu0 %1480  ;;  %v5005_v7 = vld [vmem:[#allocation2 + $0x2b0] sm:$0xf0]  ;;  %v8082_v48 = vrot.slane %v7191_v42, 4  ;;  %v5040_v8 = vor.u32 %v5634_v18, %v5037_v61  ;;  %v1356_v61 = vld [vmem:[%s5889_s26 + $0x1c] sm:$0xff] }
 0x2f8   : > { %v1496_v16 = vrot.slane %v1481_v29, 4  ;;  %v5325_v62 = vld [vmem:[#allocation2 + $0x530] sm:$0xf0]  ;;  %1364 = vst [vmem:[#allocation2 + $0x358] sm:$0xff] %v1356_v61 }
 0x2f9   : > { %4080 = vmatpush.bf16.msrb.mxu0 %v5392_v37  ;;  %4043 = vmatpush.bf16.msra.mxu2 %v5484_v24  ;;  %v1517_v37 = vsel %vm323_vm0, %v1500_v50, %v1501_v9  ;;  %v5227_v24 = vld [vmem:[#allocation2 + $0x450] sm:$0xf]  ;;  %v5602_v23 = vld [vmem:[#allocation2 + $0x1d4] sm:$0xf]  ;;  %v5328_v6 = vor.u32 %v5706_v38, %v5325_v62 }
 0x2fa   : > { %v1509_v1 = vsel %vm323_vm0, %v8082_v48, %v1496_v16  ;;  %v5698_v29 = vld [vmem:[#allocation2 + $0x4d4] sm:$0xf]  ;;  %v4912_v16 = vor.u32 %v5602_v23, %v4909_v2 }
 0x2fb   : > { %4067 = vmatpush.bf16.msrb.mxu3 %v5104_v36  ;;  %v8081_v36 = vrot.slane %v7302_v28, 4  ;;  %v5686_v40 = vld [vmem:[#allocation2 + $0x46c] sm:$0xf0]  ;;  %v5594_v62 = vld [vmem:[#allocation2 + $0x194] sm:$0xf] }
 0x2fc   : > { %v5228_v9 = vor.u32 %v5686_v40, %v5227_v24  ;;  %v2145_v38 = vpop.permute.xlu1 %2144  ;;  %v5690_v24 = vld [vmem:[#allocation2 + $0x494] sm:$0xf] }
 0x2fd   : > { %v2015_v14 = vsel %vm323_vm0, %v8081_v36, %v1999_v22  ;;  %4081 = vmatpush.bf16.msrb.mxu0 %v5360_v20  ;;  %v5293_v22 = vld [vmem:[#allocation2 + $0x4f0] sm:$0xf0] }
 0x2fe   : > { %v2016_v39 = vsel %vm2001_vm3, %v7302_v28, %v2015_v14  ;;  %v1510_v28 = vsel %vm1503_vm15, %v7191_v42, %v1509_v1  ;;  %v5451_v50 = vld [vmem:[#allocation2 + $0x610] sm:$0xf]  ;;  %v5626_v36 = vld [vmem:[#allocation2 + $0x294] sm:$0xf]  ;;  %v1360_v14 = vld [vmem:[%s5889_s26 + $0x44] sm:$0xff]  ;;  %4029 = vmatpush.bf16.msra.mxu1 %v5228_v9 }
 0x2ff   : > { %4068 = vmatpush.bf16.msrb.mxu3 %v5072_v4  ;;  %2032 = vst [vmem:[#allocation2 + $0x578] sm:$0xff] %v2016_v39  ;;  %v1518_v4 = vsel %vm1503_vm15, %v7347_v3, %v1517_v37  ;;  %v5452_v20 = vor.u32 %v5742_v34, %v5451_v50  ;;  %v1906_v3 = vpop.permute.xlu2 %1905  ;;  %v5008_v18 = vor.u32 %v5626_v36, %v5005_v7  ;;  %v4877_v39 = vld [vmem:[#allocation2 + $0x1b0] sm:$0xf0]  ;;  %v7614_v48 = vpop.permute.xlu0 %1571 }
 0x300   : > { %1534 = vst [vmem:[#allocation2 + $0x3f8] sm:$0xff] %v1518_v4  ;;  %v1916_v42 = vrot.slane %v1906_v3, 4  ;;  %v5296_v37 = vor.u32 %v5698_v29, %v5293_v22  ;;  %v4973_v1 = vld [vmem:[#allocation2 + $0x270] sm:$0xf0]  ;;  %v1583_v2 = vrot.slane %v7614_v48, 4  ;;  %v4880_v34 = vor.u32 %v5594_v62, %v4877_v39  ;;  %v3808_v3 = vpop.f32.mrf.mxu2 }
 0x301   : > { %1530 = vst [vmem:[#allocation2 + $0x3d8] sm:$0xff] %v1510_v28  ;;  %4082 = vmatpush.bf16.msrb.mxu0 %v5328_v6  ;;  %4044 = vmatpush.bf16.msra.mxu2 %v5452_v20  ;;  %v5618_v23 = vld [vmem:[#allocation2 + $0x254] sm:$0xf]  ;;  %v8083_v6 = vrot.slane %v7155_v25, 4 }
 0x302   : > { %1368 = vst [vmem:[#allocation2 + $0x378] sm:$0xff] %v1360_v14  ;;  %v1932_v7 = vsel %vm323_vm0, %v1915_v45, %v1916_v42  ;;  %v4976_v45 = vor.u32 %v5618_v23, %v4973_v1  ;;  %v5261_v22 = vld [vmem:[#allocation2 + $0x4b0] sm:$0xf0] }
 0x303   : > { %4069 = vmatpush.bf16.msrb.mxu3 %v5040_v8  ;;  %v2160_v8 = vrot.slane %v2145_v38, 4  ;;  %v1933_v4 = vsel %vm1918_vm4, %v7341_v31, %v1932_v7  ;;  %v1598_v50 = vsel %vm323_vm0, %v8083_v6, %v1583_v2  ;;  %v4845_v40 = vld [vmem:[#allocation2 + $0x170] sm:$0xf0]  ;;  %v5264_v29 = vor.u32 %v5690_v24, %v5261_v22 }
 0x304   : > { %5533 = vmatmul.msk.bf16.vlgmr.msra.gmra.mxu2 %vm3767_vm12, %v7031_v11  ;;  %1949 = vst [vmem:[#allocation2 + $0x538] sm:$0xff] %v1933_v4  ;;  %v1599_v31 = vsel %vm1586_vm10, %v7155_v25, %v1598_v50  ;;  %v4941_v61 = vld [vmem:[#allocation2 + $0x230] sm:$0xf0]  ;;  %v1408_v1 = vpop.permute.xlu1 %1407 }
 0x305   : > { %4051 = vmatpush.bf16.msrb.mxu2 %v4912_v16  ;;  %4083 = vmatpush.bf16.msrb.mxu0 %v5296_v37  ;;  %v2173_v28 = vsel %vm323_vm0, %v2159_v54, %v2160_v8  ;;  %v3822_v54 = vpop.f32.mrf.mxu3  ;;  %v5586_v9 = vld [vmem:[#allocation2 + $0x154] sm:$0xf]  ;;  %1616 = vst [vmem:[#allocation2 + $0x430] sm:$0xff] %v1599_v31  ;;  %v3794_v37 = vpop.f32.mrf.mxu1  ;;  %v1418_v7 = vrot.slane %v1408_v1, 4 }
 0x306   : > { %v2174_v20 = vsel %vm2167_vm14, %v7343_v10, %v2173_v28  ;;  %v5229_v16 = vld [vmem:[#allocation2 + $0x470] sm:$0xf0]  ;;  %v4848_v36 = vor.u32 %v5586_v9, %v4845_v40  ;;  %v5735_v9 = vld [vmem:[#allocation2 + $0x5f4] sm:$0xf0] }
 0x307   : > { %4070 = vmatpush.bf16.msrb.mxu3 %v5008_v18  ;;  %2194 = vst [vmem:[#allocation2 + $0x5d8] sm:$0xff] %v2174_v20  ;;  %v5610_v14 = vld [vmem:[#allocation2 + $0x214] sm:$0xf]  ;;  %v3780_v18 = vpop.f32.mrf.mxu0  ;;  %v1730_v39 = vpop.permute.xlu2 %1729  ;;  %v1434_v22 = vsel %vm323_vm0, %v1417_v21, %v1418_v7  ;;  %v5195_v20 = vld [vmem:[#allocation2 + $0x410] sm:$0xf] }
 0x308   : > { %v4944_v42 = vor.u32 %v5610_v14, %v4941_v61  ;;  %v5682_v10 = vld [vmem:[#allocation2 + $0x454] sm:$0xf]  ;;  %v1745_v25 = vrot.slane %v1730_v39, 4  ;;  %v1398_v62 = vpop.permute.xlu0 %1397  ;;  %v3795_v24 = vadd.f32 %v3794_v37, %v3780_v18 }
 0x309   : > { %4052 = vmatpush.bf16.msrb.mxu2 %v4880_v34  ;;  %4084 = vmatpush.bf16.msrb.mxu0 %v5264_v29  ;;  %v4813_v38 = vld [vmem:[#allocation2 + $0x130] sm:$0xf0]  ;;  %v5232_v8 = vor.u32 %v5682_v10, %v5229_v16  ;;  %v1413_v34 = vrot.slane %v1398_v62, 4 }
 0x30a   : > { %v5578_v23 = vld [vmem:[#allocation2 + $0x114] sm:$0xf]  ;;  %v1758_v4 = vsel %vm323_vm0, %v1744_v32, %v1745_v25  ;;  %v3809_v50 = vadd.f32 %v3808_v3, %v3795_v24  ;;  %v1435_v32 = vsel %vm1420_vm2, %v7380_v17, %v1434_v22 }
 0x30b   : > { %4071 = vmatpush.bf16.msrb.mxu3 %v4976_v45  ;;  %v4816_v28 = vor.u32 %v5578_v23, %v4813_v38  ;;  %v4781_v6 = vld [vmem:[#allocation2 + $0xf0] sm:$0xf0]  ;;  %v1759_v45 = vsel %vm1752_vm6, %v7516_v60, %v1758_v4  ;;  %v1426_v40 = vsel %vm323_vm0, %v1412_v58, %v1413_v34  ;;  %1451 = vst [vmem:[#allocation2 + $0x3b8] sm:$0xff] %v1435_v32 }
 0x30c   : > { %v5674_v31 = vld [vmem:[#allocation2 + $0x414] sm:$0xf]  ;;  %1779 = vst [vmem:[#allocation2 + $0x498] sm:$0xff] %v1759_v45  ;;  %v1427_v61 = vsel %vm1420_vm2, %v7385_v26, %v1426_v40  ;;  %v7652_v21 = vadd.f32 %v3822_v54, %v3809_v50  ;;  %v5678_v16 = vld [vmem:[#allocation2 + $0x42c] sm:$0xf0]  ;;  %v1979_v62 = vpop.permute.xlu1 %1978 }
 0x30d   : > { %4053 = vmatpush.bf16.msrb.mxu2 %v4848_v36  ;;  %4085 = vmatpush.bf16.msrb.mxu0 %v5232_v8  ;;  %v5517_v29 = vld [vmem:[#allocation2 + $0x6b0] sm:$0xf0]  ;;  %1447 = vst [vmem:[#allocation2 + $0x398] sm:$0xff] %v1427_v61  ;;  %v5196_v14 = vor.u32 %v5678_v16, %v5195_v20  ;;  %v3824_v17 = vpop.f32.mrf.mxu3  ;;  %v3796_v54 = vpop.f32.mrf.mxu1  ;;  %v1994_v34 = vrot.slane %v1979_v62, 4  ;;  %v8084_v20 = vrot.slane %v7419_v53, 4 }
 0x30e   : > { %v5427_v60 = vld [vmem:[#allocation2 + $0x5d8] sm:$0xf]  ;;  %v5197_v58 = vld [vmem:[#allocation2 + $0x430] sm:$0xf0] }
 0x30f   : > { %4072 = vmatpush.bf16.msrb.mxu3 %v4944_v42  ;;  %v5428_v36 = vor.u32 %v5735_v9, %v5427_v60  ;;  %v5200_v3 = vor.u32 %v5674_v31, %v5197_v58  ;;  %v5570_v18 = vld [vmem:[#allocation2 + $0xd4] sm:$0xf]  ;;  %v3782_v42 = vpop.f32.mrf.mxu0  ;;  %v2404_v26 = vpop.permute.xlu2 %2403  ;;  %4030 = vmatpush.bf16.msra.mxu1 %v5196_v14  ;;  %v2007_v31 = vsel %vm323_vm0, %v8084_v20, %v1994_v34  ;;  %v5607_v9 = vld [vmem:[#allocation2 + $0x1f4] sm:$0xf0] }
 0x310   : > { %v5754_v39 = vld [vmem:[#allocation2 + $0x694] sm:$0xf]  ;;  %v4784_v10 = vor.u32 %v5570_v18, %v4781_v6  ;;  %v2414_v8 = vrot.slane %v2404_v26, 4  ;;  %v2072_v24 = vpop.permute.xlu0 %2071  ;;  %v3797_v7 = vadd.f32 %v3796_v54, %v3782_v42 }
 0x311   : > { %4054 = vmatpush.bf16.msrb.mxu2 %v4816_v28  ;;  %v5520_v38 = vor.u32 %v5754_v39, %v5517_v29  ;;  %v4749_v37 = vld [vmem:[#allocation2 + $0xb0] sm:$0xf0]  ;;  %4086 = vmatpush.bf16.msrb.mxu0 %v5200_v3  ;;  %v2082_v23 = vrot.slane %v2072_v24, 4  ;;  %v3810_v28 = vpop.f32.mrf.mxu2  ;;  %v4915_v3 = vld [vmem:[#allocation2 + $0x1d8] sm:$0xf] }
 0x312   : > { %4073 = vmatmul.bf16.vlgmr.msrb.gmra.mxu3 %v7123_v46  ;;  %v5746_v25 = vld [vmem:[#allocation2 + $0x654] sm:$0xf]  ;;  %v2430_v6 = vsel %vm323_vm0, %v2413_v43, %v2414_v8  ;;  %v3811_v22 = vadd.f32 %v3810_v28, %v3797_v7  ;;  %4031 = vmatmul.bf16.vlgmr.msra.gmra.mxu1 %v6990_v13  ;;  %v2008_v43 = vsel %vm2001_vm3, %v7419_v53, %v2007_v31  ;;  %v7676_v53 = vld [vmem:[%s8017_s5] sm:$0xff]  ;;  %v7682_v7 = vld [vmem:[#allocation2 + $0x134] sm:$0xf0] }
 0x313   : > { %4135 = vmatpush.bf16.msra.mxu3 %v5428_v36  ;;  %v5485_v1 = vld [vmem:[#allocation2 + $0x670] sm:$0xf0]  ;;  %4098 = vmatpush.bf16.msrb.mxu1 %v5520_v38  ;;  %v2431_v40 = vsel %vm2416_vm7, %v7521_v35, %v2430_v6  ;;  %v2098_v29 = vsel %vm323_vm0, %v2081_v5, %v2082_v23  ;;  %2028 = vst [vmem:[#allocation2 + $0x558] sm:$0xff] %v2008_v43  ;;  %v4221_v24 = vperm.slane %v7676_v53, 0  ;;  %v8086_v6 = vrot.slane %v7459_v57, 4 }
 0x314   : > { %v5562_v4 = vld [vmem:[#allocation2 + $0x94] sm:$0xf]  ;;  %v5488_v45 = vor.u32 %v5746_v25, %v5485_v1  ;;  %4087 = vmatmul.bf16.vlgmr.msrb.gmra.mxu0 %v6990_v13  ;;  %2447 = vst [vmem:[#allocation2 + $0x6b8] sm:$0xff] %v2431_v40  ;;  %v2099_v32 = vsel %vm2084_vm1, %v7423_v55, %v2098_v29  ;;  %v7671_v60 = vadd.f32 %v3824_v17, %v3811_v22  ;;  %v1896_v39 = vpop.permute.xlu1 %1895  ;;  %v5171_v25 = vld [vmem:[#allocation2 + $0x3d8] sm:$0xf] }
 0x315   : > { %4055 = vmatpush.bf16.msrb.mxu2 %v4784_v10  ;;  %v4752_v50 = vor.u32 %v5562_v4, %v4749_v37  ;;  %v4717_v35 = vld [vmem:[#allocation2 + $0x70] sm:$0xf0]  ;;  %2115 = vst [vmem:[#allocation2 + $0x5b8] sm:$0xff] %v2099_v32  ;;  %v4916_v42 = vor.u32 %v5607_v9, %v4915_v3  ;;  %v5599_v10 = vld [vmem:[#allocation2 + $0x1b4] sm:$0xf0]  ;;  %v1911_v38 = vrot.slane %v1896_v39, 4  ;;  %v3836_v34 = vpop.f32.mrf.mxu3  ;;  %v3864_v31 = vpop.f32.mrf.mxu1 }
 0x316   : > { %v5738_v61 = vld [vmem:[#allocation2 + $0x614] sm:$0xf]  ;;  %v5671_v1 = vld [vmem:[#allocation2 + $0x3f4] sm:$0xf0]  ;;  %v8085_v4 = vrot.slane %v7455_v56, 4 }
 0x317   : > { %4099 = vmatpush.bf16.msrb.mxu1 %v5488_v45  ;;  %v5554_v5 = vld [vmem:[#allocation2 + $0x54] sm:$0xf]  ;;  %v2311_v58 = vpop.permute.xlu2 %2310  ;;  %v3850_v54 = vpop.f32.mrf.mxu0  ;;  %v4883_v45 = vld [vmem:[#allocation2 + $0x198] sm:$0xf]  ;;  %v5172_v32 = vor.u32 %v5671_v1, %v5171_v25 }
 0x318   : > { %v5453_v16 = vld [vmem:[#allocation2 + $0x630] sm:$0xf0]  ;;  %v4720_v36 = vor.u32 %v5554_v5, %v4717_v35  ;;  %v2326_v55 = vrot.slane %v2311_v58, 4  ;;  %v1309_v17 = vpop.permute.xlu0 %1308  ;;  %v1924_v28 = vsel %vm323_vm0, %v8085_v4, %v1911_v38  ;;  %v5591_v22 = vld [vmem:[#allocation2 + $0x174] sm:$0xf0]  ;;  %v3851_v20 = vadd.f32 %v3850_v54, %v3836_v34 }
 0x319   : > { %4056 = vmatpush.bf16.msrb.mxu2 %v4752_v50  ;;  %v5456_v14 = vor.u32 %v5738_v61, %v5453_v16  ;;  %v4685_v18 = vld [vmem:[#allocation2 + $0x30] sm:$0xf0]  ;;  %v1319_v37 = vrot.slane %v1309_v17, 4  ;;  %v7692_v40 = vld [vmem:[#allocation2 + $0x358] sm:$0xf]  ;;  %v1925_v29 = vsel %vm1918_vm4, %v7455_v56, %v1924_v28  ;;  %v4884_v43 = vor.u32 %v5599_v10, %v4883_v45  ;;  %v3878_v16 = vpop.f32.mrf.mxu2 }
 0x31a   : > { %v5546_v26 = vld [vmem:[#allocation2 + $0x14] sm:$0xf]  ;;  %v2339_v8 = vsel %vm323_vm0, %v2325_v19, %v2326_v55  ;;  %v5395_v19 = vld [vmem:[#allocation2 + $0x598] sm:$0xf]  ;;  %1945 = vst [vmem:[#allocation2 + $0x518] sm:$0xff] %v1925_v29  ;;  %v3865_v58 = vadd.f32 %v3864_v31, %v3851_v20  ;;  %v4237_v56 = vmul.f32 %v4221_v24, %v7652_v21  ;;  %v8088_v45 = vrot.slane %v7490_v47, 4 }
 0x31b   : > { %4100 = vmatpush.bf16.msrb.mxu1 %v5456_v14  ;;  %v4688_v62 = vor.u32 %v5546_v26, %v4685_v18  ;;  %v2340_v23 = vsel %vm2333_vm9, %v7547_v49, %v2339_v8  ;;  %v1335_v50 = vsel %vm323_vm0, %v8086_v6, %v1319_v37  ;;  %v5663_v35 = vld [vmem:[#allocation2 + $0x3b4] sm:$0xf0]  ;;  %v8087_v6 = vrot.slane %v7486_v15, 4 }
 0x31c   : > { %2360 = vst [vmem:[#allocation2 + $0x658] sm:$0xff] %v2340_v23  ;;  %v1336_v49 = vsel %vm1321_vm13, %v7459_v57, %v1335_v50  ;;  %v5655_v61 = vld [vmem:[#allocation2 + $0x374] sm:$0xf0]  ;;  %v3879_v17 = vadd.f32 %v3878_v16, %v3865_v58  ;;  %v1823_v26 = vpop.permute.xlu1 %1822  ;;  %v4273_v4 = vmul.f32 %v4237_v56, %v7652_v21 }
 0x31d   : > { %4057 = vmatpush.bf16.msrb.mxu2 %v4720_v36  ;;  %v5727_v9 = vld [vmem:[#allocation2 + $0x5b4] sm:$0xf0]  ;;  %v4222_v36 = vperm.slane %v7676_v53, 1  ;;  %1352 = vst [vmem:[#allocation2 + $0x338] sm:$0xff] %v1336_v49  ;;  %v5108_v25 = vor.u32 %v5655_v61, %v7692_v40  ;;  %v1833_v1 = vrot.slane %v1823_v26, 4  ;;  %v4245_v61 = vmul.f32 %v4221_v24, %v7671_v60 }
 0x31e   : > { %v5139_v5 = vld [vmem:[#allocation2 + $0x398] sm:$0xf]  ;;  %v5396_v14 = vor.u32 %v5727_v9, %v5395_v19  ;;  %v7708_v34 = vpack.c.bf16 %v3879_v17, %v7652_v21 }
 0x31f   : > { %4107 = vmatpush.bf16.msra.mxu1 %v4916_v42  ;;  %v4819_v57 = vld [vmem:[#allocation2 + $0x118] sm:$0xf]  ;;  %v1574_v3 = vpop.permute.xlu2 %1573  ;;  %v5140_v37 = vor.u32 %v5663_v35, %v5139_v5  ;;  %v1849_v50 = vsel %vm323_vm0, %v8087_v6, %v1833_v1  ;;  %v3852_v40 = vpop.f32.mrf.mxu0  ;;  %v4281_v24 = vmul.f32 %v4245_v61, %v7671_v60  ;;  %v8090_v1 = vrot.slane %v7417_v12, 4 }
 0x320   : > { %v4851_v18 = vld [vmem:[#allocation2 + $0x158] sm:$0xf]  ;;  %v4820_v39 = vor.u32 %v7682_v7, %v4819_v57  ;;  %4136 = vmatpush.bf16.msra.mxu3 %v5396_v14  ;;  %v1584_v42 = vrot.slane %v1574_v3, 4  ;;  %v1813_v10 = vpop.permute.xlu0 %1812  ;;  %v1850_v21 = vsel %vm1835_vm5, %v7486_v15, %v1849_v50  ;;  %v3866_v35 = vpop.f32.mrf.mxu1 }
 0x321   : > { %4058 = vmatpush.bf16.msrb.mxu2 %v4688_v62  ;;  %v5363_v55 = vld [vmem:[#allocation2 + $0x558] sm:$0xf]  ;;  %v4852_v38 = vor.u32 %v5591_v22, %v4851_v18  ;;  %v1828_v54 = vrot.slane %v1813_v10, 4  ;;  %v4238_v62 = vmul.f32 %v4222_v36, %v3879_v17  ;;  %v3838_v22 = vpop.f32.mrf.mxu3  ;;  %1866 = vst [vmem:[#allocation2 + $0x4f8] sm:$0xff] %v1850_v21 }
 0x322   : > { %v5719_v8 = vld [vmem:[#allocation2 + $0x574] sm:$0xf0]  ;;  %v1600_v7 = vsel %vm323_vm0, %v1583_v2, %v1584_v42  ;;  %5534 = vmatmul.msk.bf16.vlgmr.msrb.gmra.mxu1 %vm3767_vm12, %v7031_v11  ;;  %v3853_v29 = vadd.f32 %v3852_v40, %v3838_v22 }
 0x323   : > { %4108 = vmatpush.bf16.msra.mxu1 %v4884_v43  ;;  %v5364_v23 = vor.u32 %v5719_v8, %v5363_v55  ;;  %v1601_v28 = vsel %vm1586_vm10, %v7614_v48, %v1600_v7  ;;  %v1841_v19 = vsel %vm323_vm0, %v8088_v45, %v1828_v54  ;;  %v4274_v2 = vmul.f32 %v4238_v62, %v3879_v17  ;;  %v5331_v20 = vld [vmem:[#allocation2 + $0x518] sm:$0xf] }
 0x324   : > { %4059 = vmatmul.bf16.vlgmr.msrb.gmra.mxu2 %v6960_v51  ;;  %1617 = vst [vmem:[#allocation2 + $0x438] sm:$0xff] %v1601_v28  ;;  %v1842_v48 = vsel %vm1835_vm5, %v7490_v47, %v1841_v19  ;;  %v5711_v31 = vld [vmem:[#allocation2 + $0x534] sm:$0xf0]  ;;  %v3867_v15 = vadd.f32 %v3866_v35, %v3853_v29  ;;  %v3880_v47 = vpop.f32.mrf.mxu2  ;;  %v7731_v16 = vadd.f32 %v4238_v62, %v4237_v56  ;;  %v2394_v14 = vpop.permute.xlu1 %2393 }
 0x325   : > { %4121 = vmatpush.bf16.msra.mxu2 %v5172_v32  ;;  %4137 = vmatpush.bf16.msra.mxu3 %v5364_v23  ;;  %v5332_v49 = vor.u32 %v5711_v31, %v5331_v20  ;;  %v5575_v43 = vld [vmem:[#allocation2 + $0xf4] sm:$0xf0]  ;;  %1862 = vst [vmem:[#allocation2 + $0x4d8] sm:$0xff] %v1842_v48  ;;  %v7733_v58 = vadd.f32 %v4274_v2, %v4273_v4  ;;  %v2409_v17 = vrot.slane %v2394_v14, 4 }
 0x326   : > { %v5647_v32 = vld [vmem:[#allocation2 + $0x334] sm:$0xf0] }
 0x327   : > { %4109 = vmatpush.bf16.msra.mxu1 %v4852_v38  ;;  %v4787_v9 = vld [vmem:[#allocation2 + $0xd8] sm:$0xf] }
 0x328   : > { %v5075_v5 = vld [vmem:[#allocation2 + $0x318] sm:$0xf]  ;;  %v1740_v57 = vpop.permute.xlu0 %1739  ;;  %v4788_v3 = vor.u32 %v5575_v43, %v4787_v9  ;;  %v5667_v43 = vld [vmem:[#allocation2 + $0x3dc] sm:$0xf] }
 0x329   : > { %4122 = vmatpush.bf16.msra.mxu2 %v5140_v37  ;;  %4138 = vmatpush.bf16.msra.mxu3 %v5332_v49  ;;  %v5076_v18 = vor.u32 %v5647_v32, %v5075_v5  ;;  %v5567_v55 = vld [vmem:[#allocation2 + $0xb4] sm:$0xf0]  ;;  %v1750_v42 = vrot.slane %v1740_v57, 4  ;;  %v8089_v37 = vrot.slane %v7378_v30, 4  ;;  %v5173_v32 = vld [vmem:[#allocation2 + $0x3f8] sm:$0xf0] }
 0x32a   : > { %v5639_v26 = vld [vmem:[#allocation2 + $0x2f4] sm:$0xf0] }
 0x32b   : > { %4110 = vmatpush.bf16.msra.mxu1 %v4820_v39  ;;  %v3881_v39 = vadd.f32 %v3880_v47, %v3867_v15  ;;  %v4755_v10 = vld [vmem:[#allocation2 + $0x98] sm:$0xf]  ;;  %v1766_v54 = vsel %vm323_vm0, %v8090_v1, %v1750_v42  ;;  %v5731_v42 = vld [vmem:[#allocation2 + $0x5dc] sm:$0xf] }
 0x32c   : > { %v4756_v8 = vor.u32 %v5567_v55, %v4755_v10  ;;  %v5043_v62 = vld [vmem:[#allocation2 + $0x2d8] sm:$0xf]  ;;  %v1767_v23 = vsel %vm1752_vm6, %v7417_v12, %v1766_v54  ;;  %v1657_v40 = vpop.permute.xlu1 %1656  ;;  %v3906_v14 = vpop.f32.mrf.mxu2 }
 0x32d   : > { %4123 = vmatpush.bf16.msra.mxu2 %v5108_v25  ;;  %v4246_v56 = vmul.f32 %v4222_v36, %v3881_v39  ;;  %v7739_v38 = vpack.c.bf16 %v3881_v39, %v7671_v60  ;;  %v2422_v25 = vsel %vm323_vm0, %v8089_v37, %v2409_v17  ;;  %v5044_v36 = vor.u32 %v5639_v26, %v5043_v62  ;;  %v5703_v4 = vld [vmem:[#allocation2 + $0x4f4] sm:$0xf0]  ;;  %v5659_v37 = vld [vmem:[#allocation2 + $0x39c] sm:$0xf] }
 0x32e   : > { %v2423_v7 = vsel %vm2416_vm7, %v7378_v30, %v2422_v25  ;;  %v5559_v60 = vld [vmem:[#allocation2 + $0x74] sm:$0xf0]  ;;  %1783 = vst [vmem:[#allocation2 + $0x4b8] sm:$0xff] %v1767_v23  ;;  %v1667_v20 = vrot.slane %v1657_v40, 4  ;;  %v5141_v25 = vld [vmem:[#allocation2 + $0x3b8] sm:$0xf0]  ;;  %v3920_v1 = vpop.f32.mrf.mxu0 }
 0x32f   : > { %4111 = vmatpush.bf16.msra.mxu1 %v4788_v3  ;;  %v4282_v28 = vmul.f32 %v4246_v56, %v3881_v39  ;;  %2443 = vst [vmem:[#allocation2 + $0x698] sm:$0xff] %v2423_v7  ;;  %v5299_v6 = vld [vmem:[#allocation2 + $0x4d8] sm:$0xf]  ;;  %v7751_v45 = vadd.f32 %v4246_v56, %v4245_v61  ;;  %v8091_v61 = vrot.slane %v7453_v44, 4  ;;  %v5429_v7 = vld [vmem:[#allocation2 + $0x5f8] sm:$0xf0] }
 0x330   : > { %v5631_v50 = vld [vmem:[#allocation2 + $0x2b4] sm:$0xf0]  ;;  %v5300_v19 = vor.u32 %v5703_v4, %v5299_v6  ;;  %v1647_v12 = vpop.permute.xlu0 %1646  ;;  %v1683_v35 = vsel %vm323_vm0, %v1666_v59, %v1667_v20  ;;  %v5176_v59 = vor.u32 %v5667_v43, %v5173_v32  ;;  %v5651_v23 = vld [vmem:[#allocation2 + $0x35c] sm:$0xf]  ;;  %v5144_v6 = vor.u32 %v5659_v37, %v5141_v25 }
 0x331   : > { %4124 = vmatpush.bf16.msra.mxu2 %v5076_v18  ;;  %v7753_v2 = vadd.f32 %v4282_v28, %v4281_v24  ;;  %v4723_v22 = vld [vmem:[#allocation2 + $0x58] sm:$0xf]  ;;  %v1662_v31 = vrot.slane %v1647_v12, 4  ;;  %v1684_v57 = vsel %vm1669_vm8, %v7573_v33, %v1683_v35  ;;  %v8093_v12 = vrot.slane %v7545_v41, 4 }
 0x332   : > { %v5011_v30 = vld [vmem:[#allocation2 + $0x298] sm:$0xf]  ;;  %4139 = vmatpush.bf16.msra.mxu3 %v5300_v19  ;;  %v4724_v21 = vor.u32 %v5559_v60, %v4723_v22  ;;  %1700 = vst [vmem:[#allocation2 + $0x478] sm:$0xff] %v1684_v57  ;;  %v5397_v19 = vld [vmem:[#allocation2 + $0x5b8] sm:$0xf0]  ;;  %v8094_v37 = vrot.slane %v7484_v63, 4 }
 0x333   : > { %4112 = vmatpush.bf16.msra.mxu1 %v4756_v8  ;;  %v5012_v48 = vor.u32 %v5631_v50, %v5011_v30  ;;  %v5551_v29 = vld [vmem:[#allocation2 + $0x34] sm:$0xf0]  ;;  %v1675_v15 = vsel %vm323_vm0, %v8091_v61, %v1662_v31  ;;  %v5432_v50 = vor.u32 %v5731_v42, %v5429_v7  ;;  %v8092_v30 = vrot.slane %v7514_v52, 4  ;;  %v5365_v57 = vld [vmem:[#allocation2 + $0x578] sm:$0xf0] }
 0x334   : > { %v5623_v49 = vld [vmem:[#allocation2 + $0x274] sm:$0xf0]  ;;  %v1676_v3 = vsel %vm1669_vm8, %v7453_v44, %v1675_v15  ;;  %v3892_v44 = vpop.f32.mrf.mxu3  ;;  %v1564_v54 = vpop.permute.xlu1 %1563  ;;  %v5077_v15 = vld [vmem:[#allocation2 + $0x338] sm:$0xf0] }
 0x335   : > { %4125 = vmatpush.bf16.msra.mxu2 %v5044_v36  ;;  %v4691_v9 = vld [vmem:[#allocation2 + $0x18] sm:$0xf]  ;;  %1696 = vst [vmem:[#allocation2 + $0x458] sm:$0xff] %v1676_v3  ;;  %v5109_v36 = vld [vmem:[#allocation2 + $0x378] sm:$0xf0]  ;;  %v3907_v4 = vadd.f32 %v3906_v14, %v3892_v44  ;;  %v1579_v60 = vrot.slane %v1564_v54, 4  ;;  %v3908_v35 = vpop.f32.mrf.mxu2 }
 0x336   : > { %v4979_v5 = vld [vmem:[#allocation2 + $0x258] sm:$0xf]  ;;  %v4692_v18 = vor.u32 %v5551_v29, %v4691_v9  ;;  %v5723_v29 = vld [vmem:[#allocation2 + $0x59c] sm:$0xf]  ;;  %v4223_v3 = vperm.slane %v7676_v53, 2 }
 0x337   : > { %4113 = vmatpush.bf16.msra.mxu1 %v4724_v21  ;;  %v5615_v47 = vld [vmem:[#allocation2 + $0x234] sm:$0xf0]  ;;  %v4980_v55 = vor.u32 %v5623_v49, %v4979_v5  ;;  %v3921_v22 = vadd.f32 %v3920_v1, %v3907_v4  ;;  %v1592_v40 = vsel %vm323_vm0, %v8092_v30, %v1579_v60  ;;  %v5400_v43 = vor.u32 %v5723_v29, %v5397_v19  ;;  %v5715_v9 = vld [vmem:[#allocation2 + $0x55c] sm:$0xf] }
 0x338   : > { %v5523_v39 = vld [vmem:[#allocation2 + $0x698] sm:$0xf]  ;;  %v2321_v8 = vpop.permute.xlu0 %2320  ;;  %v1593_v20 = vsel %vm1586_vm10, %v7514_v52, %v1592_v40  ;;  %v5368_v42 = vor.u32 %v5715_v9, %v5365_v57  ;;  %v5635_v44 = vld [vmem:[#allocation2 + $0x2dc] sm:$0xf] }
 0x339   : > { %4126 = vmatpush.bf16.msra.mxu2 %v5012_v48  ;;  %v5759_v17 = vld [vmem:[#allocation2 + $0x6b4] sm:$0xf0]  ;;  %v2331_v28 = vrot.slane %v2321_v8, 4  ;;  %v5112_v48 = vor.u32 %v5651_v23, %v5109_v36  ;;  %1613 = vst [vmem:[#allocation2 + $0x418] sm:$0xff] %v1593_v20  ;;  %v5333_v1 = vld [vmem:[#allocation2 + $0x538] sm:$0xf0] }
 0x33a   : > { %v5267_v26 = vld [vmem:[#allocation2 + $0x498] sm:$0xf]  ;;  %v5524_v10 = vor.u32 %v5759_v17, %v5523_v39  ;;  %v5755_v36 = vld [vmem:[#allocation2 + $0x69c] sm:$0xf] }
 0x33b   : > { %v5695_v24 = vld [vmem:[#allocation2 + $0x4b4] sm:$0xf0]  ;;  %4114 = vmatpush.bf16.msra.mxu1 %v4692_v18  ;;  %v2347_v21 = vsel %vm323_vm0, %v8093_v12, %v2331_v28  ;;  %v5699_v40 = vld [vmem:[#allocation2 + $0x4dc] sm:$0xf] }
 0x33c   : > { %v5268_v56 = vor.u32 %v5695_v24, %v5267_v26  ;;  %4154 = vmatpush.bf16.msra.mxu0 %v5524_v10  ;;  %v4947_v33 = vld [vmem:[#allocation2 + $0x218] sm:$0xf]  ;;  %v2348_v31 = vsel %vm2333_vm9, %v7545_v41, %v2347_v21  ;;  %v3894_v5 = vpop.f32.mrf.mxu3  ;;  %v5643_v41 = vld [vmem:[#allocation2 + $0x31c] sm:$0xf] }
 0x33d   : > { %4127 = vmatpush.bf16.msra.mxu2 %v4980_v55  ;;  %v4948_v62 = vor.u32 %v5615_v47, %v4947_v33  ;;  %v5687_v49 = vld [vmem:[#allocation2 + $0x474] sm:$0xf0]  ;;  %2364 = vst [vmem:[#allocation2 + $0x678] sm:$0xff] %v2348_v31  ;;  %v3922_v47 = vpop.f32.mrf.mxu0  ;;  %v3909_v18 = vadd.f32 %v3908_v35, %v3894_v5  ;;  %v5080_v17 = vor.u32 %v5643_v41, %v5077_v15  ;;  %v5045_v24 = vld [vmem:[#allocation2 + $0x2f8] sm:$0xf0] }
 0x33e   : > { %4140 = vmatpush.bf16.msra.mxu3 %v5268_v56  ;;  %4115 = vmatmul.bf16.vlgmr.msra.gmra.mxu1 %v6960_v51  ;;  %v5235_v32 = vld [vmem:[#allocation2 + $0x458] sm:$0xf]  ;;  %v2238_v52 = vpop.permute.xlu1 %2237  ;;  %v5707_v10 = vld [vmem:[#allocation2 + $0x51c] sm:$0xf]  ;;  %v5048_v4 = vor.u32 %v5635_v44, %v5045_v24 }
 0x33f   : > { %4177 = vmatpush.bf16.msrb.mxu1 %v5176_v59  ;;  %v5236_v61 = vor.u32 %v5687_v49, %v5235_v32  ;;  %v2248_v55 = vrot.slane %v2238_v52, 4  ;;  %v3934_v59 = vpop.f32.mrf.mxu1  ;;  %v3923_v56 = vadd.f32 %v3922_v47, %v3909_v18  ;;  %v5679_v23 = vld [vmem:[#allocation2 + $0x434] sm:$0xf0]  ;;  %v5336_v60 = vor.u32 %v5707_v10, %v5333_v1  ;;  %v5301_v12 = vld [vmem:[#allocation2 + $0x4f8] sm:$0xf0] }
 0x340   : > { %v2228_v14 = vpop.permute.xlu0 %2227  ;;  %v7778_v26 = vadd.f32 %v3934_v59, %v3921_v22  ;;  %v5203_v7 = vld [vmem:[#allocation2 + $0x418] sm:$0xf]  ;;  %v5525_v22 = vld [vmem:[#allocation2 + $0x6b8] sm:$0xf0]  ;;  %v5304_v29 = vor.u32 %v5699_v40, %v5301_v12 }
 0x341   : > { %4128 = vmatpush.bf16.msra.mxu2 %v4948_v62  ;;  %v2243_v39 = vrot.slane %v2228_v14, 4  ;;  %v2264_v25 = vsel %vm323_vm0, %v8094_v37, %v2248_v55  ;;  %v5204_v28 = vor.u32 %v5679_v23, %v5203_v7  ;;  %v5528_v30 = vor.u32 %v5755_v36, %v5525_v22  ;;  %v5747_v49 = vld [vmem:[#allocation2 + $0x65c] sm:$0xf] }
 0x342   : > { %4141 = vmatpush.bf16.msra.mxu3 %v5236_v61  ;;  %v2265_v54 = vsel %vm2250_vm11, %v7484_v63, %v2264_v25  ;;  %v4239_v62 = vmul.f32 %v4223_v3, %v7778_v26  ;;  %v4981_v32 = vld [vmem:[#allocation2 + $0x278] sm:$0xf0] }
 0x343   : > { %4178 = vmatpush.bf16.msrb.mxu1 %v5144_v6  ;;  %v2256_v33 = vsel %vm323_vm0, %v2242_v0, %v2243_v39  ;;  %2281 = vst [vmem:[#allocation2 + $0x638] sm:$0xff] %v2265_v54  ;;  %v5491_v0 = vld [vmem:[#allocation2 + $0x658] sm:$0xf]  ;;  %v5269_v35 = vld [vmem:[#allocation2 + $0x4b8] sm:$0xf0] }
 0x344   : > { %4129 = vmatmul.bf16.vlgmr.msra.gmra.mxu2 %v7123_v46  ;;  %v2257_v8 = vsel %vm2250_vm11, %v7571_v27, %v2256_v33  ;;  %v5751_v6 = vld [vmem:[#allocation2 + $0x674] sm:$0xf0]  ;;  %v4275_v63 = vmul.f32 %v4239_v62, %v7778_v26  ;;  %v5013_v27 = vld [vmem:[#allocation2 + $0x2b8] sm:$0xf0] }
 0x345   : > { %4191 = vmatpush.bf16.msrb.mxu2 %v5432_v50  ;;  %2277 = vst [vmem:[#allocation2 + $0x618] sm:$0xff] %v2257_v8  ;;  %v7792_v50 = vadd.f32 %v7731_v16, %v4239_v62  ;;  %v5492_v19 = vor.u32 %v5751_v6, %v5491_v0  ;;  %v5493_v20 = vld [vmem:[#allocation2 + $0x678] sm:$0xf0]  ;;  %v3976_v6 = vpop.f32.mrf.mxu2  ;;  %v3990_v22 = vpop.f32.mrf.mxu0 }
 0x346   : > { %v7796_v21 = vadd.f32 %v7733_v58, %v4275_v63  ;;  %4142 = vmatpush.bf16.msra.mxu3 %v5204_v28  ;;  %v5496_v61 = vor.u32 %v5747_v49, %v5493_v20  ;;  %v5619_v15 = vld [vmem:[#allocation2 + $0x25c] sm:$0xf] }
 0x347   : > { %4179 = vmatpush.bf16.msrb.mxu1 %v5112_v48  ;;  %4155 = vmatpush.bf16.msra.mxu0 %v5492_v19  ;;  %v5627_v48 = vld [vmem:[#allocation2 + $0x29c] sm:$0xf]  ;;  %v3936_v31 = vpop.f32.mrf.mxu1  ;;  %v4984_v14 = vor.u32 %v5619_v15, %v4981_v32 }
 0x348   : > { %v5016_v16 = vor.u32 %v5627_v48, %v5013_v27  ;;  %v4917_v58 = vld [vmem:[#allocation2 + $0x1f8] sm:$0xf0] }
 0x349   : > { %4192 = vmatpush.bf16.msrb.mxu2 %v5400_v43  ;;  %v7798_v43 = vadd.f32 %v3936_v31, %v3923_v56  ;;  %4143 = vmatmul.bf16.vlgmr.msra.gmra.mxu3 %v6990_v13  ;;  %v5691_v5 = vld [vmem:[#allocation2 + $0x49c] sm:$0xf] }
 0x34a   : > { %4210 = vmatpush.bf16.msrb.mxu3 %v5528_v30  ;;  %v5743_v47 = vld [vmem:[#allocation2 + $0x634] sm:$0xf0]  ;;  %v5461_v52 = vld [vmem:[#allocation2 + $0x638] sm:$0xf0]  ;;  %v5272_v41 = vor.u32 %v5691_v5, %v5269_v35 }
 0x34b   : > { %4180 = vmatpush.bf16.msrb.mxu1 %v5080_v17  ;;  %v4247_v9 = vmul.f32 %v4223_v3, %v7798_v43  ;;  %v4949_v24 = vld [vmem:[#allocation2 + $0x238] sm:$0xf0] }
 0x34c   : > { %v5459_v57 = vld [vmem:[#allocation2 + $0x618] sm:$0xf]  ;;  %v5739_v18 = vld [vmem:[#allocation2 + $0x61c] sm:$0xf] }
 0x34d   : > { %4193 = vmatpush.bf16.msrb.mxu2 %v5368_v42  ;;  %v7803_v55 = vadd.f32 %v7751_v45, %v4247_v9  ;;  %v4283_v39 = vmul.f32 %v4247_v9, %v7798_v43  ;;  %v5460_v17 = vor.u32 %v5743_v47, %v5459_v57  ;;  %v5603_v42 = vld [vmem:[#allocation2 + $0x1dc] sm:$0xf]  ;;  %v5464_v59 = vor.u32 %v5739_v18, %v5461_v52  ;;  %v3978_v49 = vpop.f32.mrf.mxu2 }
 0x34e   : > { %4211 = vmatpush.bf16.msrb.mxu3 %v5496_v61  ;;  %v4920_v10 = vor.u32 %v5603_v42, %v4917_v58  ;;  %v5683_v3 = vld [vmem:[#allocation2 + $0x45c] sm:$0xf]  ;;  %v3992_v61 = vpop.f32.mrf.mxu0 }
 0x34f   : > { %4181 = vmatpush.bf16.msrb.mxu1 %v5048_v4  ;;  %v5237_v56 = vld [vmem:[#allocation2 + $0x478] sm:$0xf0]  ;;  %v7807_v37 = vadd.f32 %v7753_v2, %v4283_v39  ;;  %4156 = vmatpush.bf16.msra.mxu0 %v5460_v17 }
 0x350   : > { %v5611_v25 = vld [vmem:[#allocation2 + $0x21c] sm:$0xf]  ;;  %v5240_v44 = vor.u32 %v5683_v3, %v5237_v56 }
 0x351   : > { %4194 = vmatpush.bf16.msrb.mxu2 %v5336_v60  ;;  %v4885_v33 = vld [vmem:[#allocation2 + $0x1b8] sm:$0xf0]  ;;  %v4952_v45 = vor.u32 %v5611_v25, %v4949_v24 }
 0x352   : > { %4212 = vmatpush.bf16.msrb.mxu3 %v5464_v59  ;;  %v5595_v1 = vld [vmem:[#allocation2 + $0x19c] sm:$0xf]  ;;  %5535 = vmatmul.msk.bf16.vlgmr.msra.gmra.mxu0 %vm3767_vm12, %v7031_v11 }
 0x353   : > { %4182 = vmatpush.bf16.msrb.mxu1 %v5016_v16  ;;  %4163 = vmatpush.bf16.msrb.mxu0 %v4920_v10  ;;  %v4888_v54 = vor.u32 %v5595_v1, %v4885_v33  ;;  %v5675_v8 = vld [vmem:[#allocation2 + $0x41c] sm:$0xf] }
 0x354   : > { %v4853_v62 = vld [vmem:[#allocation2 + $0x178] sm:$0xf0] }
 0x355   : > { %4195 = vmatpush.bf16.msrb.mxu2 %v5304_v29  ;;  %v5205_v2 = vld [vmem:[#allocation2 + $0x438] sm:$0xf0]  ;;  %v3948_v60 = vpop.f32.mrf.mxu3 }
 0x356   : > { %v5208_v7 = vor.u32 %v5675_v8, %v5205_v2  ;;  %v5587_v23 = vld [vmem:[#allocation2 + $0x15c] sm:$0xf] }
 0x357   : > { %4183 = vmatpush.bf16.msrb.mxu1 %v4984_v14  ;;  %4164 = vmatpush.bf16.msrb.mxu0 %v4888_v54  ;;  %v4856_v36 = vor.u32 %v5587_v23, %v4853_v62  ;;  %v4821_v4 = vld [vmem:[#allocation2 + $0x138] sm:$0xf0] }
 0x358   : > { %v5579_v28 = vld [vmem:[#allocation2 + $0x11c] sm:$0xf] }
 0x359   : > { %4196 = vmatpush.bf16.msrb.mxu2 %v5272_v41  ;;  %v4824_v0 = vor.u32 %v5579_v28, %v4821_v4  ;;  %5536 = vmatmul.msk.bf16.vlgmr.msrb.gmra.mxu3 %vm3767_vm12, %v7031_v11  ;;  %v4789_v63 = vld [vmem:[#allocation2 + $0xf8] sm:$0xf0] }
 0x35a   : > { %v5571_v30 = vld [vmem:[#allocation2 + $0xdc] sm:$0xf] }
 0x35b   : > { %4184 = vmatpush.bf16.msrb.mxu1 %v4952_v45  ;;  %4165 = vmatpush.bf16.msrb.mxu0 %v4856_v36  ;;  %v4757_v12 = vld [vmem:[#allocation2 + $0xb8] sm:$0xf0] }
 0x35c   : > { %v3962_v19 = vpop.f32.mrf.mxu1  ;;  %v5563_v20 = vld [vmem:[#allocation2 + $0x9c] sm:$0xf] }
 0x35d   : > { %4197 = vmatpush.bf16.msrb.mxu2 %v5240_v44  ;;  %v3963_v27 = vadd.f32 %v3962_v19, %v3948_v60  ;;  %v3950_v16 = vpop.f32.mrf.mxu3  ;;  %v4760_v31 = vor.u32 %v5563_v20, %v4757_v12  ;;  %v4725_v11 = vld [vmem:[#allocation2 + $0x78] sm:$0xf0] }
 0x35e   : > { %4185 = vmatmul.bf16.vlgmr.msrb.gmra.mxu1 %v7123_v46  ;;  %v4792_v46 = vor.u32 %v5571_v30, %v4789_v63  ;;  %v5555_v35 = vld [vmem:[#allocation2 + $0x5c] sm:$0xf]  ;;  %v4224_v30 = vperm.slane %v7676_v53, 3 }
 0x35f   : > { %4166 = vmatpush.bf16.msrb.mxu0 %v4824_v0  ;;  %v3977_v40 = vadd.f32 %v3976_v6, %v3963_v27  ;;  %v4728_v15 = vor.u32 %v5555_v35, %v4725_v11  ;;  %v4693_v9 = vld [vmem:[#allocation2 + $0x38] sm:$0xf0]  ;;  %v4226_v11 = vperm.slane %v7676_v53, 5  ;;  %v4227_v35 = vperm.slane %v7676_v53, 6 }
 0x360   : > { %v5547_v47 = vld [vmem:[#allocation2 + $0x1c] sm:$0xf] }
 0x361   : > { %4198 = vmatpush.bf16.msrb.mxu2 %v5208_v7  ;;  %v7815_v48 = vadd.f32 %v3990_v22, %v3977_v40  ;;  %v4696_v52 = vor.u32 %v5547_v47, %v4693_v9  ;;  %v4225_v40 = vperm.slane %v7676_v53, 4 }
 0x363   : > { %4167 = vmatpush.bf16.msrb.mxu0 %v4792_v46 }
 0x364   : > { %4199 = vmatmul.bf16.vlgmr.msrb.gmra.mxu2 %v6990_v13  ;;  %v7819_v13 = vpack.c.bf16 %v7815_v48, %v7778_v26  ;;  %v3964_v29 = vpop.f32.mrf.mxu1 }
 0x365   : > { %v3965_v32 = vadd.f32 %v3964_v29, %v3950_v16 }
 0x367   : > { %4168 = vmatpush.bf16.msrb.mxu0 %v4760_v31  ;;  %v3979_v58 = vadd.f32 %v3978_v49, %v3965_v32  ;;  %v4240_v31 = vmul.f32 %v4224_v30, %v7815_v48 }
 0x369   : > { %v7821_v5 = vadd.f32 %v3992_v61, %v3979_v58 }
 0x36b   : > { %4169 = vmatpush.bf16.msrb.mxu0 %v4728_v15  ;;  %v7825_v14 = vpack.c.bf16 %v7821_v5, %v7798_v43  ;;  %v4276_v15 = vmul.f32 %v4240_v31, %v7815_v48  ;;  %v4228_v48 = vperm.slane %v7676_v53, 7 }
 0x36f   : > { %4170 = vmatpush.bf16.msrb.mxu0 %v4696_v52 }
 0x371   : > { %v4018_v41 = vpop.f32.mrf.mxu0 }
 0x372   : > { %4171 = vmatmul.bf16.vlgmr.msrb.gmra.mxu0 %v6960_v51 }
 0x375   : > { %v4004_v26 = vpop.f32.mrf.mxu3 }
 0x376   : > { %v4019_v10 = vadd.f32 %v4018_v41, %v4004_v26 }
 0x379   : > { %v4020_v17 = vpop.f32.mrf.mxu0 }
 0x37d   : > { %v4006_v39 = vpop.f32.mrf.mxu3 }
 0x37e   : > { %v4021_v1 = vadd.f32 %v4020_v17, %v4006_v39  ;;  %v4291_v17 = vadd.f32 %v7796_v21, %v4276_v15  ;;  %v5837_v15 = vmov 0  }
 0x37f   : > { %5796 = vset.pattern.permute.xlu2 %v5837_v15  ;;  %4569 = vst [vmem:[%s7854_s18] sm:$0xf] %v5837_v15  ;;  %5798 = vset.pattern.permute.xlu1 %v5837_v15 }
 0x380   : > { %4570 = vst [vmem:[%s7854_s18 + $0x28] sm:$0xf] %v5837_v15  ;;  %5797 = vset.pattern.permute.xlu0 %v5837_v15 }
 0x381   : > { %4571 = vst [vmem:[%s7854_s18 + $0x24] sm:$0xf] %v5837_v15 }
 0x382   : > { %4572 = vst [vmem:[%s7854_s18 + $0x4c] sm:$0xf] %v5837_v15 }
 0x387   : > { %v4046_v57 = vpop.f32.mrf.mxu2 }
 0x38f   : > { %v4032_v18 = vpop.f32.mrf.mxu1  ;;  %v4048_v42 = vpop.f32.mrf.mxu2 }
 0x390   : > { %v4033_v33 = vadd.f32 %v4032_v18, %v4019_v10 }
 0x391   : > { %v4088_v3 = vpop.f32.mrf.mxu0 }
 0x392   : > { %v4047_v44 = vadd.f32 %v4046_v57, %v4033_v33  ;;  %v4255_v57 = vadd.f32 %v7792_v50, %v4240_v31 }
 0x394   : > { %v4241_v49 = vmul.f32 %v4225_v40, %v4047_v44 }
 0x395   : > { %v4074_v24 = vpop.f32.mrf.mxu3 }
 0x396   : > { %v4277_v47 = vmul.f32 %v4241_v49, %v4047_v44  ;;  %v4256_v10 = vadd.f32 %v4255_v57, %v4241_v49 }
 0x397   : > { %v4034_v59 = vpop.f32.mrf.mxu1 }
 0x398   : > { %v4035_v7 = vadd.f32 %v4034_v59, %v4021_v1 }
 0x399   : > { %v4090_v2 = vpop.f32.mrf.mxu0 }
 0x39a   : > { %v4049_v60 = vadd.f32 %v4048_v42, %v4035_v7  ;;  %v4248_v42 = vmul.f32 %v4224_v30, %v7821_v5 }
 0x39c   : > { %v4284_v50 = vmul.f32 %v4248_v42, %v7821_v5 }
 0x39d   : > { %v4076_v51 = vpop.f32.mrf.mxu3 }
 0x39f   : > { %v4102_v25 = vpop.f32.mrf.mxu1 }
 0x3a7   : > { %v4060_v56 = vpop.f32.mrf.mxu2  ;;  %v4104_v36 = vpop.f32.mrf.mxu1 }
 0x3a8   : > { %v4075_v45 = vadd.f32 %v4074_v24, %v4060_v56  ;;  %v4292_v56 = vadd.f32 %v4291_v17, %v4277_v47 }
 0x3aa   : > { %v4089_v43 = vadd.f32 %v4088_v3, %v4075_v45 }
 0x3ac   : > { %v4103_v54 = vadd.f32 %v4102_v25, %v4089_v43  ;;  %v4249_v25 = vmul.f32 %v4225_v40, %v4049_v60 }
 0x3ae   : > { %v7828_v8 = vpack.c.bf16 %v4103_v54, %v4047_v44  ;;  %v4242_v58 = vmul.f32 %v4226_v11, %v4103_v54  ;;  %v4285_v7 = vmul.f32 %v4249_v25, %v4049_v60 }
 0x3af   : > { %v4062_v62 = vpop.f32.mrf.mxu2 }
 0x3b0   : > { %v4077_v23 = vadd.f32 %v4076_v51, %v4062_v62  ;;  %v4278_v59 = vmul.f32 %v4242_v58, %v4103_v54  ;;  %v4257_v45 = vadd.f32 %v4256_v10, %v4242_v58  ;;  %v4264_v54 = vadd.f32 %v7803_v55, %v4248_v42 }
 0x3b2   : > { %v4091_v4 = vadd.f32 %v4090_v2, %v4077_v23  ;;  %v4293_v1 = vadd.f32 %v4292_v56, %v4278_v59  ;;  %v4265_v5 = vadd.f32 %v4264_v54, %v4249_v25 }
 0x3b4   : > { %v4105_v28 = vadd.f32 %v4104_v36, %v4091_v4 }
 0x3b6   : > { %v7830_v0 = vpack.c.bf16 %v4105_v28, %v4049_v60  ;;  %v4250_v51 = vmul.f32 %v4226_v11, %v4105_v28 }
 0x3b8   : > { %v4286_v30 = vmul.f32 %v4250_v51, %v4105_v28  ;;  %v4266_v55 = vadd.f32 %v4265_v5, %v4250_v51  ;;  %v4367_v5 = vld [vmem:[%s266_s7] sm:$0xff] }
 0x3bb   : > { %v4116_v6 = vpop.f32.mrf.mxu1 }
 0x3c3   : > { %v4118_v46 = vpop.f32.mrf.mxu1 }
 0x3c7   : > { %v4130_v63 = vpop.f32.mrf.mxu2 }
 0x3c8   : > { %v4131_v27 = vadd.f32 %v4130_v63, %v4116_v6 }
 0x3cc   : > { %v4144_v22 = vpop.f32.mrf.mxu3 }
 0x3cd   : > { %v4145_v12 = vadd.f32 %v4144_v22, %v4131_v27  ;;  %v4300_v22 = vadd.f32 %v7807_v37, %v4284_v50  ;;  %v4335_v50 = vld [vmem:[%s8014_s2] sm:$0xff] }
 0x3cf   : > { %v4158_v19 = vpop.f32.mrf.mxu0  ;;  %v4132_v20 = vpop.f32.mrf.mxu2 }
 0x3d0   : > { %v4159_v32 = vadd.f32 %v4158_v19, %v4145_v12  ;;  %v4133_v61 = vadd.f32 %v4132_v20, %v4118_v46  ;;  %v4301_v20 = vadd.f32 %v4300_v22, %v4285_v7  ;;  %v4361_v7 = vld [vmem:[%s8015_s3] sm:$0xff]  ;;  %v4362_v22 = vld [vmem:[%s8015_s3 + $0x8] sm:$0xff] }
 0x3d2   : > { %v4243_v52 = vmul.f32 %v4227_v35, %v4159_v32  ;;  %v4302_v31 = vadd.f32 %v4301_v20, %v4286_v30  ;;  %v4385_v20 = vunpack.c.l.bf16 %v7739_v38 }
 0x3d4   : > { %v4146_v29 = vpop.f32.mrf.mxu3  ;;  %v4279_v33 = vmul.f32 %v4243_v52, %v4159_v32  ;;  %v4258_v2 = vadd.f32 %v4257_v45, %v4243_v52 }
 0x3d5   : > { %v4147_v18 = vadd.f32 %v4146_v29, %v4133_v61 }
 0x3d6   : > { %v4294_v53 = vadd.f32 %v4293_v1, %v4279_v33 }
 0x3d7   : > { %v4160_v16 = vpop.f32.mrf.mxu0 }
 0x3d8   : > { %v4161_v43 = vadd.f32 %v4160_v16, %v4147_v18 }
 0x3da   : > { %v4251_v4 = vmul.f32 %v4227_v35, %v4161_v43 }
 0x3db   : > { %v4186_v9 = vpop.f32.mrf.mxu1 }
 0x3dc   : > { %v4214_v24 = vpop.f32.mrf.mxu3  ;;  %v4287_v60 = vmul.f32 %v4251_v4, %v4161_v43  ;;  %v4267_v49 = vadd.f32 %v4266_v55, %v4251_v4  ;;  %v4336_v4 = vld [vmem:[%s8014_s2 + $0x8] sm:$0xff]  ;;  %v4386_v55 = vunpack.c.h.bf16 %v7739_v38 }
 0x3de   : > { %v4303_v35 = vadd.f32 %v4302_v31, %v4287_v60  ;;  %v4379_v60 = vunpack.c.l.bf16 %v7819_v13 }
 0x3e3   : > { %v4188_v23 = vpop.f32.mrf.mxu1 }
 0x3e4   : > { %v4216_v12 = vpop.f32.mrf.mxu3 }
 0x3e7   : > { %v4200_v26 = vpop.f32.mrf.mxu2 }
 0x3ef   : > { %v4172_v41 = vpop.f32.mrf.mxu0  ;;  %v4202_v27 = vpop.f32.mrf.mxu2 }
 0x3f0   : > { %v4187_v39 = vadd.f32 %v4186_v9, %v4172_v41 }
 0x3f2   : > { %v4201_v3 = vadd.f32 %v4200_v26, %v4187_v39 }
 0x3f4   : > { %v4215_v44 = vadd.f32 %v4214_v24, %v4201_v3 }
 0x3f6   : > { %v7843_v62 = vpack.c.bf16 %v4215_v44, %v4159_v32  ;;  %v4244_v21 = vmul.f32 %v4228_v48, %v4215_v44 }
 0x3f7   : > { %v4174_v36 = vpop.f32.mrf.mxu0 }
 0x3f8   : > { %v4189_v6 = vadd.f32 %v4188_v23, %v4174_v36  ;;  %v4259_v63 = vadd.f32 %v4258_v2, %v4244_v21  ;;  %v4280_v19 = vmul.f32 %v4244_v21, %v4215_v44  ;;  %v4384_v38 = vunpack.c.h.bf16 %v7843_v62 }
 0x3fa   : > { %v4203_v46 = vadd.f32 %v4202_v27, %v4189_v6  ;;  %4260 = vadd.xlane.f32.xlu2 %v4259_v63  ;;  %v4295_v40 = vadd.f32 %v4294_v53, %v4280_v19 }
 0x3fc   : > { %v4217_v16 = vadd.f32 %v4216_v12, %v4203_v46  ;;  %4296 = vadd.xlane.f32.xlu1 %v4295_v40  ;;  %v4368_v46 = vld [vmem:[%s266_s7 + $0x8] sm:$0xff]  ;;  %v4377_v40 = vunpack.c.l.bf16 %v7708_v34  ;;  %v4378_v12 = vunpack.c.h.bf16 %v7708_v34  ;;  %v4390_v34 = vunpack.c.h.bf16 %v7830_v0 }
 0x3fe   : > { %v7847_v11 = vpack.c.bf16 %v4217_v16, %v4161_v43  ;;  %v4252_v29 = vmul.f32 %v4228_v48, %v4217_v16 }
 0x400   : > { %v4268_v32 = vadd.f32 %v4267_v49, %v4252_v29  ;;  %v4288_v37 = vmul.f32 %v4252_v29, %v4217_v16  ;;  %v4380_v16 = vunpack.c.h.bf16 %v7819_v13  ;;  %v4387_v29 = vunpack.c.l.bf16 %v7825_v14 }
 0x401   : > { %v4388_v49 = vunpack.c.h.bf16 %v7825_v14  ;;  %v4392_v13 = vunpack.c.h.bf16 %v7847_v11  ;;  %v7895_v14 = vld [vmem:[%s8017_s5] sm:$0xff] }
 0x402   : > { %4269 = vadd.xlane.f32.xlu0 %v4268_v32  ;;  %v4304_v28 = vadd.f32 %v4303_v35, %v4288_v37  ;;  %v4381_v32 = vunpack.c.l.bf16 %v7828_v8  ;;  %v4382_v37 = vunpack.c.h.bf16 %v7828_v8  ;;  %v4389_v35 = vunpack.c.l.bf16 %v7830_v0 }
 0x404   : > { %4305 = vadd.xlane.f32.xlu2 %v4304_v28  ;;  %v4383_v28 = vunpack.c.l.bf16 %v7843_v62  ;;  %v4521_v62 = vperm.slane %v7895_v14, 0 }
 0x46d   : > { %v4261_v61 = vpop.xlane.xlu2 %4260 }
 0x46e   : > { %v4325_v58 = vmul.f32 0.001953125, %v4261_v61  ;;  %v4391_v61 = vunpack.c.l.bf16 %v7847_v11  ;;  %v4523_v11 = vperm.slane %v7895_v14, 2 }
 0x46f   : > { %v4297_v9 = vpop.xlane.xlu1 %4296 }
 0x470   : > { %v4329_v47 = vmul.f32 %v4325_v58, %v4325_v58  ;;  %v4327_v52 = vmul.f32 0.001953125, %v4297_v9 }
 0x472   : > { %v4331_v26 = vsub.f32 %v4327_v52, %v4329_v47 }
 0x474   : > { %v4333_v41 = vmax.f32 %v4331_v26, 0.0 }
 0x475   : > { %v4270_v57 = vpop.xlane.xlu0 %4269 }
 0x476   : > { %v4337_v18 = vadd.f32 1e-05, %v4333_v41  ;;  %v4326_v39 = vmul.f32 0.001953125, %v4270_v57  ;;  %v4522_v57 = vperm.slane %v7895_v14, 1 }
 0x477   : > { %v4306_v17 = vpop.xlane.xlu2 %4305 }
 0x478   : > { %5799 = vrsqrt.f32 %v4337_v18  ;;  %v4330_v42 = vmul.f32 %v4326_v39, %v4326_v39  ;;  %v4328_v59 = vmul.f32 0.001953125, %v4306_v17  ;;  %vm4345_vm13 = vweird.f32 %v4337_v18 }
 0x479   : > { %v4526_v17 = vperm.slane %v7895_v14, 5 }
 0x47a   : > { %v4332_v24 = vsub.f32 %v4328_v59, %v4330_v42  ;;  %v4527_v42 = vperm.slane %v7895_v14, 6  ;;  %v4528_v59 = vperm.slane %v7895_v14, 7 }
 0x47c   : > { %v4334_v10 = vmax.f32 %v4332_v24, 0.0 }
 0x47e   : > { %v5800_v3 = vpop.eup %5799  ;;  %v4338_v48 = vadd.f32 1e-05, %v4334_v10 }
 0x47f   : > { %v4340_v56 = vmul.f32 %v5800_v3, %v4337_v18  ;;  %vm4346_vm0 = vweird.f32 %v5800_v3  ;;  %v4524_v18 = vperm.slane %v7895_v14, 3 }
 0x480   : > { %5801 = vrsqrt.f32 %v4338_v48  ;;  %vm4347_vm14 = vmor %vm4345_vm13, %vm4346_vm0  ;;  %vm4355_vm1 = vweird.f32 %v4338_v48 }
 0x481   : > { %v4341_v25 = vmul.f32 %v5800_v3, %v4340_v56 }
 0x483   : > { %v4342_v33 = vmul.f32 0.5, %v4341_v25 }
 0x485   : > { %v4343_v45 = vsub.f32 1.5, %v4342_v33 }
 0x486   : > { %v5802_v43 = vpop.eup %5801 }
 0x487   : > { %v4350_v44 = vmul.f32 %v5802_v43, %v4338_v48  ;;  %v4344_v1 = vmul.f32 %v5800_v3, %v4343_v45  ;;  %vm4356_vm15 = vweird.f32 %v5802_v43 }
 0x488   : > { %vm4357_vm2 = vmor %vm4355_vm1, %vm4356_vm15 }
 0x489   : > { %v4351_v51 = vmul.f32 %v5802_v43, %v4350_v44  ;;  %v4348_v21 = vsel %vm4347_vm14, %v5800_v3, %v4344_v1 }
 0x48a   : > { %v4359_v2 = vmul.f32 %v4348_v21, %v4335_v50 }
 0x48b   : > { %v4352_v54 = vmul.f32 0.5, %v4351_v51 }
 0x48c   : > { %4395 = vperm.xlu2 %5796, %v4359_v2   ;;  %v4363_v23 = vmul.f32 %v4359_v2, %v4325_v58 }
 0x48d   : > { %v4353_v36 = vsub.f32 1.5, %v4352_v54 }
 0x48e   : > { %v4365_v53 = vsub.f32 %v4361_v7, %v4363_v23 }
 0x48f   : > { %v4354_v6 = vmul.f32 %v5802_v43, %v4353_v36 }
 0x490   : > { %4421 = vperm.xlu1 %5798, %v4365_v53  }
 0x491   : > { %v4358_v63 = vsel %vm4357_vm2, %v5802_v43, %v4354_v6 }
 0x492   : > { %v4360_v19 = vmul.f32 %v4358_v63, %v4336_v4 }
 0x494   : > { %4400 = vperm.xlu0 %5797, %v4360_v19   ;;  %v4364_v27 = vmul.f32 %v4360_v19, %v4326_v39  ;;  %v4525_v39 = vperm.slane %v7895_v14, 4 }
 0x496   : > { %v4366_v30 = vsub.f32 %v4362_v22, %v4364_v27 }
 0x498   : > { %4495 = vperm.xlu1 %5798, %v4367_v5   ;;  %4426 = vperm.xlu2 %5796, %v4366_v30  }
 0x4a0   : > { %4500 = vperm.xlu2 %5796, %v4368_v46  }
 0x4e6   : > { %v4396_v31 = vpop.permute.xlu2 %4395 }
 0x4e7   : > { %v4403_v15 = vmul.f32 %v4396_v31, %v4377_v40  ;;  %v4404_v58 = vmul.f32 %v4396_v31, %v4378_v12  ;;  %v4405_v8 = vmul.f32 %v4396_v31, %v4379_v60  ;;  %v4406_v9 = vmul.f32 %v4396_v31, %v4380_v16 }
 0x4e8   : > { %v4407_v47 = vmul.f32 %v4396_v31, %v4381_v32  ;;  %v4408_v52 = vmul.f32 %v4396_v31, %v4382_v37  ;;  %v4409_v0 = vmul.f32 %v4396_v31, %v4383_v28  ;;  %v4410_v26 = vmul.f32 %v4396_v31, %v4384_v38 }
 0x4f2   : > { %v4427_v21 = vpop.permute.xlu2 %4426 }
 0x502   : > { %v4422_v41 = vpop.permute.xlu1 %4421 }
 0x503   : > { %v7905_v24 = vadd.f32 %v4422_v41, %v4403_v15  ;;  %v7907_v10 = vadd.f32 %v4422_v41, %v4404_v58  ;;  %v7909_v3 = vadd.f32 %v4422_v41, %v4405_v8  ;;  %v7911_v48 = vadd.f32 %v4422_v41, %v4406_v9 }
 0x504   : > { %v7913_v56 = vadd.f32 %v4422_v41, %v4407_v47  ;;  %v7915_v25 = vadd.f32 %v4422_v41, %v4408_v52  ;;  %v7917_v33 = vadd.f32 %v4422_v41, %v4409_v0  ;;  %v7919_v45 = vadd.f32 %v4422_v41, %v4410_v26 }
 0x505   : > { %vm4445_vm3 = vcmp.ge.f32.partialorder %v7905_v24, 0.0  ;;  %vm4446_vm8 = vcmp.ge.f32.partialorder %v7907_v10, 0.0  ;;  %vm4447_vm9 = vcmp.ge.f32.partialorder %v7909_v3, 0.0  ;;  %vm4448_vm10 = vcmp.ge.f32.partialorder %v7911_v48, 0.0 }
 0x506   : > { %v4401_v43 = vpop.permute.xlu0 %4400  ;;  %vm4449_vm11 = vcmp.ge.f32.partialorder %v7913_v56, 0.0  ;;  %vm4450_vm15 = vcmp.ge.f32.partialorder %v7915_v25, 0.0  ;;  %vm4451_vm1 = vcmp.ge.f32.partialorder %v7917_v33, 0.0  ;;  %vm4452_vm2 = vcmp.ge.f32.partialorder %v7919_v45, 0.0 }
 0x507   : > { %v4411_v44 = vmul.f32 %v4401_v43, %v4385_v20  ;;  %v4412_v50 = vmul.f32 %v4401_v43, %v4386_v55  ;;  %v4413_v1 = vmul.f32 %v4401_v43, %v4387_v29  ;;  %v4414_v51 = vmul.f32 %v4401_v43, %v4388_v49  ;;  %v4501_v29 = vpop.permute.xlu2 %4500 }
 0x508   : > { %v4415_v2 = vmul.f32 %v4401_v43, %v4389_v35  ;;  %v4416_v54 = vmul.f32 %v4401_v43, %v4390_v34  ;;  %v4417_v7 = vmul.f32 %v4401_v43, %v4391_v61  ;;  %v4418_v23 = vmul.f32 %v4401_v43, %v4392_v13 }
 0x509   : > { %v4437_v36 = vadd.f32 %v4427_v21, %v4411_v44  ;;  %v4438_v53 = vadd.f32 %v4427_v21, %v4412_v50  ;;  %v4439_v4 = vadd.f32 %v4427_v21, %v4413_v1  ;;  %v4440_v6 = vadd.f32 %v4427_v21, %v4414_v51 }
 0x50a   : > { %v4441_v63 = vadd.f32 %v4427_v21, %v4415_v2  ;;  %v4442_v19 = vadd.f32 %v4427_v21, %v4416_v54  ;;  %v4443_v22 = vadd.f32 %v4427_v21, %v4417_v7  ;;  %v4444_v27 = vadd.f32 %v4427_v21, %v4418_v23  ;;  %v4496_v26 = vpop.permute.xlu1 %4495 }
 0x50b   : > { %vm4453_vm4 = vcmp.ge.f32.partialorder %v4437_v36, 0.0  ;;  %vm4454_vm5 = vcmp.ge.f32.partialorder %v4438_v53, 0.0  ;;  %vm4455_vm6 = vcmp.ge.f32.partialorder %v4439_v4, 0.0  ;;  %vm4456_vm7 = vcmp.ge.f32.partialorder %v4440_v6, 0.0 }
 0x50c   : > { %vm4457_vm12 = vcmp.ge.f32.partialorder %v4441_v63, 0.0  ;;  %vm4458_vm0 = vcmp.ge.f32.partialorder %v4442_v19, 0.0  ;;  %vm4459_vm13 = vcmp.ge.f32.partialorder %v4443_v22, 0.0  ;;  %vm4460_vm14 = vcmp.ge.f32.partialorder %v4444_v27, 0.0 }
 0x50d   : > { %v4469_v5 = vmul.f32 0.1, %v4437_v36  ;;  %v4470_v30 = vmul.f32 0.1, %v4438_v53  ;;  %v4471_v46 = vmul.f32 0.1, %v4439_v4 }
 0x50e   : > { %v4472_v40 = vmul.f32 0.1, %v4440_v6  ;;  %v4473_v12 = vmul.f32 0.1, %v4441_v63  ;;  %v4474_v20 = vmul.f32 0.1, %v4442_v19 }
 0x50f   : > { %v4475_v55 = vmul.f32 0.1, %v4443_v22  ;;  %v4476_v60 = vmul.f32 0.1, %v4444_v27  ;;  %v4485_v16 = vsel %vm4453_vm4, %v4437_v36, %v4469_v5  ;;  %v4486_v31 = vsel %vm4454_vm5, %v4438_v53, %v4470_v30 }
 0x510   : > { %v4487_v49 = vsel %vm4455_vm6, %v4439_v4, %v4471_v46  ;;  %v4488_v32 = vsel %vm4456_vm7, %v4440_v6, %v4472_v40  ;;  %v4489_v37 = vsel %vm4457_vm12, %v4441_v63, %v4473_v12  ;;  %v4490_v35 = vsel %vm4458_vm0, %v4442_v19, %v4474_v20 }
 0x511   : > { %v4491_v34 = vsel %vm4459_vm13, %v4443_v22, %v4475_v55  ;;  %v4492_v28 = vsel %vm4460_vm14, %v4444_v27, %v4476_v60  ;;  %v4511_v38 = vadd.f32 %v4501_v29, %v4485_v16  ;;  %v4512_v61 = vadd.f32 %v4501_v29, %v4486_v31 }
 0x512   : > { %v4513_v13 = vadd.f32 %v4501_v29, %v4487_v49  ;;  %v4514_v15 = vadd.f32 %v4501_v29, %v4488_v32  ;;  %v4515_v58 = vadd.f32 %v4501_v29, %v4489_v37  ;;  %v4516_v8 = vadd.f32 %v4501_v29, %v4490_v35 }
 0x513   : > { %v4517_v9 = vadd.f32 %v4501_v29, %v4491_v34  ;;  %v4518_v47 = vadd.f32 %v4501_v29, %v4492_v28  ;;  %v4461_v52 = vmul.f32 0.1, %v7905_v24  ;;  %v4462_v0 = vmul.f32 0.1, %v7907_v10 }
 0x514   : > { %v4463_v41 = vmul.f32 0.1, %v7909_v3  ;;  %v4464_v43 = vmul.f32 0.1, %v7911_v48  ;;  %v4465_v44 = vmul.f32 0.1, %v7913_v56  ;;  %v4545_v50 = vmul.f32 %v4521_v62, %v4511_v38 }
 0x515   : > { %v4466_v1 = vmul.f32 0.1, %v7915_v25  ;;  %v4467_v51 = vmul.f32 0.1, %v7917_v33  ;;  %v4468_v21 = vmul.f32 0.1, %v7919_v45  ;;  %v4477_v2 = vsel %vm4445_vm3, %v7905_v24, %v4461_v52 }
 0x516   : > { %v4478_v54 = vsel %vm4446_vm8, %v7907_v10, %v4462_v0  ;;  %v4479_v7 = vsel %vm4447_vm9, %v7909_v3, %v4463_v41  ;;  %v4480_v23 = vsel %vm4448_vm10, %v7911_v48, %v4464_v43  ;;  %v4481_v36 = vsel %vm4449_vm11, %v7913_v56, %v4465_v44 }
 0x517   : > { %v4482_v24 = vsel %vm4450_vm15, %v7915_v25, %v4466_v1  ;;  %v4483_v10 = vsel %vm4451_vm1, %v7917_v33, %v4467_v51  ;;  %v4484_v3 = vsel %vm4452_vm2, %v7919_v45, %v4468_v21  ;;  %v4503_v53 = vadd.f32 %v4496_v26, %v4477_v2 }
 0x518   : > { %v4504_v4 = vadd.f32 %v4496_v26, %v4478_v54  ;;  %v4505_v6 = vadd.f32 %v4496_v26, %v4479_v7  ;;  %v4506_v48 = vadd.f32 %v4496_v26, %v4480_v23  ;;  %v4507_v63 = vadd.f32 %v4496_v26, %v4481_v36 }
 0x519   : > { %v4508_v19 = vadd.f32 %v4496_v26, %v4482_v24  ;;  %v4509_v22 = vadd.f32 %v4496_v26, %v4483_v10  ;;  %v4510_v56 = vadd.f32 %v4496_v26, %v4484_v3  ;;  %v4537_v27 = vmul.f32 %v4521_v62, %v4503_v53 }
 0x51a   : > { %v4538_v25 = vmul.f32 %v4522_v57, %v4504_v4  ;;  %v4539_v33 = vmul.f32 %v4523_v11, %v4505_v6  ;;  %v4540_v45 = vmul.f32 %v4524_v18, %v4506_v48  ;;  %v4541_v5 = vmul.f32 %v4525_v39, %v4507_v63 }
 0x51b   : > { %v4542_v30 = vmul.f32 %v4526_v17, %v4508_v19  ;;  %v4543_v46 = vmul.f32 %v4527_v42, %v4509_v22  ;;  %v4544_v62 = vmul.f32 %v4528_v59, %v4510_v56  ;;  %v4546_v40 = vmul.f32 %v4522_v57, %v4512_v61 }
 0x51c   : > { %v4547_v12 = vmul.f32 %v4523_v11, %v4513_v13  ;;  %v4548_v20 = vmul.f32 %v4524_v18, %v4514_v15  ;;  %v4549_v55 = vmul.f32 %v4525_v39, %v4515_v58  ;;  %v4550_v60 = vmul.f32 %v4526_v17, %v4516_v8 }
 0x51d   : > { %v4553_v16 = vpack.c.bf16 %v4538_v25, %v4537_v27  ;;  %v4554_v31 = vpack.c.bf16 %v4540_v45, %v4539_v33  ;;  %v4551_v57 = vmul.f32 %v4527_v42, %v4517_v9  ;;  %v4552_v11 = vmul.f32 %v4528_v59, %v4518_v47 }
 0x51e   : > { %v4555_v18 = vpack.c.bf16 %v4542_v30, %v4541_v5  ;;  %v4556_v29 = vpack.c.bf16 %v4544_v62, %v4543_v46  ;;  %v4557_v49 = vpack.c.bf16 %v4546_v40, %v4545_v50  ;;  %v4558_v39 = vpack.c.bf16 %v4548_v20, %v4547_v12 }
 0x51f   : > { %4561 = vst [vmem:[%s7854_s18 + $0x4] sm:$0xff] %v4553_v16  ;;  %v4559_v32 = vpack.c.bf16 %v4550_v60, %v4549_v55  ;;  %v4560_v17 = vpack.c.bf16 %v4552_v11, %v4551_v57 }
 0x520   : > { %4562 = vst [vmem:[%s7854_s18 + $0xc] sm:$0xff] %v4554_v31 }
 0x521   : > { %4563 = vst [vmem:[%s7854_s18 + $0x14] sm:$0xff] %v4555_v18 }
 0x522   : > { %4564 = vst [vmem:[%s7854_s18 + $0x1c] sm:$0xff] %v4556_v29 }
 0x523   : > { %4565 = vst [vmem:[%s7854_s18 + $0x2c] sm:$0xff] %v4557_v49 }
 0x524   : > { %4566 = vst [vmem:[%s7854_s18 + $0x34] sm:$0xff] %v4558_v39 }
 0x525   : > { %4567 = vst [vmem:[%s7854_s18 + $0x3c] sm:$0xff] %v4559_v32 }
 0x526   : > { %4568 = vst [vmem:[%s7854_s18 + $0x44] sm:$0xff] %v4560_v17 }
 0x527 PF: > { %s16_s21 = sadd.s32 1, %s5809_s21  }
 0x528   : > { %p13_p4 = scmp.ge.s32.totalorder %s16_s21, 4  }
 0x52a   :  { %15 = sbr.rel (!%p13_p4) target bundleno = 1 (0x1), region = 77 }

// kernel: upcat_forward.3
= control target key start
LH: loop header
LB: loop body
LE: loop exit
PB: predicated region body
PF: predicated region fallthrough
CT: control target
= control target key end

     0   :  { %s5868_s21 = smov 0   ;;  %s8012_s0 = inlined_call_operand.vmem [shape: bf16[2,16,1280], index: 0, kind: input, shape index: {}]   ;;  %s8013_s1 = inlined_call_operand.vmem [shape: bf16[16,432], index: 1, kind: input, shape index: {}]   ;;  %s8014_s2 = inlined_call_operand.vmem [shape: f32[16,1], index: 2, kind: input, shape index: {}]   ;;  %s8015_s3 = inlined_call_operand.vmem [shape: f32[16,1], index: 3, kind: input, shape index: {}]   ;;  %s8016_s4 = inlined_call_operand.vmem [shape: f32[2,16,1], index: 4, kind: input, shape index: {}]   ;;  %s8017_s5 = inlined_call_operand.vmem [shape: f32[1,1024], index: 5, kind: input, shape index: {}]   ;;  %s8018_s6 = inlined_call_operand.vmem [shape: f32[2,16,1280], index: 6, kind: output, shape index: {}]  }
   0x1 LB: > { %s4632_s22 = sadd.s32 4294967295, %s5803_s21   ;;  %p4636_p0 = scmp.ge.s32.totalorder %s5803_s21, 1  ;;  %s5803_s21 = sphi %s5868_s21, %s16_s21  }
   0x2   : > { %p222_p1 = scmp.lt.s32.totalorder %s5803_s21, 3 }
   0x4   : > { %p223_p2 = pnand %p4636_p0, %p222_p1 }
   0x5   : > { %p257_p3 = scmp.lt.s32.totalorder (!%p223_p2), %s4632_s22, 1  ;;  %s5805_s27 = smov (!%p223_p2), 111  }
   0x6   : > { %226 = sbr.rel (%p223_p2) target bundleno = 1323 (0x52b), region = 44  ;;  %s5806_s28 = smov (!%p223_p2), 110  }
   0x7   : > { %s5807_s29 = smov (!%p223_p2), 109   ;;  %s5808_s30 = smov (!%p223_p2), 101  }
   0x8   : > { %s5809_s7 = smov (!%p223_p2), 100   ;;  %s5810_s8 = smov (!%p223_p2), 99  }
   0x9   : > { %s5811_s9 = smov (!%p223_p2), 91   ;;  %s5812_s10 = smov (!%p223_p2), 90  }
   0xa   : > { %s5813_s11 = smov (!%p223_p2), 89   ;;  %s5814_s12 = smov (!%p223_p2), 11  }
   0xb   : > { %s8096_s22 = smov (!%p257_p3, %s4632_s22), 1  ;;  %vm323_vm0 = vcmask 1043456   ;;  %vm325_vm1 = vcmask 908288   ;;  %vm408_vm2 = vcmask 900096   ;;  %vm491_vm3 = vcmask 891904   ;;  %s5815_s13 = smov 10  }
   0xc   : > { %s5752_s23 = smul.u32 80, %s8096_s22  ;;  %vm574_vm4 = vcmask 826368   ;;  %vm657_vm5 = vcmask 818176   ;;  %vm740_vm6 = vcmask 809984   ;;  %vm823_vm7 = vcmask 744448   ;;  %s5816_s14 = smov 9  }
   0xd   : > { %vm906_vm8 = vcmask 736256   ;;  %s5817_s15 = smov 1   ;;  %vm989_vm9 = vcmask 728064   ;;  %s5818_s16 = smov 27   ;;  %vm1072_vm10 = vcmask 89088   ;;  %vm1155_vm11 = vcmask 80896  }
   0xe   : > { %s5882_s26 = scalar_lea.vmem %s8012_s0, %s5752_s23  ;;  %s5819_s17 = smov 119   ;;  %vm1238_vm12 = vcmask 72704   ;;  %vm1321_vm13 = vcmask 7168   ;;  %vm2167_vm14 = vcmask 220160   ;;  %vm1503_vm15 = vcmask 973824  }
   0xf   : > { %v277_v0 = vld [vmem:[%s5882_s26 + $0x20] sm:$0xf]  ;;  %v5886_v1 = vld [vmem:[%s5882_s26 + $0x10] sm:$0xff]  ;;  %v5894_v3 = vld [vmem:[%s5882_s26 + $0x28] sm:$0xff]  ;;  %s5820_s18 = smov 28   ;;  %s5821_s19 = smov 127  }
  0x10   : > { %v5889_v2 = vld [vmem:[%s5882_s26] sm:$0xff]  ;;  %301 = vrot.lane.b32.xlu2 %v277_v0, %s5805_s27  ;;  %297 = vrot.lane.b32.xlu1 %v5886_v1, %s5805_s27  ;;  %v5897_v4 = vld [vmem:[%s5882_s26 + $0x18] sm:$0xff]  ;;  %s5822_s20 = smov 29   ;;  %s5823_s23 = smov 37  }
  0x11   : > { %293 = vrot.lane.b32.xlu0 %v5889_v2, %s5805_s27  ;;  %v5900_v5 = vld [vmem:[%s5882_s26 + $0x8] sm:$0xff]  ;;  %v5906_v6 = vld [vmem:[%s5882_s26 + $0x40] sm:$0xff]  ;;  %v5909_v7 = vld [vmem:[%s5882_s26 + $0x38] sm:$0xff]  ;;  %s5824_s24 = smov 38   ;;  %s5825_s25 = smov 39  }
  0x12   : > { %v5912_v8 = vld [vmem:[%s5882_s26 + $0x30] sm:$0xff]  ;;  %v282_v9 = vld [vmem:[%s5882_s26 + $0x48] sm:$0xf]  ;;  %v361_v10 = vld [vmem:[%s5882_s26 + $0x20] sm:$0xf] }
  0x13   : > { %v366_v11 = vld [vmem:[%s5882_s26 + $0x48] sm:$0xf]  ;;  %v444_v12 = vld [vmem:[%s5882_s26 + $0x20] sm:$0xf] }
  0x14   : > { %v449_v13 = vld [vmem:[%s5882_s26 + $0x48] sm:$0xf]  ;;  %v527_v14 = vld [vmem:[%s5882_s26 + $0x20] sm:$0xf] }
  0x15   : > { %v532_v17 = vld [vmem:[%s5882_s26 + $0x48] sm:$0xf]  ;;  %v610_v19 = vld [vmem:[%s5882_s26 + $0x20] sm:$0xf] }
  0x16   : > { %v615_v33 = vld [vmem:[%s5882_s26 + $0x48] sm:$0xf]  ;;  %v693_v62 = vld [vmem:[%s5882_s26 + $0x20] sm:$0xf] }
  0x18   : > { %303 = vrot.lane.b32.xlu2 %v5894_v3, %s5805_s27  ;;  %299 = vrot.lane.b32.xlu1 %v5897_v4, %s5805_s27 }
  0x19   : > { %295 = vrot.lane.b32.xlu0 %v5900_v5, %s5805_s27 }
  0x20   : > { %309 = vrot.lane.b32.xlu2 %v5906_v6, %s5805_s27  ;;  %307 = vrot.lane.b32.xlu1 %v5909_v7, %s5805_s27 }
  0x21   : > { %305 = vrot.lane.b32.xlu0 %v5912_v8, %s5805_s27 }
  0x28   : > { %379 = vrot.lane.b32.xlu2 %v5900_v5, %s5806_s28  ;;  %377 = vrot.lane.b32.xlu1 %v5889_v2, %s5806_s28 }
  0x29   : > { %311 = vrot.lane.b32.xlu0 %v282_v9, %s5805_s27  ;;  %s5826_s27 = smov 17  }
  0x30   : > { %385 = vrot.lane.b32.xlu2 %v361_v10, %s5806_s28  ;;  %383 = vrot.lane.b32.xlu1 %v5897_v4, %s5806_s28 }
  0x31   : > { %381 = vrot.lane.b32.xlu0 %v5886_v1, %s5806_s28 }
  0x38   : > { %391 = vrot.lane.b32.xlu2 %v5909_v7, %s5806_s28  ;;  %389 = vrot.lane.b32.xlu1 %v5912_v8, %s5806_s28 }
  0x39   : > { %387 = vrot.lane.b32.xlu0 %v5894_v3, %s5806_s28 }
  0x40   : > { %460 = vrot.lane.b32.xlu2 %v5889_v2, %s5807_s29  ;;  %395 = vrot.lane.b32.xlu1 %v366_v11, %s5806_s28 }
  0x41   : > { %393 = vrot.lane.b32.xlu0 %v5906_v6, %s5806_s28  ;;  %s5827_s28 = smov 117  }
  0x48   : > { %466 = vrot.lane.b32.xlu2 %v5897_v4, %s5807_s29  ;;  %464 = vrot.lane.b32.xlu1 %v5886_v1, %s5807_s29 }
  0x49   : > { %462 = vrot.lane.b32.xlu0 %v5900_v5, %s5807_s29 }
  0x50   : > { %472 = vrot.lane.b32.xlu2 %v5912_v8, %s5807_s29  ;;  %470 = vrot.lane.b32.xlu1 %v5894_v3, %s5807_s29 }
  0x51   : > { %468 = vrot.lane.b32.xlu0 %v444_v12, %s5807_s29 }
  0x58   : > { %478 = vrot.lane.b32.xlu2 %v449_v13, %s5807_s29  ;;  %476 = vrot.lane.b32.xlu1 %v5906_v6, %s5807_s29 }
  0x59   : > { %474 = vrot.lane.b32.xlu0 %v5909_v7, %s5807_s29  ;;  %s5828_s29 = smov 18  }
  0x60   : > { %547 = vrot.lane.b32.xlu2 %v5886_v1, %s5808_s30  ;;  %545 = vrot.lane.b32.xlu1 %v5900_v5, %s5808_s30 }
  0x61   : > { %543 = vrot.lane.b32.xlu0 %v5889_v2, %s5808_s30 }
  0x68   : > { %553 = vrot.lane.b32.xlu2 %v5894_v3, %s5808_s30  ;;  %551 = vrot.lane.b32.xlu1 %v527_v14, %s5808_s30 }
  0x69   : > { %549 = vrot.lane.b32.xlu0 %v5897_v4, %s5808_s30 }
  0x6a   : > { %v302_v15 = vpop.permute.xlu2 %301 }
  0x6b   : > { %v317_v23 = vrot.slane %v302_v15, 4  ;;  %v698_v15 = vld [vmem:[%s5882_s26 + $0x48] sm:$0xf] }
  0x70   : > { %559 = vrot.lane.b32.xlu2 %v5906_v6, %s5808_s30  ;;  %557 = vrot.lane.b32.xlu1 %v5909_v7, %s5808_s30 }
  0x71   : > { %555 = vrot.lane.b32.xlu0 %v5912_v8, %s5808_s30 }
  0x72   : > { %v304_v16 = vpop.permute.xlu2 %303 }
  0x73   : > { %v318_v41 = vrot.slane %v304_v16, 4 }
  0x78   : > { %628 = vrot.lane.b32.xlu2 %v5900_v5, %s5809_s7  ;;  %626 = vrot.lane.b32.xlu1 %v5889_v2, %s5809_s7 }
  0x79   : > { %561 = vrot.lane.b32.xlu0 %v532_v17, %s5808_s30  ;;  %s5829_s30 = smov 118  }
  0x7a   : > { %v5952_v18 = vpop.permute.xlu2 %309 }
  0x7b   : > { %v321_v40 = vrot.slane %v5952_v18, 4 }
  0x80   : > { %634 = vrot.lane.b32.xlu2 %v610_v19, %s5809_s7  ;;  %632 = vrot.lane.b32.xlu1 %v5897_v4, %s5809_s7 }
  0x81   : > { %630 = vrot.lane.b32.xlu0 %v5886_v1, %s5809_s7 }
  0x82   : > { %v5960_v20 = vpop.permute.xlu2 %379  ;;  %v298_v21 = vpop.permute.xlu1 %297 }
  0x83   : > { %v294_v22 = vpop.permute.xlu0 %293  ;;  %v315_v26 = vrot.slane %v298_v21, 4  ;;  %v398_v53 = vrot.slane %v5960_v20, 4 }
  0x84   : > { %v313_v29 = vrot.slane %v294_v22, 4 }
  0x88   : > { %640 = vrot.lane.b32.xlu2 %v5909_v7, %s5809_s7  ;;  %638 = vrot.lane.b32.xlu1 %v5912_v8, %s5809_s7 }
  0x89   : > { %636 = vrot.lane.b32.xlu0 %v5894_v3, %s5809_s7 }
  0x8a   : > { %v5968_v24 = vpop.permute.xlu2 %385  ;;  %v300_v25 = vpop.permute.xlu1 %299 }
  0x8b   : > { %v316_v27 = vrot.slane %v300_v25, 4  ;;  %v296_v28 = vpop.permute.xlu0 %295  ;;  %v401_v0 = vrot.slane %v5968_v24, 4 }
  0x8c   : > { %v314_v30 = vrot.slane %v296_v28, 4 }
  0x8d   : > { %v329_v31 = vsel %vm323_vm0, %v315_v26, %v316_v27  ;;  %v331_v32 = vsel %vm323_vm0, %v316_v27, %v317_v23 }
  0x8e   : > { %v330_v34 = vsel %vm325_vm1, %v298_v21, %v329_v31  ;;  %v332_v35 = vsel %vm325_vm1, %v300_v25, %v331_v32  ;;  %v324_v36 = vsel %vm323_vm0, %v313_v29, %v314_v30  ;;  %v327_v37 = vsel %vm323_vm0, %v314_v30, %v315_v26 }
  0x8f   : > { %351 = vst [vmem:[#allocation2 + $0x10] sm:$0xff] %v330_v34  ;;  %v326_v38 = vsel %vm325_vm1, %v294_v22, %v324_v36  ;;  %v328_v39 = vsel %vm325_vm1, %v296_v28, %v327_v37  ;;  %v776_v36 = vld [vmem:[%s5882_s26 + $0x20] sm:$0xf] }
  0x90   : > { %352 = vst [vmem:[#allocation2 + $0x18] sm:$0xff] %v332_v35  ;;  %709 = vrot.lane.b32.xlu2 %v5889_v2, %s5810_s8  ;;  %644 = vrot.lane.b32.xlu1 %v615_v33, %s5809_s7 }
  0x91   : > { %349 = vst [vmem:[#allocation2] sm:$0xff] %v326_v38  ;;  %642 = vrot.lane.b32.xlu0 %v5906_v6, %s5809_s7  ;;  %s5830_s7 = smov 19  }
  0x92   : > { %350 = vst [vmem:[#allocation2 + $0x8] sm:$0xff] %v328_v39  ;;  %v5985_v42 = vpop.permute.xlu2 %391  ;;  %v308_v43 = vpop.permute.xlu1 %307 }
  0x93   : > { %v320_v44 = vrot.slane %v308_v43, 4  ;;  %v306_v45 = vpop.permute.xlu0 %305  ;;  %v404_v22 = vrot.slane %v5985_v42, 4 }
  0x94   : > { %v319_v46 = vrot.slane %v306_v45, 4 }
  0x95   : > { %v337_v47 = vsel %vm323_vm0, %v320_v44, %v321_v40 }
  0x96   : > { %v338_v48 = vsel %vm325_vm1, %v308_v43, %v337_v47  ;;  %v333_v49 = vsel %vm323_vm0, %v318_v41, %v319_v46  ;;  %v335_v50 = vsel %vm323_vm0, %v319_v46, %v320_v44 }
  0x97   : > { %355 = vst [vmem:[#allocation2 + $0x30] sm:$0xff] %v338_v48  ;;  %v334_v51 = vsel %vm325_vm1, %v304_v16, %v333_v49  ;;  %v336_v52 = vsel %vm325_vm1, %v306_v45, %v335_v50 }
  0x98   : > { %353 = vst [vmem:[#allocation2 + $0x20] sm:$0xff] %v334_v51  ;;  %715 = vrot.lane.b32.xlu2 %v5897_v4, %s5810_s8  ;;  %713 = vrot.lane.b32.xlu1 %v5886_v1, %s5810_s8 }
  0x99   : > { %354 = vst [vmem:[#allocation2 + $0x28] sm:$0xff] %v336_v52  ;;  %711 = vrot.lane.b32.xlu0 %v5900_v5, %s5810_s8 }
  0x9a   : > { %v6000_v54 = vpop.permute.xlu2 %460  ;;  %v378_v55 = vpop.permute.xlu1 %377 }
  0x9b   : > { %v397_v56 = vrot.slane %v378_v55, 4  ;;  %v312_v57 = vpop.permute.xlu0 %311  ;;  %v480_v43 = vrot.slane %v6000_v54, 4 }
  0x9c   : > { %v322_v58 = vrot.slane %v312_v57, 4 }
  0x9d   : > { %v407_v59 = vsel %vm323_vm0, %v397_v56, %v398_v53 }
  0x9e   : > { %v409_v60 = vsel %vm408_vm2, %v378_v55, %v407_v59  ;;  %v339_v61 = vsel %vm323_vm0, %v321_v40, %v322_v58 }
  0x9f   : > { %432 = vst [vmem:[#allocation2 + $0x40] sm:$0xff] %v409_v60  ;;  %v340_v63 = vsel %vm325_vm1, %v5952_v18, %v339_v61  ;;  %vm2084_vm1 = vcmask 228352  }
  0xa0   : > { %356 = vst [vmem:[#allocation2 + $0x38] sm:$0xff] %v340_v63  ;;  %721 = vrot.lane.b32.xlu2 %v5912_v8, %s5810_s8  ;;  %719 = vrot.lane.b32.xlu1 %v5894_v3, %s5810_s8  ;;  %v781_v63 = vld [vmem:[%s5882_s26 + $0x48] sm:$0xf] }
  0xa1   : > { %717 = vrot.lane.b32.xlu0 %v693_v62, %s5810_s8 }
  0xa2   : > { %v6014_v9 = vpop.permute.xlu2 %466  ;;  %v384_v10 = vpop.permute.xlu1 %383 }
  0xa3   : > { %v400_v11 = vrot.slane %v384_v10, 4  ;;  %v382_v12 = vpop.permute.xlu0 %381  ;;  %v483_v41 = vrot.slane %v6014_v9, 4 }
  0xa4   : > { %v399_v13 = vrot.slane %v382_v12, 4 }
  0xa5   : > { %v414_v14 = vsel %vm323_vm0, %v400_v11, %v401_v0 }
  0xa6   : > { %v415_v16 = vsel %vm408_vm2, %v384_v10, %v414_v14  ;;  %v410_v17 = vsel %vm323_vm0, %v398_v53, %v399_v13  ;;  %v412_v18 = vsel %vm323_vm0, %v399_v13, %v400_v11 }
  0xa7   : > { %435 = vst [vmem:[#allocation2 + $0x58] sm:$0xff] %v415_v16  ;;  %v411_v19 = vsel %vm408_vm2, %v5960_v20, %v410_v17  ;;  %v413_v21 = vsel %vm408_vm2, %v382_v12, %v412_v18 }
  0xa8   : > { %433 = vst [vmem:[#allocation2 + $0x48] sm:$0xff] %v411_v19  ;;  %727 = vrot.lane.b32.xlu2 %v698_v15, %s5810_s8  ;;  %725 = vrot.lane.b32.xlu1 %v5906_v6, %s5810_s8 }
  0xa9   : > { %434 = vst [vmem:[#allocation2 + $0x50] sm:$0xff] %v413_v21  ;;  %723 = vrot.lane.b32.xlu0 %v5909_v7, %s5810_s8 }
  0xaa   : > { %v6030_v23 = vpop.permute.xlu2 %472  ;;  %v390_v24 = vpop.permute.xlu1 %389 }
  0xab   : > { %v403_v25 = vrot.slane %v390_v24, 4  ;;  %v388_v26 = vpop.permute.xlu0 %387  ;;  %v486_v55 = vrot.slane %v6030_v23, 4 }
  0xac   : > { %v402_v20 = vrot.slane %v388_v26, 4 }
  0xad   : > { %v418_v27 = vsel %vm323_vm0, %v403_v25, %v404_v22 }
  0xae   : > { %v419_v28 = vsel %vm408_vm2, %v390_v24, %v418_v27  ;;  %v416_v29 = vsel %vm323_vm0, %v402_v20, %v403_v25 }
  0xaf   : > { %437 = vst [vmem:[#allocation2 + $0x68] sm:$0xff] %v419_v28  ;;  %v417_v30 = vsel %vm408_vm2, %v388_v26, %v416_v29 }
  0xb0   : > { %436 = vst [vmem:[#allocation2 + $0x60] sm:$0xff] %v417_v30  ;;  %796 = vrot.lane.b32.xlu2 %v5886_v1, %s5811_s9  ;;  %794 = vrot.lane.b32.xlu1 %v5900_v5, %s5811_s9 }
  0xb1   : > { %792 = vrot.lane.b32.xlu0 %v5889_v2, %s5811_s9 }
  0xb2   : > { %v479_v31 = vpop.permute.xlu2 %478  ;;  %v396_v32 = vpop.permute.xlu1 %395 }
  0xb3   : > { %v406_v33 = vrot.slane %v396_v32, 4  ;;  %v394_v34 = vpop.permute.xlu0 %393  ;;  %v489_v10 = vrot.slane %v479_v31, 4 }
  0xb4   : > { %v405_v35 = vrot.slane %v394_v34, 4 }
  0xb6   : > { %v420_v37 = vsel %vm323_vm0, %v404_v22, %v405_v35  ;;  %v422_v38 = vsel %vm323_vm0, %v405_v35, %v406_v33 }
  0xb7   : > { %v421_v39 = vsel %vm408_vm2, %v5985_v42, %v420_v37  ;;  %v423_v40 = vsel %vm408_vm2, %v394_v34, %v422_v38  ;;  %v864_v37 = vld [vmem:[%s5882_s26 + $0x48] sm:$0xf]  ;;  %vm1420_vm2 = vcmask 1039360  }
  0xb8   : > { %438 = vst [vmem:[#allocation2 + $0x70] sm:$0xff] %v421_v39  ;;  %802 = vrot.lane.b32.xlu2 %v5894_v3, %s5811_s9  ;;  %800 = vrot.lane.b32.xlu1 %v776_v36, %s5811_s9 }
  0xb9   : > { %439 = vst [vmem:[#allocation2 + $0x78] sm:$0xff] %v423_v40  ;;  %798 = vrot.lane.b32.xlu0 %v5897_v4, %s5811_s9 }
  0xba   : > { %v6055_v44 = vpop.permute.xlu2 %547  ;;  %v465_v45 = vpop.permute.xlu1 %464 }
  0xbb   : > { %v482_v42 = vrot.slane %v465_v45, 4  ;;  %v463_v46 = vpop.permute.xlu0 %462  ;;  %v565_v24 = vrot.slane %v6055_v44, 4 }
  0xbc   : > { %v481_v47 = vrot.slane %v463_v46, 4 }
  0xbd   : > { %v495_v48 = vsel %vm323_vm0, %v482_v42, %v483_v41 }
  0xbe   : > { %v496_v49 = vsel %vm491_vm3, %v465_v45, %v495_v48  ;;  %v490_v50 = vsel %vm323_vm0, %v480_v43, %v481_v47  ;;  %v493_v51 = vsel %vm323_vm0, %v481_v47, %v482_v42 }
  0xbf   : > { %517 = vst [vmem:[#allocation2 + $0x90] sm:$0xff] %v496_v49  ;;  %v492_v52 = vsel %vm491_vm3, %v6000_v54, %v490_v50  ;;  %v494_v53 = vsel %vm491_vm3, %v463_v46, %v493_v51 }
  0xc0   : > { %515 = vst [vmem:[#allocation2 + $0x80] sm:$0xff] %v492_v52  ;;  %808 = vrot.lane.b32.xlu2 %v5906_v6, %s5811_s9  ;;  %806 = vrot.lane.b32.xlu1 %v5909_v7, %s5811_s9 }
  0xc1   : > { %516 = vst [vmem:[#allocation2 + $0x88] sm:$0xff] %v494_v53  ;;  %804 = vrot.lane.b32.xlu0 %v5912_v8, %s5811_s9 }
  0xc2   : > { %v6071_v56 = vpop.permute.xlu2 %553  ;;  %v471_v57 = vpop.permute.xlu1 %470 }
  0xc3   : > { %v485_v54 = vrot.slane %v471_v57, 4  ;;  %v469_v58 = vpop.permute.xlu0 %468  ;;  %v568_v45 = vrot.slane %v6071_v56, 4 }
  0xc4   : > { %v484_v59 = vrot.slane %v469_v58, 4 }
  0xc5   : > { %v499_v60 = vsel %vm323_vm0, %v485_v54, %v486_v55 }
  0xc6   : > { %v500_v61 = vsel %vm491_vm3, %v471_v57, %v499_v60  ;;  %v497_v62 = vsel %vm323_vm0, %v483_v41, %v484_v59 }
  0xc7   : > { %519 = vst [vmem:[#allocation2 + $0xa0] sm:$0xff] %v500_v61  ;;  %v498_v0 = vsel %vm491_vm3, %v6014_v9, %v497_v62  ;;  %v859_v9 = vld [vmem:[%s5882_s26 + $0x20] sm:$0xf] }
  0xc8   : > { %518 = vst [vmem:[#allocation2 + $0x98] sm:$0xff] %v498_v0  ;;  %877 = vrot.lane.b32.xlu2 %v5900_v5, %s5812_s10  ;;  %875 = vrot.lane.b32.xlu1 %v5889_v2, %s5812_s10  ;;  %v942_v0 = vld [vmem:[%s5882_s26 + $0x20] sm:$0xf] }
  0xc9   : > { %810 = vrot.lane.b32.xlu0 %v781_v63, %s5811_s9 }
  0xca   : > { %v6084_v11 = vpop.permute.xlu2 %559  ;;  %v477_v12 = vpop.permute.xlu1 %476 }
  0xcb   : > { %v488_v13 = vrot.slane %v477_v12, 4  ;;  %v475_v14 = vpop.permute.xlu0 %474  ;;  %v571_v43 = vrot.slane %v6084_v11, 4 }
  0xcc   : > { %v487_v15 = vrot.slane %v475_v14, 4 }
  0xcd   : > { %v505_v16 = vsel %vm323_vm0, %v488_v13, %v489_v10 }
  0xce   : > { %v506_v17 = vsel %vm491_vm3, %v477_v12, %v505_v16  ;;  %v501_v18 = vsel %vm323_vm0, %v486_v55, %v487_v15  ;;  %v503_v19 = vsel %vm323_vm0, %v487_v15, %v488_v13 }
  0xcf   : > { %522 = vst [vmem:[#allocation2 + $0xb8] sm:$0xff] %v506_v17  ;;  %v502_v21 = vsel %vm491_vm3, %v6030_v23, %v501_v18  ;;  %v504_v22 = vsel %vm491_vm3, %v475_v14, %v503_v19  ;;  %v947_v18 = vld [vmem:[%s5882_s26 + $0x48] sm:$0xf]  ;;  %vm2001_vm3 = vcmask 236544  }
  0xd0   : > { %520 = vst [vmem:[#allocation2 + $0xa8] sm:$0xff] %v502_v21  ;;  %883 = vrot.lane.b32.xlu2 %v859_v9, %s5812_s10  ;;  %881 = vrot.lane.b32.xlu1 %v5897_v4, %s5812_s10 }
  0xd1   : > { %521 = vst [vmem:[#allocation2 + $0xb0] sm:$0xff] %v504_v22  ;;  %879 = vrot.lane.b32.xlu0 %v5886_v1, %s5812_s10 }
  0xd2   : > { %v6100_v25 = vpop.permute.xlu2 %628  ;;  %v546_v26 = vpop.permute.xlu1 %545 }
  0xd3   : > { %v564_v20 = vrot.slane %v546_v26, 4  ;;  %v544_v23 = vpop.permute.xlu0 %543  ;;  %v647_v57 = vrot.slane %v6100_v25, 4 }
  0xd4   : > { %v563_v27 = vrot.slane %v544_v23, 4 }
  0xd5   : > { %v576_v28 = vsel %vm323_vm0, %v564_v20, %v565_v24 }
  0xd6   : > { %v577_v29 = vsel %vm574_vm4, %v546_v26, %v576_v28  ;;  %v573_v30 = vsel %vm323_vm0, %v563_v27, %v564_v20 }
  0xd7   : > { %599 = vst [vmem:[#allocation2 + $0xc8] sm:$0xff] %v577_v29  ;;  %v575_v31 = vsel %vm574_vm4, %v544_v23, %v573_v30 }
  0xd8   : > { %598 = vst [vmem:[#allocation2 + $0xc0] sm:$0xff] %v575_v31  ;;  %889 = vrot.lane.b32.xlu2 %v5909_v7, %s5812_s10  ;;  %887 = vrot.lane.b32.xlu1 %v5912_v8, %s5812_s10 }
  0xd9   : > { %885 = vrot.lane.b32.xlu0 %v5894_v3, %s5812_s10 }
  0xda   : > { %v635_v32 = vpop.permute.xlu2 %634  ;;  %v552_v33 = vpop.permute.xlu1 %551 }
  0xdb   : > { %v567_v34 = vrot.slane %v552_v33, 4  ;;  %v550_v35 = vpop.permute.xlu0 %549  ;;  %v650_v12 = vrot.slane %v635_v32, 4 }
  0xdc   : > { %v566_v36 = vrot.slane %v550_v35, 4 }
  0xde   : > { %v578_v38 = vsel %vm323_vm0, %v565_v24, %v566_v36  ;;  %v580_v39 = vsel %vm323_vm0, %v566_v36, %v567_v34 }
  0xdf   : > { %v579_v40 = vsel %vm574_vm4, %v6055_v44, %v578_v38  ;;  %v581_v41 = vsel %vm574_vm4, %v550_v35, %v580_v39  ;;  %v1025_v38 = vld [vmem:[%s5882_s26 + $0x20] sm:$0xf] }
  0xe0   : > { %600 = vst [vmem:[#allocation2 + $0xd0] sm:$0xff] %v579_v40  ;;  %958 = vrot.lane.b32.xlu2 %v5889_v2, %s5813_s11  ;;  %893 = vrot.lane.b32.xlu1 %v864_v37, %s5812_s10 }
  0xe1   : > { %601 = vst [vmem:[#allocation2 + $0xd8] sm:$0xff] %v581_v41  ;;  %891 = vrot.lane.b32.xlu0 %v5906_v6, %s5812_s10 }
  0xe2   : > { %v6125_v42 = vpop.permute.xlu2 %640  ;;  %v558_v44 = vpop.permute.xlu1 %557 }
  0xe3   : > { %v570_v46 = vrot.slane %v558_v44, 4  ;;  %v556_v47 = vpop.permute.xlu0 %555  ;;  %v653_v26 = vrot.slane %v6125_v42, 4 }
  0xe4   : > { %v569_v48 = vrot.slane %v556_v47, 4 }
  0xe5   : > { %v586_v49 = vsel %vm323_vm0, %v570_v46, %v571_v43 }
  0xe6   : > { %v587_v50 = vsel %vm574_vm4, %v558_v44, %v586_v49  ;;  %v582_v51 = vsel %vm323_vm0, %v568_v45, %v569_v48  ;;  %v584_v52 = vsel %vm323_vm0, %v569_v48, %v570_v46 }
  0xe7   : > { %604 = vst [vmem:[#allocation2 + $0xf0] sm:$0xff] %v587_v50  ;;  %v583_v53 = vsel %vm574_vm4, %v6071_v56, %v582_v51  ;;  %v585_v55 = vsel %vm574_vm4, %v556_v47, %v584_v52 }
  0xe8   : > { %602 = vst [vmem:[#allocation2 + $0xe0] sm:$0xff] %v583_v53  ;;  %964 = vrot.lane.b32.xlu2 %v5897_v4, %s5813_s11  ;;  %962 = vrot.lane.b32.xlu1 %v5886_v1, %s5813_s11 }
  0xe9   : > { %603 = vst [vmem:[#allocation2 + $0xe8] sm:$0xff] %v585_v55  ;;  %960 = vrot.lane.b32.xlu0 %v5900_v5, %s5813_s11 }
  0xea   : > { %v6141_v54 = vpop.permute.xlu2 %709  ;;  %v627_v58 = vpop.permute.xlu1 %626 }
  0xeb   : > { %v646_v56 = vrot.slane %v627_v58, 4  ;;  %v562_v59 = vpop.permute.xlu0 %561  ;;  %v729_v44 = vrot.slane %v6141_v54, 4 }
  0xec   : > { %v572_v60 = vrot.slane %v562_v59, 4 }
  0xed   : > { %v656_v61 = vsel %vm323_vm0, %v646_v56, %v647_v57 }
  0xee   : > { %v658_v62 = vsel %vm657_vm5, %v627_v58, %v656_v61  ;;  %v588_v63 = vsel %vm323_vm0, %v571_v43, %v572_v60 }
  0xef   : > { %681 = vst [vmem:[#allocation2 + $0x100] sm:$0xff] %v658_v62  ;;  %v589_v10 = vsel %vm574_vm4, %v6084_v11, %v588_v63  ;;  %vm1918_vm4 = vcmask 302080  }
  0xf0   : > { %605 = vst [vmem:[#allocation2 + $0xf8] sm:$0xff] %v589_v10  ;;  %970 = vrot.lane.b32.xlu2 %v5912_v8, %s5813_s11  ;;  %968 = vrot.lane.b32.xlu1 %v5894_v3, %s5813_s11 }
  0xf1   : > { %966 = vrot.lane.b32.xlu0 %v942_v0, %s5813_s11  ;;  %v1030_v0 = vld [vmem:[%s5882_s26 + $0x48] sm:$0xf] }
  0xf2   : > { %v6154_v13 = vpop.permute.xlu2 %715  ;;  %v633_v14 = vpop.permute.xlu1 %632 }
  0xf3   : > { %v649_v15 = vrot.slane %v633_v14, 4  ;;  %v631_v16 = vpop.permute.xlu0 %630  ;;  %v732_v45 = vrot.slane %v6154_v13, 4 }
  0xf4   : > { %v648_v9 = vrot.slane %v631_v16, 4 }
  0xf5   : > { %v663_v17 = vsel %vm323_vm0, %v649_v15, %v650_v12 }
  0xf6   : > { %v664_v11 = vsel %vm657_vm5, %v633_v14, %v663_v17  ;;  %v659_v19 = vsel %vm323_vm0, %v647_v57, %v648_v9  ;;  %v661_v21 = vsel %vm323_vm0, %v648_v9, %v649_v15 }
  0xf7   : > { %684 = vst [vmem:[#allocation2 + $0x118] sm:$0xff] %v664_v11  ;;  %v660_v22 = vsel %vm657_vm5, %v6100_v25, %v659_v19  ;;  %v662_v24 = vsel %vm657_vm5, %v631_v16, %v661_v21 }
  0xf8   : > { %682 = vst [vmem:[#allocation2 + $0x108] sm:$0xff] %v660_v22  ;;  %976 = vrot.lane.b32.xlu2 %v947_v18, %s5813_s11  ;;  %974 = vrot.lane.b32.xlu1 %v5906_v6, %s5813_s11 }
  0xf9   : > { %683 = vst [vmem:[#allocation2 + $0x110] sm:$0xff] %v662_v24  ;;  %972 = vrot.lane.b32.xlu0 %v5909_v7, %s5813_s11  ;;  %s5753_s11 = smul.u32 160, %s8096_s22 }
  0xfa   : > { %v6170_v20 = vpop.permute.xlu2 %721  ;;  %v639_v23 = vpop.permute.xlu1 %638 }
  0xfb   : > { %v652_v27 = vrot.slane %v639_v23, 4  ;;  %v637_v28 = vpop.permute.xlu0 %636  ;;  %v735_v58 = vrot.slane %v6170_v20, 4 }
  0xfc   : > { %v651_v25 = vrot.slane %v637_v28, 4 }
  0xfd   : > { %v667_v29 = vsel %vm323_vm0, %v652_v27, %v653_v26 }
  0xfe   : > { %v668_v30 = vsel %vm657_vm5, %v639_v23, %v667_v29  ;;  %v665_v31 = vsel %vm323_vm0, %v651_v25, %v652_v27 }
  0xff   : > { %686 = vst [vmem:[#allocation2 + $0x128] sm:$0xff] %v668_v30  ;;  %v666_v32 = vsel %vm657_vm5, %v637_v28, %v665_v31 }
 0x100   : > { %685 = vst [vmem:[#allocation2 + $0x120] sm:$0xff] %v666_v32  ;;  %1045 = vrot.lane.b32.xlu2 %v5886_v1, %s5814_s12  ;;  %1043 = vrot.lane.b32.xlu1 %v5900_v5, %s5814_s12 }
 0x101   : > { %1041 = vrot.lane.b32.xlu0 %v5889_v2, %s5814_s12 }
 0x102   : > { %v728_v33 = vpop.permute.xlu2 %727  ;;  %v645_v34 = vpop.permute.xlu1 %644 }
 0x103   : > { %v655_v35 = vrot.slane %v645_v34, 4  ;;  %v643_v36 = vpop.permute.xlu0 %642  ;;  %v738_v12 = vrot.slane %v728_v33, 4  ;;  %v6255_v34 = vld [vmem:[%s5882_s26] sm:$0xff] }
 0x104   : > { %v654_v37 = vrot.slane %v643_v36, 4 }
 0x106   : > { %v669_v39 = vsel %vm323_vm0, %v653_v26, %v654_v37  ;;  %v671_v40 = vsel %vm323_vm0, %v654_v37, %v655_v35  ;;  %v1113_v35 = vld [vmem:[%s5882_s26 + $0x48] sm:$0xf] }
 0x107   : > { %v670_v41 = vsel %vm657_vm5, %v6125_v42, %v669_v39  ;;  %v672_v43 = vsel %vm657_vm5, %v643_v36, %v671_v40  ;;  %vm1835_vm5 = vcmask 310272  }
 0x108   : > { %687 = vst [vmem:[#allocation2 + $0x130] sm:$0xff] %v670_v41  ;;  %1051 = vrot.lane.b32.xlu2 %v5894_v3, %s5814_s12  ;;  %1049 = vrot.lane.b32.xlu1 %v1025_v38, %s5814_s12 }
 0x109   : > { %688 = vst [vmem:[#allocation2 + $0x138] sm:$0xff] %v672_v43  ;;  %1047 = vrot.lane.b32.xlu0 %v5897_v4, %s5814_s12 }
 0x10a   : > { %v6195_v46 = vpop.permute.xlu2 %796  ;;  %v714_v47 = vpop.permute.xlu1 %713 }
 0x10b   : > { %v731_v42 = vrot.slane %v714_v47, 4  ;;  %v712_v48 = vpop.permute.xlu0 %711  ;;  %v814_v22 = vrot.slane %v6195_v46, 4 }
 0x10c   : > { %v730_v49 = vrot.slane %v712_v48, 4 }
 0x10d   : > { %v744_v50 = vsel %vm323_vm0, %v731_v42, %v732_v45 }
 0x10e   : > { %v745_v51 = vsel %vm740_vm6, %v714_v47, %v744_v50  ;;  %v739_v52 = vsel %vm323_vm0, %v729_v44, %v730_v49  ;;  %v742_v53 = vsel %vm323_vm0, %v730_v49, %v731_v42  ;;  %v6277_v47 = vld [vmem:[%s5882_s26 + $0x18] sm:$0xff]  ;;  %v6280_v42 = vld [vmem:[%s5882_s26 + $0x10] sm:$0xff] }
 0x10f   : > { %766 = vst [vmem:[#allocation2 + $0x150] sm:$0xff] %v745_v51  ;;  %v741_v55 = vsel %vm740_vm6, %v6141_v54, %v739_v52  ;;  %v743_v57 = vsel %vm740_vm6, %v712_v48, %v742_v53  ;;  %v6286_v51 = vld [vmem:[%s5882_s26 + $0x8] sm:$0xff] }
 0x110   : > { %764 = vst [vmem:[#allocation2 + $0x140] sm:$0xff] %v741_v55  ;;  %1057 = vrot.lane.b32.xlu2 %v5906_v6, %s5814_s12  ;;  %1055 = vrot.lane.b32.xlu1 %v5909_v7, %s5814_s12 }
 0x111   : > { %765 = vst [vmem:[#allocation2 + $0x148] sm:$0xff] %v743_v57  ;;  %1053 = vrot.lane.b32.xlu0 %v5912_v8, %s5814_s12 }
 0x112   : > { %v6211_v56 = vpop.permute.xlu2 %802  ;;  %v720_v59 = vpop.permute.xlu1 %719 }
 0x113   : > { %v734_v54 = vrot.slane %v720_v59, 4  ;;  %v718_v60 = vpop.permute.xlu0 %717  ;;  %v817_v39 = vrot.slane %v6211_v56, 4 }
 0x114   : > { %v733_v61 = vrot.slane %v718_v60, 4 }
 0x115   : > { %v748_v62 = vsel %vm323_vm0, %v734_v54, %v735_v58 }
 0x116   : > { %v749_v63 = vsel %vm740_vm6, %v720_v59, %v748_v62  ;;  %v746_v6 = vsel %vm323_vm0, %v732_v45, %v733_v61  ;;  %v6302_v61 = vld [vmem:[%s5882_s26 + $0x30] sm:$0xff]  ;;  %v1192_v62 = vld [vmem:[%s5882_s26 + $0x28] sm:$0xff] }
 0x117   : > { %768 = vst [vmem:[#allocation2 + $0x160] sm:$0xff] %v749_v63  ;;  %v747_v10 = vsel %vm740_vm6, %v6154_v13, %v746_v6  ;;  %v1108_v13 = vld [vmem:[%s5882_s26 + $0x20] sm:$0xf] }
 0x118   : > { %767 = vst [vmem:[#allocation2 + $0x158] sm:$0xff] %v747_v10  ;;  %1126 = vrot.lane.b32.xlu2 %v5900_v5, %s5815_s13  ;;  %1124 = vrot.lane.b32.xlu1 %v5889_v2, %s5815_s13 }
 0x119   : > { %1059 = vrot.lane.b32.xlu0 %v1030_v0, %s5814_s12  ;;  %v1191_v0 = vld [vmem:[%s5882_s26 + $0x20] sm:$0xf] }
 0x11a   : > { %v6224_v14 = vpop.permute.xlu2 %808  ;;  %v726_v15 = vpop.permute.xlu1 %725 }
 0x11b   : > { %v737_v16 = vrot.slane %v726_v15, 4  ;;  %v724_v9 = vpop.permute.xlu0 %723  ;;  %v820_v38 = vrot.slane %v6224_v14, 4 }
 0x11c   : > { %v736_v17 = vrot.slane %v724_v9, 4 }
 0x11d   : > { %v754_v18 = vsel %vm323_vm0, %v737_v16, %v738_v12 }
 0x11e   : > { %v755_v11 = vsel %vm740_vm6, %v726_v15, %v754_v18  ;;  %v750_v19 = vsel %vm323_vm0, %v735_v58, %v736_v17  ;;  %v752_v5 = vsel %vm323_vm0, %v736_v17, %v737_v16  ;;  %v6316_v15 = vld [vmem:[%s5882_s26 + $0x4] sm:$0xff] }
 0x11f   : > { %771 = vst [vmem:[#allocation2 + $0x178] sm:$0xff] %v755_v11  ;;  %v751_v2 = vsel %vm740_vm6, %v6170_v20, %v750_v19  ;;  %v753_v21 = vsel %vm740_vm6, %v724_v9, %v752_v5  ;;  %v1196_v11 = vld [vmem:[%s5882_s26 + $0x48] sm:$0xf]  ;;  %vm1752_vm6 = vcmask 318464  }
 0x120   : > { %769 = vst [vmem:[#allocation2 + $0x168] sm:$0xff] %v751_v2  ;;  %1132 = vrot.lane.b32.xlu2 %v1108_v13, %s5815_s13  ;;  %1130 = vrot.lane.b32.xlu1 %v5897_v4, %s5815_s13 }
 0x121   : > { %770 = vst [vmem:[#allocation2 + $0x170] sm:$0xff] %v753_v21  ;;  %1128 = vrot.lane.b32.xlu0 %v5886_v1, %s5815_s13  ;;  %v6327_v21 = vld [vmem:[%s5882_s26 + $0x38] sm:$0xff] }
 0x122   : > { %v6240_v24 = vpop.permute.xlu2 %877  ;;  %v795_v26 = vpop.permute.xlu1 %794  ;;  %1361 = vst [vmem:[#allocation2 + $0x340] sm:$0xff] %v6316_v15 }
 0x123   : > { %v813_v23 = vrot.slane %v795_v26, 4  ;;  %v793_v20 = vpop.permute.xlu0 %792  ;;  %v896_v55 = vrot.slane %v6240_v24, 4 }
 0x124   : > { %v812_v27 = vrot.slane %v793_v20, 4 }
 0x125   : > { %v825_v28 = vsel %vm323_vm0, %v813_v23, %v814_v22 }
 0x126   : > { %v826_v25 = vsel %vm823_vm7, %v795_v26, %v825_v28  ;;  %v822_v4 = vsel %vm323_vm0, %v812_v27, %v813_v23 }
 0x127   : > { %848 = vst [vmem:[#allocation2 + $0x188] sm:$0xff] %v826_v25  ;;  %v824_v29 = vsel %vm823_vm7, %v793_v20, %v822_v4  ;;  %v6339_v20 = vld [vmem:[%s5882_s26 + $0x2c] sm:$0xff] }
 0x128   : > { %847 = vst [vmem:[#allocation2 + $0x180] sm:$0xff] %v824_v29  ;;  %1138 = vrot.lane.b32.xlu2 %v5909_v7, %s5815_s13  ;;  %1136 = vrot.lane.b32.xlu1 %v5912_v8, %s5815_s13  ;;  %v6261_v7 = vld [vmem:[%s5882_s26 + $0x40] sm:$0xff] }
 0x129   : > { %1134 = vrot.lane.b32.xlu0 %v5894_v3, %s5815_s13  ;;  %1365 = vst [vmem:[#allocation2 + $0x360] sm:$0xff] %v6339_v20 }
 0x12a   : > { %v6252_v1 = vpop.permute.xlu2 %883  ;;  %v801_v30 = vpop.permute.xlu1 %800 }
 0x12b   : > { %v816_v31 = vrot.slane %v801_v30, 4  ;;  %v799_v32 = vpop.permute.xlu0 %798  ;;  %v899_v12 = vrot.slane %v6252_v1, 4 }
 0x12c   : > { %v815_v33 = vrot.slane %v799_v32, 4 }
 0x12e   : > { %v827_v36 = vsel %vm323_vm0, %v814_v22, %v815_v33  ;;  %v829_v37 = vsel %vm323_vm0, %v815_v33, %v816_v31 }
 0x12f   : > { %v828_v8 = vsel %vm823_vm7, %v6195_v46, %v827_v36  ;;  %v830_v3 = vsel %vm823_vm7, %v799_v32, %v829_v37 }
 0x130   : > { %849 = vst [vmem:[#allocation2 + $0x190] sm:$0xff] %v828_v8  ;;  %1207 = vrot.lane.b32.xlu2 %v6255_v34, %s5816_s14  ;;  %1142 = vrot.lane.b32.xlu1 %v1113_v35, %s5815_s13 }
 0x131   : > { %850 = vst [vmem:[#allocation2 + $0x198] sm:$0xff] %v830_v3  ;;  %1140 = vrot.lane.b32.xlu0 %v6261_v7, %s5815_s13  ;;  %s7919_s13 = scalar_lea.vmem %s8018_s6, %s5753_s11 }
 0x132   : > { %v6273_v40 = vpop.permute.xlu2 %889  ;;  %v807_v41 = vpop.permute.xlu1 %806 }
 0x133   : > { %v819_v43 = vrot.slane %v807_v41, 4  ;;  %v805_v45 = vpop.permute.xlu0 %804  ;;  %v902_v23 = vrot.slane %v6273_v40, 4 }
 0x134   : > { %v818_v44 = vrot.slane %v805_v45, 4 }
 0x135   : > { %v835_v46 = vsel %vm323_vm0, %v819_v43, %v820_v38 }
 0x136   : > { %v836_v48 = vsel %vm823_vm7, %v807_v41, %v835_v46  ;;  %v831_v49 = vsel %vm323_vm0, %v817_v39, %v818_v44  ;;  %v833_v50 = vsel %vm323_vm0, %v818_v44, %v819_v43 }
 0x137   : > { %853 = vst [vmem:[#allocation2 + $0x1b0] sm:$0xff] %v836_v48  ;;  %v832_v52 = vsel %vm823_vm7, %v6211_v56, %v831_v49  ;;  %v834_v53 = vsel %vm823_vm7, %v805_v45, %v833_v50  ;;  %v4851_v50 = vld [vmem:[#allocation2 + $0x180] sm:$0xf] }
 0x138   : > { %851 = vst [vmem:[#allocation2 + $0x1a0] sm:$0xff] %v832_v52  ;;  %1213 = vrot.lane.b32.xlu2 %v6277_v47, %s5816_s14  ;;  %1211 = vrot.lane.b32.xlu1 %v6280_v42, %s5816_s14 }
 0x139   : > { %852 = vst [vmem:[#allocation2 + $0x1a8] sm:$0xff] %v834_v53  ;;  %1209 = vrot.lane.b32.xlu0 %v6286_v51, %s5816_s14 }
 0x13a   : > { %v6298_v57 = vpop.permute.xlu2 %958  ;;  %v876_v58 = vpop.permute.xlu1 %875 }
 0x13b   : > { %v895_v56 = vrot.slane %v876_v58, 4  ;;  %v811_v59 = vpop.permute.xlu0 %810 }
 0x13c   : > { %v821_v54 = vrot.slane %v811_v59, 4 }
 0x13d   : > { %v905_v60 = vsel %vm323_vm0, %v895_v56, %v896_v55 }
 0x13e   : > { %v907_v63 = vsel %vm906_vm8, %v876_v58, %v905_v60  ;;  %v837_v6 = vsel %vm323_vm0, %v820_v38, %v821_v54  ;;  %v5580_v58 = vld [vmem:[#allocation2 + $0x15c] sm:$0xf0] }
 0x13f   : > { %930 = vst [vmem:[#allocation2 + $0x1c0] sm:$0xff] %v907_v63  ;;  %v838_v10 = vsel %vm823_vm7, %v6224_v14, %v837_v6  ;;  %v5588_v44 = vld [vmem:[#allocation2 + $0x19c] sm:$0xf0]  ;;  %vm2416_vm7 = vcmask 138240  }
 0x140   : > { %854 = vst [vmem:[#allocation2 + $0x1b8] sm:$0xff] %v838_v10  ;;  %1219 = vrot.lane.b32.xlu2 %v6302_v61, %s5816_s14  ;;  %1217 = vrot.lane.b32.xlu1 %v1192_v62, %s5816_s14  ;;  %v4852_v52 = vor.u32 %v5588_v44, %v4851_v50 }
 0x141   : > { %1215 = vrot.lane.b32.xlu0 %v1191_v0, %s5816_s14 }
 0x142   : > { %v6318_v16 = vpop.permute.xlu2 %964  ;;  %v882_v9 = vpop.permute.xlu1 %881 }
 0x143   : > { %v898_v17 = vrot.slane %v882_v9, 4  ;;  %v880_v14 = vpop.permute.xlu0 %879  ;;  %v981_v45 = vrot.slane %v6318_v16, 4 }
 0x144   : > { %v897_v18 = vrot.slane %v880_v14, 4 }
 0x145   : > { %v912_v13 = vsel %vm323_vm0, %v898_v17, %v899_v12 }
 0x146   : > { %v913_v19 = vsel %vm906_vm8, %v882_v9, %v912_v13  ;;  %v908_v5 = vsel %vm323_vm0, %v896_v55, %v897_v18  ;;  %v910_v2 = vsel %vm323_vm0, %v897_v18, %v898_v17  ;;  %v4883_v41 = vld [vmem:[#allocation2 + $0x1c0] sm:$0xf]  ;;  %v6372_v55 = vld [vmem:[%s5882_s26 + $0xc] sm:$0xff] }
 0x147   : > { %933 = vst [vmem:[#allocation2 + $0x1d8] sm:$0xff] %v913_v19  ;;  %v909_v22 = vsel %vm906_vm8, %v6240_v24, %v908_v5  ;;  %v911_v26 = vsel %vm906_vm8, %v880_v14, %v910_v2  ;;  %v4787_v17 = vld [vmem:[#allocation2 + $0x100] sm:$0xf] }
 0x148   : > { %931 = vst [vmem:[#allocation2 + $0x1c8] sm:$0xff] %v909_v22  ;;  %1225 = vrot.lane.b32.xlu2 %v1196_v11, %s5816_s14  ;;  %1223 = vrot.lane.b32.xlu1 %v6261_v7, %s5816_s14  ;;  %v1274_v7 = vld [vmem:[%s5882_s26 + $0x20] sm:$0xf]  ;;  %v6391_v11 = vld [vmem:[%s5882_s26 + $0x34] sm:$0xff] }
 0x149   : > { %932 = vst [vmem:[#allocation2 + $0x1d0] sm:$0xff] %v911_v26  ;;  %1221 = vrot.lane.b32.xlu0 %v6327_v21, %s5816_s14  ;;  %v5564_v19 = vld [vmem:[#allocation2 + $0xdc] sm:$0xf0] }
 0x14a   : > { %v6341_v27 = vpop.permute.xlu2 %970  ;;  %v888_v28 = vpop.permute.xlu1 %887  ;;  %v4755_v22 = vld [vmem:[#allocation2 + $0xc0] sm:$0xf] }
 0x14b   : > { %v901_v24 = vrot.slane %v888_v28, 4  ;;  %v886_v25 = vpop.permute.xlu0 %885  ;;  %v984_v6 = vrot.slane %v6341_v27, 4  ;;  %v4756_v26 = vor.u32 %v5564_v19, %v4755_v22 }
 0x14c   : > { %v900_v4 = vrot.slane %v886_v25, 4 }
 0x14d   : > { %v916_v29 = vsel %vm323_vm0, %v901_v24, %v902_v23 }
 0x14e   : > { %v917_v1 = vsel %vm906_vm8, %v888_v28, %v916_v29  ;;  %v914_v30 = vsel %vm323_vm0, %v900_v4, %v901_v24  ;;  %v5556_v28 = vld [vmem:[#allocation2 + $0x9c] sm:$0xf0] }
 0x14f   : > { %935 = vst [vmem:[#allocation2 + $0x1e8] sm:$0xff] %v917_v1  ;;  %v915_v31 = vsel %vm906_vm8, %v886_v25, %v914_v30  ;;  %v4723_v29 = vld [vmem:[#allocation2 + $0x80] sm:$0xf] }
 0x150   : > { %934 = vst [vmem:[#allocation2 + $0x1e0] sm:$0xff] %v915_v31  ;;  %1294 = vrot.lane.b32.xlu2 %v6280_v42, %s5817_s15  ;;  %1292 = vrot.lane.b32.xlu1 %v6286_v51, %s5817_s15  ;;  %v4724_v30 = vor.u32 %v5556_v28, %v4723_v29 }
 0x151   : > { %1290 = vrot.lane.b32.xlu0 %v6255_v34, %s5817_s15 }
 0x152   : > { %v6354_v32 = vpop.permute.xlu2 %976  ;;  %v894_v33 = vpop.permute.xlu1 %893 }
 0x153   : > { %v904_v35 = vrot.slane %v894_v33, 4  ;;  %v892_v36 = vpop.permute.xlu0 %891  ;;  %v5548_v33 = vld [vmem:[#allocation2 + $0x5c] sm:$0xf0] }
 0x154   : > { %v903_v37 = vrot.slane %v892_v36, 4 }
 0x156   : > { %v918_v8 = vsel %vm323_vm0, %v902_v23, %v903_v37  ;;  %v920_v3 = vsel %vm323_vm0, %v903_v37, %v904_v35  ;;  %v987_v23 = vrot.slane %v6354_v32, 4 }
 0x157   : > { %v919_v38 = vsel %vm906_vm8, %v6273_v40, %v918_v8  ;;  %v921_v39 = vsel %vm906_vm8, %v892_v36, %v920_v3  ;;  %v5596_v43 = vld [vmem:[#allocation2 + $0x1dc] sm:$0xf0]  ;;  %v978_v40 = vrot.slane %v6298_v57, 4  ;;  %vm1669_vm8 = vcmask 957440  }
 0x158   : > { %936 = vst [vmem:[#allocation2 + $0x1f0] sm:$0xff] %v919_v38  ;;  %1300 = vrot.lane.b32.xlu2 %v1192_v62, %s5817_s15  ;;  %1298 = vrot.lane.b32.xlu1 %v1274_v7, %s5817_s15  ;;  %v4884_v34 = vor.u32 %v5596_v43, %v4883_v41  ;;  %v4819_v62 = vld [vmem:[#allocation2 + $0x140] sm:$0xf] }
 0x159   : > { %937 = vst [vmem:[#allocation2 + $0x1f8] sm:$0xff] %v921_v39  ;;  %1296 = vrot.lane.b32.xlu0 %v6277_v47, %s5817_s15  ;;  %v4820_v63 = vor.u32 %v5580_v58, %v4819_v62  ;;  %v4691_v8 = vld [vmem:[#allocation2 + $0x40] sm:$0xf] }
 0x15a   : > { %3771 = vmatpush.bf16.msra.mxu0 %v4884_v34  ;;  %v6368_v46 = vpop.permute.xlu2 %1045  ;;  %v963_v42 = vpop.permute.xlu1 %962  ;;  %v4692_v3 = vor.u32 %v5548_v33, %v4691_v8  ;;  %v5540_v39 = vld [vmem:[#allocation2 + $0x1c] sm:$0xf0] }
 0x15b   : > { %v980_v48 = vrot.slane %v963_v42, 4  ;;  %v961_v49 = vpop.permute.xlu0 %960  ;;  %v1063_v38 = vrot.slane %v6368_v46, 4 }
 0x15c   : > { %v979_v51 = vrot.slane %v961_v49, 4 }
 0x15d   : > { %v993_v53 = vsel %vm323_vm0, %v980_v48, %v981_v45 }
 0x15e   : > { %v994_v47 = vsel %vm989_vm9, %v963_v42, %v993_v53  ;;  %v988_v56 = vsel %vm323_vm0, %v978_v40, %v979_v51  ;;  %v991_v59 = vsel %vm323_vm0, %v979_v51, %v980_v48  ;;  %3772 = vmatpush.bf16.msra.mxu0 %v4852_v52 }
 0x15f   : > { %1015 = vst [vmem:[#allocation2 + $0x210] sm:$0xff] %v994_v47  ;;  %v990_v54 = vsel %vm989_vm9, %v6298_v57, %v988_v56  ;;  %v992_v60 = vsel %vm989_vm9, %v961_v49, %v991_v59  ;;  %v5572_v57 = vld [vmem:[#allocation2 + $0x11c] sm:$0xf0] }
 0x160   : > { %1013 = vst [vmem:[#allocation2 + $0x200] sm:$0xff] %v990_v54  ;;  %2138 = vrot.lane.b32.xlu2 %v6372_v55, %s5818_s16  ;;  %2136 = vrot.lane.b32.xlu1 %v6316_v15, %s5818_s16  ;;  %v4788_v18 = vor.u32 %v5572_v57, %v4787_v17 }
 0x161   : > { %1014 = vst [vmem:[#allocation2 + $0x208] sm:$0xff] %v992_v60  ;;  %1302 = vrot.lane.b32.xlu0 %v6302_v61, %s5817_s15 }
 0x162   : > { %3773 = vmatpush.bf16.msra.mxu0 %v4820_v63  ;;  %v6387_v0 = vpop.permute.xlu2 %1051  ;;  %v969_v10 = vpop.permute.xlu1 %968 }
 0x163   : > { %v983_v12 = vrot.slane %v969_v10, 4  ;;  %v967_v9 = vpop.permute.xlu0 %966  ;;  %v1066_v63 = vrot.slane %v6387_v0, 4 }
 0x164   : > { %v982_v14 = vrot.slane %v967_v9, 4 }
 0x165   : > { %v997_v13 = vsel %vm323_vm0, %v983_v12, %v984_v6 }
 0x166   : > { %v998_v5 = vsel %vm989_vm9, %v969_v10, %v997_v13  ;;  %v995_v2 = vsel %vm323_vm0, %v981_v45, %v982_v14  ;;  %3774 = vmatpush.bf16.msra.mxu0 %v4788_v18  ;;  %v4659_v45 = vld [vmem:[#allocation2] sm:$0xf] }
 0x167   : > { %1017 = vst [vmem:[#allocation2 + $0x220] sm:$0xff] %v998_v5  ;;  %v996_v61 = vsel %vm989_vm9, %v6318_v16, %v995_v2  ;;  %v4660_v40 = vor.u32 %v5540_v39, %v4659_v45 }
 0x168   : > { %1016 = vst [vmem:[#allocation2 + $0x218] sm:$0xff] %v996_v61  ;;  %1472 = vrot.lane.b32.xlu2 %v6316_v15, %s5819_s17  ;;  %2148 = vrot.lane.b32.xlu1 %v6391_v11, %s5818_s16 }
 0x169   : > { %2146 = vrot.lane.b32.xlu0 %v6339_v20, %s5818_s16 }
 0x16a   : > { %3775 = vmatpush.bf16.msra.mxu0 %v4756_v26  ;;  %v6404_v24 = vpop.permute.xlu2 %1057  ;;  %v975_v16 = vpop.permute.xlu1 %974 }
 0x16b   : > { %v986_v25 = vrot.slane %v975_v16, 4  ;;  %v973_v4 = vpop.permute.xlu0 %972  ;;  %v1069_v62 = vrot.slane %v6404_v24, 4 }
 0x16c   : > { %v985_v1 = vrot.slane %v973_v4, 4 }
 0x16d   : > { %v1003_v31 = vsel %vm323_vm0, %v986_v25, %v987_v23 }
 0x16e   : > { %v1004_v35 = vsel %vm989_vm9, %v975_v16, %v1003_v31  ;;  %v999_v32 = vsel %vm323_vm0, %v984_v6, %v985_v1  ;;  %v1001_v36 = vsel %vm323_vm0, %v985_v1, %v986_v25  ;;  %3776 = vmatpush.bf16.msra.mxu0 %v4724_v30 }
 0x16f   : > { %1020 = vst [vmem:[#allocation2 + $0x238] sm:$0xff] %v1004_v35  ;;  %v1000_v37 = vsel %vm989_vm9, %v6341_v27, %v999_v32  ;;  %v1002_v7 = vsel %vm989_vm9, %v973_v4, %v1001_v36  ;;  %vm2333_vm9 = vcmask 146432  }
 0x170   : > { %1018 = vst [vmem:[#allocation2 + $0x228] sm:$0xff] %v1000_v37  ;;  %1484 = vrot.lane.b32.xlu2 %v6391_v11, %s5819_s17  ;;  %1482 = vrot.lane.b32.xlu1 %v6339_v20, %s5819_s17 }
 0x171   : > { %1019 = vst [vmem:[#allocation2 + $0x230] sm:$0xff] %v1002_v7  ;;  %1474 = vrot.lane.b32.xlu0 %v6372_v55, %s5819_s17 }
 0x172   : > { %3777 = vmatpush.bf16.msra.mxu0 %v4692_v3  ;;  %v6420_v27 = vpop.permute.xlu2 %1126  ;;  %v1044_v41 = vpop.permute.xlu1 %1043 }
 0x173   : > { %v1062_v43 = vrot.slane %v1044_v41, 4  ;;  %v1042_v34 = vpop.permute.xlu0 %1041  ;;  %v1145_v5 = vrot.slane %v6420_v27, 4 }
 0x174   : > { %v1061_v44 = vrot.slane %v1042_v34, 4 }
 0x175   : > { %v1074_v42 = vsel %vm323_vm0, %v1062_v43, %v1063_v38 }
 0x176   : > { %v1075_v48 = vsel %vm1072_vm10, %v1044_v41, %v1074_v42  ;;  %v1071_v49 = vsel %vm323_vm0, %v1061_v44, %v1062_v43  ;;  %3778 = vmatpush.bf16.msra.mxu0 %v4660_v40 }
 0x177   : > { %1097 = vst [vmem:[#allocation2 + $0x248] sm:$0xff] %v1075_v48  ;;  %v1073_v50 = vsel %vm1072_vm10, %v1042_v34, %v1071_v49 }
 0x178   : > { %1096 = vst [vmem:[#allocation2 + $0x240] sm:$0xff] %v1073_v50  ;;  %2063 = vrot.lane.b32.xlu2 %v6339_v20, %s5820_s18  ;;  %2055 = vrot.lane.b32.xlu1 %v6372_v55, %s5820_s18 }
 0x179   : > { %2053 = vrot.lane.b32.xlu0 %v6316_v15, %s5820_s18 }
 0x17a   : > { %v1133_v51 = vpop.permute.xlu2 %1132  ;;  %v1050_v52 = vpop.permute.xlu1 %1049 }
 0x17b   : > { %v1065_v53 = vrot.slane %v1050_v52, 4  ;;  %v1048_v58 = vpop.permute.xlu0 %1047  ;;  %v1148_v4 = vrot.slane %v1133_v51, 4 }
 0x17c   : > { %v1064_v47 = vrot.slane %v1048_v58, 4 }
 0x17e   : > { %v1076_v56 = vsel %vm323_vm0, %v1063_v38, %v1064_v47  ;;  %v1078_v59 = vsel %vm323_vm0, %v1064_v47, %v1065_v53 }
 0x17f   : > { %v1077_v54 = vsel %vm1072_vm10, %v6368_v46, %v1076_v56  ;;  %v1079_v60 = vsel %vm1072_vm10, %v1048_v58, %v1078_v59 }
 0x180   : > { %1098 = vst [vmem:[#allocation2 + $0x250] sm:$0xff] %v1077_v54  ;;  %1391 = vrot.lane.b32.xlu2 %v6372_v55, %s5821_s19  ;;  %1389 = vrot.lane.b32.xlu1 %v6316_v15, %s5821_s19 }
 0x181   : > { %1099 = vst [vmem:[#allocation2 + $0x258] sm:$0xff] %v1079_v60  ;;  %2065 = vrot.lane.b32.xlu0 %v6391_v11, %s5820_s18 }
 0x182   : > { %v6445_v6 = vpop.permute.xlu2 %1138  ;;  %v1056_v46 = vpop.permute.xlu1 %1055 }
 0x183   : > { %v1068_v57 = vrot.slane %v1056_v46, 4  ;;  %v1054_v10 = vpop.permute.xlu0 %1053  ;;  %v1151_v8 = vrot.slane %v6445_v6, 4 }
 0x184   : > { %v1067_v12 = vrot.slane %v1054_v10, 4 }
 0x185   : > { %v1084_v9 = vsel %vm323_vm0, %v1068_v57, %v1069_v62 }
 0x186   : > { %v1085_v17 = vsel %vm1072_vm10, %v1056_v46, %v1084_v9  ;;  %v1080_v14 = vsel %vm323_vm0, %v1066_v63, %v1067_v12  ;;  %v1082_v18 = vsel %vm323_vm0, %v1067_v12, %v1068_v57 }
 0x187   : > { %1102 = vst [vmem:[#allocation2 + $0x270] sm:$0xff] %v1085_v17  ;;  %v1081_v13 = vsel %vm1072_vm10, %v6387_v0, %v1080_v14  ;;  %v1083_v19 = vsel %vm1072_vm10, %v1054_v10, %v1082_v18 }
 0x188   : > { %1100 = vst [vmem:[#allocation2 + $0x260] sm:$0xff] %v1081_v13  ;;  %1970 = vrot.lane.b32.xlu2 %v6316_v15, %s5822_s20  ;;  %1401 = vrot.lane.b32.xlu1 %v6391_v11, %s5821_s19 }
 0x189   : > { %1101 = vst [vmem:[#allocation2 + $0x268] sm:$0xff] %v1083_v19  ;;  %1399 = vrot.lane.b32.xlu0 %v6339_v20, %s5821_s19 }
 0x18a   : > { %v6461_v2 = vpop.permute.xlu2 %1207  ;;  %v1125_v61 = vpop.permute.xlu1 %1124 }
 0x18b   : > { %v1144_v0 = vrot.slane %v1125_v61, 4  ;;  %v1060_v22 = vpop.permute.xlu0 %1059  ;;  %v1227_v56 = vrot.slane %v6461_v2, 4 }
 0x18c   : > { %v1070_v26 = vrot.slane %v1060_v22, 4 }
 0x18d   : > { %v1154_v23 = vsel %vm323_vm0, %v1144_v0, %v1145_v5 }
 0x18e   : > { %v1156_v28 = vsel %vm1155_vm11, %v1125_v61, %v1154_v23  ;;  %v1086_v16 = vsel %vm323_vm0, %v1069_v62, %v1070_v26 }
 0x18f   : > { %1179 = vst [vmem:[#allocation2 + $0x280] sm:$0xff] %v1156_v28  ;;  %v1087_v25 = vsel %vm1072_vm10, %v6404_v24, %v1086_v16  ;;  %vm1586_vm10 = vcmask 965632  }
 0x190   : > { %1103 = vst [vmem:[#allocation2 + $0x278] sm:$0xff] %v1087_v25  ;;  %1982 = vrot.lane.b32.xlu2 %v6391_v11, %s5822_s20  ;;  %1980 = vrot.lane.b32.xlu1 %v6339_v20, %s5822_s20 }
 0x191   : > { %1972 = vrot.lane.b32.xlu0 %v6372_v55, %s5822_s20 }
 0x192   : > { %v6474_v29 = vpop.permute.xlu2 %1213  ;;  %v1131_v1 = vpop.permute.xlu1 %1130 }
 0x193   : > { %v1147_v30 = vrot.slane %v1131_v1, 4  ;;  %v1129_v31 = vpop.permute.xlu0 %1128  ;;  %v1230_v47 = vrot.slane %v6474_v29, 4 }
 0x194   : > { %v1146_v33 = vrot.slane %v1129_v31, 4 }
 0x195   : > { %v1161_v35 = vsel %vm323_vm0, %v1147_v30, %v1148_v4 }
 0x196   : > { %v1162_v24 = vsel %vm1155_vm11, %v1131_v1, %v1161_v35  ;;  %v1157_v32 = vsel %vm323_vm0, %v1145_v5, %v1146_v33  ;;  %v1159_v36 = vsel %vm323_vm0, %v1146_v33, %v1147_v30 }
 0x197   : > { %1182 = vst [vmem:[#allocation2 + $0x298] sm:$0xff] %v1162_v24  ;;  %v1158_v37 = vsel %vm1155_vm11, %v6420_v27, %v1157_v32  ;;  %v1160_v7 = vsel %vm1155_vm11, %v1129_v31, %v1159_v36 }
 0x198   : > { %1180 = vst [vmem:[#allocation2 + $0x288] sm:$0xff] %v1158_v37  ;;  %1897 = vrot.lane.b32.xlu2 %v6339_v20, %s5823_s23  ;;  %1889 = vrot.lane.b32.xlu1 %v6372_v55, %s5823_s23 }
 0x199   : > { %1181 = vst [vmem:[#allocation2 + $0x290] sm:$0xff] %v1160_v7  ;;  %1887 = vrot.lane.b32.xlu0 %v6316_v15, %s5823_s23 }
 0x19a   : > { %v6490_v3 = vpop.permute.xlu2 %1219  ;;  %v1137_v38 = vpop.permute.xlu1 %1136 }
 0x19b   : > { %v1150_v39 = vrot.slane %v1137_v38, 4  ;;  %v1135_v27 = vpop.permute.xlu0 %1134  ;;  %v1233_v17 = vrot.slane %v6490_v3, 4 }
 0x19c   : > { %v1149_v41 = vrot.slane %v1135_v27, 4 }
 0x19d   : > { %v1165_v43 = vsel %vm323_vm0, %v1150_v39, %v1151_v8 }
 0x19e   : > { %v1166_v34 = vsel %vm1155_vm11, %v1137_v38, %v1165_v43  ;;  %v1163_v45 = vsel %vm323_vm0, %v1149_v41, %v1150_v39 }
 0x19f   : > { %1184 = vst [vmem:[#allocation2 + $0x2a8] sm:$0xff] %v1166_v34  ;;  %v1164_v44 = vsel %vm1155_vm11, %v1135_v27, %v1163_v45 }
 0x1a0   : > { %1183 = vst [vmem:[#allocation2 + $0x2a0] sm:$0xff] %v1164_v44  ;;  %1806 = vrot.lane.b32.xlu2 %v6372_v55, %s5824_s24  ;;  %1804 = vrot.lane.b32.xlu1 %v6316_v15, %s5824_s24 }
 0x1a1   : > { %1899 = vrot.lane.b32.xlu0 %v6391_v11, %s5823_s23 }
 0x1a2   : > { %v1226_v40 = vpop.permute.xlu2 %1225  ;;  %v1143_v42 = vpop.permute.xlu1 %1142 }
 0x1a3   : > { %v1153_v48 = vrot.slane %v1143_v42, 4  ;;  %v1141_v49 = vpop.permute.xlu0 %1140  ;;  %v1236_v26 = vrot.slane %v1226_v40, 4 }
 0x1a4   : > { %v1152_v50 = vrot.slane %v1141_v49, 4 }
 0x1a6   : > { %v1167_v51 = vsel %vm323_vm0, %v1151_v8, %v1152_v50  ;;  %v1169_v52 = vsel %vm323_vm0, %v1152_v50, %v1153_v48 }
 0x1a7   : > { %v1168_v53 = vsel %vm1155_vm11, %v6445_v6, %v1167_v51  ;;  %v1170_v58 = vsel %vm1155_vm11, %v1141_v49, %v1169_v52  ;;  %vm2250_vm11 = vcmask 154624  }
 0x1a8   : > { %1185 = vst [vmem:[#allocation2 + $0x2b0] sm:$0xff] %v1168_v53  ;;  %1721 = vrot.lane.b32.xlu2 %v6316_v15, %s5825_s25  ;;  %1816 = vrot.lane.b32.xlu1 %v6391_v11, %s5824_s24 }
 0x1a9   : > { %1186 = vst [vmem:[#allocation2 + $0x2b8] sm:$0xff] %v1170_v58  ;;  %1814 = vrot.lane.b32.xlu0 %v6339_v20, %s5824_s24 }
 0x1aa   : > { %v6515_v59 = vpop.permute.xlu2 %1294  ;;  %v1212_v54 = vpop.permute.xlu1 %1211 }
 0x1ab   : > { %v1229_v60 = vrot.slane %v1212_v54, 4  ;;  %v1210_v62 = vpop.permute.xlu0 %1209  ;;  %v1312_v24 = vrot.slane %v6515_v59, 4 }
 0x1ac   : > { %v1228_v63 = vrot.slane %v1210_v62, 4 }
 0x1ad   : > { %v1242_v6 = vsel %vm323_vm0, %v1229_v60, %v1230_v47 }
 0x1ae   : > { %v1243_v46 = vsel %vm1238_vm12, %v1212_v54, %v1242_v6  ;;  %v1237_v57 = vsel %vm323_vm0, %v1227_v56, %v1228_v63  ;;  %v1240_v10 = vsel %vm323_vm0, %v1228_v63, %v1229_v60 }
 0x1af   : > { %1264 = vst [vmem:[#allocation2 + $0x2d0] sm:$0xff] %v1243_v46  ;;  %v1239_v12 = vsel %vm1238_vm12, %v6461_v2, %v1237_v57  ;;  %v1241_v9 = vsel %vm1238_vm12, %v1210_v62, %v1240_v10 }
 0x1b0   : > { %1262 = vst [vmem:[#allocation2 + $0x2c0] sm:$0xff] %v1239_v12  ;;  %1733 = vrot.lane.b32.xlu2 %v6391_v11, %s5825_s25  ;;  %1731 = vrot.lane.b32.xlu1 %v6339_v20, %s5825_s25 }
 0x1b1   : > { %1263 = vst [vmem:[#allocation2 + $0x2c8] sm:$0xff] %v1241_v9  ;;  %1723 = vrot.lane.b32.xlu0 %v6372_v55, %s5825_s25 }
 0x1b2   : > { %v6531_v14 = vpop.permute.xlu2 %1300  ;;  %v1218_v18 = vpop.permute.xlu1 %1217 }
 0x1b3   : > { %v1232_v13 = vrot.slane %v1218_v18, 4  ;;  %v1216_v19 = vpop.permute.xlu0 %1215  ;;  %v1315_v51 = vrot.slane %v6531_v14, 4 }
 0x1b4   : > { %v1231_v5 = vrot.slane %v1216_v19, 4 }
 0x1b5   : > { %v1246_v2 = vsel %vm323_vm0, %v1232_v13, %v1233_v17 }
 0x1b6   : > { %v1247_v61 = vsel %vm1238_vm12, %v1218_v18, %v1246_v2  ;;  %v1244_v0 = vsel %vm323_vm0, %v1230_v47, %v1231_v5 }
 0x1b7   : > { %1266 = vst [vmem:[#allocation2 + $0x2e0] sm:$0xff] %v1247_v61  ;;  %v1245_v22 = vsel %vm1238_vm12, %v6474_v29, %v1244_v0 }
 0x1b8   : > { %1265 = vst [vmem:[#allocation2 + $0x2d8] sm:$0xff] %v1245_v22  ;;  %2395 = vrot.lane.b32.xlu2 %v6339_v20, %s5826_s27  ;;  %2387 = vrot.lane.b32.xlu1 %v6372_v55, %s5826_s27 }
 0x1b9   : > { %2385 = vrot.lane.b32.xlu0 %v6316_v15, %s5826_s27 }
 0x1ba   : > { %v6544_v23 = vpop.permute.xlu2 %2138  ;;  %v1224_v28 = vpop.permute.xlu1 %1223 }
 0x1bb   : > { %v1235_v16 = vrot.slane %v1224_v28, 4  ;;  %v1222_v25 = vpop.permute.xlu0 %1221  ;;  %v2157_v50 = vrot.slane %v6544_v23, 4 }
 0x1bc   : > { %v1234_v4 = vrot.slane %v1222_v25, 4 }
 0x1bd   : > { %v1252_v29 = vsel %vm323_vm0, %v1235_v16, %v1236_v26 }
 0x1be   : > { %v1253_v1 = vsel %vm1238_vm12, %v1224_v28, %v1252_v29  ;;  %v1248_v30 = vsel %vm323_vm0, %v1233_v17, %v1234_v4  ;;  %v1250_v31 = vsel %vm323_vm0, %v1234_v4, %v1235_v16 }
 0x1bf   : > { %1269 = vst [vmem:[#allocation2 + $0x2f8] sm:$0xff] %v1253_v1  ;;  %v1249_v33 = vsel %vm1238_vm12, %v6490_v3, %v1248_v30  ;;  %v1251_v35 = vsel %vm1238_vm12, %v1222_v25, %v1250_v31  ;;  %v6653_v31 = vld [vmem:[%s5882_s26 + $0x3c] sm:$0xff]  ;;  %vm3767_vm12 = vcmask 392192  }
 0x1c0   : > { %1267 = vst [vmem:[#allocation2 + $0x2e8] sm:$0xff] %v1249_v33  ;;  %1640 = vrot.lane.b32.xlu2 %v6372_v55, %s5827_s28  ;;  %1638 = vrot.lane.b32.xlu1 %v6316_v15, %s5827_s28 }
 0x1c1   : > { %1268 = vst [vmem:[#allocation2 + $0x2f0] sm:$0xff] %v1251_v35  ;;  %2397 = vrot.lane.b32.xlu0 %v6391_v11, %s5826_s27 }
 0x1c2   : > { %v6560_v32 = vpop.permute.xlu2 %1472  ;;  %v1293_v36 = vpop.permute.xlu1 %1292 }
 0x1c3   : > { %v1311_v37 = vrot.slane %v1293_v36, 4  ;;  %v1291_v7 = vpop.permute.xlu0 %1290 }
 0x1c4   : > { %v1310_v8 = vrot.slane %v1291_v7, 4 }
 0x1c5   : > { %v1323_v3 = vsel %vm323_vm0, %v1311_v37, %v1312_v24 }
 0x1c6   : > { %v1324_v38 = vsel %vm1321_vm13, %v1293_v36, %v1323_v3  ;;  %v1320_v39 = vsel %vm323_vm0, %v1310_v8, %v1311_v37 }
 0x1c7   : > { %1346 = vst [vmem:[#allocation2 + $0x308] sm:$0xff] %v1324_v38  ;;  %v1322_v27 = vsel %vm1321_vm13, %v1291_v7, %v1320_v39 }
 0x1c8   : > { %1345 = vst [vmem:[#allocation2 + $0x300] sm:$0xff] %v1322_v27  ;;  %2302 = vrot.lane.b32.xlu2 %v6316_v15, %s5828_s29  ;;  %1650 = vrot.lane.b32.xlu1 %v6391_v11, %s5827_s28 }
 0x1c9   : > { %1648 = vrot.lane.b32.xlu0 %v6339_v20, %s5827_s28 }
 0x1ca   : > { %v6572_v41 = vpop.permute.xlu2 %1484  ;;  %v1299_v43 = vpop.permute.xlu1 %1298 }
 0x1cb   : > { %v1314_v34 = vrot.slane %v1299_v43, 4  ;;  %v1297_v45 = vpop.permute.xlu0 %1296  ;;  %v1498_v17 = vrot.slane %v6572_v41, 4 }
 0x1cc   : > { %v1313_v44 = vrot.slane %v1297_v45, 4 }
 0x1ce   : > { %v1325_v40 = vsel %vm323_vm0, %v1312_v24, %v1313_v44  ;;  %v1327_v42 = vsel %vm323_vm0, %v1313_v44, %v1314_v34 }
 0x1cf   : > { %v1326_v48 = vsel %vm1321_vm13, %v6515_v59, %v1325_v40  ;;  %v1328_v49 = vsel %vm1321_vm13, %v1297_v45, %v1327_v42 }
 0x1d0   : > { %1347 = vst [vmem:[#allocation2 + $0x310] sm:$0xff] %v1326_v48  ;;  %2314 = vrot.lane.b32.xlu2 %v6391_v11, %s5828_s29  ;;  %2312 = vrot.lane.b32.xlu1 %v6339_v20, %s5828_s29 }
 0x1d1   : > { %1348 = vst [vmem:[#allocation2 + $0x318] sm:$0xff] %v1328_v49  ;;  %2304 = vrot.lane.b32.xlu0 %v6372_v55, %s5828_s29 }
 0x1d2   : > { %v6587_v52 = vpop.permute.xlu2 %2063  ;;  %v2137_v53 = vpop.permute.xlu1 %2136 }
 0x1d3   : > { %v2156_v58 = vrot.slane %v2137_v53, 4  ;;  %v6589_v47 = vpop.permute.xlu0 %1302  ;;  %v2078_v8 = vrot.slane %v6587_v52, 4 }
 0x1d4   : > { %v1316_v56 = vrot.slane %v6589_v47, 4 }
 0x1d5   : > { %v2166_v59 = vsel %vm323_vm0, %v2156_v58, %v2157_v50 }
 0x1d6   : > { %v2168_v54 = vsel %vm2167_vm14, %v2137_v53, %v2166_v59  ;;  %v1329_v60 = vsel %vm323_vm0, %v1315_v51, %v1316_v56 }
 0x1d7   : > { %2191 = vst [vmem:[#allocation2 + $0x5c0] sm:$0xff] %v2168_v54  ;;  %v1330_v62 = vsel %vm1321_vm13, %v6531_v14, %v1329_v60  ;;  %v1492_v14 = vrot.slane %v6560_v32, 4 }
 0x1d8   : > { %1349 = vst [vmem:[#allocation2 + $0x320] sm:$0xff] %v1330_v62  ;;  %1565 = vrot.lane.b32.xlu2 %v6339_v20, %s5829_s30  ;;  %1557 = vrot.lane.b32.xlu1 %v6372_v55, %s5829_s30 }
 0x1d9   : > { %1555 = vrot.lane.b32.xlu0 %v6316_v15, %s5829_s30 }
 0x1da   : > { %v6607_v63 = vpop.permute.xlu2 %1391  ;;  %v6609_v6 = vpop.permute.xlu1 %2148 }
 0x1db   : > { %v2162_v46 = vrot.slane %v6609_v6, 4  ;;  %v2147_v57 = vpop.permute.xlu0 %2146  ;;  %v1410_v7 = vrot.slane %v6607_v63, 4 }
 0x1dc   : > { %v2161_v10 = vrot.slane %v2147_v57, 4 }
 0x1de   : > { %v2175_v12 = vsel %vm323_vm0, %v2161_v10, %v2162_v46  ;;  %v5395_v26 = vld [vmem:[#allocation2 + $0x5c0] sm:$0xf] }
 0x1df   : > { %v2176_v9 = vsel %vm2167_vm14, %v2147_v57, %v2175_v12 }
 0x1e0   : > { %2195 = vst [vmem:[#allocation2 + $0x5e0] sm:$0xff] %v2176_v9  ;;  %2221 = vrot.lane.b32.xlu2 %v6372_v55, %s5830_s7  ;;  %2219 = vrot.lane.b32.xlu1 %v6316_v15, %s5830_s7  ;;  %v6633_v55 = vld [vmem:[%s5882_s26 + $0x14] sm:$0xff] }
 0x1e1   : > { %1567 = vrot.lane.b32.xlu0 %v6391_v11, %s5829_s30 }
 0x1e2   : > { %v6624_v18 = vpop.permute.xlu2 %1970  ;;  %v1483_v13 = vpop.permute.xlu1 %1482 }
 0x1e3   : > { %v1497_v19 = vrot.slane %v1483_v13, 4  ;;  %v6626_v5 = vpop.permute.xlu0 %1474  ;;  %v1990_v57 = vrot.slane %v6624_v18, 4 }
 0x1e4   : > { %v1493_v2 = vrot.slane %v6626_v5, 4 }
 0x1e5   : > { %v1511_v15 = vsel %vm323_vm0, %v1497_v19, %v1498_v17  ;;  %v5075_v19 = vld [vmem:[#allocation2 + $0x340] sm:$0xf] }
 0x1e6   : > { %v1512_v61 = vsel %vm1503_vm15, %v1483_v13, %v1511_v15  ;;  %v1502_v0 = vsel %vm323_vm0, %v1492_v14, %v1493_v2  ;;  %v5644_v15 = vld [vmem:[#allocation2 + $0x35c] sm:$0xf0] }
 0x1e7   : > { %1531 = vst [vmem:[#allocation2 + $0x3e0] sm:$0xff] %v1512_v61  ;;  %v1504_v22 = vsel %vm1503_vm15, %v6560_v32, %v1502_v0  ;;  %v5724_v28 = vld [vmem:[#allocation2 + $0x5dc] sm:$0xf0]  ;;  %v5640_v61 = vld [vmem:[#allocation2 + $0x344] sm:$0xf] }
 0x1e8   : > { %1527 = vst [vmem:[#allocation2 + $0x3c0] sm:$0xff] %v1504_v22  ;;  %1476 = vrot.lane.b32.xlu2 %v6633_v55, %s5819_s17  ;;  %2231 = vrot.lane.b32.xlu1 %v6391_v11, %s5830_s7  ;;  %v5396_v16 = vor.u32 %v5724_v28, %v5395_v26 }
 0x1e9   : > { %2229 = vrot.lane.b32.xlu0 %v6339_v20, %s5830_s7 }
 0x1ea   : > { %3799 = vmatpush.bf16.msra.mxu2 %v5396_v16  ;;  %v6647_v25 = vpop.permute.xlu2 %1982  ;;  %v6649_v4 = vpop.permute.xlu1 %2055  ;;  %v5077_v16 = vld [vmem:[#allocation2 + $0x360] sm:$0xf0] }
 0x1eb   : > { %v2074_v29 = vrot.slane %v6649_v4, 4  ;;  %v2054_v1 = vpop.permute.xlu0 %2053  ;;  %v1996_v62 = vrot.slane %v6647_v25, 4 }
 0x1ec   : > { %v2073_v30 = vrot.slane %v2054_v1, 4 }
 0x1ee   : > { %v2083_v11 = vsel %vm323_vm0, %v2073_v30, %v2074_v29  ;;  %v5660_v33 = vld [vmem:[#allocation2 + $0x3dc] sm:$0xf0]  ;;  %v5141_v35 = vld [vmem:[#allocation2 + $0x3e0] sm:$0xf0] }
 0x1ef   : > { %v2085_v20 = vsel %vm2084_vm1, %v2054_v1, %v2083_v11  ;;  %v5139_v24 = vld [vmem:[#allocation2 + $0x3c0] sm:$0xf]  ;;  %v5656_v32 = vld [vmem:[#allocation2 + $0x3c4] sm:$0xf] }
 0x1f0   : > { %2108 = vst [vmem:[#allocation2 + $0x580] sm:$0xff] %v2085_v20  ;;  %1403 = vrot.lane.b32.xlu2 %v6653_v31, %s5821_s19  ;;  %1393 = vrot.lane.b32.xlu1 %v6633_v55, %s5821_s19  ;;  %v5140_v36 = vor.u32 %v5660_v33, %v5139_v24  ;;  %v5144_v37 = vor.u32 %v5656_v32, %v5141_v35 }
 0x1f1   : > { %1486 = vrot.lane.b32.xlu0 %v6653_v31, %s5819_s17  ;;  %v5080_v32 = vor.u32 %v5640_v61, %v5077_v16  ;;  %v5011_v61 = vld [vmem:[#allocation2 + $0x2c0] sm:$0xf] }
 0x1f2   : > { %3785 = vmatpush.bf16.msra.mxu1 %v5140_v36  ;;  %3841 = vmatpush.bf16.msrb.mxu0 %v5144_v37  ;;  %v6667_v3 = vpop.permute.xlu2 %1897  ;;  %v1390_v38 = vpop.permute.xlu1 %1389 }
 0x1f3   : > { %v1409_v39 = vrot.slane %v1390_v38, 4  ;;  %v6669_v27 = vpop.permute.xlu0 %2065 }
 0x1f4   : > { %v2079_v43 = vrot.slane %v6669_v27, 4 }
 0x1f5   : > { %v1419_v34 = vsel %vm323_vm0, %v1409_v39, %v1410_v7 }
 0x1f6   : > { %v1421_v45 = vsel %vm1420_vm2, %v1390_v38, %v1419_v34  ;;  %v2092_v44 = vsel %vm323_vm0, %v2078_v8, %v2079_v43  ;;  %v5636_v38 = vld [vmem:[#allocation2 + $0x31c] sm:$0xf0] }
 0x1f7   : > { %1444 = vst [vmem:[#allocation2 + $0x380] sm:$0xff] %v1421_v45  ;;  %v2093_v40 = vsel %vm2084_vm1, %v6587_v52, %v2092_v44  ;;  %v5363_v59 = vld [vmem:[#allocation2 + $0x580] sm:$0xf]  ;;  %v5045_v45 = vld [vmem:[#allocation2 + $0x320] sm:$0xf0] }
 0x1f8   : > { %2112 = vst [vmem:[#allocation2 + $0x5a0] sm:$0xff] %v2093_v40  ;;  %2057 = vrot.lane.b32.xlu2 %v6633_v55, %s5820_s18  ;;  %2150 = vrot.lane.b32.xlu1 %v6653_v31, %s5818_s16  ;;  %v5043_v40 = vld [vmem:[#allocation2 + $0x300] sm:$0xf] }
 0x1f9   : > { %2140 = vrot.lane.b32.xlu0 %v6633_v55, %s5818_s16 }
 0x1fa   : > { %v6687_v42 = vpop.permute.xlu2 %1806  ;;  %v6689_v48 = vpop.permute.xlu1 %1401 }
 0x1fb   : > { %v1415_v49 = vrot.slane %v6689_v48, 4  ;;  %v1400_v51 = vpop.permute.xlu0 %1399 }
 0x1fc   : > { %v1414_v53 = vrot.slane %v1400_v51, 4 }
 0x1fe   : > { %v1428_v52 = vsel %vm323_vm0, %v1414_v53, %v1415_v49  ;;  %v5107_v26 = vld [vmem:[#allocation2 + $0x380] sm:$0xf]  ;;  %v5648_v28 = vld [vmem:[#allocation2 + $0x384] sm:$0xf]  ;;  %v5044_v53 = vor.u32 %v5636_v38, %v5043_v40 }
 0x1ff   : > { %v1429_v58 = vsel %vm1420_vm2, %v1400_v51, %v1428_v52  ;;  %v5716_v54 = vld [vmem:[#allocation2 + $0x59c] sm:$0xf0] }
 0x200   : > { %1448 = vst [vmem:[#allocation2 + $0x3a0] sm:$0xff] %v1429_v58  ;;  %1974 = vrot.lane.b32.xlu2 %v6633_v55, %s5822_s20  ;;  %1304 = vrot.lane.b32.xlu1 %v6327_v21, %s5817_s15  ;;  %v5364_v60 = vor.u32 %v5716_v54, %v5363_v59  ;;  %v5632_v58 = vld [vmem:[#allocation2 + $0x304] sm:$0xf]  ;;  %v1825_v59 = vrot.slane %v6687_v42, 4  ;;  %v5612_v38 = vld [vmem:[#allocation2 + $0x25c] sm:$0xf0] }
 0x201   : > { %2067 = vrot.lane.b32.xlu0 %v6653_v31, %s5820_s18  ;;  %v5048_v54 = vor.u32 %v5632_v58, %v5045_v45  ;;  %v4947_v40 = vld [vmem:[#allocation2 + $0x240] sm:$0xf] }
 0x202   : > { %3800 = vmatpush.bf16.msra.mxu2 %v5364_v60  ;;  %v6704_v10 = vpop.permute.xlu2 %1721  ;;  %v1981_v12 = vpop.permute.xlu1 %1980  ;;  %v5628_v60 = vld [vmem:[#allocation2 + $0x2dc] sm:$0xf0] }
 0x203   : > { %v1995_v9 = vrot.slane %v1981_v12, 4  ;;  %v6706_v14 = vpop.permute.xlu0 %1972 }
 0x204   : > { %v1991_v13 = vrot.slane %v6706_v14, 4 }
 0x205   : > { %v2009_v21 = vsel %vm323_vm0, %v1995_v9, %v1996_v62 }
 0x206   : > { %v2010_v0 = vsel %vm2001_vm3, %v1981_v12, %v2009_v21  ;;  %v2000_v22 = vsel %vm323_vm0, %v1990_v57, %v1991_v13  ;;  %v1912_v57 = vrot.slane %v6667_v3, 4  ;;  %v5013_v21 = vld [vmem:[#allocation2 + $0x2e0] sm:$0xf0] }
 0x207   : > { %2029 = vst [vmem:[#allocation2 + $0x560] sm:$0xff] %v2010_v0  ;;  %v2002_v1 = vsel %vm2001_vm3, %v6624_v18, %v2000_v22  ;;  %v5652_v30 = vld [vmem:[#allocation2 + $0x39c] sm:$0xf0]  ;;  %v5109_v11 = vld [vmem:[#allocation2 + $0x3a0] sm:$0xf0]  ;;  %v5076_v18 = vor.u32 %v5644_v15, %v5075_v19  ;;  %v5012_v22 = vor.u32 %v5628_v60, %v5011_v61 }
 0x208   : > { %2025 = vst [vmem:[#allocation2 + $0x540] sm:$0xff] %v2002_v1  ;;  %1901 = vrot.lane.b32.xlu2 %v6653_v31, %s5823_s23  ;;  %1891 = vrot.lane.b32.xlu1 %v6633_v55, %s5823_s23  ;;  %v5108_v33 = vor.u32 %v5652_v30, %v5107_v26  ;;  %v5112_v35 = vor.u32 %v5648_v28, %v5109_v11  ;;  %v5624_v26 = vld [vmem:[#allocation2 + $0x2c4] sm:$0xf]  ;;  %v5620_v1 = vld [vmem:[#allocation2 + $0x29c] sm:$0xf0] }
 0x209   : > { %1984 = vrot.lane.b32.xlu0 %v6653_v31, %s5822_s20  ;;  %v5016_v16 = vor.u32 %v5624_v26, %v5013_v21 }
 0x20a   : > { %3786 = vmatpush.bf16.msra.mxu1 %v5108_v33  ;;  %3842 = vmatpush.bf16.msrb.mxu0 %v5112_v35  ;;  %v6724_v20 = vpop.permute.xlu2 %1733  ;;  %v6726_v24 = vpop.permute.xlu1 %1889  ;;  %v4981_v33 = vld [vmem:[#allocation2 + $0x2a0] sm:$0xf0] }
 0x20b   : > { %v1908_v36 = vrot.slane %v6726_v24, 4  ;;  %v1888_v37 = vpop.permute.xlu0 %1887 }
 0x20c   : > { %v1907_v8 = vrot.slane %v1888_v37, 4 }
 0x20e   : > { %v1917_v39 = vsel %vm323_vm0, %v1907_v8, %v1908_v36  ;;  %3787 = vmatpush.bf16.msra.mxu1 %v5076_v18  ;;  %3843 = vmatpush.bf16.msrb.mxu0 %v5080_v32  ;;  %v5708_v34 = vld [vmem:[#allocation2 + $0x55c] sm:$0xf0] }
 0x20f   : > { %v1919_v44 = vsel %vm1918_vm4, %v1888_v37, %v1917_v39  ;;  %v5331_v51 = vld [vmem:[#allocation2 + $0x540] sm:$0xf]  ;;  %v5616_v37 = vld [vmem:[#allocation2 + $0x284] sm:$0xf] }
 0x210   : > { %1942 = vst [vmem:[#allocation2 + $0x500] sm:$0xff] %v1919_v44  ;;  %1725 = vrot.lane.b32.xlu2 %v6633_v55, %s5825_s25  ;;  %1818 = vrot.lane.b32.xlu1 %v6653_v31, %s5824_s24  ;;  %v5332_v52 = vor.u32 %v5708_v34, %v5331_v51  ;;  %v4979_v18 = vld [vmem:[#allocation2 + $0x280] sm:$0xf]  ;;  %v4984_v8 = vor.u32 %v5616_v37, %v4981_v33  ;;  %v4949_v34 = vld [vmem:[#allocation2 + $0x260] sm:$0xf0] }
 0x211   : > { %1808 = vrot.lane.b32.xlu0 %v6633_v55, %s5824_s24  ;;  %v4980_v32 = vor.u32 %v5620_v1, %v4979_v18  ;;  %v5720_v1 = vld [vmem:[#allocation2 + $0x5c4] sm:$0xf] }
 0x212   : > { %3788 = vmatpush.bf16.msra.mxu1 %v5044_v53  ;;  %3801 = vmatpush.bf16.msra.mxu2 %v5332_v52  ;;  %v6741_v12 = vpop.permute.xlu2 %2395  ;;  %v1805_v9 = vpop.permute.xlu1 %1804  ;;  %v4948_v53 = vor.u32 %v5612_v38, %v4947_v40  ;;  %v5608_v52 = vld [vmem:[#allocation2 + $0x244] sm:$0xf] }
 0x213   : > { %3844 = vmatpush.bf16.msrb.mxu0 %v5048_v54  ;;  %v1824_v19 = vrot.slane %v1805_v9, 4  ;;  %v6743_v15 = vpop.permute.xlu0 %1899  ;;  %v4952_v58 = vor.u32 %v5608_v52, %v4949_v34  ;;  %v5604_v54 = vld [vmem:[#allocation2 + $0x21c] sm:$0xf0]  ;;  %v5365_v37 = vld [vmem:[#allocation2 + $0x5a0] sm:$0xf0] }
 0x214   : > { %v1913_v0 = vrot.slane %v6743_v15, 4 }
 0x215   : > { %v1834_v28 = vsel %vm323_vm0, %v1824_v19, %v1825_v59  ;;  %v4915_v19 = vld [vmem:[#allocation2 + $0x200] sm:$0xf] }
 0x216   : > { %v1836_v30 = vsel %vm1835_vm5, %v1805_v9, %v1834_v28  ;;  %v1926_v11 = vsel %vm323_vm0, %v1912_v57, %v1913_v0  ;;  %3789 = vmatpush.bf16.msra.mxu1 %v5012_v22  ;;  %v4917_v57 = vld [vmem:[#allocation2 + $0x220] sm:$0xf0]  ;;  %v4916_v26 = vor.u32 %v5604_v54, %v4915_v19 }
 0x217   : > { %1859 = vst [vmem:[#allocation2 + $0x4c0] sm:$0xff] %v1836_v30  ;;  %v1927_v35 = vsel %vm1918_vm4, %v6667_v3, %v1926_v11  ;;  %3845 = vmatpush.bf16.msrb.mxu0 %v5016_v16  ;;  %v5397_v9 = vld [vmem:[#allocation2 + $0x5e0] sm:$0xf0]  ;;  %v5299_v61 = vld [vmem:[#allocation2 + $0x500] sm:$0xf]  ;;  %v8028_v30 = vrot.slane %v6724_v20, 4 }
 0x218   : > { %1946 = vst [vmem:[#allocation2 + $0x520] sm:$0xff] %v1927_v35  ;;  %2399 = vrot.lane.b32.xlu2 %v6653_v31, %s5826_s27  ;;  %2389 = vrot.lane.b32.xlu1 %v6633_v55, %s5826_s27  ;;  %v5600_v16 = vld [vmem:[#allocation2 + $0x204] sm:$0xf]  ;;  %v5400_v33 = vor.u32 %v5720_v1, %v5397_v9  ;;  %v1741_v35 = vrot.slane %v6704_v10, 4 }
 0x219   : > { %1735 = vrot.lane.b32.xlu0 %v6653_v31, %s5825_s25  ;;  %v4920_v11 = vor.u32 %v5600_v16, %v4917_v57  ;;  %v5333_v54 = vld [vmem:[#allocation2 + $0x560] sm:$0xf0] }
 0x21a   : > { %3790 = vmatpush.bf16.msra.mxu1 %v4980_v32  ;;  %v6761_v39 = vpop.permute.xlu2 %1640  ;;  %v6763_v3 = vpop.permute.xlu1 %1816  ;;  %v5696_v1 = vld [vmem:[#allocation2 + $0x504] sm:$0xf] }
 0x21b   : > { %3846 = vmatpush.bf16.msrb.mxu0 %v4984_v8  ;;  %v1830_v45 = vrot.slane %v6763_v3, 4  ;;  %v1815_v44 = vpop.permute.xlu0 %1814 }
 0x21c   : > { %v1829_v51 = vrot.slane %v1815_v44, 4 }
 0x21e   : > { %v1843_v60 = vsel %vm323_vm0, %v1829_v51, %v1830_v45  ;;  %3791 = vmatpush.bf16.msra.mxu1 %v4948_v53  ;;  %v5267_v57 = vld [vmem:[#allocation2 + $0x4c0] sm:$0xf] }
 0x21f   : > { %v1844_v21 = vsel %vm1835_vm5, %v1815_v44, %v1843_v60  ;;  %3847 = vmatpush.bf16.msrb.mxu0 %v4952_v58  ;;  %v5700_v22 = vld [vmem:[#allocation2 + $0x51c] sm:$0xf0]  ;;  %v5712_v44 = vld [vmem:[#allocation2 + $0x584] sm:$0xf] }
 0x220   : > { %1863 = vst [vmem:[#allocation2 + $0x4e0] sm:$0xff] %v1844_v21  ;;  %2306 = vrot.lane.b32.xlu2 %v6633_v55, %s5828_s29  ;;  %1652 = vrot.lane.b32.xlu1 %v6653_v31, %s5827_s28  ;;  %v5300_v28 = vor.u32 %v5700_v22, %v5299_v61  ;;  %v5368_v51 = vor.u32 %v5712_v44, %v5365_v37  ;;  %v5704_v58 = vld [vmem:[#allocation2 + $0x544] sm:$0xf] }
 0x221   : > { %1642 = vrot.lane.b32.xlu0 %v6633_v55, %s5827_s28  ;;  %v5336_v19 = vor.u32 %v5704_v58, %v5333_v54  ;;  %v5301_v22 = vld [vmem:[#allocation2 + $0x520] sm:$0xf0]  ;;  %v2410_v58 = vrot.slane %v6741_v12, 4 }
 0x222   : > { %3792 = vmatpush.bf16.msra.mxu1 %v4916_v26  ;;  %3802 = vmatpush.bf16.msra.mxu2 %v5300_v28  ;;  %v6778_v18 = vpop.permute.xlu2 %2302  ;;  %v1732_v32 = vpop.permute.xlu1 %1731 }
 0x223   : > { %3848 = vmatpush.bf16.msrb.mxu0 %v4920_v11  ;;  %v1746_v8 = vrot.slane %v1732_v32, 4  ;;  %v6780_v38 = vpop.permute.xlu0 %1723  ;;  %v5304_v11 = vor.u32 %v5696_v1, %v5301_v22 }
 0x224   : > { %v1742_v34 = vrot.slane %v6780_v38, 4 }
 0x225   : > { %v1760_v40 = vsel %vm323_vm0, %v1746_v8, %v8028_v30 }
 0x226   : > { %3855 = vmatpush.bf16.msrb.mxu1 %v5400_v33  ;;  %v1761_v53 = vsel %vm1752_vm6, %v1732_v32, %v1760_v40  ;;  %v1751_v52 = vsel %vm323_vm0, %v1741_v35, %v1742_v34  ;;  %v6804_v33 = vld [vmem:[%s5882_s26 + $0x1c] sm:$0xff] }
 0x227   : > { %1780 = vst [vmem:[#allocation2 + $0x4a0] sm:$0xff] %v1761_v53  ;;  %v1753_v60 = vsel %vm1752_vm6, %v6704_v10, %v1751_v52  ;;  %v5692_v9 = vld [vmem:[#allocation2 + $0x4dc] sm:$0xf0]  ;;  %v5269_v37 = vld [vmem:[#allocation2 + $0x4e0] sm:$0xf0]  ;;  %v8019_v53 = vrot.slane %v6761_v39, 4 }
 0x228   : > { %1776 = vst [vmem:[#allocation2 + $0x480] sm:$0xff] %v1753_v60  ;;  %1569 = vrot.lane.b32.xlu2 %v6653_v31, %s5829_s30  ;;  %1559 = vrot.lane.b32.xlu1 %v6633_v55, %s5829_s30  ;;  %v5268_v21 = vor.u32 %v5692_v9, %v5267_v57 }
 0x229   : > { %2316 = vrot.lane.b32.xlu0 %v6653_v31, %s5828_s29 }
 0x22a   : > { %3856 = vmatpush.bf16.msrb.mxu1 %v5368_v51  ;;  %3803 = vmatpush.bf16.msra.mxu2 %v5268_v21  ;;  %v6798_v61 = vpop.permute.xlu2 %2314  ;;  %v6800_v10 = vpop.permute.xlu1 %2387  ;;  %v5688_v51 = vld [vmem:[#allocation2 + $0x4c4] sm:$0xf] }
 0x22b   : > { %v8029_v26 = vrot.slane %v6800_v10, 4  ;;  %v2386_v28 = vpop.permute.xlu0 %2385  ;;  %v5272_v52 = vor.u32 %v5688_v51, %v5269_v37 }
 0x22c   : > { %v2405_v16 = vrot.slane %v2386_v28, 4 }
 0x22e   : > { %3857 = vmatpush.bf16.msrb.mxu1 %v5336_v19  ;;  %v2415_v35 = vsel %vm323_vm0, %v2405_v16, %v8029_v26  ;;  %v5684_v32 = vld [vmem:[#allocation2 + $0x49c] sm:$0xf0]  ;;  %v5237_v9 = vld [vmem:[#allocation2 + $0x4a0] sm:$0xf0] }
 0x22f   : > { %v2417_v8 = vsel %vm2416_vm7, %v2386_v28, %v2415_v35  ;;  %v5235_v44 = vld [vmem:[#allocation2 + $0x480] sm:$0xf]  ;;  %v5680_v57 = vld [vmem:[#allocation2 + $0x484] sm:$0xf] }
 0x230   : > { %2440 = vst [vmem:[#allocation2 + $0x680] sm:$0xff] %v2417_v8  ;;  %1478 = vrot.lane.b32.xlu2 %v6804_v33, %s5819_s17  ;;  %2233 = vrot.lane.b32.xlu1 %v6653_v31, %s5830_s7  ;;  %v5236_v40 = vor.u32 %v5684_v32, %v5235_v44  ;;  %v5240_v22 = vor.u32 %v5680_v57, %v5237_v9  ;;  %v6827_v28 = vld [vmem:[%s5882_s26 + $0x44] sm:$0xff]  ;;  %v2322_v57 = vrot.slane %v6778_v18, 4 }
 0x231   : > { %2223 = vrot.lane.b32.xlu0 %v6633_v55, %s5830_s7 }
 0x232   : > { %3858 = vmatpush.bf16.msrb.mxu1 %v5304_v11  ;;  %3804 = vmatpush.bf16.msra.mxu2 %v5236_v40  ;;  %v6818_v54 = vpop.permute.xlu2 %1565  ;;  %v1639_v60 = vpop.permute.xlu1 %1638 }
 0x233   : > { %v1658_v21 = vrot.slane %v1639_v60, 4  ;;  %v6820_v31 = vpop.permute.xlu0 %2397 }
 0x234   : > { %v2411_v19 = vrot.slane %v6820_v31, 4 }
 0x235   : > { %v1668_v55 = vsel %vm323_vm0, %v1658_v21, %v8019_v53 }
 0x236   : > { %3859 = vmatpush.bf16.msrb.mxu1 %v5272_v52  ;;  %v1670_v16 = vsel %vm1669_vm8, %v1639_v60, %v1668_v55  ;;  %v2424_v1 = vsel %vm323_vm0, %v2410_v58, %v2411_v19  ;;  %v8021_v60 = vrot.slane %v6798_v61, 4 }
 0x237   : > { %1693 = vst [vmem:[#allocation2 + $0x440] sm:$0xff] %v1670_v16  ;;  %v2425_v11 = vsel %vm2416_vm7, %v6741_v12, %v2424_v1  ;;  %v5491_v51 = vld [vmem:[#allocation2 + $0x680] sm:$0xf] }
 0x238   : > { %2444 = vst [vmem:[#allocation2 + $0x6a0] sm:$0xff] %v2425_v11  ;;  %2152 = vrot.lane.b32.xlu2 %v6827_v28, %s5818_s16  ;;  %2142 = vrot.lane.b32.xlu1 %v6804_v33, %s5818_s16 }
 0x239   : > { %1488 = vrot.lane.b32.xlu0 %v6827_v28, %s5819_s17 }
 0x23a   : > { %3860 = vmatpush.bf16.msrb.mxu1 %v5240_v22  ;;  %v6841_v35 = vpop.permute.xlu2 %2221  ;;  %v6843_v32 = vpop.permute.xlu1 %1650 }
 0x23b   : > { %v8027_v37 = vrot.slane %v6843_v32, 4  ;;  %v1649_v8 = vpop.permute.xlu0 %1648 }
 0x23c   : > { %v1663_v44 = vrot.slane %v1649_v8, 4 }
 0x23e   : > { %v1677_v12 = vsel %vm323_vm0, %v1663_v44, %v8027_v37 }
 0x23f   : > { %v1678_v40 = vsel %vm1669_vm8, %v1649_v8, %v1677_v12  ;;  %v5748_v52 = vld [vmem:[#allocation2 + $0x69c] sm:$0xf0] }
 0x240   : > { %1697 = vst [vmem:[#allocation2 + $0x460] sm:$0xff] %v1678_v40  ;;  %2059 = vrot.lane.b32.xlu2 %v6804_v33, %s5820_s18  ;;  %1405 = vrot.lane.b32.xlu1 %v6827_v28, %s5821_s19  ;;  %v5492_v58 = vor.u32 %v5748_v52, %v5491_v51  ;;  %v5203_v51 = vld [vmem:[#allocation2 + $0x440] sm:$0xf]  ;;  %v5672_v52 = vld [vmem:[#allocation2 + $0x444] sm:$0xf] }
 0x241   : > { %1395 = vrot.lane.b32.xlu0 %v6804_v33, %s5821_s19 }
 0x242   : > { %3818 = vmatpush.bf16.msra.mxu3 %v5492_v58  ;;  %v6858_v9 = vpop.permute.xlu2 %1476  ;;  %v2313_v21 = vpop.permute.xlu1 %2312 }
 0x243   : > { %v8030_v55 = vrot.slane %v6858_v9, 4  ;;  %v2327_v22 = vrot.slane %v2313_v21, 4  ;;  %v6861_v16 = vpop.permute.xlu0 %2304 }
 0x244   : > { %v2323_v1 = vrot.slane %v6861_v16, 4 }
 0x245   : > { %v1505_v11 = vsel %vm323_vm0, %v1493_v2, %v8030_v55  ;;  %v2341_v8 = vsel %vm323_vm0, %v2327_v22, %v8021_v60 }
 0x246   : > { %v1506_v44 = vsel %vm1503_vm15, %v6626_v5, %v1505_v11  ;;  %v2342_v12 = vsel %vm2333_vm9, %v2313_v21, %v2341_v8  ;;  %v2332_v40 = vsel %vm323_vm0, %v2322_v57, %v2323_v1 }
 0x247   : > { %1528 = vst [vmem:[#allocation2 + $0x3c8] sm:$0xff] %v1506_v44  ;;  %v2334_v58 = vsel %vm2333_vm9, %v6778_v18, %v2332_v40  ;;  %v5676_v2 = vld [vmem:[#allocation2 + $0x45c] sm:$0xf0]  ;;  %v5205_v53 = vld [vmem:[#allocation2 + $0x460] sm:$0xf0] }
 0x248   : > { %2361 = vst [vmem:[#allocation2 + $0x660] sm:$0xff] %v2342_v12  ;;  %1986 = vrot.lane.b32.xlu2 %v6827_v28, %s5822_s20  ;;  %1976 = vrot.lane.b32.xlu1 %v6804_v33, %s5822_s20  ;;  %v5204_v5 = vor.u32 %v5676_v2, %v5203_v51  ;;  %v5208_v21 = vor.u32 %v5672_v52, %v5205_v53  ;;  %v1278_v51 = vld [vmem:[%s5882_s26 + $0x40] sm:$0xff] }
 0x249   : > { %2357 = vst [vmem:[#allocation2 + $0x640] sm:$0xff] %v2334_v58  ;;  %2069 = vrot.lane.b32.xlu0 %v6827_v28, %s5820_s18 }
 0x24a   : > { %3805 = vmatpush.bf16.msra.mxu2 %v5204_v5  ;;  %3861 = vmatpush.bf16.msrb.mxu1 %v5208_v21  ;;  %v6886_v57 = vpop.permute.xlu2 %1403  ;;  %v6888_v18 = vpop.permute.xlu1 %1557  ;;  %v1580_v5 = vrot.slane %v6818_v54, 4 }
 0x24b   : > { %v8020_v22 = vrot.slane %v6886_v57, 4  ;;  %v8025_v11 = vrot.slane %v6888_v18, 4  ;;  %v1556_v8 = vpop.permute.xlu0 %1555 }
 0x24c   : > { %v1575_v44 = vrot.slane %v1556_v8, 4 }
 0x24d   : > { %v1430_v53 = vsel %vm323_vm0, %v1415_v49, %v8020_v22 }
 0x24e   : > { %v1431_v12 = vsel %vm1420_vm2, %v6689_v48, %v1430_v53  ;;  %v1585_v40 = vsel %vm323_vm0, %v1575_v44, %v8025_v11  ;;  %v8023_v48 = vrot.slane %v6841_v35, 4  ;;  %v5744_v11 = vld [vmem:[#allocation2 + $0x684] sm:$0xf] }
 0x24f   : > { %1449 = vst [vmem:[#allocation2 + $0x3a8] sm:$0xff] %v1431_v12  ;;  %v1587_v52 = vsel %vm1586_vm10, %v1556_v8, %v1585_v40  ;;  %v5740_v58 = vld [vmem:[#allocation2 + $0x65c] sm:$0xf0]  ;;  %v5461_v55 = vld [vmem:[#allocation2 + $0x660] sm:$0xf0] }
 0x250   : > { %1610 = vst [vmem:[#allocation2 + $0x400] sm:$0xff] %v1587_v52  ;;  %1903 = vrot.lane.b32.xlu2 %v6827_v28, %s5823_s23  ;;  %1893 = vrot.lane.b32.xlu1 %v6804_v33, %s5823_s23  ;;  %v5459_v49 = vld [vmem:[#allocation2 + $0x640] sm:$0xf]  ;;  %v5736_v26 = vld [vmem:[#allocation2 + $0x644] sm:$0xf] }
 0x251   : > { %1306 = vrot.lane.b32.xlu0 %v1278_v51, %s5817_s15  ;;  %v5460_v2 = vor.u32 %v5740_v58, %v5459_v49  ;;  %v1354_v58 = vld [vmem:[%s5882_s26 + $0xc] sm:$0xff] }
 0x252   : > { %v6911_v21 = vpop.permute.xlu2 %2057  ;;  %v2220_v8 = vpop.permute.xlu1 %2219  ;;  %1362 = vst [vmem:[#allocation2 + $0x348] sm:$0xff] %v1354_v58 }
 0x253   : > { %3819 = vmatpush.bf16.msra.mxu3 %v5460_v2  ;;  %v8026_v44 = vrot.slane %v6911_v21, 4  ;;  %v2239_v53 = vrot.slane %v2220_v8, 4  ;;  %v6914_v12 = vpop.permute.xlu0 %1567 }
 0x254   : > { %v1581_v40 = vrot.slane %v6914_v12, 4 }
 0x255   : > { %v2086_v51 = vsel %vm323_vm0, %v2074_v29, %v8026_v44  ;;  %v2249_v52 = vsel %vm323_vm0, %v2239_v53, %v8023_v48  ;;  %v1358_v29 = vld [vmem:[%s5882_s26 + $0x34] sm:$0xff] }
 0x256   : > { %v2087_v49 = vsel %vm2084_vm1, %v6649_v4, %v2086_v51  ;;  %v2251_v2 = vsel %vm2250_vm11, %v2220_v8, %v2249_v52  ;;  %v1594_v22 = vsel %vm323_vm0, %v1580_v5, %v1581_v40  ;;  %1366 = vst [vmem:[#allocation2 + $0x368] sm:$0xff] %v1358_v29  ;;  %v5493_v29 = vld [vmem:[#allocation2 + $0x6a0] sm:$0xf0] }
 0x257   : > { %2109 = vst [vmem:[#allocation2 + $0x588] sm:$0xff] %v2087_v49  ;;  %v1595_v60 = vsel %vm1586_vm10, %v6818_v54, %v1594_v22  ;;  %v4643_v54 = vld [vmem:[%s8013_s1] sm:$0xf]  ;;  %v5534_v22 = vld [vmem:[%s8013_s1 + $0xc] sm:$0xf0] }
 0x258   : > { %2274 = vst [vmem:[#allocation2 + $0x600] sm:$0xff] %v2251_v2  ;;  %2391 = vrot.lane.b32.xlu2 %v6804_v33, %s5826_s27  ;;  %1820 = vrot.lane.b32.xlu1 %v6827_v28, %s5824_s24  ;;  %v6953_v51 = vor.u32 %v5534_v22, %v4643_v54  ;;  %v4651_v54 = vld [vmem:[%s8013_s1 + $0x8] sm:$0xf]  ;;  %v5535_v22 = vld [vmem:[%s8013_s1 + $0x14] sm:$0xf0] }
 0x259   : > { %1614 = vst [vmem:[#allocation2 + $0x420] sm:$0xff] %v1595_v60  ;;  %1810 = vrot.lane.b32.xlu0 %v6804_v33, %s5824_s24  ;;  %v5664_v48 = vld [vmem:[#allocation2 + $0x404] sm:$0xf] }
 0x25a   : > { %v6941_v4 = vpop.permute.xlu2 %1974  ;;  %v6943_v5 = vpop.permute.xlu1 %2231  ;;  %3779 = vmatmul.bf16.vlgmr.msra.gmra.mxu0 %v6953_v51 }
 0x25b   : > { %v8022_v8 = vrot.slane %v6941_v4, 4  ;;  %v8024_v60 = vrot.slane %v6943_v5, 4  ;;  %v2230_v53 = vpop.permute.xlu0 %2229 }
 0x25c   : > { %v2244_v52 = vrot.slane %v2230_v53, 4 }
 0x25d   : > { %v2003_v58 = vsel %vm323_vm0, %v1991_v13, %v8022_v8  ;;  %v5171_v8 = vld [vmem:[#allocation2 + $0x400] sm:$0xf] }
 0x25e   : > { %v2004_v49 = vsel %vm2001_vm3, %v6706_v14, %v2003_v58  ;;  %v2258_v2 = vsel %vm323_vm0, %v2244_v52, %v8024_v60 }
 0x25f   : > { %2026 = vst [vmem:[#allocation2 + $0x548] sm:$0xff] %v2004_v49  ;;  %v2259_v13 = vsel %vm2250_vm11, %v2230_v53, %v2258_v2  ;;  %v5496_v2 = vor.u32 %v5744_v11, %v5493_v29 }
 0x260   : > { %2278 = vst [vmem:[#allocation2 + $0x620] sm:$0xff] %v2259_v13  ;;  %1737 = vrot.lane.b32.xlu2 %v6827_v28, %s5825_s25  ;;  %1727 = vrot.lane.b32.xlu1 %v6804_v33, %s5825_s25  ;;  %v5668_v14 = vld [vmem:[#allocation2 + $0x41c] sm:$0xf0]  ;;  %v5173_v52 = vld [vmem:[#allocation2 + $0x420] sm:$0xf0]  ;;  %v6983_v13 = vor.u32 %v5535_v22, %v4651_v54  ;;  %v5464_v22 = vor.u32 %v5736_v26, %v5461_v55 }
 0x261   : > { %2401 = vrot.lane.b32.xlu0 %v6827_v28, %s5826_s27  ;;  %v5172_v58 = vor.u32 %v5668_v14, %v5171_v8  ;;  %v5176_v60 = vor.u32 %v5664_v48, %v5173_v52  ;;  %v5592_v14 = vld [vmem:[#allocation2 + $0x1c4] sm:$0xf]  ;;  %v5533_v26 = vld [vmem:[%s8013_s1 + $0xc] sm:$0xf]  ;;  %v4653_v55 = vld [vmem:[%s8013_s1 + $0x18] sm:$0xf0] }
 0x262   : > { %v6979_v49 = vpop.permute.xlu2 %1901  ;;  %v6981_v53 = vpop.permute.xlu1 %1393  ;;  %v4885_v52 = vld [vmem:[#allocation2 + $0x1e0] sm:$0xf0] }
 0x263   : > { %3806 = vmatpush.bf16.msra.mxu2 %v5172_v58  ;;  %3862 = vmatpush.bf16.msrb.mxu1 %v5176_v60  ;;  %v1914_v44 = vrot.slane %v6979_v49, 4  ;;  %v8033_v37 = vrot.slane %v6981_v53, 4  ;;  %v6987_v30 = vpop.permute.xlu0 %1486  ;;  %v5728_v58 = vld [vmem:[#allocation2 + $0x604] sm:$0xf] }
 0x264   : > { %v8034_v48 = vrot.slane %v6987_v30, 4 }
 0x265   : > { %v1928_v11 = vsel %vm323_vm0, %v1913_v0, %v1914_v44  ;;  %v1422_v8 = vsel %vm323_vm0, %v1410_v7, %v8033_v37  ;;  %v5427_v0 = vld [vmem:[#allocation2 + $0x600] sm:$0xf]  ;;  %v1456_v37 = vld [vmem:[%s5882_s26 + $0x24] sm:$0xf] }
 0x266   : > { %v1929_v60 = vsel %vm1918_vm4, %v6743_v15, %v1928_v11  ;;  %v1423_v29 = vsel %vm1420_vm2, %v6607_v63, %v1422_v8  ;;  %v1513_v54 = vsel %vm323_vm0, %v1498_v17, %v8034_v48  ;;  %3807 = vmatmul.bf16.vlgmr.msra.gmra.mxu2 %v6983_v13  ;;  %v7024_v11 = vor.u32 %v5533_v26, %v4653_v55  ;;  %v5576_v26 = vld [vmem:[#allocation2 + $0x144] sm:$0xf] }
 0x267   : > { %3874 = vmatpush.bf16.msrb.mxu2 %v5496_v2  ;;  %1947 = vst [vmem:[#allocation2 + $0x528] sm:$0xff] %v1929_v60  ;;  %v1514_v7 = vsel %vm1503_vm15, %v6572_v41, %v1513_v54  ;;  %v5732_v15 = vld [vmem:[#allocation2 + $0x61c] sm:$0xf0]  ;;  %v5429_v2 = vld [vmem:[#allocation2 + $0x620] sm:$0xf0]  ;;  %v4888_v41 = vor.u32 %v5592_v14, %v4885_v52 }
 0x268   : > { %1445 = vst [vmem:[#allocation2 + $0x388] sm:$0xff] %v1423_v29  ;;  %1644 = vrot.lane.b32.xlu2 %v6804_v33, %s5827_s28  ;;  %v5428_v63 = vor.u32 %v5732_v15, %v5427_v0  ;;  %v5432_v17 = vor.u32 %v5728_v58, %v5429_v2  ;;  %2318 = vrot.lane.b32.xlu1 %v6827_v28, %s5828_s29  ;;  %v4853_v29 = vld [vmem:[#allocation2 + $0x1a0] sm:$0xf0] }
 0x269   : > { %1532 = vst [vmem:[#allocation2 + $0x3e8] sm:$0xff] %v1514_v7  ;;  %2308 = vrot.lane.b32.xlu0 %v6804_v33, %s5828_s29  ;;  %v5584_v14 = vld [vmem:[#allocation2 + $0x184] sm:$0xf] }
 0x26a   : > { %3820 = vmatpush.bf16.msra.mxu3 %v5428_v63  ;;  %v7026_v8 = vpop.permute.xlu2 %1725  ;;  %v7028_v60 = vpop.permute.xlu1 %2150  ;;  %v4856_v15 = vor.u32 %v5584_v14, %v4853_v29  ;;  %v4789_v14 = vld [vmem:[#allocation2 + $0x120] sm:$0xf0] }
 0x26b   : > { %3875 = vmatpush.bf16.msrb.mxu2 %v5464_v22  ;;  %v8031_v54 = vrot.slane %v7026_v8, 4  ;;  %v2163_v22 = vrot.slane %v7028_v60, 4  ;;  %v7032_v0 = vpop.permute.xlu0 %2140  ;;  %v4757_v48 = vld [vmem:[#allocation2 + $0xe0] sm:$0xf0] }
 0x26c   : > { %v2158_v58 = vrot.slane %v7032_v0, 4 }
 0x26d   : > { %v1754_v52 = vsel %vm323_vm0, %v1742_v34, %v8031_v54  ;;  %v2177_v7 = vsel %vm323_vm0, %v2162_v46, %v2163_v22  ;;  %5521 = vmatmul.msk.bf16.vlgmr.msra.gmra.mxu3 %vm3767_vm12, %v7024_v11 }
 0x26e   : > { %3827 = vmatpush.bf16.msrb.mxu3 %v4888_v41  ;;  %v1755_v2 = vsel %vm1752_vm6, %v6780_v38, %v1754_v52  ;;  %v2178_v63 = vsel %vm2167_vm14, %v6609_v6, %v2177_v7  ;;  %v2169_v34 = vsel %vm323_vm0, %v2157_v50, %v2158_v58  ;;  %v5147_v38 = vld [vmem:[#allocation2 + $0x3c8] sm:$0xf] }
 0x26f   : > { %3876 = vmatpush.bf16.msrb.mxu2 %v5432_v17  ;;  %v4821_v17 = vld [vmem:[#allocation2 + $0x160] sm:$0xf0]  ;;  %1777 = vst [vmem:[#allocation2 + $0x488] sm:$0xff] %v1755_v2  ;;  %v2170_v46 = vsel %vm2167_vm14, %v6544_v23, %v2169_v34  ;;  %v5115_v29 = vld [vmem:[#allocation2 + $0x388] sm:$0xf] }
 0x270   : > { %2196 = vst [vmem:[#allocation2 + $0x5e8] sm:$0xff] %v2178_v63  ;;  %2235 = vrot.lane.b32.xlu2 %v6827_v28, %s5830_s7  ;;  %v5661_v55 = vld [vmem:[#allocation2 + $0x3e4] sm:$0xf0]  ;;  %2225 = vrot.lane.b32.xlu1 %v6804_v33, %s5830_s7  ;;  %v4824_v6 = vor.u32 %v5576_v26, %v4821_v17  ;;  %v5568_v34 = vld [vmem:[#allocation2 + $0x104] sm:$0xf] }
 0x271   : > { %2192 = vst [vmem:[#allocation2 + $0x5c8] sm:$0xff] %v2170_v46  ;;  %1654 = vrot.lane.b32.xlu0 %v6827_v28, %s5827_s28  ;;  %v5148_v50 = vor.u32 %v5661_v55, %v5147_v38  ;;  %v5653_v63 = vld [vmem:[#allocation2 + $0x3a4] sm:$0xf0]  ;;  %v4792_v38 = vor.u32 %v5568_v34, %v4789_v14 }
 0x272   : > { %3828 = vmatpush.bf16.msrb.mxu3 %v4856_v15  ;;  %v7064_v41 = vpop.permute.xlu2 %2399  ;;  %v7066_v23 = vpop.permute.xlu1 %1304  ;;  %v5116_v26 = vor.u32 %v5653_v63, %v5115_v29  ;;  %v5083_v55 = vld [vmem:[#allocation2 + $0x348] sm:$0xf]  ;;  %v5560_v29 = vld [vmem:[#allocation2 + $0xc4] sm:$0xf] }
 0x273   : > { %3897 = vmatpush.bf16.msra.mxu2 %v5148_v50  ;;  %v8032_v52 = vrot.slane %v7064_v41, 4  ;;  %v1317_v7 = vrot.slane %v7066_v23, 4  ;;  %v7070_v15 = vpop.permute.xlu0 %2067  ;;  %v5645_v50 = vld [vmem:[#allocation2 + $0x364] sm:$0xf0]  ;;  %v4760_v63 = vor.u32 %v5560_v29, %v4757_v48  ;;  %v4693_v29 = vld [vmem:[#allocation2 + $0x60] sm:$0xf0] }
 0x274   : > { %v2080_v2 = vrot.slane %v7070_v15, 4 }
 0x275   : > { %v2426_v17 = vsel %vm323_vm0, %v2411_v19, %v8032_v52  ;;  %v1331_v46 = vsel %vm323_vm0, %v1316_v56, %v1317_v7  ;;  %v1461_v52 = vld [vmem:[%s5882_s26 + $0x4c] sm:$0xf] }
 0x276   : > { %3829 = vmatpush.bf16.msrb.mxu3 %v4824_v6  ;;  %v2427_v6 = vsel %vm2416_vm7, %v6820_v31, %v2426_v17  ;;  %v1332_v54 = vsel %vm1321_vm13, %v6589_v47, %v1331_v46  ;;  %v2094_v19 = vsel %vm323_vm0, %v2079_v43, %v2080_v2  ;;  %5522 = vmatmul.msk.bf16.vlgmr.msrb.gmra.mxu2 %vm3767_vm12, %v7024_v11  ;;  %v4725_v17 = vld [vmem:[#allocation2 + $0xa0] sm:$0xf0] }
 0x277   : > { %2445 = vst [vmem:[#allocation2 + $0x6a8] sm:$0xff] %v2427_v6  ;;  %v2095_v56 = vsel %vm2084_vm1, %v6669_v27, %v2094_v19  ;;  %3898 = vmatpush.bf16.msra.mxu2 %v5116_v26  ;;  %v5725_v31 = vld [vmem:[#allocation2 + $0x5e4] sm:$0xf0]  ;;  %v5084_v43 = vor.u32 %v5645_v50, %v5083_v55  ;;  %v2125_v19 = vld [vmem:[%s5882_s26 + $0x4c] sm:$0xf] }
 0x278   : > { %1350 = vst [vmem:[#allocation2 + $0x328] sm:$0xff] %v1332_v54  ;;  %1561 = vrot.lane.b32.xlu2 %v6804_v33, %s5829_s30  ;;  %v5403_v47 = vld [vmem:[#allocation2 + $0x5c8] sm:$0xf]  ;;  %1490 = vrot.lane.b32.xlu1 %v1461_v52, %s5819_s17  ;;  %v5532_v33 = vld [vmem:[%s8013_s1 + $0x4] sm:$0xf] }
 0x279   : > { %2113 = vst [vmem:[#allocation2 + $0x5a8] sm:$0xff] %v2095_v56  ;;  %1480 = vrot.lane.b32.xlu0 %v1456_v37, %s5819_s17  ;;  %v5404_v14 = vor.u32 %v5725_v31, %v5403_v47  ;;  %v4645_v54 = vld [vmem:[%s8013_s1 + $0x10] sm:$0xf0]  ;;  %v2120_v47 = vld [vmem:[%s5882_s26 + $0x24] sm:$0xf] }
 0x27a   : > { %3830 = vmatpush.bf16.msrb.mxu3 %v4792_v38  ;;  %v7102_v34 = vpop.permute.xlu2 %2306  ;;  %v7104_v27 = vpop.permute.xlu1 %1891  ;;  %v7116_v46 = vor.u32 %v5532_v33, %v4645_v54  ;;  %v5552_v38 = vld [vmem:[#allocation2 + $0x84] sm:$0xf]  ;;  %v5629_v54 = vld [vmem:[#allocation2 + $0x2e4] sm:$0xf0] }
 0x27b   : > { %3911 = vmatpush.bf16.msra.mxu0 %v5404_v14  ;;  %v8037_v52 = vrot.slane %v7102_v34, 4  ;;  %v1909_v37 = vrot.slane %v7104_v27, 4  ;;  %v7114_v48 = vpop.permute.xlu0 %1984  ;;  %3899 = vmatpush.bf16.msra.mxu2 %v5084_v43  ;;  %v4728_v6 = vor.u32 %v5552_v38, %v4725_v17  ;;  %v5051_v14 = vld [vmem:[#allocation2 + $0x308] sm:$0xf] }
 0x27c   : > { %v1997_v26 = vrot.slane %v7114_v48, 4  ;;  %3793 = vmatmul.bf16.vlgmr.msra.gmra.mxu1 %v7116_v46  ;;  %3849 = vmatmul.bf16.vlgmr.msrb.gmra.mxu0 %v7116_v46 }
 0x27d   : > { %v2335_v55 = vsel %vm323_vm0, %v2323_v1, %v8037_v52  ;;  %v1920_v50 = vsel %vm323_vm0, %v1908_v36, %v1909_v37  ;;  %v5544_v36 = vld [vmem:[#allocation2 + $0x44] sm:$0xf] }
 0x27e   : > { %3831 = vmatpush.bf16.msrb.mxu3 %v4760_v63  ;;  %v2336_v56 = vsel %vm2333_vm9, %v6861_v16, %v2335_v55  ;;  %v1921_v31 = vsel %vm1918_vm4, %v6726_v24, %v1920_v50  ;;  %v2011_v1 = vsel %vm323_vm0, %v1996_v62, %v1997_v26  ;;  %v5371_v16 = vld [vmem:[#allocation2 + $0x588] sm:$0xf]  ;;  %v4696_v33 = vor.u32 %v5544_v36, %v4693_v29  ;;  %v4661_v55 = vld [vmem:[#allocation2 + $0x20] sm:$0xf0] }
 0x27f   : > { %2358 = vst [vmem:[#allocation2 + $0x648] sm:$0xff] %v2336_v56  ;;  %v2012_v43 = vsel %vm2001_vm3, %v6647_v25, %v2011_v1  ;;  %v5637_v63 = vld [vmem:[#allocation2 + $0x324] sm:$0xf0] }
 0x280   : > { %1943 = vst [vmem:[#allocation2 + $0x508] sm:$0xff] %v1921_v31  ;;  %2154 = vrot.lane.b32.xlu2 %v2125_v19, %s5818_s16  ;;  %v5052_v24 = vor.u32 %v5637_v63, %v5051_v14  ;;  %v5717_v17 = vld [vmem:[#allocation2 + $0x5a4] sm:$0xf0]  ;;  %2144 = vrot.lane.b32.xlu1 %v2120_v47, %s5818_s16  ;;  %v5536_v47 = vld [vmem:[#allocation2 + $0x4] sm:$0xf] }
 0x281   : > { %2030 = vst [vmem:[#allocation2 + $0x568] sm:$0xff] %v2012_v43  ;;  %1571 = vrot.lane.b32.xlu0 %v6827_v28, %s5829_s30  ;;  %v5372_v62 = vor.u32 %v5717_v17, %v5371_v16  ;;  %v5019_v56 = vld [vmem:[#allocation2 + $0x2c8] sm:$0xf]  ;;  %v4664_v43 = vor.u32 %v5536_v47, %v4661_v55  ;;  %v2037_v63 = vld [vmem:[%s5882_s26 + $0x24] sm:$0xf] }
 0x282   : > { %3832 = vmatpush.bf16.msrb.mxu3 %v4728_v6  ;;  %3900 = vmatpush.bf16.msra.mxu2 %v5052_v24  ;;  %v7148_v25 = vpop.permute.xlu2 %1569  ;;  %v7150_v38 = vpop.permute.xlu1 %1818  ;;  %v5597_v28 = vld [vmem:[#allocation2 + $0x1e4] sm:$0xf0]  ;;  %v5020_v1 = vor.u32 %v5629_v54, %v5019_v56 }
 0x283   : > { %3912 = vmatpush.bf16.msra.mxu0 %v5372_v62  ;;  %v8035_v50 = vrot.slane %v7148_v25, 4  ;;  %v1831_v6 = vrot.slane %v7150_v38, 4  ;;  %v7154_v19 = vpop.permute.xlu0 %1808  ;;  %v4891_v14 = vld [vmem:[#allocation2 + $0x1c8] sm:$0xf] }
 0x284   : > { %v8045_v31 = vrot.slane %v7154_v19, 4  ;;  %v5621_v24 = vld [vmem:[#allocation2 + $0x2a4] sm:$0xf0]  ;;  %v4892_v62 = vor.u32 %v5597_v28, %v4891_v14 }
 0x285   : > { %v1596_v36 = vsel %vm323_vm0, %v1581_v40, %v8035_v50  ;;  %v1845_v29 = vsel %vm323_vm0, %v1830_v45, %v1831_v6  ;;  %v1373_v45 = vld [vmem:[%s5882_s26 + $0x24] sm:$0xf]  ;;  %v4987_v55 = vld [vmem:[#allocation2 + $0x288] sm:$0xf] }
 0x286   : > { %3833 = vmatpush.bf16.msrb.mxu3 %v4696_v33  ;;  %v1597_v16 = vsel %vm1586_vm10, %v6914_v12, %v1596_v36  ;;  %v1846_v17 = vsel %vm1835_vm5, %v6763_v3, %v1845_v29  ;;  %v1837_v40 = vsel %vm323_vm0, %v1825_v59, %v8045_v31  ;;  %3901 = vmatpush.bf16.msra.mxu2 %v5020_v1  ;;  %v1378_v33 = vld [vmem:[%s5882_s26 + $0x4c] sm:$0xf]  ;;  %v5589_v12 = vld [vmem:[#allocation2 + $0x1a4] sm:$0xf0] }
 0x287   : > { %1615 = vst [vmem:[#allocation2 + $0x428] sm:$0xff] %v1597_v16  ;;  %v1838_v54 = vsel %vm1835_vm5, %v6687_v42, %v1837_v40  ;;  %v4988_v3 = vor.u32 %v5621_v24, %v4987_v55  ;;  %v5339_v56 = vld [vmem:[#allocation2 + $0x548] sm:$0xf] }
 0x288   : > { %1864 = vst [vmem:[#allocation2 + $0x4e8] sm:$0xff] %v1846_v17  ;;  %2061 = vrot.lane.b32.xlu2 %v2037_v63, %s5820_s18  ;;  %v5709_v47 = vld [vmem:[#allocation2 + $0x564] sm:$0xf0]  ;;  %1407 = vrot.lane.b32.xlu1 %v1378_v33, %s5821_s19 }
 0x289   : > { %1860 = vst [vmem:[#allocation2 + $0x4c8] sm:$0xff] %v1838_v54  ;;  %1397 = vrot.lane.b32.xlu0 %v1373_v45, %s5821_s19  ;;  %v5340_v59 = vor.u32 %v5709_v47, %v5339_v56  ;;  %v4859_v28 = vld [vmem:[#allocation2 + $0x188] sm:$0xf]  ;;  %v8057_v54 = vrot.slane %v6858_v9, 4  ;;  %v1959_v47 = vld [vmem:[%s5882_s26 + $0x4c] sm:$0xf] }
 0x28a   : > { %3834 = vmatpush.bf16.msrb.mxu3 %v4664_v43  ;;  %v5613_v1 = vld [vmem:[#allocation2 + $0x264] sm:$0xf0]  ;;  %3902 = vmatpush.bf16.msra.mxu2 %v4988_v3  ;;  %v7184_v42 = vpop.permute.xlu2 %1478  ;;  %v7186_v36 = vpop.permute.xlu1 %2389  ;;  %v4860_v29 = vor.u32 %v5589_v12, %v4859_v28  ;;  %v8058_v12 = vrot.slane %v6800_v10, 4 }
 0x28b   : > { %v5307_v43 = vld [vmem:[#allocation2 + $0x508] sm:$0xf]  ;;  %3913 = vmatpush.bf16.msra.mxu0 %v5340_v59  ;;  %v8036_v14 = vrot.slane %v7184_v42, 4  ;;  %v2407_v63 = vrot.slane %v7186_v36, 4  ;;  %v7191_v24 = vpop.permute.xlu0 %1735  ;;  %v1954_v59 = vld [vmem:[%s5882_s26 + $0x24] sm:$0xf] }
 0x28c   : > { %v4955_v16 = vld [vmem:[#allocation2 + $0x248] sm:$0xf]  ;;  %v1748_v40 = vrot.slane %v7191_v24, 4  ;;  %3863 = vmatmul.bf16.vlgmr.msrb.gmra.mxu1 %v6983_v13 }
 0x28d   : > { %3835 = vmatmul.bf16.vlgmr.msrb.gmra.mxu3 %v6953_v51  ;;  %v5581_v17 = vld [vmem:[#allocation2 + $0x164] sm:$0xf0]  ;;  %v1507_v55 = vsel %vm323_vm0, %v8057_v54, %v8036_v14  ;;  %v2418_v3 = vsel %vm323_vm0, %v8058_v12, %v2407_v63  ;;  %v8059_v54 = vrot.slane %v6724_v20, 4  ;;  %v5721_v12 = vld [vmem:[#allocation2 + $0x5cc] sm:$0xf] }
 0x28e   : > { %3883 = vmatpush.bf16.msra.mxu3 %v4892_v62  ;;  %v4956_v62 = vor.u32 %v5613_v1, %v4955_v16  ;;  %v5701_v33 = vld [vmem:[#allocation2 + $0x524] sm:$0xf0]  ;;  %v2419_v16 = vsel %vm2416_vm7, %v6800_v10, %v2418_v3  ;;  %v5405_v14 = vld [vmem:[#allocation2 + $0x5e8] sm:$0xf0] }
 0x28f   : > { %v4827_v45 = vld [vmem:[#allocation2 + $0x148] sm:$0xf]  ;;  %v5308_v56 = vor.u32 %v5701_v33, %v5307_v43  ;;  %v1762_v50 = vsel %vm323_vm0, %v8059_v54, %v1748_v40  ;;  %v2042_v33 = vld [vmem:[%s5882_s26 + $0x4c] sm:$0xf]  ;;  %2441 = vst [vmem:[#allocation2 + $0x688] sm:$0xff] %v2419_v16  ;;  %v8060_v54 = vrot.slane %v6843_v32, 4 }
 0x290   : > { %v5605_v28 = vld [vmem:[#allocation2 + $0x224] sm:$0xf0]  ;;  %3903 = vmatpush.bf16.msra.mxu2 %v4956_v62  ;;  %v4828_v43 = vor.u32 %v5581_v17, %v4827_v45  ;;  %v1763_v52 = vsel %vm1752_vm6, %v6724_v20, %v1762_v50  ;;  %1988 = vrot.lane.b32.xlu2 %v1959_v47, %s5822_s20  ;;  %v5408_v62 = vor.u32 %v5721_v12, %v5405_v14  ;;  %v5713_v16 = vld [vmem:[#allocation2 + $0x58c] sm:$0xf] }
 0x291   : > { %v5573_v1 = vld [vmem:[#allocation2 + $0x124] sm:$0xf0]  ;;  %3914 = vmatpush.bf16.msra.mxu0 %v5308_v56  ;;  %1781 = vst [vmem:[#allocation2 + $0x4a8] sm:$0xff] %v1763_v52  ;;  %1978 = vrot.lane.b32.xlu1 %v1954_v59, %s5822_s20  ;;  %v5373_v56 = vld [vmem:[#allocation2 + $0x5a8] sm:$0xf0] }
 0x292   : > { %3884 = vmatpush.bf16.msra.mxu3 %v4860_v29  ;;  %v1508_v29 = vsel %vm1503_vm15, %v6858_v9, %v1507_v55  ;;  %v4923_v9 = vld [vmem:[#allocation2 + $0x208] sm:$0xf]  ;;  %2071 = vrot.lane.b32.xlu0 %v2042_v33, %s5820_s18  ;;  %v7224_v20 = vpop.permute.xlu1 %1652  ;;  %v5376_v33 = vor.u32 %v5713_v16, %v5373_v56  ;;  %v5705_v56 = vld [vmem:[#allocation2 + $0x54c] sm:$0xf] }
 0x293   : > { %1529 = vst [vmem:[#allocation2 + $0x3d0] sm:$0xff] %v1508_v29  ;;  %v5693_v55 = vld [vmem:[#allocation2 + $0x4e4] sm:$0xf0]  ;;  %v4924_v10 = vor.u32 %v5605_v28, %v4923_v9  ;;  %v7222_v29 = vpop.permute.xlu2 %2152  ;;  %v8038_v52 = vrot.slane %v7224_v20, 4  ;;  %v7228_v59 = vpop.permute.xlu0 %1642  ;;  %v1876_v9 = vld [vmem:[%s5882_s26 + $0x4c] sm:$0xf] }
 0x294   : > { %v5275_v3 = vld [vmem:[#allocation2 + $0x4c8] sm:$0xf]  ;;  %v8040_v47 = vrot.slane %v7222_v29, 4  ;;  %v1660_v14 = vrot.slane %v7228_v59, 4  ;;  %v5341_v16 = vld [vmem:[#allocation2 + $0x568] sm:$0xf0] }
 0x295   : > { %v5276_v17 = vor.u32 %v5693_v55, %v5275_v3  ;;  %v4795_v45 = vld [vmem:[#allocation2 + $0x108] sm:$0xf]  ;;  %3904 = vmatpush.bf16.msra.mxu2 %v4924_v10 }
 0x296   : > { %3885 = vmatpush.bf16.msra.mxu3 %v4828_v43  ;;  %v4796_v50 = vor.u32 %v5573_v1, %v4795_v45  ;;  %v5565_v28 = vld [vmem:[#allocation2 + $0xe4] sm:$0xf0]  ;;  %v2179_v1 = vsel %vm323_vm0, %v2163_v22, %v8040_v47  ;;  %v1679_v43 = vsel %vm323_vm0, %v8060_v54, %v8038_v52  ;;  %v8061_v22 = vrot.slane %v6761_v39, 4  ;;  %v1871_v45 = vld [vmem:[%s5882_s26 + $0x24] sm:$0xf] }
 0x297   : > { %3915 = vmatpush.bf16.msra.mxu0 %v5276_v17  ;;  %v4763_v12 = vld [vmem:[#allocation2 + $0xc8] sm:$0xf]  ;;  %v2180_v10 = vsel %vm2167_vm14, %v7028_v60, %v2179_v1  ;;  %v1680_v3 = vsel %vm1669_vm8, %v6843_v32, %v1679_v43  ;;  %v5689_v47 = vld [vmem:[#allocation2 + $0x4cc] sm:$0xf] }
 0x298   : > { %v5557_v55 = vld [vmem:[#allocation2 + $0xa4] sm:$0xf0]  ;;  %3905 = vmatmul.bf16.vlgmr.msra.gmra.mxu2 %v7116_v46  ;;  %v1671_v17 = vsel %vm323_vm0, %v8061_v22, %v1660_v14  ;;  %2197 = vst [vmem:[#allocation2 + $0x5f0] sm:$0xff] %v2180_v10  ;;  %1905 = vrot.lane.b32.xlu2 %v1876_v9, %s5823_s23  ;;  %v5697_v9 = vld [vmem:[#allocation2 + $0x50c] sm:$0xf] }
 0x299   : > { %3967 = vmatpush.bf16.msrb.mxu2 %v5408_v62  ;;  %v4764_v62 = vor.u32 %v5565_v28, %v4763_v12  ;;  %v1672_v54 = vsel %vm1669_vm8, %v6761_v39, %v1671_v17  ;;  %v5499_v60 = vld [vmem:[#allocation2 + $0x688] sm:$0xf]  ;;  %1698 = vst [vmem:[#allocation2 + $0x468] sm:$0xff] %v1680_v3  ;;  %1895 = vrot.lane.b32.xlu1 %v1871_v45, %s5823_s23 }
 0x29a   : > { %3886 = vmatpush.bf16.msra.mxu3 %v4796_v50  ;;  %v1279_v50 = vld [vmem:[%s5882_s26 + $0x48] sm:$0xf]  ;;  %1694 = vst [vmem:[#allocation2 + $0x448] sm:$0xff] %v1672_v54  ;;  %v5344_v12 = vor.u32 %v5705_v56, %v5341_v16  ;;  %v8063_v16 = vrot.slane %v6888_v18, 4 }
 0x29b   : > { %v5749_v1 = vld [vmem:[#allocation2 + $0x6a4] sm:$0xf0]  ;;  %1308 = vrot.lane.b32.xlu0 %v1279_v50, %s5817_s15  ;;  %v7259_v39 = vpop.permute.xlu2 %2059  ;;  %v5309_v50 = vld [vmem:[#allocation2 + $0x528] sm:$0xf0] }
 0x29c   : > { %v5243_v32 = vld [vmem:[#allocation2 + $0x488] sm:$0xf]  ;;  %v5500_v52 = vor.u32 %v5749_v1, %v5499_v60  ;;  %v8039_v22 = vrot.slane %v7259_v39, 4  ;;  %v5312_v60 = vor.u32 %v5697_v9, %v5309_v50 }
 0x29d   : > { %3968 = vmatpush.bf16.msrb.mxu2 %v5376_v33  ;;  %v5685_v43 = vld [vmem:[#allocation2 + $0x4a4] sm:$0xf0]  ;;  %v7261_v33 = vpop.permute.xlu1 %1559 }
 0x29e   : > { %3887 = vmatpush.bf16.msra.mxu3 %v4764_v62  ;;  %v5244_v28 = vor.u32 %v5685_v43, %v5243_v32  ;;  %v4731_v10 = vld [vmem:[#allocation2 + $0x88] sm:$0xf]  ;;  %3930 = vmatpush.bf16.msra.mxu1 %v5500_v52  ;;  %v8044_v17 = vrot.slane %v7261_v33, 4  ;;  %v7265_v62 = vpop.permute.xlu0 %2316  ;;  %v1705_v32 = vld [vmem:[%s5882_s26 + $0x24] sm:$0xf] }
 0x29f   : > { %v4732_v3 = vor.u32 %v5557_v55, %v4731_v10  ;;  %v5549_v45 = vld [vmem:[#allocation2 + $0x64] sm:$0xf0]  ;;  %v8042_v52 = vrot.slane %v7265_v62, 4  ;;  %v8062_v55 = vrot.slane %v6911_v21, 4  ;;  %v1793_v43 = vld [vmem:[%s5882_s26 + $0x4c] sm:$0xf] }
 0x2a0   : > { %3916 = vmatpush.bf16.msra.mxu0 %v5244_v28  ;;  %v1588_v54 = vsel %vm323_vm0, %v8063_v16, %v8044_v17  ;;  %v4699_v1 = vld [vmem:[#allocation2 + $0x48] sm:$0xf]  ;;  %v8064_v10 = vrot.slane %v6798_v61, 4  ;;  %v5277_v16 = vld [vmem:[#allocation2 + $0x4e8] sm:$0xf0]  ;;  %1729 = vrot.lane.b32.xlu2 %v1705_v32, %s5825_s25  ;;  %v1359_v17 = vld [vmem:[%s5882_s26 + $0x3c] sm:$0xff] }
 0x2a1   : > { %3969 = vmatpush.bf16.msrb.mxu2 %v5344_v12  ;;  %v2088_v56 = vsel %vm323_vm0, %v8062_v55, %v8039_v22  ;;  %v1589_v12 = vsel %vm1586_vm10, %v6888_v18, %v1588_v54  ;;  %v4700_v55 = vor.u32 %v5549_v45, %v4699_v1  ;;  %v1788_v22 = vld [vmem:[%s5882_s26 + $0x24] sm:$0xf]  ;;  %v5677_v50 = vld [vmem:[#allocation2 + $0x464] sm:$0xf0]  ;;  %1822 = vrot.lane.b32.xlu1 %v1793_v43, %s5824_s24 }
 0x2a2   : > { %3888 = vmatpush.bf16.msra.mxu3 %v4732_v3  ;;  %v2089_v28 = vsel %vm2084_vm1, %v6911_v21, %v2088_v56  ;;  %v2343_v3 = vsel %vm323_vm0, %v8064_v10, %v8042_v52  ;;  %v5541_v21 = vld [vmem:[#allocation2 + $0x24] sm:$0xf0]  ;;  %1611 = vst [vmem:[#allocation2 + $0x408] sm:$0xff] %v1589_v12  ;;  %v4893_v56 = vld [vmem:[#allocation2 + $0x1e8] sm:$0xf0]  ;;  %v5280_v54 = vor.u32 %v5689_v47, %v5277_v16 }
 0x2a3   : > { %2110 = vst [vmem:[#allocation2 + $0x590] sm:$0xff] %v2089_v28  ;;  %v2344_v9 = vsel %vm2333_vm9, %v6798_v61, %v2343_v3  ;;  %v5211_v18 = vld [vmem:[#allocation2 + $0x448] sm:$0xf]  ;;  %1812 = vrot.lane.b32.xlu0 %v1788_v22, %s5824_s24  ;;  %v7295_v28 = vpop.permute.xlu2 %1986  ;;  %v5593_v10 = vld [vmem:[#allocation2 + $0x1cc] sm:$0xf]  ;;  %s5531_s24 = sshll.u32 %s8096_s22, 4 }
 0x2a4   : > { %2362 = vst [vmem:[#allocation2 + $0x668] sm:$0xff] %v2344_v9  ;;  %v5212_v45 = vor.u32 %v5677_v50, %v5211_v18  ;;  %v4667_v1 = vld [vmem:[#allocation2 + $0x8] sm:$0xf]  ;;  %v5245_v12 = vld [vmem:[#allocation2 + $0x4a8] sm:$0xf0]  ;;  %v8041_v32 = vrot.slane %v7295_v28, 4  ;;  %v4896_v47 = vor.u32 %v5593_v10, %v4893_v56 }
 0x2a5   : > { %3970 = vmatpush.bf16.msrb.mxu2 %v5312_v60  ;;  %v7297_v61 = vpop.permute.xlu1 %2233  ;;  %v4668_v60 = vor.u32 %v5541_v21, %v4667_v1  ;;  %v4861_v16 = vld [vmem:[#allocation2 + $0x1a8] sm:$0xf0]  ;;  %v8065_v50 = vrot.slane %v6943_v5, 4  ;;  %1367 = vst [vmem:[#allocation2 + $0x370] sm:$0xff] %v1359_v17 }
 0x2a6   : > { %3889 = vmatpush.bf16.msra.mxu3 %v4700_v55  ;;  %3917 = vmatpush.bf16.msra.mxu0 %v5212_v45  ;;  %v2246_v43 = vrot.slane %v7297_v61, 4  ;;  %v7301_v22 = vpop.permute.xlu0 %2223  ;;  %v5681_v55 = vld [vmem:[#allocation2 + $0x48c] sm:$0xf]  ;;  %v2013_v9 = vsel %vm323_vm0, %v1997_v26, %v8041_v32  ;;  %v2369_v45 = vld [vmem:[%s5882_s26 + $0x24] sm:$0xf]  ;;  %v8066_v26 = vrot.slane %v6841_v35, 4 }
 0x2a7   : > { %v8043_v3 = vrot.slane %v7301_v22, 4  ;;  %v5248_v18 = vor.u32 %v5681_v55, %v5245_v12  ;;  %v2374_v56 = vld [vmem:[%s5882_s26 + $0x4c] sm:$0xf] }
 0x2a8   : > { %v2260_v21 = vsel %vm323_vm0, %v8065_v50, %v2246_v43  ;;  %v5585_v1 = vld [vmem:[#allocation2 + $0x18c] sm:$0xf]  ;;  %v5669_v50 = vld [vmem:[#allocation2 + $0x424] sm:$0xf0]  ;;  %2403 = vrot.lane.b32.xlu2 %v2374_v56, %s5826_s27 }
 0x2a9   : > { %3971 = vmatpush.bf16.msrb.mxu2 %v5280_v54  ;;  %v1710_v54 = vld [vmem:[%s5882_s26 + $0x4c] sm:$0xf]  ;;  %v2261_v10 = vsel %vm2250_vm11, %v6943_v5, %v2260_v21  ;;  %v2252_v32 = vsel %vm323_vm0, %v8066_v26, %v8043_v3  ;;  %v5179_v52 = vld [vmem:[#allocation2 + $0x408] sm:$0xf]  ;;  %v1355_v5 = vld [vmem:[%s5882_s26 + $0x14] sm:$0xff]  ;;  %2393 = vrot.lane.b32.xlu1 %v2369_v45, %s5826_s27 }
 0x2aa   : > { %3890 = vmatpush.bf16.msra.mxu3 %v4668_v60  ;;  %v2014_v60 = vsel %vm2001_vm3, %v7114_v48, %v2013_v9  ;;  %v5673_v12 = vld [vmem:[#allocation2 + $0x44c] sm:$0xf]  ;;  %v2253_v55 = vsel %vm2250_vm11, %v6841_v35, %v2252_v32  ;;  %2279 = vst [vmem:[#allocation2 + $0x628] sm:$0xff] %v2261_v10  ;;  %v4864_v9 = vor.u32 %v5585_v1, %v4861_v16  ;;  %v5467_v26 = vld [vmem:[#allocation2 + $0x648] sm:$0xf] }
 0x2ab   : > { %2031 = vst [vmem:[#allocation2 + $0x570] sm:$0xff] %v2014_v60  ;;  %v5745_v48 = vld [vmem:[#allocation2 + $0x68c] sm:$0xf]  ;;  %v5180_v21 = vor.u32 %v5669_v50, %v5179_v52  ;;  %v5741_v3 = vld [vmem:[#allocation2 + $0x664] sm:$0xf0]  ;;  %1739 = vrot.lane.b32.xlu0 %v1710_v54, %s5825_s25  ;;  %v7334_v31 = vpop.permute.xlu2 %1903 }
 0x2ac   : > { %2275 = vst [vmem:[#allocation2 + $0x608] sm:$0xff] %v2253_v55  ;;  %v5468_v35 = vor.u32 %v5741_v3, %v5467_v26  ;;  %v4829_v60 = vld [vmem:[#allocation2 + $0x168] sm:$0xf0]  ;;  %v1915_v45 = vrot.slane %v7334_v31, 4 }
 0x2ad   : > { %3972 = vmatpush.bf16.msrb.mxu2 %v5248_v18  ;;  %3891 = vmatmul.bf16.vlgmr.msra.gmra.mxu3 %v6953_v51  ;;  %v5501_v18 = vld [vmem:[#allocation2 + $0x6a8] sm:$0xf0]  ;;  %v7336_v10 = vpop.permute.xlu1 %2142  ;;  %1363 = vst [vmem:[#allocation2 + $0x350] sm:$0xff] %v1355_v5 }
 0x2ae   : > { %3939 = vmatpush.bf16.msrb.mxu3 %v4896_v47  ;;  %v5213_v47 = vld [vmem:[#allocation2 + $0x468] sm:$0xf0]  ;;  %3918 = vmatpush.bf16.msra.mxu0 %v5180_v21  ;;  %v5504_v16 = vor.u32 %v5745_v48, %v5501_v18  ;;  %v2159_v54 = vrot.slane %v7336_v10, 4  ;;  %v7340_v3 = vpop.permute.xlu0 %1488  ;;  %v1930_v55 = vsel %vm323_vm0, %v1914_v44, %v1915_v45  ;;  %v8067_v44 = vrot.slane %v6987_v30, 4 }
 0x2af   : > { %v5216_v32 = vor.u32 %v5673_v12, %v5213_v47  ;;  %v5577_v52 = vld [vmem:[#allocation2 + $0x14c] sm:$0xf]  ;;  %3931 = vmatpush.bf16.msra.mxu1 %v5468_v35  ;;  %v1500_v50 = vrot.slane %v7340_v3, 4  ;;  %v1931_v35 = vsel %vm1918_vm4, %v6979_v49, %v1930_v55 }
 0x2b0   : > { %v5665_v56 = vld [vmem:[#allocation2 + $0x40c] sm:$0xf]  ;;  %v4832_v12 = vor.u32 %v5577_v52, %v4829_v60  ;;  %v2171_v48 = vsel %vm323_vm0, %v2158_v58, %v2159_v54  ;;  %1948 = vst [vmem:[#allocation2 + $0x530] sm:$0xff] %v1931_v35 }
 0x2b1   : > { %3973 = vmatpush.bf16.msrb.mxu2 %v5216_v32  ;;  %v5469_v1 = vld [vmem:[#allocation2 + $0x668] sm:$0xf0]  ;;  %3919 = vmatmul.bf16.vlgmr.msra.gmra.mxu0 %v6983_v13  ;;  %v2172_v32 = vsel %vm2167_vm14, %v7032_v0, %v2171_v48  ;;  %v1515_v18 = vsel %vm323_vm0, %v8067_v44, %v1500_v50  ;;  %v5733_v49 = vld [vmem:[#allocation2 + $0x624] sm:$0xf0] }
 0x2b2   : > { %3940 = vmatpush.bf16.msrb.mxu3 %v4864_v9  ;;  %3986 = vmatpush.bf16.msrb.mxu0 %v5504_v16  ;;  %v5181_v47 = vld [vmem:[#allocation2 + $0x428] sm:$0xf0]  ;;  %v2286_v9 = vld [vmem:[%s5882_s26 + $0x24] sm:$0xf]  ;;  %2193 = vst [vmem:[#allocation2 + $0x5d0] sm:$0xff] %v2172_v32 }
 0x2b3   : > { %v5184_v17 = vor.u32 %v5665_v56, %v5181_v47  ;;  %v5737_v5 = vld [vmem:[#allocation2 + $0x64c] sm:$0xf]  ;;  %v1622_v16 = vld [vmem:[%s5882_s26 + $0x24] sm:$0xf]  ;;  %v1516_v56 = vsel %vm1503_vm15, %v6987_v30, %v1515_v18  ;;  %2310 = vrot.lane.b32.xlu2 %v2286_v9, %s5828_s29  ;;  %v5435_v55 = vld [vmem:[#allocation2 + $0x608] sm:$0xf]  ;;  %v7371_v30 = vpop.permute.xlu2 %2391 }
 0x2b4   : > { %v5569_v21 = vld [vmem:[#allocation2 + $0x10c] sm:$0xf]  ;;  %v5472_v58 = vor.u32 %v5737_v5, %v5469_v1  ;;  %1533 = vst [vmem:[#allocation2 + $0x3f0] sm:$0xff] %v1516_v56  ;;  %1646 = vrot.lane.b32.xlu0 %v1622_v16, %s5827_s28  ;;  %v5436_v1 = vor.u32 %v5733_v49, %v5435_v55  ;;  %v8047_v9 = vrot.slane %v7371_v30, 4  ;;  %v8068_v49 = vrot.slane %v6886_v57, 4 }
 0x2b5   : > { %v4797_v26 = vld [vmem:[#allocation2 + $0x128] sm:$0xf0]  ;;  %3974 = vmatpush.bf16.msrb.mxu2 %v5184_v17  ;;  %v7373_v17 = vpop.permute.xlu1 %1405 }
 0x2b6   : > { %3941 = vmatpush.bf16.msrb.mxu3 %v4832_v12  ;;  %v1627_v60 = vld [vmem:[%s5882_s26 + $0x4c] sm:$0xf]  ;;  %3987 = vmatpush.bf16.msrb.mxu0 %v5472_v58  ;;  %v4800_v0 = vor.u32 %v5569_v21, %v4797_v26  ;;  %v1417_v21 = vrot.slane %v7373_v17, 4  ;;  %v7378_v26 = vpop.permute.xlu0 %1395  ;;  %v2420_v56 = vsel %vm323_vm0, %v2407_v63, %v8047_v9  ;;  %v8069_v63 = vrot.slane %v6981_v53, 4 }
 0x2b7   : > { %v5149_v52 = vld [vmem:[#allocation2 + $0x3e8] sm:$0xf0]  ;;  %1656 = vrot.lane.b32.xlu1 %v1627_v60, %s5827_s28  ;;  %3932 = vmatpush.bf16.msra.mxu1 %v5436_v1  ;;  %v1412_v58 = vrot.slane %v7378_v26, 4  ;;  %s266_s28 = scalar_lea.vmem %s8016_s4, %s5531_s24 }
 0x2b8   : > { %v5437_v47 = vld [vmem:[#allocation2 + $0x628] sm:$0xf0]  ;;  %3975 = vmatmul.bf16.vlgmr.msrb.gmra.mxu2 %v6983_v13 }
 0x2b9   : > { %v5729_v48 = vld [vmem:[#allocation2 + $0x60c] sm:$0xf] }
 0x2ba   : > { %v5657_v12 = vld [vmem:[#allocation2 + $0x3cc] sm:$0xf]  ;;  %v5440_v5 = vor.u32 %v5729_v48, %v5437_v47  ;;  %3942 = vmatpush.bf16.msrb.mxu3 %v4800_v0  ;;  %v1432_v47 = vsel %vm323_vm0, %v8068_v49, %v1417_v21  ;;  %5523 = vmatmul.msk.bf16.vlgmr.msra.gmra.mxu1 %vm3767_vm12, %v7024_v11 }
 0x2bb   : > { %v4765_v35 = vld [vmem:[#allocation2 + $0xe8] sm:$0xf0]  ;;  %v5152_v32 = vor.u32 %v5657_v12, %v5149_v52  ;;  %v2421_v12 = vsel %vm2416_vm7, %v7186_v36, %v2420_v56  ;;  %v5662_v56 = vld [vmem:[#allocation2 + $0x3ec] sm:$0xf0] }
 0x2bc   : > { %v5649_v44 = vld [vmem:[#allocation2 + $0x38c] sm:$0xf]  ;;  %3988 = vmatpush.bf16.msrb.mxu0 %v5440_v5  ;;  %v1433_v5 = vsel %vm1420_vm2, %v6886_v57, %v1432_v47  ;;  %2442 = vst [vmem:[#allocation2 + $0x690] sm:$0xff] %v2421_v12  ;;  %v7410_v12 = vpop.permute.xlu2 %1737 }
 0x2bd   : > { %v5561_v18 = vld [vmem:[#allocation2 + $0xcc] sm:$0xf]  ;;  %3953 = vmatpush.bf16.msrb.mxu1 %v5152_v32  ;;  %v1539_v32 = vld [vmem:[%s5882_s26 + $0x24] sm:$0xf]  ;;  %1450 = vst [vmem:[#allocation2 + $0x3b0] sm:$0xff] %v1433_v5 }
 0x2be   : > { %v4768_v60 = vor.u32 %v5561_v18, %v4765_v35  ;;  %v5117_v16 = vld [vmem:[#allocation2 + $0x3a8] sm:$0xf0]  ;;  %v1424_v35 = vsel %vm323_vm0, %v8069_v63, %v1412_v58 }
 0x2bf   : > { %v4733_v52 = vld [vmem:[#allocation2 + $0xa8] sm:$0xf0]  ;;  %v5120_v0 = vor.u32 %v5649_v44, %v5117_v16  ;;  %v1425_v44 = vsel %vm1420_vm2, %v6981_v53, %v1424_v35  ;;  %v5155_v16 = vld [vmem:[#allocation2 + $0x3d0] sm:$0xf]  ;;  %1563 = vrot.lane.b32.xlu1 %v1539_v32, %s5829_s30  ;;  %v7412_v53 = vpop.permute.xlu1 %1976  ;;  %v8070_v32 = vrot.slane %v6941_v4, 4 }
 0x2c0   : > { %v1544_v55 = vld [vmem:[%s5882_s26 + $0x4c] sm:$0xf]  ;;  %3943 = vmatpush.bf16.msrb.mxu3 %v4768_v60  ;;  %1446 = vst [vmem:[#allocation2 + $0x390] sm:$0xff] %v1425_v44  ;;  %v5156_v60 = vor.u32 %v5662_v56, %v5155_v16  ;;  %v5598_v16 = vld [vmem:[#allocation2 + $0x1ec] sm:$0xf0] }
 0x2c1   : > { %v5641_v48 = vld [vmem:[#allocation2 + $0x34c] sm:$0xf]  ;;  %3954 = vmatpush.bf16.msrb.mxu1 %v5120_v0  ;;  %1573 = vrot.lane.b32.xlu2 %v1544_v55, %s5829_s30  ;;  %v8046_v0 = vrot.slane %v7410_v12, 4  ;;  %v7416_v55 = vpop.permute.xlu0 %2069 }
 0x2c2   : > { %v5085_v1 = vld [vmem:[#allocation2 + $0x368] sm:$0xf0]  ;;  %4009 = vmatpush.bf16.msra.mxu0 %v5156_v60  ;;  %v2081_v5 = vrot.slane %v7416_v55, 4 }
 0x2c3   : > { %v2291_v18 = vld [vmem:[%s5882_s26 + $0x4c] sm:$0xf]  ;;  %v5088_v49 = vor.u32 %v5641_v48, %v5085_v1  ;;  %v1764_v35 = vsel %vm323_vm0, %v1748_v40, %v8046_v0  ;;  %5524 = vmatmul.msk.bf16.vlgmr.msrb.gmra.mxu0 %vm3767_vm12, %v7024_v11 }
 0x2c4   : > { %v5553_v36 = vld [vmem:[#allocation2 + $0x8c] sm:$0xf]  ;;  %2320 = vrot.lane.b32.xlu0 %v2291_v18, %s5828_s29  ;;  %v1765_v56 = vsel %vm1752_vm6, %v7191_v24, %v1764_v35  ;;  %v2096_v40 = vsel %vm323_vm0, %v2080_v2, %v2081_v5  ;;  %v5654_v24 = vld [vmem:[#allocation2 + $0x3ac] sm:$0xf0] }
 0x2c5   : > { %v4736_v57 = vor.u32 %v5553_v36, %v4733_v52  ;;  %v4701_v47 = vld [vmem:[#allocation2 + $0x68] sm:$0xf0]  ;;  %v8048_v52 = vrot.slane %v7412_v53, 4  ;;  %3955 = vmatpush.bf16.msrb.mxu1 %v5088_v49  ;;  %1782 = vst [vmem:[#allocation2 + $0x4b0] sm:$0xff] %v1765_v56  ;;  %v2097_v9 = vsel %vm2084_vm1, %v7070_v15, %v2096_v40  ;;  %v5091_v35 = vld [vmem:[#allocation2 + $0x350] sm:$0xf] }
 0x2c6   : > { %v5545_v48 = vld [vmem:[#allocation2 + $0x4c] sm:$0xf]  ;;  %2114 = vst [vmem:[#allocation2 + $0x5b0] sm:$0xff] %v2097_v9  ;;  %v5590_v40 = vld [vmem:[#allocation2 + $0x1ac] sm:$0xf0] }
 0x2c7   : > { %3944 = vmatpush.bf16.msrb.mxu3 %v4736_v57  ;;  %v5053_v1 = vld [vmem:[#allocation2 + $0x328] sm:$0xf0]  ;;  %v4704_v63 = vor.u32 %v5545_v48, %v4701_v47  ;;  %v2005_v18 = vsel %vm323_vm0, %v8070_v32, %v8048_v52  ;;  %v2203_v48 = vld [vmem:[%s5882_s26 + $0x24] sm:$0xf]  ;;  %v4899_v32 = vld [vmem:[#allocation2 + $0x1d0] sm:$0xf]  ;;  %v7448_v56 = vpop.permute.xlu1 %1893 }
 0x2c8   : > { %v5633_v44 = vld [vmem:[#allocation2 + $0x30c] sm:$0xf]  ;;  %v2006_v49 = vsel %vm2001_vm3, %v6941_v4, %v2005_v18  ;;  %v5123_v18 = vld [vmem:[#allocation2 + $0x390] sm:$0xf]  ;;  %v4900_v2 = vor.u32 %v5598_v16, %v4899_v32  ;;  %v8056_v9 = vrot.slane %v7448_v56, 4 }
 0x2c9   : > { %v5537_v36 = vld [vmem:[#allocation2 + $0xc] sm:$0xf]  ;;  %v5056_v60 = vor.u32 %v5633_v44, %v5053_v1  ;;  %2027 = vst [vmem:[#allocation2 + $0x550] sm:$0xff] %v2006_v49  ;;  %v5646_v52 = vld [vmem:[#allocation2 + $0x36c] sm:$0xf0]  ;;  %v5124_v1 = vor.u32 %v5654_v24, %v5123_v18  ;;  %v7446_v44 = vpop.permute.xlu2 %1644 }
 0x2ca   : > { %v4669_v57 = vld [vmem:[#allocation2 + $0x28] sm:$0xf0]  ;;  %v5582_v18 = vld [vmem:[#allocation2 + $0x16c] sm:$0xf0] }
 0x2cb   : > { %3945 = vmatpush.bf16.msrb.mxu3 %v4704_v63  ;;  %v2208_v47 = vld [vmem:[%s5882_s26 + $0x4c] sm:$0xf]  ;;  %3956 = vmatpush.bf16.msrb.mxu1 %v5056_v60  ;;  %v4672_v4 = vor.u32 %v5537_v36, %v4669_v57  ;;  %v8051_v36 = vrot.slane %v7446_v44, 4  ;;  %v7452_v57 = vpop.permute.xlu0 %1306  ;;  %v5092_v60 = vor.u32 %v5646_v52, %v5091_v35 }
 0x2cc   : > { %v5021_v0 = vld [vmem:[#allocation2 + $0x2e8] sm:$0xf0]  ;;  %2237 = vrot.lane.b32.xlu1 %v2208_v47, %s5830_s7  ;;  %2227 = vrot.lane.b32.xlu0 %v2203_v48, %s5830_s7  ;;  %v8055_v16 = vrot.slane %v7452_v57, 4  ;;  %v4867_v47 = vld [vmem:[#allocation2 + $0x190] sm:$0xf]  ;;  %v1922_v48 = vsel %vm323_vm0, %v1909_v37, %v8056_v9 }
 0x2cd   : > { %v5625_v63 = vld [vmem:[#allocation2 + $0x2cc] sm:$0xf]  ;;  %4010 = vmatpush.bf16.msra.mxu0 %v5124_v1  ;;  %v4868_v32 = vor.u32 %v5590_v40, %v4867_v47  ;;  %v1923_v35 = vsel %vm1918_vm4, %v7104_v27, %v1922_v48  ;;  %v5574_v40 = vld [vmem:[#allocation2 + $0x12c] sm:$0xf0]  ;;  %v5413_v9 = vld [vmem:[#allocation2 + $0x5f0] sm:$0xf0] }
 0x2ce   : > { %v5024_v15 = vor.u32 %v5625_v63, %v5021_v0  ;;  %v4989_v49 = vld [vmem:[#allocation2 + $0x2a8] sm:$0xf0]  ;;  %v1673_v0 = vsel %vm323_vm0, %v1660_v14, %v8051_v36  ;;  %v1333_v14 = vsel %vm323_vm0, %v1317_v7, %v8055_v16  ;;  %1944 = vst [vmem:[#allocation2 + $0x510] sm:$0xff] %v1923_v35  ;;  %v4803_v48 = vld [vmem:[#allocation2 + $0x110] sm:$0xf] }
 0x2cf   : > { %3946 = vmatpush.bf16.msrb.mxu3 %v4672_v4  ;;  %v5617_v24 = vld [vmem:[#allocation2 + $0x28c] sm:$0xf]  ;;  %v1674_v52 = vsel %vm1669_vm8, %v7228_v59, %v1673_v0  ;;  %v1334_v37 = vsel %vm1321_vm13, %v7066_v23, %v1333_v14  ;;  %v4835_v59 = vld [vmem:[#allocation2 + $0x150] sm:$0xf]  ;;  %v4804_v35 = vor.u32 %v5574_v40, %v4803_v48 }
 0x2d0   : > { %3957 = vmatpush.bf16.msrb.mxu1 %v5024_v15  ;;  %v4992_v4 = vor.u32 %v5617_v24, %v4989_v49  ;;  %1695 = vst [vmem:[#allocation2 + $0x450] sm:$0xff] %v1674_v52  ;;  %v4836_v27 = vor.u32 %v5582_v18, %v4835_v59  ;;  %v5609_v1 = vld [vmem:[#allocation2 + $0x24c] sm:$0xf]  ;;  %v7479_v15 = vpop.permute.xlu1 %1820  ;;  %v5726_v59 = vld [vmem:[#allocation2 + $0x5ec] sm:$0xf0] }
 0x2d1   : > { %4011 = vmatpush.bf16.msra.mxu0 %v5092_v60  ;;  %1351 = vst [vmem:[#allocation2 + $0x330] sm:$0xff] %v1334_v37  ;;  %v7477_v63 = vpop.permute.xlu2 %2235  ;;  %v8053_v23 = vrot.slane %v7479_v15, 4  ;;  %v4925_v60 = vld [vmem:[#allocation2 + $0x228] sm:$0xf0]  ;;  %v8071_v37 = vrot.slane %v7154_v19, 4 }
 0x2d2   : > { %3947 = vmatmul.bf16.vlgmr.msrb.gmra.mxu3 %v6953_v51  ;;  %v8049_v49 = vrot.slane %v7477_v63, 4  ;;  %v5601_v14 = vld [vmem:[#allocation2 + $0x20c] sm:$0xf]  ;;  %v5718_v40 = vld [vmem:[#allocation2 + $0x5ac] sm:$0xf0] }
 0x2d3   : > { %3995 = vmatpush.bf16.msra.mxu3 %v4900_v2  ;;  %v4957_v2 = vld [vmem:[#allocation2 + $0x268] sm:$0xf0]  ;;  %v7483_v47 = vpop.permute.xlu0 %1810  ;;  %v1847_v52 = vsel %vm323_vm0, %v1831_v6, %v8053_v23  ;;  %v5542_v36 = vld [vmem:[#allocation2 + $0x2c] sm:$0xf0] }
 0x2d4   : > { %3958 = vmatpush.bf16.msrb.mxu1 %v4992_v4  ;;  %v4960_v7 = vor.u32 %v5609_v1, %v4957_v2  ;;  %v8052_v0 = vrot.slane %v7483_v47, 4  ;;  %v2262_v24 = vsel %vm323_vm0, %v2246_v43, %v8049_v49  ;;  %v1848_v18 = vsel %vm1835_vm5, %v7150_v38, %v1847_v52  ;;  %v5710_v49 = vld [vmem:[#allocation2 + $0x56c] sm:$0xf0] }
 0x2d5   : > { %v2263_v4 = vsel %vm2250_vm11, %v7297_v61, %v2262_v24  ;;  %v4928_v2 = vor.u32 %v5601_v14, %v4925_v60  ;;  %v5059_v61 = vld [vmem:[#allocation2 + $0x310] sm:$0xf]  ;;  %1865 = vst [vmem:[#allocation2 + $0x4f0] sm:$0xff] %v1848_v18 }
 0x2d6   : > { %v1839_v43 = vsel %vm323_vm0, %v8071_v37, %v8052_v0  ;;  %2280 = vst [vmem:[#allocation2 + $0x630] sm:$0xff] %v2263_v4  ;;  %v5379_v14 = vld [vmem:[#allocation2 + $0x590] sm:$0xf] }
 0x2d7   : > { %3996 = vmatpush.bf16.msra.mxu3 %v4868_v32  ;;  %v5411_v32 = vld [vmem:[#allocation2 + $0x5d0] sm:$0xf]  ;;  %v1840_v6 = vsel %vm1835_vm5, %v7154_v19, %v1839_v43  ;;  %v5380_v18 = vor.u32 %v5718_v40, %v5379_v14 }
 0x2d8   : > { %3959 = vmatpush.bf16.msrb.mxu1 %v4960_v7  ;;  %v5412_v1 = vor.u32 %v5726_v59, %v5411_v32  ;;  %v4771_v7 = vld [vmem:[#allocation2 + $0xd0] sm:$0xf]  ;;  %1861 = vst [vmem:[#allocation2 + $0x4d0] sm:$0xff] %v1840_v6  ;;  %v7509_v60 = vpop.permute.xlu1 %1727 }
 0x2d9   : > { %v5638_v38 = vld [vmem:[#allocation2 + $0x32c] sm:$0xf0]  ;;  %v7507_v52 = vpop.permute.xlu2 %1561  ;;  %v1744_v32 = vrot.slane %v7509_v60, 4 }
 0x2da   : > { %v5060_v24 = vor.u32 %v5638_v38, %v5059_v61  ;;  %v5558_v4 = vld [vmem:[#allocation2 + $0xac] sm:$0xf0]  ;;  %v8050_v19 = vrot.slane %v7507_v52, 4 }
 0x2db   : > { %3997 = vmatpush.bf16.msra.mxu3 %v4836_v27  ;;  %v5566_v27 = vld [vmem:[#allocation2 + $0xec] sm:$0xf0] }
 0x2dc   : > { %3960 = vmatpush.bf16.msrb.mxu1 %v4928_v2  ;;  %v4772_v48 = vor.u32 %v5566_v27, %v4771_v7  ;;  %v5630_v37 = vld [vmem:[#allocation2 + $0x2ec] sm:$0xf0]  ;;  %4012 = vmatpush.bf16.msra.mxu0 %v5060_v24  ;;  %v8072_v27 = vrot.slane %v7261_v33, 4  ;;  %v8074_v24 = vrot.slane %v7064_v41, 4 }
 0x2dd   : > { %v4739_v2 = vld [vmem:[#allocation2 + $0x90] sm:$0xf] }
 0x2de   : > { %v5347_v59 = vld [vmem:[#allocation2 + $0x550] sm:$0xf]  ;;  %v1590_v6 = vsel %vm323_vm0, %v8072_v27, %v8050_v19  ;;  %v4740_v61 = vor.u32 %v5558_v4, %v4739_v2 }
 0x2df   : > { %3998 = vmatpush.bf16.msra.mxu3 %v4804_v35  ;;  %3961 = vmatmul.bf16.vlgmr.msrb.gmra.mxu1 %v7116_v46  ;;  %v7514_v35 = vpop.permute.xlu0 %2401  ;;  %v5027_v38 = vld [vmem:[#allocation2 + $0x2d0] sm:$0xf]  ;;  %v1591_v40 = vsel %vm1586_vm10, %v7261_v33, %v1590_v6 }
 0x2e0   : > { %4023 = vmatpush.bf16.msra.mxu1 %v5412_v1  ;;  %v2413_v43 = vrot.slane %v7514_v35, 4  ;;  %v8073_v1 = vrot.slane %v7026_v8, 4  ;;  %v5028_v27 = vor.u32 %v5630_v37, %v5027_v38  ;;  %v5550_v19 = vld [vmem:[#allocation2 + $0x6c] sm:$0xf0]  ;;  %1612 = vst [vmem:[#allocation2 + $0x410] sm:$0xff] %v1591_v40 }
 0x2e1   : > { %v5622_v2 = vld [vmem:[#allocation2 + $0x2ac] sm:$0xf0] }
 0x2e2   : > { %v1756_v7 = vsel %vm323_vm0, %v8073_v1, %v1744_v32  ;;  %v2428_v14 = vsel %vm323_vm0, %v8074_v24, %v2413_v43  ;;  %4013 = vmatpush.bf16.msra.mxu0 %v5028_v27  ;;  %v4707_v33 = vld [vmem:[#allocation2 + $0x50] sm:$0xf]  ;;  %v2155_v24 = vpop.permute.xlu2 %2154 }
 0x2e3   : > { %3999 = vmatpush.bf16.msra.mxu3 %v4772_v48  ;;  %v1757_v48 = vsel %vm1752_vm6, %v7026_v8, %v1756_v7  ;;  %v2429_v4 = vsel %vm2416_vm7, %v7064_v41, %v2428_v14  ;;  %v5315_v8 = vld [vmem:[#allocation2 + $0x510] sm:$0xf]  ;;  %v4708_v6 = vor.u32 %v5550_v19, %v4707_v33  ;;  %v2165_v0 = vrot.slane %v2155_v24, 4  ;;  %v7538_v41 = vpop.permute.xlu1 %2318 }
 0x2e4   : > { %4024 = vmatpush.bf16.msra.mxu1 %v5380_v18  ;;  %v5348_v18 = vor.u32 %v5710_v49, %v5347_v59  ;;  %1778 = vst [vmem:[#allocation2 + $0x490] sm:$0xff] %v1757_v48  ;;  %v4995_v1 = vld [vmem:[#allocation2 + $0x290] sm:$0xf]  ;;  %v5157_v48 = vld [vmem:[#allocation2 + $0x3f0] sm:$0xf0]  ;;  %v8054_v14 = vrot.slane %v7538_v41, 4 }
 0x2e5   : > { %2446 = vst [vmem:[#allocation2 + $0x6b0] sm:$0xff] %v2429_v4  ;;  %v4996_v7 = vor.u32 %v5622_v2, %v4995_v1  ;;  %v5702_v37 = vld [vmem:[#allocation2 + $0x52c] sm:$0xf0]  ;;  %v5658_v1 = vld [vmem:[#allocation2 + $0x3d4] sm:$0xf] }
 0x2e6   : > { %v4675_v38 = vld [vmem:[#allocation2 + $0x10] sm:$0xf]  ;;  %v5316_v59 = vor.u32 %v5702_v37, %v5315_v8  ;;  %v8077_v37 = vrot.slane %v7102_v34, 4 }
 0x2e7   : > { %4000 = vmatpush.bf16.msra.mxu3 %v4740_v61  ;;  %v5614_v40 = vld [vmem:[#allocation2 + $0x26c] sm:$0xf0]  ;;  %v7540_v49 = vpop.permute.xlu0 %2308  ;;  %4014 = vmatpush.bf16.msra.mxu0 %v4996_v7  ;;  %v4676_v33 = vor.u32 %v5542_v36, %v4675_v38  ;;  %v8076_v7 = vrot.slane %v7265_v62, 4  ;;  %v5722_v38 = vld [vmem:[#allocation2 + $0x5d4] sm:$0xf] }
 0x2e8   : > { %4025 = vmatpush.bf16.msra.mxu1 %v5348_v18  ;;  %v4963_v61 = vld [vmem:[#allocation2 + $0x250] sm:$0xf]  ;;  %v2325_v19 = vrot.slane %v7540_v49, 4  ;;  %v8075_v18 = vrot.slane %v7222_v29, 4 }
 0x2e9   : > { %v5283_v27 = vld [vmem:[#allocation2 + $0x4d0] sm:$0xf]  ;;  %v2345_v24 = vsel %vm323_vm0, %v8076_v7, %v8054_v14  ;;  %v5125_v7 = vld [vmem:[#allocation2 + $0x3b0] sm:$0xf0] }
 0x2ea   : > { %v5694_v4 = vld [vmem:[#allocation2 + $0x4ec] sm:$0xf0]  ;;  %v2181_v2 = vsel %vm323_vm0, %v8075_v18, %v2165_v0  ;;  %v2337_v23 = vsel %vm323_vm0, %v8077_v37, %v2325_v19  ;;  %v5160_v0 = vor.u32 %v5658_v1, %v5157_v48  ;;  %v5093_v14 = vld [vmem:[#allocation2 + $0x370] sm:$0xf0] }
 0x2eb   : > { %4001 = vmatpush.bf16.msra.mxu3 %v4708_v6  ;;  %v4964_v6 = vor.u32 %v5614_v40, %v4963_v61  ;;  %v2182_v8 = vsel %vm2167_vm14, %v7222_v29, %v2181_v2  ;;  %v5507_v36 = vld [vmem:[#allocation2 + $0x690] sm:$0xf]  ;;  %v2346_v29 = vsel %vm2333_vm9, %v7265_v62, %v2345_v24  ;;  %v2338_v40 = vsel %vm2333_vm9, %v7102_v34, %v2337_v23  ;;  %v5650_v2 = vld [vmem:[#allocation2 + $0x394] sm:$0xf]  ;;  %v2062_v62 = vpop.permute.xlu2 %2061 }
 0x2ec   : > { %4026 = vmatpush.bf16.msra.mxu1 %v5316_v59  ;;  %v5606_v59 = vld [vmem:[#allocation2 + $0x22c] sm:$0xf0]  ;;  %2198 = vst [vmem:[#allocation2 + $0x5f8] sm:$0xff] %v2182_v8  ;;  %v5284_v61 = vor.u32 %v5694_v4, %v5283_v27  ;;  %v5642_v8 = vld [vmem:[#allocation2 + $0x354] sm:$0xf]  ;;  %v5128_v24 = vor.u32 %v5650_v2, %v5125_v7  ;;  %v2077_v23 = vrot.slane %v2062_v62, 4  ;;  %v7564_v27 = vpop.permute.xlu1 %2225  ;;  %v5416_v4 = vor.u32 %v5722_v38, %v5413_v9 }
 0x2ed   : > { %v4931_v18 = vld [vmem:[#allocation2 + $0x210] sm:$0xf]  ;;  %2363 = vst [vmem:[#allocation2 + $0x670] sm:$0xff] %v2346_v29  ;;  %4015 = vmatpush.bf16.msra.mxu0 %v4964_v6  ;;  %v5381_v29 = vld [vmem:[#allocation2 + $0x5b0] sm:$0xf0] }
 0x2ee   : > { %v5750_v37 = vld [vmem:[#allocation2 + $0x6ac] sm:$0xf0]  ;;  %2359 = vst [vmem:[#allocation2 + $0x650] sm:$0xff] %v2338_v40  ;;  %v4932_v16 = vor.u32 %v5606_v59, %v4931_v18  ;;  %v8078_v40 = vrot.slane %v7259_v39, 4  ;;  %v5714_v2 = vld [vmem:[#allocation2 + $0x594] sm:$0xf] }
 0x2ef   : > { %4002 = vmatpush.bf16.msra.mxu3 %v4676_v33  ;;  %v5251_v48 = vld [vmem:[#allocation2 + $0x490] sm:$0xf]  ;;  %v5508_v1 = vor.u32 %v5750_v37, %v5507_v36  ;;  %v7566_v33 = vpop.permute.xlu0 %1654  ;;  %v5096_v36 = vor.u32 %v5642_v8, %v5093_v14  ;;  %v8080_v14 = vrot.slane %v7224_v20, 4  ;;  %v5384_v37 = vor.u32 %v5714_v2, %v5381_v29  ;;  %v5706_v62 = vld [vmem:[#allocation2 + $0x554] sm:$0xf] }
 0x2f0   : > { %4027 = vmatpush.bf16.msra.mxu1 %v5284_v61  ;;  %v5686_v34 = vld [vmem:[#allocation2 + $0x4ac] sm:$0xf0]  ;;  %v1666_v59 = vrot.slane %v7566_v33, 4  ;;  %v2090_v61 = vsel %vm323_vm0, %v8078_v40, %v2077_v23  ;;  %v4901_v2 = vld [vmem:[#allocation2 + $0x1f0] sm:$0xf0] }
 0x2f1   : > { %4042 = vmatpush.bf16.msra.mxu2 %v5508_v1  ;;  %v5252_v6 = vor.u32 %v5686_v34, %v5251_v48  ;;  %4016 = vmatpush.bf16.msra.mxu0 %v4932_v16  ;;  %v2091_v9 = vsel %vm2084_vm1, %v7259_v39, %v2090_v61  ;;  %v8079_v16 = vrot.slane %v7301_v22, 4  ;;  %v5061_v1 = vld [vmem:[#allocation2 + $0x330] sm:$0xf0] }
 0x2f2   : > { %4003 = vmatmul.bf16.vlgmr.msra.gmra.mxu3 %v6953_v51  ;;  %v1681_v18 = vsel %vm323_vm0, %v8080_v14, %v1666_v59  ;;  %2111 = vst [vmem:[#allocation2 + $0x598] sm:$0xff] %v2091_v9  ;;  %v5634_v34 = vld [vmem:[#allocation2 + $0x314] sm:$0xf] }
 0x2f3   : > { %4065 = vmatpush.bf16.msrb.mxu3 %v5160_v0  ;;  %v2242_v0 = vrot.slane %v7564_v27, 4  ;;  %v1682_v39 = vsel %vm1669_vm8, %v7224_v20, %v1681_v18  ;;  %v1989_v23 = vpop.permute.xlu2 %1988  ;;  %v5029_v61 = vld [vmem:[#allocation2 + $0x2f0] sm:$0xf0] }
 0x2f4   : > { %4028 = vmatpush.bf16.msra.mxu1 %v5252_v6  ;;  %v5742_v48 = vld [vmem:[#allocation2 + $0x66c] sm:$0xf0]  ;;  %4017 = vmatmul.bf16.vlgmr.msra.gmra.mxu0 %v7116_v46  ;;  %1699 = vst [vmem:[#allocation2 + $0x470] sm:$0xff] %v1682_v39  ;;  %v5349_v6 = vld [vmem:[#allocation2 + $0x570] sm:$0xf0]  ;;  %v1491_v40 = vpop.permute.xlu1 %1490 }
 0x2f5   : > { %4079 = vmatpush.bf16.msrb.mxu0 %v5416_v4  ;;  %v2254_v38 = vsel %vm323_vm0, %v8079_v16, %v2242_v0  ;;  %v5475_v8 = vld [vmem:[#allocation2 + $0x650] sm:$0xf]  ;;  %v5064_v4 = vor.u32 %v5634_v34, %v5061_v1  ;;  %v5352_v20 = vor.u32 %v5706_v62, %v5349_v6  ;;  %v1501_v9 = vrot.slane %v1491_v40, 4  ;;  %v5626_v18 = vld [vmem:[#allocation2 + $0x2d4] sm:$0xf] }
 0x2f6   : > { %v2255_v7 = vsel %vm2250_vm11, %v7301_v22, %v2254_v38  ;;  %v1999_v22 = vrot.slane %v1989_v23, 4  ;;  %v5698_v38 = vld [vmem:[#allocation2 + $0x514] sm:$0xf]  ;;  %v5734_v34 = vld [vmem:[#allocation2 + $0x62c] sm:$0xf0] }
 0x2f7   : > { %4066 = vmatpush.bf16.msrb.mxu3 %v5128_v24  ;;  %2276 = vst [vmem:[#allocation2 + $0x610] sm:$0xff] %v2255_v7  ;;  %v5476_v24 = vor.u32 %v5742_v48, %v5475_v8  ;;  %v1481_v29 = vpop.permute.xlu0 %1480  ;;  %v4997_v7 = vld [vmem:[#allocation2 + $0x2b0] sm:$0xf0]  ;;  %v8082_v48 = vrot.slane %v7184_v42, 4  ;;  %v5032_v8 = vor.u32 %v5626_v18, %v5029_v61  ;;  %v1356_v61 = vld [vmem:[%s5882_s26 + $0x1c] sm:$0xff] }
 0x2f8   : > { %v1496_v16 = vrot.slane %v1481_v29, 4  ;;  %v5317_v62 = vld [vmem:[#allocation2 + $0x530] sm:$0xf0]  ;;  %1364 = vst [vmem:[#allocation2 + $0x358] sm:$0xff] %v1356_v61 }
 0x2f9   : > { %4080 = vmatpush.bf16.msrb.mxu0 %v5384_v37  ;;  %4043 = vmatpush.bf16.msra.mxu2 %v5476_v24  ;;  %v1517_v37 = vsel %vm323_vm0, %v1500_v50, %v1501_v9  ;;  %v5219_v24 = vld [vmem:[#allocation2 + $0x450] sm:$0xf]  ;;  %v5594_v23 = vld [vmem:[#allocation2 + $0x1d4] sm:$0xf]  ;;  %v5320_v6 = vor.u32 %v5698_v38, %v5317_v62 }
 0x2fa   : > { %v1509_v1 = vsel %vm323_vm0, %v8082_v48, %v1496_v16  ;;  %v5690_v29 = vld [vmem:[#allocation2 + $0x4d4] sm:$0xf]  ;;  %v4904_v16 = vor.u32 %v5594_v23, %v4901_v2 }
 0x2fb   : > { %4067 = vmatpush.bf16.msrb.mxu3 %v5096_v36  ;;  %v8081_v36 = vrot.slane %v7295_v28, 4  ;;  %v5678_v40 = vld [vmem:[#allocation2 + $0x46c] sm:$0xf0]  ;;  %v5586_v62 = vld [vmem:[#allocation2 + $0x194] sm:$0xf] }
 0x2fc   : > { %v5220_v9 = vor.u32 %v5678_v40, %v5219_v24  ;;  %v2145_v38 = vpop.permute.xlu1 %2144  ;;  %v5682_v24 = vld [vmem:[#allocation2 + $0x494] sm:$0xf] }
 0x2fd   : > { %v2015_v14 = vsel %vm323_vm0, %v8081_v36, %v1999_v22  ;;  %4081 = vmatpush.bf16.msrb.mxu0 %v5352_v20  ;;  %v5285_v22 = vld [vmem:[#allocation2 + $0x4f0] sm:$0xf0] }
 0x2fe   : > { %v2016_v39 = vsel %vm2001_vm3, %v7295_v28, %v2015_v14  ;;  %v1510_v28 = vsel %vm1503_vm15, %v7184_v42, %v1509_v1  ;;  %v5443_v50 = vld [vmem:[#allocation2 + $0x610] sm:$0xf]  ;;  %v5618_v36 = vld [vmem:[#allocation2 + $0x294] sm:$0xf]  ;;  %v1360_v14 = vld [vmem:[%s5882_s26 + $0x44] sm:$0xff]  ;;  %4029 = vmatpush.bf16.msra.mxu1 %v5220_v9 }
 0x2ff   : > { %4068 = vmatpush.bf16.msrb.mxu3 %v5064_v4  ;;  %2032 = vst [vmem:[#allocation2 + $0x578] sm:$0xff] %v2016_v39  ;;  %v1518_v4 = vsel %vm1503_vm15, %v7340_v3, %v1517_v37  ;;  %v5444_v20 = vor.u32 %v5734_v34, %v5443_v50  ;;  %v1906_v3 = vpop.permute.xlu2 %1905  ;;  %v5000_v18 = vor.u32 %v5618_v36, %v4997_v7  ;;  %v4869_v39 = vld [vmem:[#allocation2 + $0x1b0] sm:$0xf0]  ;;  %v7607_v48 = vpop.permute.xlu0 %1571 }
 0x300   : > { %1534 = vst [vmem:[#allocation2 + $0x3f8] sm:$0xff] %v1518_v4  ;;  %v1916_v42 = vrot.slane %v1906_v3, 4  ;;  %v5288_v37 = vor.u32 %v5690_v29, %v5285_v22  ;;  %v4965_v1 = vld [vmem:[#allocation2 + $0x270] sm:$0xf0]  ;;  %v1583_v2 = vrot.slane %v7607_v48, 4  ;;  %v4872_v34 = vor.u32 %v5586_v62, %v4869_v39  ;;  %v3808_v3 = vpop.f32.mrf.mxu2 }
 0x301   : > { %1530 = vst [vmem:[#allocation2 + $0x3d8] sm:$0xff] %v1510_v28  ;;  %4082 = vmatpush.bf16.msrb.mxu0 %v5320_v6  ;;  %4044 = vmatpush.bf16.msra.mxu2 %v5444_v20  ;;  %v5610_v23 = vld [vmem:[#allocation2 + $0x254] sm:$0xf]  ;;  %v8083_v6 = vrot.slane %v7148_v25, 4 }
 0x302   : > { %1368 = vst [vmem:[#allocation2 + $0x378] sm:$0xff] %v1360_v14  ;;  %v1932_v7 = vsel %vm323_vm0, %v1915_v45, %v1916_v42  ;;  %v4968_v45 = vor.u32 %v5610_v23, %v4965_v1  ;;  %v5253_v22 = vld [vmem:[#allocation2 + $0x4b0] sm:$0xf0] }
 0x303   : > { %4069 = vmatpush.bf16.msrb.mxu3 %v5032_v8  ;;  %v2160_v8 = vrot.slane %v2145_v38, 4  ;;  %v1933_v4 = vsel %vm1918_vm4, %v7334_v31, %v1932_v7  ;;  %v1598_v50 = vsel %vm323_vm0, %v8083_v6, %v1583_v2  ;;  %v4837_v40 = vld [vmem:[#allocation2 + $0x170] sm:$0xf0]  ;;  %v5256_v29 = vor.u32 %v5682_v24, %v5253_v22 }
 0x304   : > { %5525 = vmatmul.msk.bf16.vlgmr.msra.gmra.mxu2 %vm3767_vm12, %v7024_v11  ;;  %1949 = vst [vmem:[#allocation2 + $0x538] sm:$0xff] %v1933_v4  ;;  %v1599_v31 = vsel %vm1586_vm10, %v7148_v25, %v1598_v50  ;;  %v4933_v61 = vld [vmem:[#allocation2 + $0x230] sm:$0xf0]  ;;  %v1408_v1 = vpop.permute.xlu1 %1407 }
 0x305   : > { %4051 = vmatpush.bf16.msrb.mxu2 %v4904_v16  ;;  %4083 = vmatpush.bf16.msrb.mxu0 %v5288_v37  ;;  %v2173_v28 = vsel %vm323_vm0, %v2159_v54, %v2160_v8  ;;  %v3822_v54 = vpop.f32.mrf.mxu3  ;;  %v5578_v9 = vld [vmem:[#allocation2 + $0x154] sm:$0xf]  ;;  %1616 = vst [vmem:[#allocation2 + $0x430] sm:$0xff] %v1599_v31  ;;  %v3794_v37 = vpop.f32.mrf.mxu1  ;;  %v1418_v7 = vrot.slane %v1408_v1, 4 }
 0x306   : > { %v2174_v20 = vsel %vm2167_vm14, %v7336_v10, %v2173_v28  ;;  %v5221_v16 = vld [vmem:[#allocation2 + $0x470] sm:$0xf0]  ;;  %v4840_v36 = vor.u32 %v5578_v9, %v4837_v40  ;;  %v5727_v9 = vld [vmem:[#allocation2 + $0x5f4] sm:$0xf0] }
 0x307   : > { %4070 = vmatpush.bf16.msrb.mxu3 %v5000_v18  ;;  %2194 = vst [vmem:[#allocation2 + $0x5d8] sm:$0xff] %v2174_v20  ;;  %v5602_v14 = vld [vmem:[#allocation2 + $0x214] sm:$0xf]  ;;  %v3780_v18 = vpop.f32.mrf.mxu0  ;;  %v1730_v39 = vpop.permute.xlu2 %1729  ;;  %v1434_v22 = vsel %vm323_vm0, %v1417_v21, %v1418_v7  ;;  %v5187_v20 = vld [vmem:[#allocation2 + $0x410] sm:$0xf] }
 0x308   : > { %v4936_v42 = vor.u32 %v5602_v14, %v4933_v61  ;;  %v5674_v10 = vld [vmem:[#allocation2 + $0x454] sm:$0xf]  ;;  %v1745_v25 = vrot.slane %v1730_v39, 4  ;;  %v1398_v62 = vpop.permute.xlu0 %1397  ;;  %v3795_v24 = vadd.f32 %v3794_v37, %v3780_v18 }
 0x309   : > { %4052 = vmatpush.bf16.msrb.mxu2 %v4872_v34  ;;  %4084 = vmatpush.bf16.msrb.mxu0 %v5256_v29  ;;  %v4805_v38 = vld [vmem:[#allocation2 + $0x130] sm:$0xf0]  ;;  %v5224_v8 = vor.u32 %v5674_v10, %v5221_v16  ;;  %v1413_v34 = vrot.slane %v1398_v62, 4 }
 0x30a   : > { %v5570_v23 = vld [vmem:[#allocation2 + $0x114] sm:$0xf]  ;;  %v1758_v4 = vsel %vm323_vm0, %v1744_v32, %v1745_v25  ;;  %v3809_v50 = vadd.f32 %v3808_v3, %v3795_v24  ;;  %v1435_v32 = vsel %vm1420_vm2, %v7373_v17, %v1434_v22 }
 0x30b   : > { %4071 = vmatpush.bf16.msrb.mxu3 %v4968_v45  ;;  %v4808_v28 = vor.u32 %v5570_v23, %v4805_v38  ;;  %v4773_v6 = vld [vmem:[#allocation2 + $0xf0] sm:$0xf0]  ;;  %v1759_v45 = vsel %vm1752_vm6, %v7509_v60, %v1758_v4  ;;  %v1426_v40 = vsel %vm323_vm0, %v1412_v58, %v1413_v34  ;;  %1451 = vst [vmem:[#allocation2 + $0x3b8] sm:$0xff] %v1435_v32 }
 0x30c   : > { %v5666_v31 = vld [vmem:[#allocation2 + $0x414] sm:$0xf]  ;;  %1779 = vst [vmem:[#allocation2 + $0x498] sm:$0xff] %v1759_v45  ;;  %v1427_v61 = vsel %vm1420_vm2, %v7378_v26, %v1426_v40  ;;  %v7645_v21 = vadd.f32 %v3822_v54, %v3809_v50  ;;  %v5670_v16 = vld [vmem:[#allocation2 + $0x42c] sm:$0xf0]  ;;  %v1979_v62 = vpop.permute.xlu1 %1978 }
 0x30d   : > { %4053 = vmatpush.bf16.msrb.mxu2 %v4840_v36  ;;  %4085 = vmatpush.bf16.msrb.mxu0 %v5224_v8  ;;  %v5509_v29 = vld [vmem:[#allocation2 + $0x6b0] sm:$0xf0]  ;;  %1447 = vst [vmem:[#allocation2 + $0x398] sm:$0xff] %v1427_v61  ;;  %v5188_v14 = vor.u32 %v5670_v16, %v5187_v20  ;;  %v3824_v17 = vpop.f32.mrf.mxu3  ;;  %v3796_v54 = vpop.f32.mrf.mxu1  ;;  %v1994_v34 = vrot.slane %v1979_v62, 4  ;;  %v8084_v20 = vrot.slane %v7412_v53, 4 }
 0x30e   : > { %v5419_v60 = vld [vmem:[#allocation2 + $0x5d8] sm:$0xf]  ;;  %v5189_v58 = vld [vmem:[#allocation2 + $0x430] sm:$0xf0] }
 0x30f   : > { %4072 = vmatpush.bf16.msrb.mxu3 %v4936_v42  ;;  %v5420_v36 = vor.u32 %v5727_v9, %v5419_v60  ;;  %v5192_v3 = vor.u32 %v5666_v31, %v5189_v58  ;;  %v5562_v18 = vld [vmem:[#allocation2 + $0xd4] sm:$0xf]  ;;  %v3782_v42 = vpop.f32.mrf.mxu0  ;;  %v2404_v26 = vpop.permute.xlu2 %2403  ;;  %4030 = vmatpush.bf16.msra.mxu1 %v5188_v14  ;;  %v2007_v31 = vsel %vm323_vm0, %v8084_v20, %v1994_v34  ;;  %v5599_v9 = vld [vmem:[#allocation2 + $0x1f4] sm:$0xf0] }
 0x310   : > { %v5746_v39 = vld [vmem:[#allocation2 + $0x694] sm:$0xf]  ;;  %v4776_v10 = vor.u32 %v5562_v18, %v4773_v6  ;;  %v2414_v8 = vrot.slane %v2404_v26, 4  ;;  %v2072_v24 = vpop.permute.xlu0 %2071  ;;  %v3797_v7 = vadd.f32 %v3796_v54, %v3782_v42  ;;  %v5387_v20 = vld [vmem:[#allocation2 + $0x598] sm:$0xf] }
 0x311   : > { %4054 = vmatpush.bf16.msrb.mxu2 %v4808_v28  ;;  %v5512_v38 = vor.u32 %v5746_v39, %v5509_v29  ;;  %v4741_v37 = vld [vmem:[#allocation2 + $0xb0] sm:$0xf0]  ;;  %4086 = vmatpush.bf16.msrb.mxu0 %v5192_v3  ;;  %v2082_v23 = vrot.slane %v2072_v24, 4  ;;  %v3810_v28 = vpop.f32.mrf.mxu2  ;;  %v4907_v3 = vld [vmem:[#allocation2 + $0x1d8] sm:$0xf] }
 0x312   : > { %4073 = vmatmul.bf16.vlgmr.msrb.gmra.mxu3 %v7116_v46  ;;  %v5738_v25 = vld [vmem:[#allocation2 + $0x654] sm:$0xf]  ;;  %v2430_v6 = vsel %vm323_vm0, %v2413_v43, %v2414_v8  ;;  %v3811_v22 = vadd.f32 %v3810_v28, %v3797_v7  ;;  %4031 = vmatmul.bf16.vlgmr.msra.gmra.mxu1 %v6983_v13  ;;  %v2008_v43 = vsel %vm2001_vm3, %v7412_v53, %v2007_v31  ;;  %v8085_v7 = vrot.slane %v7448_v56, 4  ;;  %v4875_v28 = vld [vmem:[#allocation2 + $0x198] sm:$0xf] }
 0x313   : > { %4135 = vmatpush.bf16.msra.mxu3 %v5420_v36  ;;  %v5477_v1 = vld [vmem:[#allocation2 + $0x670] sm:$0xf0]  ;;  %4098 = vmatpush.bf16.msrb.mxu1 %v5512_v38  ;;  %v2431_v40 = vsel %vm2416_vm7, %v7514_v35, %v2430_v6  ;;  %v2098_v29 = vsel %vm323_vm0, %v2081_v5, %v2082_v23  ;;  %2028 = vst [vmem:[#allocation2 + $0x558] sm:$0xff] %v2008_v43  ;;  %v8086_v23 = vrot.slane %v7452_v57, 4  ;;  %v5583_v6 = vld [vmem:[#allocation2 + $0x174] sm:$0xf0] }
 0x314   : > { %v5554_v4 = vld [vmem:[#allocation2 + $0x94] sm:$0xf]  ;;  %v5480_v45 = vor.u32 %v5738_v25, %v5477_v1  ;;  %4087 = vmatmul.bf16.vlgmr.msrb.gmra.mxu0 %v6983_v13  ;;  %2447 = vst [vmem:[#allocation2 + $0x6b8] sm:$0xff] %v2431_v40  ;;  %v2099_v32 = vsel %vm2084_vm1, %v7416_v55, %v2098_v29  ;;  %v7664_v60 = vadd.f32 %v3824_v17, %v3811_v22  ;;  %v1896_v39 = vpop.permute.xlu1 %1895  ;;  %v5663_v25 = vld [vmem:[#allocation2 + $0x3f4] sm:$0xf0] }
 0x315   : > { %4055 = vmatpush.bf16.msrb.mxu2 %v4776_v10  ;;  %v4744_v50 = vor.u32 %v5554_v4, %v4741_v37  ;;  %v4709_v35 = vld [vmem:[#allocation2 + $0x70] sm:$0xf0]  ;;  %2115 = vst [vmem:[#allocation2 + $0x5b8] sm:$0xff] %v2099_v32  ;;  %v4908_v55 = vor.u32 %v5599_v9, %v4907_v3  ;;  %v5591_v10 = vld [vmem:[#allocation2 + $0x1b4] sm:$0xf0]  ;;  %v1911_v17 = vrot.slane %v1896_v39, 4  ;;  %v3836_v62 = vpop.f32.mrf.mxu3 }
 0x316   : > { %v5730_v61 = vld [vmem:[#allocation2 + $0x614] sm:$0xf]  ;;  %v5163_v37 = vld [vmem:[#allocation2 + $0x3d8] sm:$0xf] }
 0x317   : > { %4099 = vmatpush.bf16.msrb.mxu1 %v5480_v45  ;;  %v5546_v5 = vld [vmem:[#allocation2 + $0x54] sm:$0xf]  ;;  %v2311_v58 = vpop.permute.xlu2 %2310  ;;  %v3850_v1 = vpop.f32.mrf.mxu0  ;;  %v1924_v34 = vsel %vm323_vm0, %v8085_v7, %v1911_v17  ;;  %v5164_v40 = vor.u32 %v5663_v25, %v5163_v37  ;;  %v5655_v31 = vld [vmem:[#allocation2 + $0x3b4] sm:$0xf0] }
 0x318   : > { %v5445_v16 = vld [vmem:[#allocation2 + $0x630] sm:$0xf0]  ;;  %v4712_v36 = vor.u32 %v5546_v5, %v4709_v35  ;;  %v2326_v53 = vrot.slane %v2311_v58, 4  ;;  %v1309_v42 = vpop.permute.xlu0 %1308  ;;  %v3864_v45 = vpop.f32.mrf.mxu1  ;;  %v5131_v43 = vld [vmem:[#allocation2 + $0x398] sm:$0xf] }
 0x319   : > { %4056 = vmatpush.bf16.msrb.mxu2 %v4744_v50  ;;  %v5448_v14 = vor.u32 %v5730_v61, %v5445_v16  ;;  %v4677_v18 = vld [vmem:[#allocation2 + $0x30] sm:$0xf0]  ;;  %v1319_v38 = vrot.slane %v1309_v42, 4  ;;  %v3851_v50 = vadd.f32 %v3850_v1, %v3836_v62  ;;  %v3878_v32 = vpop.f32.mrf.mxu2  ;;  %v4843_v9 = vld [vmem:[#allocation2 + $0x158] sm:$0xf]  ;;  %v8087_v1 = vrot.slane %v7479_v15, 4 }
 0x31a   : > { %v5538_v26 = vld [vmem:[#allocation2 + $0x14] sm:$0xf]  ;;  %v2339_v54 = vsel %vm323_vm0, %v2325_v19, %v2326_v53  ;;  %v1925_v19 = vsel %vm1918_vm4, %v7448_v56, %v1924_v34  ;;  %v5355_v56 = vld [vmem:[#allocation2 + $0x558] sm:$0xf]  ;;  %v5132_v53 = vor.u32 %v5655_v31, %v5131_v43 }
 0x31b   : > { %4100 = vmatpush.bf16.msrb.mxu1 %v5448_v14  ;;  %v4680_v8 = vor.u32 %v5538_v26, %v4677_v18  ;;  %v2340_v24 = vsel %vm2333_vm9, %v7540_v49, %v2339_v54  ;;  %v1335_v4 = vsel %vm323_vm0, %v8086_v23, %v1319_v38  ;;  %v4876_v49 = vor.u32 %v5591_v10, %v4875_v28  ;;  %v5099_v16 = vld [vmem:[#allocation2 + $0x358] sm:$0xf] }
 0x31c   : > { %2360 = vst [vmem:[#allocation2 + $0x658] sm:$0xff] %v2340_v24  ;;  %v1336_v22 = vsel %vm1321_vm13, %v7452_v57, %v1335_v4  ;;  %v5719_v29 = vld [vmem:[#allocation2 + $0x5b4] sm:$0xf0]  ;;  %v3865_v35 = vadd.f32 %v3864_v45, %v3851_v50  ;;  %v1823_v14 = vpop.permute.xlu1 %1822  ;;  %v4844_v18 = vor.u32 %v5583_v6, %v4843_v9 }
 0x31d   : > { %4057 = vmatpush.bf16.msrb.mxu2 %v4712_v36  ;;  %1945 = vst [vmem:[#allocation2 + $0x518] sm:$0xff] %v1925_v19  ;;  %v5388_v61 = vor.u32 %v5719_v29, %v5387_v20  ;;  %v5647_v58 = vld [vmem:[#allocation2 + $0x374] sm:$0xf0]  ;;  %v1833_v42 = vrot.slane %v1823_v14, 4 }
 0x31e   : > { %1352 = vst [vmem:[#allocation2 + $0x338] sm:$0xff] %v1336_v22  ;;  %v7681_v57 = vadd.f32 %v3878_v32, %v3865_v35  ;;  %v5575_v39 = vld [vmem:[#allocation2 + $0x134] sm:$0xf0]  ;;  %v5100_v37 = vor.u32 %v5647_v58, %v5099_v16  ;;  %v8090_v16 = vrot.slane %v7410_v12, 4 }
 0x31f   : > { %4107 = vmatpush.bf16.msra.mxu1 %v4908_v55  ;;  %v1574_v5 = vpop.permute.xlu2 %1573  ;;  %4136 = vmatpush.bf16.msra.mxu3 %v5388_v61  ;;  %v5711_v26 = vld [vmem:[#allocation2 + $0x574] sm:$0xf0]  ;;  %v1849_v54 = vsel %vm323_vm0, %v8087_v1, %v1833_v42  ;;  %v3852_v7 = vpop.f32.mrf.mxu0 }
 0x320   : > { %v1584_v36 = vrot.slane %v1574_v5, 4  ;;  %v1813_v3 = vpop.permute.xlu0 %1812  ;;  %v5356_v17 = vor.u32 %v5711_v26, %v5355_v56  ;;  %v4811_v38 = vld [vmem:[#allocation2 + $0x118] sm:$0xf]  ;;  %v1850_v34 = vsel %vm1835_vm5, %v7479_v15, %v1849_v54  ;;  %v3866_v19 = vpop.f32.mrf.mxu1  ;;  %v8089_v5 = vrot.slane %v7371_v30, 4 }
 0x321   : > { %4058 = vmatpush.bf16.msrb.mxu2 %v4680_v8  ;;  %v1828_v55 = vrot.slane %v1813_v3, 4  ;;  %v8088_v8 = vrot.slane %v7483_v47, 4  ;;  %v4812_v24 = vor.u32 %v5575_v39, %v4811_v38  ;;  %v5703_v4 = vld [vmem:[#allocation2 + $0x534] sm:$0xf0]  ;;  %1866 = vst [vmem:[#allocation2 + $0x4f8] sm:$0xff] %v1850_v34  ;;  %v3880_v20 = vpop.f32.mrf.mxu2 }
 0x322   : > { %v1600_v10 = vsel %vm323_vm0, %v1583_v2, %v1584_v36  ;;  %5526 = vmatmul.msk.bf16.vlgmr.msrb.gmra.mxu1 %vm3767_vm12, %v7024_v11  ;;  %v3838_v2 = vpop.f32.mrf.mxu3  ;;  %v5567_v50 = vld [vmem:[#allocation2 + $0xf4] sm:$0xf0] }
 0x323   : > { %4108 = vmatpush.bf16.msra.mxu1 %v4876_v49  ;;  %v1601_v25 = vsel %vm1586_vm10, %v7607_v48, %v1600_v10  ;;  %v1841_v62 = vsel %vm323_vm0, %v8088_v8, %v1828_v55  ;;  %4137 = vmatpush.bf16.msra.mxu3 %v5356_v17  ;;  %v3853_v28 = vadd.f32 %v3852_v7, %v3838_v2  ;;  %v4779_v49 = vld [vmem:[#allocation2 + $0xd8] sm:$0xf]  ;;  %v5659_v2 = vld [vmem:[#allocation2 + $0x3dc] sm:$0xf] }
 0x324   : > { %4059 = vmatmul.bf16.vlgmr.msrb.gmra.mxu2 %v6953_v51  ;;  %1617 = vst [vmem:[#allocation2 + $0x438] sm:$0xff] %v1601_v25  ;;  %v1842_v48 = vsel %vm1835_vm5, %v7483_v47, %v1841_v62  ;;  %v5323_v23 = vld [vmem:[#allocation2 + $0x518] sm:$0xf]  ;;  %v2394_v15 = vpop.permute.xlu1 %2393  ;;  %v4780_v47 = vor.u32 %v5567_v50, %v4779_v49  ;;  %v5165_v7 = vld [vmem:[#allocation2 + $0x3f8] sm:$0xf0] }
 0x325   : > { %4121 = vmatpush.bf16.msra.mxu2 %v5164_v40  ;;  %v5324_v6 = vor.u32 %v5703_v4, %v5323_v23  ;;  %v5639_v45 = vld [vmem:[#allocation2 + $0x334] sm:$0xf0]  ;;  %1862 = vst [vmem:[#allocation2 + $0x4d8] sm:$0xff] %v1842_v48  ;;  %v3867_v22 = vadd.f32 %v3866_v19, %v3853_v28  ;;  %v2409_v32 = vrot.slane %v2394_v15, 4  ;;  %v8091_v48 = vrot.slane %v7446_v44, 4 }
 0x326   : > { %v5067_v40 = vld [vmem:[#allocation2 + $0x318] sm:$0xf]  ;;  %v5723_v15 = vld [vmem:[#allocation2 + $0x5dc] sm:$0xf] }
 0x327   : > { %4109 = vmatpush.bf16.msra.mxu1 %v4844_v18  ;;  %4138 = vmatpush.bf16.msra.mxu3 %v5324_v6  ;;  %v5068_v29 = vor.u32 %v5639_v45, %v5067_v40  ;;  %v7701_v43 = vadd.f32 %v3880_v20, %v3867_v22  ;;  %v5559_v61 = vld [vmem:[#allocation2 + $0xb4] sm:$0xf0]  ;;  %v2422_v56 = vsel %vm323_vm0, %v8089_v5, %v2409_v32 }
 0x328   : > { %v1740_v31 = vpop.permute.xlu0 %1739  ;;  %v5631_v9 = vld [vmem:[#allocation2 + $0x2f4] sm:$0xf0]  ;;  %v2423_v3 = vsel %vm2416_vm7, %v7371_v30, %v2422_v56 }
 0x329   : > { %4122 = vmatpush.bf16.msra.mxu2 %v5132_v53  ;;  %v1750_v35 = vrot.slane %v1740_v31, 4  ;;  %v4747_v36 = vld [vmem:[#allocation2 + $0x98] sm:$0xf]  ;;  %2443 = vst [vmem:[#allocation2 + $0x698] sm:$0xff] %v2423_v3  ;;  %v3906_v50 = vpop.f32.mrf.mxu2 }
 0x32a   : > { %v5035_v14 = vld [vmem:[#allocation2 + $0x2d8] sm:$0xf]  ;;  %v4748_v53 = vor.u32 %v5559_v61, %v4747_v36  ;;  %v5133_v61 = vld [vmem:[#allocation2 + $0x3b8] sm:$0xf0] }
 0x32b   : > { %4110 = vmatpush.bf16.msra.mxu1 %v4812_v24  ;;  %v1766_v58 = vsel %vm323_vm0, %v8090_v16, %v1750_v35  ;;  %v5036_v39 = vor.u32 %v5631_v9, %v5035_v14  ;;  %v5695_v42 = vld [vmem:[#allocation2 + $0x4f4] sm:$0xf0]  ;;  %v5651_v35 = vld [vmem:[#allocation2 + $0x39c] sm:$0xf] }
 0x32c   : > { %v1767_v18 = vsel %vm1752_vm6, %v7410_v12, %v1766_v58  ;;  %v5551_v55 = vld [vmem:[#allocation2 + $0x74] sm:$0xf0]  ;;  %v1657_v25 = vpop.permute.xlu1 %1656  ;;  %v5421_v58 = vld [vmem:[#allocation2 + $0x5f8] sm:$0xf0] }
 0x32d   : > { %4123 = vmatpush.bf16.msra.mxu2 %v5100_v37  ;;  %v5291_v26 = vld [vmem:[#allocation2 + $0x4d8] sm:$0xf]  ;;  %1783 = vst [vmem:[#allocation2 + $0x4b8] sm:$0xff] %v1767_v18  ;;  %v1667_v8 = vrot.slane %v1657_v25, 4  ;;  %v5643_v36 = vld [vmem:[#allocation2 + $0x35c] sm:$0xf] }
 0x32e   : > { %v5623_v10 = vld [vmem:[#allocation2 + $0x2b4] sm:$0xf0]  ;;  %v5292_v17 = vor.u32 %v5695_v42, %v5291_v26  ;;  %v3920_v9 = vpop.f32.mrf.mxu0  ;;  %v5101_v14 = vld [vmem:[#allocation2 + $0x378] sm:$0xf0]  ;;  %v5424_v42 = vor.u32 %v5723_v15, %v5421_v58 }
 0x32f   : > { %4111 = vmatpush.bf16.msra.mxu1 %v4780_v47  ;;  %v4715_v38 = vld [vmem:[#allocation2 + $0x58] sm:$0xf]  ;;  %v1683_v34 = vsel %vm323_vm0, %v1666_v59, %v1667_v8  ;;  %v5168_v59 = vor.u32 %v5659_v2, %v5165_v7  ;;  %v5104_v25 = vor.u32 %v5643_v36, %v5101_v14  ;;  %v5069_v7 = vld [vmem:[#allocation2 + $0x338] sm:$0xf0] }
 0x330   : > { %v5003_v37 = vld [vmem:[#allocation2 + $0x298] sm:$0xf]  ;;  %4139 = vmatpush.bf16.msra.mxu3 %v5292_v17  ;;  %v1647_v1 = vpop.permute.xlu0 %1646  ;;  %v4716_v30 = vor.u32 %v5551_v55, %v4715_v38  ;;  %v1684_v45 = vsel %vm1669_vm8, %v7566_v33, %v1683_v34  ;;  %v5389_v55 = vld [vmem:[#allocation2 + $0x5b8] sm:$0xf0]  ;;  %v8093_v38 = vrot.slane %v7538_v41, 4 }
 0x331   : > { %4124 = vmatpush.bf16.msra.mxu2 %v5068_v29  ;;  %v5004_v54 = vor.u32 %v5623_v10, %v5003_v37  ;;  %v1662_v12 = vrot.slane %v1647_v1, 4  ;;  %v5543_v62 = vld [vmem:[#allocation2 + $0x34] sm:$0xf0]  ;;  %1700 = vst [vmem:[#allocation2 + $0x478] sm:$0xff] %v1684_v45  ;;  %v8092_v10 = vrot.slane %v7507_v52, 4 }
 0x332   : > { %v5615_v24 = vld [vmem:[#allocation2 + $0x274] sm:$0xf0]  ;;  %v5707_v34 = vld [vmem:[#allocation2 + $0x55c] sm:$0xf] }
 0x333   : > { %4112 = vmatpush.bf16.msra.mxu1 %v4748_v53  ;;  %v1675_v23 = vsel %vm323_vm0, %v8091_v48, %v1662_v12  ;;  %v4683_v4 = vld [vmem:[#allocation2 + $0x18] sm:$0xf]  ;;  %v5699_v15 = vld [vmem:[#allocation2 + $0x51c] sm:$0xf] }
 0x334   : > { %v4971_v28 = vld [vmem:[#allocation2 + $0x258] sm:$0xf]  ;;  %v1676_v19 = vsel %vm1669_vm8, %v7446_v44, %v1675_v23  ;;  %v4684_v22 = vor.u32 %v5543_v62, %v4683_v4  ;;  %v3892_v44 = vpop.f32.mrf.mxu3  ;;  %v1564_v5 = vpop.permute.xlu1 %1563 }
 0x335   : > { %4125 = vmatpush.bf16.msra.mxu2 %v5036_v39  ;;  %v5607_v6 = vld [vmem:[#allocation2 + $0x234] sm:$0xf0]  ;;  %v4972_v49 = vor.u32 %v5615_v24, %v4971_v28  ;;  %1696 = vst [vmem:[#allocation2 + $0x458] sm:$0xff] %v1676_v19  ;;  %v3907_v3 = vadd.f32 %v3906_v50, %v3892_v44  ;;  %v1579_v18 = vrot.slane %v1564_v5, 4  ;;  %v5136_v39 = vor.u32 %v5651_v35, %v5133_v61  ;;  %v3908_v24 = vpop.f32.mrf.mxu2  ;;  %v5357_v28 = vld [vmem:[#allocation2 + $0x578] sm:$0xf0] }
 0x336   : > { %v5515_v40 = vld [vmem:[#allocation2 + $0x698] sm:$0xf]  ;;  %v3922_v23 = vpop.f32.mrf.mxu0  ;;  %v5325_v35 = vld [vmem:[#allocation2 + $0x538] sm:$0xf0] }
 0x337   : > { %4113 = vmatpush.bf16.msra.mxu1 %v4716_v30  ;;  %v5751_v20 = vld [vmem:[#allocation2 + $0x6b4] sm:$0xf0]  ;;  %v3921_v26 = vadd.f32 %v3920_v9, %v3907_v3  ;;  %v1592_v17 = vsel %vm323_vm0, %v8092_v10, %v1579_v18  ;;  %v5747_v5 = vld [vmem:[#allocation2 + $0x69c] sm:$0xf] }
 0x338   : > { %v5259_v31 = vld [vmem:[#allocation2 + $0x498] sm:$0xf]  ;;  %v5516_v29 = vor.u32 %v5751_v20, %v5515_v40  ;;  %v2321_v56 = vpop.permute.xlu0 %2320  ;;  %v1593_v1 = vsel %vm1586_vm10, %v7507_v52, %v1592_v17  ;;  %v5037_v20 = vld [vmem:[#allocation2 + $0x2f8] sm:$0xf0] }
 0x339   : > { %4126 = vmatpush.bf16.msra.mxu2 %v5004_v54  ;;  %v5687_v47 = vld [vmem:[#allocation2 + $0x4b4] sm:$0xf0]  ;;  %v2331_v53 = vrot.slane %v2321_v56, 4  ;;  %v5715_v54 = vld [vmem:[#allocation2 + $0x59c] sm:$0xf]  ;;  %1613 = vst [vmem:[#allocation2 + $0x418] sm:$0xff] %v1593_v1 }
 0x33a   : > { %v5260_v32 = vor.u32 %v5687_v47, %v5259_v31  ;;  %4154 = vmatpush.bf16.msra.mxu0 %v5516_v29  ;;  %v4939_v33 = vld [vmem:[#allocation2 + $0x218] sm:$0xf]  ;;  %v5392_v12 = vor.u32 %v5715_v54, %v5389_v55  ;;  %v8094_v31 = vrot.slane %v7477_v63, 4  ;;  %v5517_v3 = vld [vmem:[#allocation2 + $0x6b8] sm:$0xf0] }
 0x33b   : > { %4114 = vmatpush.bf16.msra.mxu1 %v4684_v22  ;;  %v4940_v16 = vor.u32 %v5607_v6, %v4939_v33  ;;  %v2347_v37 = vsel %vm323_vm0, %v8093_v38, %v2331_v53  ;;  %v5679_v8 = vld [vmem:[#allocation2 + $0x474] sm:$0xf0]  ;;  %v5360_v22 = vor.u32 %v5707_v34, %v5357_v28  ;;  %v5005_v18 = vld [vmem:[#allocation2 + $0x2b8] sm:$0xf0]  ;;  %v5520_v53 = vor.u32 %v5747_v5, %v5517_v3 }
 0x33c   : > { %4140 = vmatpush.bf16.msra.mxu3 %v5260_v32  ;;  %v2348_v30 = vsel %vm2333_vm9, %v7538_v41, %v2347_v37  ;;  %v5227_v62 = vld [vmem:[#allocation2 + $0x458] sm:$0xf]  ;;  %v3894_v48 = vpop.f32.mrf.mxu3  ;;  %v5635_v41 = vld [vmem:[#allocation2 + $0x31c] sm:$0xf] }
 0x33d   : > { %4127 = vmatpush.bf16.msra.mxu2 %v4972_v49  ;;  %2364 = vst [vmem:[#allocation2 + $0x678] sm:$0xff] %v2348_v30  ;;  %v5228_v2 = vor.u32 %v5679_v8, %v5227_v62  ;;  %v3909_v6 = vadd.f32 %v3908_v24, %v3894_v48  ;;  %v5072_v19 = vor.u32 %v5635_v41, %v5069_v7  ;;  %v3934_v49 = vpop.f32.mrf.mxu1  ;;  %v5627_v32 = vld [vmem:[#allocation2 + $0x2dc] sm:$0xf]  ;;  %v5671_v9 = vld [vmem:[#allocation2 + $0x434] sm:$0xf0] }
 0x33e   : > { %4115 = vmatmul.bf16.vlgmr.msra.gmra.mxu1 %v6953_v51  ;;  %v2238_v52 = vpop.permute.xlu1 %2237  ;;  %v7735_v40 = vadd.f32 %v3934_v49, %v3921_v26  ;;  %v5040_v56 = vor.u32 %v5627_v32, %v5037_v20  ;;  %v5483_v36 = vld [vmem:[#allocation2 + $0x658] sm:$0xf]  ;;  %v5739_v17 = vld [vmem:[#allocation2 + $0x65c] sm:$0xf] }
 0x33f   : > { %4177 = vmatpush.bf16.msrb.mxu1 %v5168_v59  ;;  %v2248_v50 = vrot.slane %v2238_v52, 4  ;;  %v3923_v59 = vadd.f32 %v3922_v23, %v3909_v6  ;;  %v4973_v37 = vld [vmem:[#allocation2 + $0x278] sm:$0xf0] }
 0x340   : > { %4141 = vmatpush.bf16.msra.mxu3 %v5228_v2  ;;  %v2228_v4 = vpop.permute.xlu0 %2227  ;;  %v5195_v44 = vld [vmem:[#allocation2 + $0x418] sm:$0xf]  ;;  %v5261_v1 = vld [vmem:[#allocation2 + $0x4b8] sm:$0xf0] }
 0x341   : > { %4128 = vmatpush.bf16.msra.mxu2 %v4940_v16  ;;  %v2243_v45 = vrot.slane %v2228_v4, 4  ;;  %v2264_v47 = vsel %vm323_vm0, %v8094_v31, %v2248_v50  ;;  %v5328_v16 = vor.u32 %v5699_v15, %v5325_v35  ;;  %v5196_v58 = vor.u32 %v5671_v9, %v5195_v44  ;;  %v4909_v30 = vld [vmem:[#allocation2 + $0x1f8] sm:$0xf0] }
 0x342   : > { %v2265_v61 = vsel %vm2250_vm11, %v7477_v63, %v2264_v47  ;;  %v5691_v63 = vld [vmem:[#allocation2 + $0x4dc] sm:$0xf] }
 0x343   : > { %4178 = vmatpush.bf16.msrb.mxu1 %v5136_v39  ;;  %v2256_v29 = vsel %vm323_vm0, %v2242_v0, %v2243_v45  ;;  %2281 = vst [vmem:[#allocation2 + $0x638] sm:$0xff] %v2265_v61  ;;  %v5293_v39 = vld [vmem:[#allocation2 + $0x4f8] sm:$0xf0] }
 0x344   : > { %4129 = vmatmul.bf16.vlgmr.msra.gmra.mxu2 %v7116_v46  ;;  %v2257_v33 = vsel %vm2250_vm11, %v7564_v27, %v2256_v29  ;;  %v5743_v14 = vld [vmem:[#allocation2 + $0x674] sm:$0xf0]  ;;  %4142 = vmatpush.bf16.msra.mxu3 %v5196_v58  ;;  %v5619_v27 = vld [vmem:[#allocation2 + $0x29c] sm:$0xf]  ;;  %v5296_v10 = vor.u32 %v5691_v63, %v5293_v39 }
 0x345   : > { %4191 = vmatpush.bf16.msrb.mxu2 %v5424_v42  ;;  %2277 = vst [vmem:[#allocation2 + $0x618] sm:$0xff] %v2257_v33  ;;  %v5484_v0 = vor.u32 %v5743_v14, %v5483_v36  ;;  %v5485_v42 = vld [vmem:[#allocation2 + $0x678] sm:$0xf0]  ;;  %v5008_v55 = vor.u32 %v5619_v27, %v5005_v18  ;;  %v3936_v26 = vpop.f32.mrf.mxu1 }
 0x346   : > { %v7747_v38 = vadd.f32 %v3936_v26, %v3923_v59  ;;  %v5611_v54 = vld [vmem:[#allocation2 + $0x25c] sm:$0xf] }
 0x347   : > { %4179 = vmatpush.bf16.msrb.mxu1 %v5104_v25  ;;  %4155 = vmatpush.bf16.msra.mxu0 %v5484_v0  ;;  %v5488_v25 = vor.u32 %v5739_v17, %v5485_v42  ;;  %v4976_v62 = vor.u32 %v5611_v54, %v4973_v37  ;;  %v5683_v24 = vld [vmem:[#allocation2 + $0x49c] sm:$0xf] }
 0x348   : > { %4210 = vmatpush.bf16.msrb.mxu3 %v5520_v53  ;;  %v5264_v34 = vor.u32 %v5683_v24, %v5261_v1  ;;  %v5595_v23 = vld [vmem:[#allocation2 + $0x1dc] sm:$0xf]  ;;  %v3990_v53 = vpop.f32.mrf.mxu0 }
 0x349   : > { %4192 = vmatpush.bf16.msrb.mxu2 %v5392_v12  ;;  %4143 = vmatmul.bf16.vlgmr.msra.gmra.mxu3 %v6983_v13  ;;  %v4941_v4 = vld [vmem:[#allocation2 + $0x238] sm:$0xf0]  ;;  %v4912_v41 = vor.u32 %v5595_v23, %v4909_v30 }
 0x34a   : > { %v5735_v8 = vld [vmem:[#allocation2 + $0x634] sm:$0xf0]  ;;  %v5453_v12 = vld [vmem:[#allocation2 + $0x638] sm:$0xf0] }
 0x34b   : > { %4180 = vmatpush.bf16.msrb.mxu1 %v5072_v19  ;;  %v5675_v28 = vld [vmem:[#allocation2 + $0x45c] sm:$0xf] }
 0x34c   : > { %4211 = vmatpush.bf16.msrb.mxu3 %v5488_v25  ;;  %v5451_v2 = vld [vmem:[#allocation2 + $0x618] sm:$0xf]  ;;  %v5731_v7 = vld [vmem:[#allocation2 + $0x61c] sm:$0xf] }
 0x34d   : > { %4193 = vmatpush.bf16.msrb.mxu2 %v5360_v22  ;;  %v5452_v48 = vor.u32 %v5735_v8, %v5451_v2  ;;  %v5456_v52 = vor.u32 %v5731_v7, %v5453_v12  ;;  %v5229_v6 = vld [vmem:[#allocation2 + $0x478] sm:$0xf0] }
 0x34e   : > { %v5603_v50 = vld [vmem:[#allocation2 + $0x21c] sm:$0xf]  ;;  %v5232_v22 = vor.u32 %v5675_v28, %v5229_v6 }
 0x34f   : > { %4181 = vmatpush.bf16.msrb.mxu1 %v5040_v56  ;;  %4156 = vmatpush.bf16.msra.mxu0 %v5452_v48  ;;  %v4877_v45 = vld [vmem:[#allocation2 + $0x1b8] sm:$0xf0]  ;;  %v4944_v19 = vor.u32 %v5603_v50, %v4941_v4  ;;  %v7766_v48 = vld [vmem:[%s8017_s5] sm:$0xff] }
 0x350   : > { %4212 = vmatpush.bf16.msrb.mxu3 %v5456_v52  ;;  %v5587_v49 = vld [vmem:[#allocation2 + $0x19c] sm:$0xf]  ;;  %v7757_v42 = vpop.f32.mrf.mxu0  ;;  %v4221_v28 = vperm.slane %v7766_v48, 0  ;;  %v4222_v6 = vperm.slane %v7766_v48, 1 }
 0x351   : > { %4194 = vmatpush.bf16.msrb.mxu2 %v5328_v16  ;;  %v4880_v20 = vor.u32 %v5587_v49, %v4877_v45  ;;  %v5667_v15 = vld [vmem:[#allocation2 + $0x41c] sm:$0xf] }
 0x352   : > { %5527 = vmatmul.msk.bf16.vlgmr.msra.gmra.mxu0 %vm3767_vm12, %v7024_v11  ;;  %v4845_v59 = vld [vmem:[#allocation2 + $0x178] sm:$0xf0]  ;;  %v4237_v49 = vmul.f32 %v4221_v28, %v7645_v21 }
 0x353   : > { %4182 = vmatpush.bf16.msrb.mxu1 %v5008_v55  ;;  %4163 = vmatpush.bf16.msrb.mxu0 %v4912_v41  ;;  %v5197_v31 = vld [vmem:[#allocation2 + $0x438] sm:$0xf0] }
 0x354   : > { %v5200_v47 = vor.u32 %v5667_v15, %v5197_v31  ;;  %v5579_v29 = vld [vmem:[#allocation2 + $0x15c] sm:$0xf]  ;;  %v4223_v15 = vperm.slane %v7766_v48, 2 }
 0x355   : > { %4195 = vmatpush.bf16.msrb.mxu2 %v5296_v10  ;;  %v4848_v32 = vor.u32 %v5579_v29, %v4845_v59  ;;  %v4813_v35 = vld [vmem:[#allocation2 + $0x138] sm:$0xf0]  ;;  %v3948_v63 = vpop.f32.mrf.mxu3  ;;  %v4224_v29 = vperm.slane %v7766_v48, 3 }
 0x356   : > { %v5571_v61 = vld [vmem:[#allocation2 + $0x11c] sm:$0xf] }
 0x357   : > { %4183 = vmatpush.bf16.msrb.mxu1 %v4976_v62  ;;  %4164 = vmatpush.bf16.msrb.mxu0 %v4880_v20  ;;  %v4816_v33 = vor.u32 %v5571_v61, %v4813_v35  ;;  %v4781_v44 = vld [vmem:[#allocation2 + $0xf8] sm:$0xf0]  ;;  %v4238_v20 = vmul.f32 %v4222_v6, %v7681_v57 }
 0x358   : > { %v5563_v9 = vld [vmem:[#allocation2 + $0xdc] sm:$0xf] }
 0x359   : > { %4196 = vmatpush.bf16.msrb.mxu2 %v5264_v34  ;;  %5528 = vmatmul.msk.bf16.vlgmr.msrb.gmra.mxu3 %vm3767_vm12, %v7024_v11  ;;  %v4784_v5 = vor.u32 %v5563_v9, %v4781_v44  ;;  %v4749_v56 = vld [vmem:[#allocation2 + $0xb8] sm:$0xf0]  ;;  %v3976_v11 = vpop.f32.mrf.mxu2  ;;  %v4274_v44 = vmul.f32 %v4238_v20, %v7681_v57  ;;  %v4239_v9 = vmul.f32 %v4223_v15, %v7735_v40 }
 0x35a   : > { %v5555_v16 = vld [vmem:[#allocation2 + $0x9c] sm:$0xf] }
 0x35b   : > { %4184 = vmatpush.bf16.msrb.mxu1 %v4944_v19  ;;  %4165 = vmatpush.bf16.msrb.mxu0 %v4848_v32  ;;  %v4752_v58 = vor.u32 %v5555_v16, %v4749_v56  ;;  %v5547_v36 = vld [vmem:[#allocation2 + $0x5c] sm:$0xf]  ;;  %v4225_v56 = vperm.slane %v7766_v48, 4 }
 0x35c   : > { %v4685_v0 = vld [vmem:[#allocation2 + $0x38] sm:$0xf0] }
 0x35d   : > { %4197 = vmatpush.bf16.msrb.mxu2 %v5232_v22  ;;  %v5539_v3 = vld [vmem:[#allocation2 + $0x1c] sm:$0xf]  ;;  %v3950_v55 = vpop.f32.mrf.mxu3 }
 0x35e   : > { %4185 = vmatmul.bf16.vlgmr.msrb.gmra.mxu1 %v7116_v46  ;;  %v4717_v46 = vld [vmem:[#allocation2 + $0x78] sm:$0xf0]  ;;  %v4688_v18 = vor.u32 %v5539_v3, %v4685_v0  ;;  %v4246_v0 = vmul.f32 %v4222_v6, %v7701_v43 }
 0x35f   : > { %4166 = vmatpush.bf16.msrb.mxu0 %v4816_v33  ;;  %v4720_v14 = vor.u32 %v5547_v36, %v4717_v46  ;;  %v4273_v33 = vmul.f32 %v4237_v49, %v7645_v21 }
 0x361   : > { %4198 = vmatpush.bf16.msrb.mxu2 %v5200_v47  ;;  %v3978_v27 = vpop.f32.mrf.mxu2 }
 0x363   : > { %4167 = vmatpush.bf16.msrb.mxu0 %v4784_v5 }
 0x364   : > { %4199 = vmatmul.bf16.vlgmr.msrb.gmra.mxu2 %v6983_v13  ;;  %v3962_v13 = vpop.f32.mrf.mxu1 }
 0x365   : > { %v3963_v52 = vadd.f32 %v3962_v13, %v3948_v63  ;;  %v4253_v63 = vadd.f32 %v4238_v20, %v4237_v49 }
 0x367   : > { %4168 = vmatpush.bf16.msrb.mxu0 %v4752_v58  ;;  %v3977_v19 = vadd.f32 %v3976_v11, %v3963_v52  ;;  %v4226_v11 = vperm.slane %v7766_v48, 5  ;;  %v4247_v52 = vmul.f32 %v4223_v15, %v7747_v38 }
 0x369   : > { %v7773_v47 = vadd.f32 %v3990_v53, %v3977_v19 }
 0x36b   : > { %4169 = vmatpush.bf16.msrb.mxu0 %v4720_v14  ;;  %v4245_v14 = vmul.f32 %v4221_v28, %v7664_v60  ;;  %v4240_v3 = vmul.f32 %v4224_v29, %v7773_v47 }
 0x36c   : > { %v3964_v39 = vpop.f32.mrf.mxu1 }
 0x36d   : > { %v3965_v32 = vadd.f32 %v3964_v39, %v3950_v55  ;;  %v4275_v39 = vmul.f32 %v4239_v9, %v7735_v40  ;;  %v4289_v55 = vadd.f32 %v4274_v44, %v4273_v33 }
 0x36f   : > { %4170 = vmatpush.bf16.msrb.mxu0 %v4688_v18  ;;  %v3979_v18 = vadd.f32 %v3978_v27, %v3965_v32 }
 0x371   : > { %v4018_v17 = vpop.f32.mrf.mxu0 }
 0x372   : > { %4171 = vmatmul.bf16.vlgmr.msrb.gmra.mxu0 %v6953_v51 }
 0x375   : > { %v4004_v37 = vpop.f32.mrf.mxu3 }
 0x376   : > { %v4019_v50 = vadd.f32 %v4018_v17, %v4004_v37 }
 0x379   : > { %v4020_v30 = vpop.f32.mrf.mxu0 }
 0x37d   : > { %v4006_v54 = vpop.f32.mrf.mxu3 }
 0x37e   : > { %v4021_v16 = vadd.f32 %v4020_v30, %v4006_v54  ;;  %v4227_v30 = vperm.slane %v7766_v48, 6  ;;  %v4281_v54 = vmul.f32 %v4245_v14, %v7664_v60 }
 0x387   : > { %v4046_v10 = vpop.f32.mrf.mxu2 }
 0x38f   : > { %v4032_v26 = vpop.f32.mrf.mxu1  ;;  %v7759_v1 = vpop.f32.mrf.mxu2 }
 0x390   : > { %v4033_v59 = vadd.f32 %v4032_v26, %v4019_v50 }
 0x391   : > { %v4088_v12 = vpop.f32.mrf.mxu0 }
 0x392   : > { %v7779_v5 = vadd.f32 %v4046_v10, %v4033_v59 }
 0x394   : > { %v4241_v10 = vmul.f32 %v4225_v56, %v7779_v5 }
 0x395   : > { %v4074_v62 = vpop.f32.mrf.mxu3 }
 0x397   : > { %v4034_v25 = vpop.f32.mrf.mxu1 }
 0x398   : > { %v4035_v17 = vadd.f32 %v4034_v25, %v4021_v16 }
 0x399   : > { %v4090_v7 = vpop.f32.mrf.mxu0 }
 0x39d   : > { %v4076_v34 = vpop.f32.mrf.mxu3 }
 0x39f   : > { %v4102_v8 = vpop.f32.mrf.mxu1 }
 0x3a7   : > { %v4060_v51 = vpop.f32.mrf.mxu2  ;;  %v7761_v24 = vpop.f32.mrf.mxu1 }
 0x3a8   : > { %v4075_v22 = vadd.f32 %v4074_v62, %v4060_v51  ;;  %v4276_v51 = vmul.f32 %v4240_v3, %v7773_v47 }
 0x3aa   : > { %v4089_v35 = vadd.f32 %v4088_v12, %v4075_v22  ;;  %v7797_v12 = vadd.f32 %v7757_v42, %v3979_v18 }
 0x3ac   : > { %v7785_v13 = vadd.f32 %v4102_v8, %v4089_v35  ;;  %v4282_v8 = vmul.f32 %v4246_v0, %v7701_v43  ;;  %v4248_v59 = vmul.f32 %v4224_v29, %v7797_v12  ;;  %v4228_v35 = vperm.slane %v7766_v48, 7 }
 0x3ae   : > { %v4242_v62 = vmul.f32 %v4226_v11, %v7785_v13  ;;  %v4298_v49 = vadd.f32 %v4282_v8, %v4281_v54 }
 0x3af   : > { %v4062_v2 = vpop.f32.mrf.mxu2 }
 0x3b0   : > { %v4077_v26 = vadd.f32 %v4076_v34, %v4062_v2  ;;  %v4254_v34 = vadd.f32 %v4253_v63, %v4239_v9 }
 0x3b2   : > { %v4091_v25 = vadd.f32 %v4090_v7, %v4077_v26  ;;  %v4255_v42 = vadd.f32 %v4254_v34, %v4240_v3  ;;  %v4278_v7 = vmul.f32 %v4242_v62, %v7785_v13 }
 0x3b4   : > { %v7809_v32 = vadd.f32 %v7761_v24, %v4091_v25 }
 0x3bb   : > { %v4116_v23 = vpop.f32.mrf.mxu1 }
 0x3c3   : > { %v4118_v61 = vpop.f32.mrf.mxu1 }
 0x3c7   : > { %v4130_v4 = vpop.f32.mrf.mxu2 }
 0x3c8   : > { %v4131_v31 = vadd.f32 %v4130_v4, %v4116_v23  ;;  %v4290_v23 = vadd.f32 %v4289_v55, %v4275_v39  ;;  %v4277_v4 = vmul.f32 %v4241_v10, %v7779_v5 }
 0x3ca   : > { %v4291_v20 = vadd.f32 %v4290_v23, %v4276_v51 }
 0x3cc   : > { %v4144_v45 = vpop.f32.mrf.mxu3  ;;  %v4292_v33 = vadd.f32 %v4291_v20, %v4277_v4 }
 0x3cd   : > { %v4145_v58 = vadd.f32 %v4144_v45, %v4131_v31  ;;  %v4262_v45 = vadd.f32 %v4246_v0, %v4245_v14  ;;  %v4256_v31 = vadd.f32 %v4255_v42, %v4241_v10  ;;  %v4284_v14 = vmul.f32 %v4248_v59, %v7797_v12 }
 0x3ce   : > { %v4293_v24 = vadd.f32 %v4292_v33, %v4278_v7  ;;  %v4250_v0 = vmul.f32 %v4226_v11, %v7809_v32 }
 0x3cf   : > { %v4158_v41 = vpop.f32.mrf.mxu0  ;;  %v4132_v46 = vpop.f32.mrf.mxu2  ;;  %v4257_v16 = vadd.f32 %v4256_v31, %v4242_v62 }
 0x3d0   : > { %v7790_v37 = vadd.f32 %v4158_v41, %v4145_v58  ;;  %v4133_v27 = vadd.f32 %v4132_v46, %v4118_v61  ;;  %v7803_v41 = vadd.f32 %v7759_v1, %v4035_v17  ;;  %v4283_v61 = vmul.f32 %v4247_v52, %v7747_v38 }
 0x3d1   : > { %v4263_v46 = vadd.f32 %v4262_v45, %v4247_v52  ;;  %v4286_v11 = vmul.f32 %v4250_v0, %v7809_v32 }
 0x3d2   : > { %v4243_v28 = vmul.f32 %v4227_v30, %v7790_v37  ;;  %v4249_v44 = vmul.f32 %v4225_v56, %v7803_v41  ;;  %v4299_v18 = vadd.f32 %v4298_v49, %v4283_v61 }
 0x3d4   : > { %v4146_v53 = vpop.f32.mrf.mxu3  ;;  %v4279_v9 = vmul.f32 %v4243_v28, %v7790_v37  ;;  %v4258_v3 = vadd.f32 %v4257_v16, %v4243_v28  ;;  %v4285_v56 = vmul.f32 %v4249_v44, %v7803_v41  ;;  %v4300_v54 = vadd.f32 %v4299_v18, %v4284_v14 }
 0x3d5   : > { %v4147_v19 = vadd.f32 %v4146_v53, %v4133_v27  ;;  %v4264_v53 = vadd.f32 %v4263_v46, %v4248_v59 }
 0x3d6   : > { %v4294_v55 = vadd.f32 %v4293_v24, %v4279_v9  ;;  %v4301_v34 = vadd.f32 %v4300_v54, %v4285_v56 }
 0x3d7   : > { %v4160_v36 = vpop.f32.mrf.mxu0  ;;  %v4265_v8 = vadd.f32 %v4264_v53, %v4249_v44 }
 0x3d8   : > { %v7815_v58 = vadd.f32 %v4160_v36, %v4147_v19 }
 0x3d9   : > { %v4266_v23 = vadd.f32 %v4265_v8, %v4250_v0 }
 0x3da   : > { %v4251_v36 = vmul.f32 %v4227_v30, %v7815_v58  ;;  %v4302_v30 = vadd.f32 %v4301_v34, %v4286_v11  ;;  %v4336_v11 = vld [vmem:[%s8014_s2 + $0x8] sm:$0xff] }
 0x3db   : > { %v4186_v2 = vpop.f32.mrf.mxu1  ;;  %v4362_v34 = vld [vmem:[%s8015_s3 + $0x8] sm:$0xff] }
 0x3dc   : > { %v4214_v15 = vpop.f32.mrf.mxu3  ;;  %v4287_v25 = vmul.f32 %v4251_v36, %v7815_v58  ;;  %v4267_v28 = vadd.f32 %v4266_v23, %v4251_v36 }
 0x3de   : > { %v4303_v45 = vadd.f32 %v4302_v30, %v4287_v25  ;;  %v4367_v25 = vld [vmem:[%s266_s28] sm:$0xff] }
 0x3e3   : > { %v4188_v63 = vpop.f32.mrf.mxu1 }
 0x3e7   : > { %v4200_v6 = vpop.f32.mrf.mxu2 }
 0x3ef   : > { %v4172_v50 = vpop.f32.mrf.mxu0  ;;  %v4202_v27 = vpop.f32.mrf.mxu2 }
 0x3f0   : > { %v4187_v22 = vadd.f32 %v4186_v2, %v4172_v50  ;;  %v4216_v2 = vpop.f32.mrf.mxu3 }
 0x3f2   : > { %v4201_v1 = vadd.f32 %v4200_v6, %v4187_v22  ;;  %v5831_v22 = vmov 0  }
 0x3f3   : > { %5790 = vset.pattern.permute.xlu2 %v5831_v22  ;;  %5792 = vset.pattern.permute.xlu1 %v5831_v22 }
 0x3f4   : > { %v7817_v29 = vadd.f32 %v4214_v15, %v4201_v1  ;;  %5791 = vset.pattern.permute.xlu0 %v5831_v22 }
 0x3f6   : > { %v4244_v48 = vmul.f32 %v4228_v35, %v7817_v29 }
 0x3f7   : > { %v4174_v39 = vpop.f32.mrf.mxu0 }
 0x3f8   : > { %v4189_v26 = vadd.f32 %v4188_v63, %v4174_v39  ;;  %v4259_v10 = vadd.f32 %v4258_v3, %v4244_v48  ;;  %v4280_v17 = vmul.f32 %v4244_v48, %v7817_v29  ;;  %v4335_v63 = vld [vmem:[%s8014_s2] sm:$0xff] }
 0x3fa   : > { %v4203_v51 = vadd.f32 %v4202_v27, %v4189_v26  ;;  %4260 = vadd.xlane.f32.xlu2 %v4259_v10  ;;  %v4295_v62 = vadd.f32 %v4294_v55, %v4280_v17  ;;  %v4361_v17 = vld [vmem:[%s8015_s3] sm:$0xff] }
 0x3fc   : > { %v7827_v52 = vadd.f32 %v4216_v2, %v4203_v51  ;;  %4296 = vadd.xlane.f32.xlu1 %v4295_v62 }
 0x3fe   : > { %v4252_v4 = vmul.f32 %v4228_v35, %v7827_v52 }
 0x400   : > { %v4268_v6 = vadd.f32 %v4267_v28, %v4252_v4  ;;  %v4288_v50 = vmul.f32 %v4252_v4, %v7827_v52  ;;  %v4368_v4 = vld [vmem:[%s266_s28 + $0x8] sm:$0xff] }
 0x402   : > { %4269 = vadd.xlane.f32.xlu0 %v4268_v6  ;;  %v4304_v42 = vadd.f32 %v4303_v45, %v4288_v50  ;;  %v7850_v6 = vld [vmem:[%s8017_s5] sm:$0xff] }
 0x404   : > { %4305 = vadd.xlane.f32.xlu2 %v4304_v42 }
 0x46d   : > { %v4261_v19 = vpop.xlane.xlu2 %4260 }
 0x46e   : > { %v4325_v49 = vmul.f32 0.001953125, %v4261_v19 }
 0x46f   : > { %v4297_v20 = vpop.xlane.xlu1 %4296 }
 0x470   : > { %v4329_v59 = vmul.f32 %v4325_v49, %v4325_v49  ;;  %v4327_v7 = vmul.f32 0.001953125, %v4297_v20 }
 0x472   : > { %v4331_v15 = vsub.f32 %v4327_v7, %v4329_v59 }
 0x474   : > { %v4333_v31 = vmax.f32 %v4331_v15, 0.0  ;;  %v4513_v15 = vperm.slane %v7850_v6, 0 }
 0x475   : > { %v4270_v1 = vpop.xlane.xlu0 %4269 }
 0x476   : > { %v4337_v35 = vadd.f32 1e-05, %v4333_v31  ;;  %v4326_v61 = vmul.f32 0.001953125, %v4270_v1  ;;  %v4514_v31 = vperm.slane %v7850_v6, 1  ;;  %v4518_v1 = vperm.slane %v7850_v6, 5 }
 0x477   : > { %v4306_v33 = vpop.xlane.xlu2 %4305 }
 0x478   : > { %5793 = vrsqrt.f32 %v4337_v35  ;;  %v4330_v44 = vmul.f32 %v4326_v61, %v4326_v61  ;;  %v4328_v9 = vmul.f32 0.001953125, %v4306_v33  ;;  %vm4345_vm13 = vweird.f32 %v4337_v35 }
 0x47a   : > { %v4332_v16 = vsub.f32 %v4328_v9, %v4330_v44 }
 0x47c   : > { %v4334_v46 = vmax.f32 %v4332_v16, 0.0 }
 0x47e   : > { %v5794_v14 = vpop.eup %5793  ;;  %v4338_v24 = vadd.f32 1e-05, %v4334_v46 }
 0x47f   : > { %v4340_v0 = vmul.f32 %v5794_v14, %v4337_v35  ;;  %vm4346_vm0 = vweird.f32 %v5794_v14 }
 0x480   : > { %5795 = vrsqrt.f32 %v4338_v24  ;;  %vm4347_vm14 = vmor %vm4345_vm13, %vm4346_vm0  ;;  %vm4355_vm1 = vweird.f32 %v4338_v24 }
 0x481   : > { %v4341_v48 = vmul.f32 %v5794_v14, %v4340_v0 }
 0x483   : > { %v4342_v3 = vmul.f32 0.5, %v4341_v48 }
 0x485   : > { %v4343_v18 = vsub.f32 1.5, %v4342_v3 }
 0x486   : > { %v5796_v53 = vpop.eup %5795 }
 0x487   : > { %v4350_v56 = vmul.f32 %v5796_v53, %v4338_v24  ;;  %v4344_v39 = vmul.f32 %v5794_v14, %v4343_v18  ;;  %vm4356_vm15 = vweird.f32 %v5796_v53 }
 0x488   : > { %vm4357_vm2 = vmor %vm4355_vm1, %vm4356_vm15 }
 0x489   : > { %v4351_v55 = vmul.f32 %v5796_v53, %v4350_v56  ;;  %v4348_v36 = vsel %vm4347_vm14, %v5794_v14, %v4344_v39 }
 0x48a   : > { %v4359_v26 = vmul.f32 %v4348_v36, %v4335_v63 }
 0x48b   : > { %v4352_v10 = vmul.f32 0.5, %v4351_v55 }
 0x48c   : > { %4387 = vperm.xlu2 %5790, %v4359_v26   ;;  %v4363_v54 = vmul.f32 %v4359_v26, %v4325_v49 }
 0x48d   : > { %v4353_v27 = vsub.f32 1.5, %v4352_v10 }
 0x48e   : > { %v4365_v8 = vsub.f32 %v4361_v17, %v4363_v54 }
 0x48f   : > { %v4354_v51 = vmul.f32 %v5796_v53, %v4353_v27 }
 0x490   : > { %4413 = vperm.xlu1 %5792, %v4365_v8  }
 0x491   : > { %v4358_v62 = vsel %vm4357_vm2, %v5796_v53, %v4354_v51 }
 0x492   : > { %v4360_v2 = vmul.f32 %v4358_v62, %v4336_v11 }
 0x494   : > { %4392 = vperm.xlu0 %5791, %v4360_v2   ;;  %v4364_v23 = vmul.f32 %v4360_v2, %v4326_v61 }
 0x496   : > { %v4366_v30 = vsub.f32 %v4362_v34, %v4364_v23 }
 0x498   : > { %4487 = vperm.xlu1 %5792, %v4367_v25   ;;  %4418 = vperm.xlu2 %5790, %v4366_v30  }
 0x4a0   : > { %4492 = vperm.xlu2 %5790, %v4368_v4  }
 0x4e6   : > { %v4388_v28 = vpop.permute.xlu2 %4387 }
 0x4e7   : > { %v4395_v50 = vmul.f32 %v4388_v28, %v7645_v21  ;;  %v4396_v45 = vmul.f32 %v4388_v28, %v7681_v57  ;;  %v4397_v42 = vmul.f32 %v4388_v28, %v7735_v40  ;;  %v4398_v19 = vmul.f32 %v4388_v28, %v7773_v47 }
 0x4e8   : > { %v4399_v22 = vmul.f32 %v4388_v28, %v7779_v5  ;;  %v4400_v20 = vmul.f32 %v4388_v28, %v7785_v13  ;;  %v4401_v59 = vmul.f32 %v4388_v28, %v7790_v37  ;;  %v4402_v7 = vmul.f32 %v4388_v28, %v7817_v29 }
 0x4e9   : > { %v4515_v21 = vperm.slane %v7850_v6, 2  ;;  %v4516_v57 = vperm.slane %v7850_v6, 3  ;;  %v4517_v40 = vperm.slane %v7850_v6, 4  ;;  %v4519_v13 = vperm.slane %v7850_v6, 6 }
 0x4ea   : > { %v4520_v37 = vperm.slane %v7850_v6, 7 }
 0x4f2   : > { %v4419_v44 = vpop.permute.xlu2 %4418 }
 0x4fa   : > { %v7899_v26 = vpop.permute.xlu2 %4492 }
 0x502   : > { %v4414_v49 = vpop.permute.xlu1 %4413 }
 0x503   : > { %v7865_v47 = vadd.f32 %v4414_v49, %v4395_v50  ;;  %v7870_v29 = vadd.f32 %v4414_v49, %v4396_v45  ;;  %v7875_v9 = vadd.f32 %v4414_v49, %v4397_v42  ;;  %v7877_v16 = vadd.f32 %v4414_v49, %v4398_v19 }
 0x504   : > { %v4425_v24 = vadd.f32 %v4414_v49, %v4399_v22  ;;  %v4426_v0 = vadd.f32 %v4414_v49, %v4400_v20  ;;  %v4427_v18 = vadd.f32 %v4414_v49, %v4401_v59 }
 0x505   : > { %vm4437_vm3 = vcmp.ge.f32.partialorder %v7865_v47, 0.0  ;;  %vm4438_vm4 = vcmp.ge.f32.partialorder %v7870_v29, 0.0  ;;  %vm4439_vm6 = vcmp.ge.f32.partialorder %v7875_v9, 0.0  ;;  %vm4440_vm7 = vcmp.ge.f32.partialorder %v7877_v16, 0.0 }
 0x506   : > { %v4393_v5 = vpop.permute.xlu0 %4392  ;;  %vm4441_vm8 = vcmp.ge.f32.partialorder %v4425_v24, 0.0  ;;  %vm4442_vm9 = vcmp.ge.f32.partialorder %v4426_v0, 0.0  ;;  %vm4443_vm10 = vcmp.ge.f32.partialorder %v4427_v18, 0.0  ;;  %v4453_v2 = vmul.f32 0.1, %v7865_v47 }
 0x507   : > { %v4403_v35 = vmul.f32 %v4393_v5, %v7664_v60  ;;  %v4404_v61 = vmul.f32 %v4393_v5, %v7701_v43  ;;  %v4405_v33 = vmul.f32 %v4393_v5, %v7747_v38  ;;  %v4406_v46 = vmul.f32 %v4393_v5, %v7797_v12 }
 0x508   : > { %v4407_v14 = vmul.f32 %v4393_v5, %v7803_v41  ;;  %v4408_v48 = vmul.f32 %v4393_v5, %v7809_v32  ;;  %v7882_v60 = vadd.f32 %v4414_v49, %v4402_v7  ;;  %v4409_v43 = vmul.f32 %v4393_v5, %v7815_v58 }
 0x509   : > { %v4429_v3 = vadd.f32 %v4419_v44, %v4403_v35  ;;  %v4410_v38 = vmul.f32 %v4393_v5, %v7827_v52  ;;  %v4430_v53 = vadd.f32 %v4419_v44, %v4404_v61  ;;  %v4431_v56 = vadd.f32 %v4419_v44, %v4405_v33 }
 0x50a   : > { %v4432_v12 = vadd.f32 %v4419_v44, %v4406_v46  ;;  %v7888_v41 = vadd.f32 %v4419_v44, %v4407_v14  ;;  %v7891_v32 = vadd.f32 %v4419_v44, %v4408_v48  ;;  %v7894_v58 = vadd.f32 %v4419_v44, %v4409_v43  ;;  %v4488_v23 = vpop.permute.xlu1 %4487 }
 0x50b   : > { %vm4445_vm5 = vcmp.ge.f32.partialorder %v4429_v3, 0.0  ;;  %v4461_v63 = vmul.f32 0.1, %v4429_v3  ;;  %v7896_v52 = vadd.f32 %v4419_v44, %v4410_v38  ;;  %v4462_v39 = vmul.f32 0.1, %v4430_v53 }
 0x50c   : > { %v4463_v55 = vmul.f32 0.1, %v4431_v56  ;;  %vm4444_vm11 = vcmp.ge.f32.partialorder %v7882_v60, 0.0  ;;  %vm4446_vm12 = vcmp.ge.f32.partialorder %v4430_v53, 0.0  ;;  %vm4447_vm0 = vcmp.ge.f32.partialorder %v4431_v56, 0.0 }
 0x50d   : > { %v4477_v36 = vsel %vm4445_vm5, %v4429_v3, %v4461_v63  ;;  %vm4448_vm13 = vcmp.ge.f32.partialorder %v4432_v12, 0.0  ;;  %vm4449_vm14 = vcmp.ge.f32.partialorder %v7888_v41, 0.0  ;;  %vm4450_vm15 = vcmp.ge.f32.partialorder %v7891_v32, 0.0 }
 0x50e   : > { %v4464_v10 = vmul.f32 0.1, %v4432_v12  ;;  %v4465_v17 = vmul.f32 0.1, %v7888_v41  ;;  %v4503_v54 = vadd.f32 %v7899_v26, %v4477_v36  ;;  %vm4451_vm1 = vcmp.ge.f32.partialorder %v7894_v58, 0.0 }
 0x50f   : > { %v4466_v27 = vmul.f32 0.1, %v7891_v32  ;;  %v4467_v8 = vmul.f32 0.1, %v7894_v58  ;;  %v4468_v11 = vmul.f32 0.1, %v7896_v52  ;;  %v4478_v51 = vsel %vm4446_vm12, %v4430_v53, %v4462_v39 }
 0x510   : > { %v4479_v62 = vsel %vm4447_vm0, %v4431_v56, %v4463_v55  ;;  %v4454_v34 = vmul.f32 0.1, %v7870_v29  ;;  %v4455_v25 = vmul.f32 0.1, %v7875_v9  ;;  %v4456_v30 = vmul.f32 0.1, %v7877_v16 }
 0x511   : > { %v4457_v4 = vmul.f32 0.1, %v4425_v24  ;;  %v4537_v28 = vmul.f32 %v4513_v15, %v4503_v54  ;;  %v4480_v50 = vsel %vm4448_vm13, %v4432_v12, %v4464_v10  ;;  %v4458_v45 = vmul.f32 0.1, %v4426_v0 }
 0x512   : > { %v4459_v42 = vmul.f32 0.1, %v4427_v18  ;;  %v4460_v19 = vmul.f32 0.1, %v7882_v60  ;;  %v4469_v22 = vsel %vm4437_vm3, %v7865_v47, %v4453_v2  ;;  %v4470_v49 = vsel %vm4438_vm4, %v7870_v29, %v4454_v34 }
 0x513   : > { %v4471_v20 = vsel %vm4439_vm6, %v7875_v9, %v4455_v25  ;;  %v4472_v59 = vsel %vm4440_vm7, %v7877_v16, %v4456_v30  ;;  %4553 = vst [vmem:[%s7919_s13 + $0x58] sm:$0xff] %v4537_v28  ;;  %v4473_v7 = vsel %vm4441_vm8, %v4425_v24, %v4457_v4  ;;  %v4474_v5 = vsel %vm4442_vm9, %v4426_v0, %v4458_v45 }
 0x514   : > { %v4475_v35 = vsel %vm4443_vm10, %v4427_v18, %v4459_v42  ;;  %v4495_v47 = vadd.f32 %v4488_v23, %v4469_v22  ;;  %v4496_v61 = vadd.f32 %v4488_v23, %v4470_v49  ;;  %v4497_v33 = vadd.f32 %v4488_v23, %v4471_v20 }
 0x515   : > { %v4498_v29 = vadd.f32 %v4488_v23, %v4472_v59  ;;  %v4499_v44 = vadd.f32 %v4488_v23, %v4473_v7  ;;  %v4476_v9 = vsel %vm4444_vm11, %v7882_v60, %v4460_v19  ;;  %v4500_v46 = vadd.f32 %v4488_v23, %v4474_v5 }
 0x516   : > { %v4501_v16 = vadd.f32 %v4488_v23, %v4475_v35  ;;  %v4529_v14 = vmul.f32 %v4513_v15, %v4495_v47  ;;  %v4502_v24 = vadd.f32 %v4488_v23, %v4476_v9  ;;  %v4530_v0 = vmul.f32 %v4514_v31, %v4496_v61 }
 0x517   : > { %v4531_v48 = vmul.f32 %v4515_v21, %v4497_v33  ;;  %v4532_v3 = vmul.f32 %v4516_v57, %v4498_v29  ;;  %vm4452_vm2 = vcmp.ge.f32.partialorder %v7896_v52, 0.0  ;;  %v4481_v18 = vsel %vm4449_vm14, %v7888_v41, %v4465_v17 }
 0x518   : > { %v4504_v15 = vadd.f32 %v7899_v26, %v4478_v51  ;;  %v4533_v60 = vmul.f32 %v4517_v40, %v4499_v44  ;;  %4545 = vst [vmem:[%s7919_s13 + $0x8] sm:$0xff] %v4529_v14  ;;  %v4482_v43 = vsel %vm4450_vm15, %v7891_v32, %v4466_v27  ;;  %v4505_v38 = vadd.f32 %v7899_v26, %v4479_v62 }
 0x519   : > { %v4534_v53 = vmul.f32 %v4518_v1, %v4500_v46  ;;  %4546 = vst [vmem:[%s7919_s13 + $0x10] sm:$0xff] %v4530_v0  ;;  %v4483_v56 = vsel %vm4451_vm1, %v7894_v58, %v4467_v8  ;;  %v4506_v12 = vadd.f32 %v7899_v26, %v4480_v50  ;;  %v4535_v41 = vmul.f32 %v4519_v13, %v4501_v16 }
 0x51a   : > { %4547 = vst [vmem:[%s7919_s13 + $0x18] sm:$0xff] %v4531_v48  ;;  %v4484_v32 = vsel %vm4452_vm2, %v7896_v52, %v4468_v11  ;;  %v4507_v63 = vadd.f32 %v7899_v26, %v4481_v18  ;;  %v4536_v39 = vmul.f32 %v4520_v37, %v4502_v24  ;;  %v4508_v58 = vadd.f32 %v7899_v26, %v4482_v43 }
 0x51b   : > { %4548 = vst [vmem:[%s7919_s13 + $0x20] sm:$0xff] %v4532_v3  ;;  %v4538_v55 = vmul.f32 %v4514_v31, %v4504_v15  ;;  %v4509_v36 = vadd.f32 %v7899_v26, %v4483_v56  ;;  %v4539_v52 = vmul.f32 %v4515_v21, %v4505_v38  ;;  %v4510_v10 = vadd.f32 %v7899_v26, %v4484_v32 }
 0x51c   : > { %4549 = vst [vmem:[%s7919_s13 + $0x28] sm:$0xff] %v4533_v60  ;;  %v4540_v17 = vmul.f32 %v4516_v57, %v4506_v12  ;;  %v4541_v31 = vmul.f32 %v4517_v40, %v4507_v63  ;;  %v4542_v54 = vmul.f32 %v4518_v1, %v4508_v58  ;;  %v5832_v57 = vmov 0.0  }
 0x51d   : > { %4550 = vst [vmem:[%s7919_s13 + $0x30] sm:$0xff] %v4534_v53  ;;  %v4543_v21 = vmul.f32 %v4519_v13, %v4509_v36  ;;  %v4544_v26 = vmul.f32 %v4520_v37, %v4510_v10 }
 0x51e   : > { %4551 = vst [vmem:[%s7919_s13 + $0x38] sm:$0xff] %v4535_v41 }
 0x51f   : > { %4552 = vst [vmem:[%s7919_s13 + $0x40] sm:$0xff] %v4536_v39 }
 0x520   : > { %4554 = vst [vmem:[%s7919_s13 + $0x60] sm:$0xff] %v4538_v55 }
 0x521   : > { %4555 = vst [vmem:[%s7919_s13 + $0x68] sm:$0xff] %v4539_v52 }
 0x522   : > { %4556 = vst [vmem:[%s7919_s13 + $0x70] sm:$0xff] %v4540_v17 }
 0x523   : > { %4557 = vst [vmem:[%s7919_s13 + $0x78] sm:$0xff] %v4541_v31 }
 0x524   : > { %4558 = vst [vmem:[%s7919_s13 + $0x80] sm:$0xff] %v4542_v54 }
 0x525   : > { %4559 = vst [vmem:[%s7919_s13 + $0x88] sm:$0xff] %v4543_v21 }
 0x526   : > { %4560 = vst [vmem:[%s7919_s13 + $0x90] sm:$0xff] %v4544_v26 }
 0x527   : > { %4561 = vst [vmem:[%s7919_s13] sm:$0xff] %v5832_v57 }
 0x528   : > { %4562 = vst [vmem:[%s7919_s13 + $0x50] sm:$0xff] %v5832_v57 }
 0x529   : > { %4563 = vst [vmem:[%s7919_s13 + $0x48] sm:$0xff] %v5832_v57 }
 0x52a   : > { %4564 = vst [vmem:[%s7919_s13 + $0x98] sm:$0xff] %v5832_v57 }
 0x52b PF: > { %s16_s21 = sadd.s32 1, %s5803_s21  }
 0x52c   : > { %p13_p4 = scmp.ge.s32.totalorder %s16_s21, 4  }
 0x52e   :  { %15 = sbr.rel (!%p13_p4) target bundleno = 1 (0x1), region = 77 }

</bundles_post_ra>
